<compile_context>
chip_gen: v6e
topology: v6e:2x2x1
jax: 0.10.0
libtpu: 0.0.40
codegen_flags: <defaults>
</compile_context>

<pallas_src>
import numpy as np

import jax
import jax.numpy as jnp
from jax.experimental import pallas as pl
from jax.experimental.pallas import tpu as pltpu  # noqa: F401  (TPU backend)

# ----------------------------- model config ---------------------------------
HIDDEN = [8, 16, 32]          # hidden_dim kwarg (small for the demo)
IN_CH = 4                     # in_channels
IMG = 16                      # image_size (divisible by 2**len(HIDDEN))
LATENT = 16                   # latent_dim kwarg
BATCH = 2
BETA = 4.0                    # beta (unused in forward, kept for fidelity)

ZIP = 2 ** len(HIDDEN)
FH = IMG // ZIP
FW = IMG // ZIP
FEAT = HIDDEN[-1] * FH * FW

LEAKY_SLOPE = 0.01            # nn.LeakyReLU default
BN_EPS = 1e-5                 # nn.BatchNorm2d default

# Static per-layer geometry.
# Encoder Conv2d blocks: (Hi, Wi, Cin, Ho, Wo, Cout, stride)
ENC_CFG = []
_h, _c = IMG, IN_CH
for _ch in HIDDEN:
    ENC_CFG.append((_h, _h, _c, _h // 2, _h // 2, _ch, 2))
    _h, _c = _h // 2, _ch

# ConvTranspose2d blocks (two decoder blocks + the one inside `final`):
# (Hi, Wi, Cin, Ho, Wo, Cout)
DEC_CT_CFG = []
_h, _c = FH, HIDDEN[-1]
for _i in range(len(HIDDEN) - 1, 0, -1):
    DEC_CT_CFG.append((_h, _h, _c, 2 * _h, 2 * _h, HIDDEN[_i - 1]))
    _h, _c = 2 * _h, HIDDEN[_i - 1]
DEC_CT_CFG.append((_h, _h, _c, 2 * _h, 2 * _h, _c))       # final ConvTranspose2d
FINAL_CONV_CFG = (IMG, IMG, HIDDEN[0], IMG, IMG, IN_CH, 1)


# --------------------------- in-kernel building blocks ------------------------
def _leaky(y):
    return jnp.where(y > 0, y, LEAKY_SLOPE * y)


def _row_conv(rows_in, m_ref, Hi, Ho, stride):
    """Conv2d(k=3, pad=1, given stride) as per-output-row 2-D MXU matmuls."""
    m = [m_ref[d] for d in range(3)]
    out = []
    for oi in range(Ho):
        acc = None
        for di in range(3):
            ii = stride * oi + di - 1
            if 0 <= ii < Hi:
                t = jnp.dot(rows_in[ii], m[di],
                            preferred_element_type=jnp.float32)
                acc = t if acc is None else acc + t
        out.append(acc)
    return out


def _row_conv_transpose(rows_in, m_ref, Hi, Ho):
    """ConvTranspose2d(k=3, s=2, p=1, output_padding=1) as per-row matmuls."""
    m = [m_ref[d] for d in range(3)]
    out = []
    for oi in range(Ho):
        acc = None
        for di in range(3):
            num = oi + 1 - di                      # oi = 2*ii - 1 + di
            if num % 2 == 0 and 0 <= num // 2 < Hi:
                t = jnp.dot(rows_in[num // 2], m[di],
                            preferred_element_type=jnp.float32)
                acc = t if acc is None else acc + t
        out.append(acc)
    return out


def _batchnorm_leaky(rows, gamma_ref, beta_ref, C, W):
    """Train-mode BatchNorm2d (batch stats, biased var) + LeakyReLU on row slabs."""
    B = rows[0].shape[0]
    s = rows[0]
    q = rows[0] * rows[0]
    for r in rows[1:]:
        s = s + r
        q = q + r * r
    ch_s = s[:, 0:C]
    ch_q = q[:, 0:C]
    for w in range(1, W):                          # reduce W groups within lanes
        ch_s = ch_s + s[:, w * C:(w + 1) * C]
        ch_q = ch_q + q[:, w * C:(w + 1) * C]
    ch_s = jnp.sum(ch_s, axis=0, keepdims=True)    # (1, C)
    ch_q = jnp.sum(ch_q, axis=0, keepdims=True)
    n = float(B * len(rows) * W)
    mean = ch_s / n
    var = ch_q / n - mean * mean
    scale = gamma_ref[...] * jax.lax.rsqrt(var + BN_EPS)
    shift = beta_ref[...] - mean * scale
    scale_f = jnp.concatenate([scale] * W, axis=1)  # (1, W*C)
    shift_f = jnp.concatenate([shift] * W, axis=1)
    return [_leaky(r * scale_f + shift_f) for r in rows]


# ------------------------------- the fused kernel ------------------------------
def _beta_vae_kernel(*refs):
    it = iter(refs)
    x_ref, eps_ref = next(it), next(it)
    enc = [(next(it), next(it), next(it)) for _ in ENC_CFG]
    mulv_w_ref, mulv_b_ref = next(it), next(it)
    dec_w_ref, dec_b_ref = next(it), next(it)
    dct = [(next(it), next(it), next(it)) for _ in DEC_CT_CFG]
    fc_m_ref, fc_b_ref = next(it), next(it)
    recon_ref, mu_ref, lv_ref = next(it), next(it), next(it)

    # ---- encoder: [Conv2d(s=2) -> BN -> LeakyReLU] x 3 ----
    rows = [x_ref[h] for h in range(IMG)]                 # (B, W*Cin) slabs
    for (m_ref, g_ref, b_ref), (Hi, Wi, Ci, Ho, Wo, Co, st) in zip(enc, ENC_CFG):
        rows = _row_conv(rows, m_ref, Hi, Ho, st)
        rows = _batchnorm_leaky(rows, g_ref, b_ref, Co, Wo)

    # ---- fused mu / log_var heads + reparameterization ----
    lat = mulv_b_ref[...]                                 # (1, 2*LATENT)
    for h in range(FH):
        lat = lat + jnp.dot(rows[h], mulv_w_ref[h],
                            preferred_element_type=jnp.float32)
    mu = lat[:, :LATENT]
    log_var = lat[:, LATENT:]
    z = eps_ref[...] * jnp.exp(0.5 * log_var) + mu
    mu_ref[...] = mu
    lv_ref[...] = log_var

    # ---- decoder linear (no activation in the reference model) ----
    rows = [jnp.dot(z, dec_w_ref[h], preferred_element_type=jnp.float32)
            + dec_b_ref[h] for h in range(FH)]

    # ---- [ConvTranspose2d -> BN -> LeakyReLU] x 3 (incl. `final` CT block) ----
    for (m_ref, g_ref, b_ref), (Hi, Wi, Ci, Ho, Wo, Co) in zip(dct, DEC_CT_CFG):
        rows = _row_conv_transpose(rows, m_ref, Hi, Ho)
        rows = _batchnorm_leaky(rows, g_ref, b_ref, Co, Wo)

    # ---- final Conv2d(s=1) + bias + Tanh ----
    Hi, Wi, Ci, Ho, Wo, Co, st = FINAL_CONV_CFG
    rows = _row_conv(rows, fc_m_ref, Hi, Ho, st)
    bias_f = fc_b_ref[...]                                # (1, Wo*Cout)
    for oi in range(Ho):
        recon_ref[oi] = jnp.tanh(rows[oi] + bias_f)


def beta_vae_forward(kernel_params, x_nchw, eps):
    """Returns (recon, x, mu, log_var), matching the torch module's forward()."""
    B = x_nchw.shape[0]
    # NCHW -> row slabs: x_rows[h, b, w*Cin + c] = x[b, c, h, w]  (tiny layout op)
    x_rows = jnp.transpose(x_nchw.astype(jnp.float32),
                           (2, 0, 3, 1)).reshape(IMG, B, IMG * IN_CH)
    recon_rows, mu, log_var = pl.pallas_call(
        _beta_vae_kernel,
        out_shape=(
            jax.ShapeDtypeStruct((IMG, B, IMG * IN_CH), jnp.float32),
            jax.ShapeDtypeStruct((B, LATENT), jnp.float32),
            jax.ShapeDtypeStruct((B, LATENT), jnp.float32),
        ),
    )(x_rows, eps.astype(jnp.float32), *kernel_params)
    recon = jnp.transpose(recon_rows.reshape(IMG, B, IMG, IN_CH), (1, 3, 0, 2))
    return recon, x_nchw, mu, log_var


# --------------------------- parameter construction ---------------------------
def _conv_row_mats(w_oihw, Wi, Wo, stride):
    """torch Conv2d weight (Cout,Cin,3,3), pad=1 -> 3 row-operator matrices."""
    Cout, Cin = w_oihw.shape[:2]
    m = np.zeros((3, Wi * Cin, Wo * Cout), np.float32)
    for di in range(3):
        for oj in range(Wo):
            for dj in range(3):
                ij = stride * oj + dj - 1
                if 0 <= ij < Wi:
                    m[di, ij * Cin:(ij + 1) * Cin,
                      oj * Cout:(oj + 1) * Cout] = w_oihw[:, :, di, dj].T
    return jnp.asarray(m)


def _convt_row_mats(w_iohw, Wi, Wo):
    """torch ConvTranspose2d weight (Cin,Cout,3,3), s=2,p=1,op=1 -> 3 matrices."""
    Cin, Cout = w_iohw.shape[:2]
    m = np.zeros((3, Wi * Cin, Wo * Cout), np.float32)
    for di in range(3):
        for ij in range(Wi):
            for dj in range(3):
                oj = 2 * ij - 1 + dj
                if 0 <= oj < Wo:
                    m[di, ij * Cin:(ij + 1) * Cin,
                      oj * Cout:(oj + 1) * Cout] = w_iohw[:, :, di, dj]
    return jnp.asarray(m)


def init_nominal_params(key):
    """Random params in torch layouts (Conv2d OIHW, ConvT IOHW, Linear (out,in))."""
    keys = iter(jax.random.split(key, 64))

    def nrm(shape, scale=0.1):
        return np.asarray(scale * jax.random.normal(next(keys), shape, jnp.float32))

    p = {}
    enc, last = [], IN_CH
    for c in HIDDEN:
        enc.append(dict(w=nrm((c, last, 3, 3)), b=nrm((c,), 0.05),
                        g=1.0 + nrm((c,), 0.05), bt=nrm((c,), 0.05)))
        last = c
    p["enc"] = enc
    p["mu_w"] = nrm((LATENT, FEAT)); p["mu_b"] = nrm((LATENT,), 0.05)
    p["lv_w"] = nrm((LATENT, FEAT)); p["lv_b"] = nrm((LATENT,), 0.05)
    p["dec_lin_w"] = nrm((FEAT, LATENT)); p["dec_lin_b"] = nrm((FEAT,), 0.05)
    dec, last = [], HIDDEN[-1]
    for i in range(len(HIDDEN) - 1, 0, -1):
        prev = HIDDEN[i - 1]
        dec.append(dict(w=nrm((last, prev, 3, 3)), b=nrm((prev,), 0.05),
                        g=1.0 + nrm((prev,), 0.05), bt=nrm((prev,), 0.05)))
        last = prev
    p["dec"] = dec
    p["final_ct"] = dict(w=nrm((last, last, 3, 3)), b=nrm((last,), 0.05),
                         g=1.0 + nrm((last,), 0.05), bt=nrm((last,), 0.05))
    p["final_conv"] = dict(w=nrm((IN_CH, last, 3, 3)), b=nrm((IN_CH,), 0.05))
    return p


def build_kernel_params(nominal):
    """Fold torch-layout parameters into the operands the fused kernel consumes."""
    ops = []
    # Encoder blocks (conv bias dropped: exactly cancelled by BN mean subtraction).
    for layer, (Hi, Wi, Ci, Ho, Wo, Co, st) in zip(nominal["enc"], ENC_CFG):
        ops += [_conv_row_mats(layer["w"], Wi, Wo, st),
                jnp.asarray(layer["g"].reshape(1, Co)),
                jnp.asarray(layer["bt"].reshape(1, Co))]
    # Fused mu/log_var projection and decoder Linear, reindexed for the
    # NHWC row-slab layout (torch flatten order is 'b c h w -> b (c h w)').
    C = HIDDEN[-1]
    mulv = np.zeros((FH, FW * C, 2 * LATENT), np.float32)
    dlin = np.zeros((FH, LATENT, FW * C), np.float32)
    dbias = np.zeros((FH, 1, FW * C), np.float32)
    for h in range(FH):
        for w in range(FW):
            for c in range(C):
                k = c * (FH * FW) + h * FW + w
                mulv[h, w * C + c, :LATENT] = nominal["mu_w"][:, k]
                mulv[h, w * C + c, LATENT:] = nominal["lv_w"][:, k]
                dlin[h, :, w * C + c] = nominal["dec_lin_w"][k, :]
                dbias[h, 0, w * C + c] = nominal["dec_lin_b"][k]
    ops += [jnp.asarray(mulv),
            jnp.asarray(np.concatenate([nominal["mu_b"],
                                        nominal["lv_b"]]).reshape(1, 2 * LATENT)),
            jnp.asarray(dlin), jnp.asarray(dbias)]
    # Decoder conv-transpose blocks + the `final` conv-transpose block.
    ct_layers = list(nominal["dec"]) + [nominal["final_ct"]]
    for layer, (Hi, Wi, Ci, Ho, Wo, Co) in zip(ct_layers, DEC_CT_CFG):
        ops += [_convt_row_mats(layer["w"], Wi, Wo),
                jnp.asarray(layer["g"].reshape(1, Co)),
                jnp.asarray(layer["bt"].reshape(1, Co))]
    # Final Conv2d keeps its bias (no BN), followed by Tanh.
    Hi, Wi, Ci, Ho, Wo, Co, st = FINAL_CONV_CFG
    fc = nominal["final_conv"]
    ops += [_conv_row_mats(fc["w"], Wi, Wo, st),
            jnp.asarray(np.tile(fc["b"].reshape(1, Co), (1, Wo)))]
    return ops


# ---------------- plain-XLA reference (correctness check only) ----------------
def _ref_conv(x, w, b, stride):
    y = jax.lax.conv_general_dilated(
        x, jnp.asarray(w), window_strides=(stride, stride),
        padding=((1, 1), (1, 1)), dimension_numbers=("NCHW", "OIHW", "NCHW"),
        precision=jax.lax.Precision.HIGHEST)
    return y + jnp.asarray(b).reshape(1, -1, 1, 1)


def _ref_convt(x, w, b):
    wk = jnp.transpose(jnp.flip(jnp.asarray(w), (2, 3)), (1, 0, 2, 3))
    y = jax.lax.conv_general_dilated(
        x, wk, window_strides=(1, 1), padding=((1, 2), (1, 2)),
        lhs_dilation=(2, 2), dimension_numbers=("NCHW", "OIHW", "NCHW"),
        precision=jax.lax.Precision.HIGHEST)
    return y + jnp.asarray(b).reshape(1, -1, 1, 1)


def _ref_bn_leaky(y, g, bt):
    mean = jnp.mean(y, axis=(0, 2, 3), keepdims=True)
    var = jnp.mean((y - mean) ** 2, axis=(0, 2, 3), keepdims=True)
    y = (y - mean) * jax.lax.rsqrt(var + BN_EPS)
    y = y * jnp.asarray(g).reshape(1, -1, 1, 1) + jnp.asarray(bt).reshape(1, -1, 1, 1)
    return jnp.where(y > 0, y, LEAKY_SLOPE * y)


def reference_forward(nominal, x, eps):
    h = x
    for l in nominal["enc"]:
        h = _ref_bn_leaky(_ref_conv(h, l["w"], l["b"], 2), l["g"], l["bt"])
    flat = h.reshape(h.shape[0], -1)
    mu = flat @ jnp.asarray(nominal["mu_w"]).T + jnp.asarray(nominal["mu_b"])
    lv = flat @ jnp.asarray(nominal["lv_w"]).T + jnp.asarray(nominal["lv_b"])
    z = eps * jnp.exp(0.5 * lv) + mu
    d = z @ jnp.asarray(nominal["dec_lin_w"]).T + jnp.asarray(nominal["dec_lin_b"])
    h = d.reshape(d.shape[0], HIDDEN[-1], FH, FW)
    for l in nominal["dec"]:
        h = _ref_bn_leaky(_ref_convt(h, l["w"], l["b"]), l["g"], l["bt"])
    fct = nominal["final_ct"]
    h = _ref_bn_leaky(_ref_convt(h, fct["w"], fct["b"]), fct["g"], fct["bt"])
    fc = nominal["final_conv"]
    h = jnp.tanh(_ref_conv(h, fc["w"], fc["b"], 1))
    return h, mu, lv


# ------------------------------------ main -------------------------------------
if __name__ == "__main__":
    key = jax.random.PRNGKey(0)
    k_params, k_x, k_eps = jax.random.split(key, 3)

    nominal = init_nominal_params(k_params)
    kernel_params = build_kernel_params(nominal)

    x = jax.random.normal(k_x, (BATCH, IN_CH, IMG, IMG), jnp.float32)
    eps = jax.random.normal(k_eps, (BATCH, LATENT), jnp.float32)

    fwd = jax.jit(beta_vae_forward)
    recon, x_out, mu, log_var = fwd(kernel_params, x, eps)
    jax.block_until_ready((recon, x_out, mu, log_var))

    assert recon.shape == x.shape, (recon.shape, x.shape)
    assert mu.shape == (BATCH, LATENT) and log_var.shape == (BATCH, LATENT)
    assert bool(jnp.all(jnp.isfinite(recon)))
    assert bool(jnp.all(jnp.abs(recon) <= 1.0 + 1e-6))     # tanh output range

    # Cross-check the fused Pallas kernel against a plain-XLA reference.
    r_recon, r_mu, r_lv = reference_forward(nominal, x, eps)
    err = max(float(jnp.max(jnp.abs(recon - r_recon))),
              float(jnp.max(jnp.abs(mu - r_mu))),
              float(jnp.max(jnp.abs(log_var - r_lv))))
    assert err < 5e-2, f"mismatch vs reference: {err}"
    print("KERNEL_OK")
</pallas_src>

<mosaic_0001>
module attributes {stable_mosaic.version = 11 : i64} {
  func.func @_beta_vae_kernel(%arg0: memref<16x2x64xf32, #tpu.memory_space<vmem>>, %arg1: memref<2x16xf32, #tpu.memory_space<vmem>>, %arg2: memref<3x64x64xf32, #tpu.memory_space<vmem>>, %arg3: memref<1x8xf32, #tpu.memory_space<vmem>>, %arg4: memref<1x8xf32, #tpu.memory_space<vmem>>, %arg5: memref<3x64x64xf32, #tpu.memory_space<vmem>>, %arg6: memref<1x16xf32, #tpu.memory_space<vmem>>, %arg7: memref<1x16xf32, #tpu.memory_space<vmem>>, %arg8: memref<3x64x64xf32, #tpu.memory_space<vmem>>, %arg9: memref<1x32xf32, #tpu.memory_space<vmem>>, %arg10: memref<1x32xf32, #tpu.memory_space<vmem>>, %arg11: memref<2x64x32xf32, #tpu.memory_space<vmem>>, %arg12: memref<1x32xf32, #tpu.memory_space<vmem>>, %arg13: memref<2x16x64xf32, #tpu.memory_space<vmem>>, %arg14: memref<2x1x64xf32, #tpu.memory_space<vmem>>, %arg15: memref<3x64x64xf32, #tpu.memory_space<vmem>>, %arg16: memref<1x16xf32, #tpu.memory_space<vmem>>, %arg17: memref<1x16xf32, #tpu.memory_space<vmem>>, %arg18: memref<3x64x64xf32, #tpu.memory_space<vmem>>, %arg19: memref<1x8xf32, #tpu.memory_space<vmem>>, %arg20: memref<1x8xf32, #tpu.memory_space<vmem>>, %arg21: memref<3x64x128xf32, #tpu.memory_space<vmem>>, %arg22: memref<1x8xf32, #tpu.memory_space<vmem>>, %arg23: memref<1x8xf32, #tpu.memory_space<vmem>>, %arg24: memref<3x128x64xf32, #tpu.memory_space<vmem>>, %arg25: memref<1x64xf32, #tpu.memory_space<vmem>>, %arg26: memref<16x2x64xf32, #tpu.memory_space<vmem>>, %arg27: memref<2x16xf32, #tpu.memory_space<vmem>>, %arg28: memref<2x16xf32, #tpu.memory_space<vmem>>) attributes {dimension_semantics = [], scalar_prefetch = 0 : i64, scratch_operands = 0 : i64, tpu.core_type = #tpu.core_type<tc>} {
    %c0 = arith.constant 0 : index
    %c0_0 = arith.constant 0 : index
    %c0_1 = arith.constant 0 : index
    %0 = vector.load %arg0[%c0, %c0_0, %c0_1] : memref<16x2x64xf32, #tpu.memory_space<vmem>>, vector<1x2x64xf32>
    %1 = vector.shape_cast %0 : vector<1x2x64xf32> to vector<2x64xf32>
    %c1 = arith.constant 1 : index
    %c0_2 = arith.constant 0 : index
    %c0_3 = arith.constant 0 : index
    %2 = vector.load %arg0[%c1, %c0_2, %c0_3] : memref<16x2x64xf32, #tpu.memory_space<vmem>>, vector<1x2x64xf32>
    %3 = vector.shape_cast %2 : vector<1x2x64xf32> to vector<2x64xf32>
    %c2 = arith.constant 2 : index
    %c0_4 = arith.constant 0 : index
    %c0_5 = arith.constant 0 : index
    %4 = vector.load %arg0[%c2, %c0_4, %c0_5] : memref<16x2x64xf32, #tpu.memory_space<vmem>>, vector<1x2x64xf32>
    %5 = vector.shape_cast %4 : vector<1x2x64xf32> to vector<2x64xf32>
    %c3 = arith.constant 3 : index
    %c0_6 = arith.constant 0 : index
    %c0_7 = arith.constant 0 : index
    %6 = vector.load %arg0[%c3, %c0_6, %c0_7] : memref<16x2x64xf32, #tpu.memory_space<vmem>>, vector<1x2x64xf32>
    %7 = vector.shape_cast %6 : vector<1x2x64xf32> to vector<2x64xf32>
    %c4 = arith.constant 4 : index
    %c0_8 = arith.constant 0 : index
    %c0_9 = arith.constant 0 : index
    %8 = vector.load %arg0[%c4, %c0_8, %c0_9] : memref<16x2x64xf32, #tpu.memory_space<vmem>>, vector<1x2x64xf32>
    %9 = vector.shape_cast %8 : vector<1x2x64xf32> to vector<2x64xf32>
    %c5 = arith.constant 5 : index
    %c0_10 = arith.constant 0 : index
    %c0_11 = arith.constant 0 : index
    %10 = vector.load %arg0[%c5, %c0_10, %c0_11] : memref<16x2x64xf32, #tpu.memory_space<vmem>>, vector<1x2x64xf32>
    %11 = vector.shape_cast %10 : vector<1x2x64xf32> to vector<2x64xf32>
    %c6 = arith.constant 6 : index
    %c0_12 = arith.constant 0 : index
    %c0_13 = arith.constant 0 : index
    %12 = vector.load %arg0[%c6, %c0_12, %c0_13] : memref<16x2x64xf32, #tpu.memory_space<vmem>>, vector<1x2x64xf32>
    %13 = vector.shape_cast %12 : vector<1x2x64xf32> to vector<2x64xf32>
    %c7 = arith.constant 7 : index
    %c0_14 = arith.constant 0 : index
    %c0_15 = arith.constant 0 : index
    %14 = vector.load %arg0[%c7, %c0_14, %c0_15] : memref<16x2x64xf32, #tpu.memory_space<vmem>>, vector<1x2x64xf32>
    %15 = vector.shape_cast %14 : vector<1x2x64xf32> to vector<2x64xf32>
    %c8 = arith.constant 8 : index
    %c0_16 = arith.constant 0 : index
    %c0_17 = arith.constant 0 : index
    %16 = vector.load %arg0[%c8, %c0_16, %c0_17] : memref<16x2x64xf32, #tpu.memory_space<vmem>>, vector<1x2x64xf32>
    %17 = vector.shape_cast %16 : vector<1x2x64xf32> to vector<2x64xf32>
    %c9 = arith.constant 9 : index
    %c0_18 = arith.constant 0 : index
    %c0_19 = arith.constant 0 : index
    %18 = vector.load %arg0[%c9, %c0_18, %c0_19] : memref<16x2x64xf32, #tpu.memory_space<vmem>>, vector<1x2x64xf32>
    %19 = vector.shape_cast %18 : vector<1x2x64xf32> to vector<2x64xf32>
    %c10 = arith.constant 10 : index
    %c0_20 = arith.constant 0 : index
    %c0_21 = arith.constant 0 : index
    %20 = vector.load %arg0[%c10, %c0_20, %c0_21] : memref<16x2x64xf32, #tpu.memory_space<vmem>>, vector<1x2x64xf32>
    %21 = vector.shape_cast %20 : vector<1x2x64xf32> to vector<2x64xf32>
    %c11 = arith.constant 11 : index
    %c0_22 = arith.constant 0 : index
    %c0_23 = arith.constant 0 : index
    %22 = vector.load %arg0[%c11, %c0_22, %c0_23] : memref<16x2x64xf32, #tpu.memory_space<vmem>>, vector<1x2x64xf32>
    %23 = vector.shape_cast %22 : vector<1x2x64xf32> to vector<2x64xf32>
    %c12 = arith.constant 12 : index
    %c0_24 = arith.constant 0 : index
    %c0_25 = arith.constant 0 : index
    %24 = vector.load %arg0[%c12, %c0_24, %c0_25] : memref<16x2x64xf32, #tpu.memory_space<vmem>>, vector<1x2x64xf32>
    %25 = vector.shape_cast %24 : vector<1x2x64xf32> to vector<2x64xf32>
    %c13 = arith.constant 13 : index
    %c0_26 = arith.constant 0 : index
    %c0_27 = arith.constant 0 : index
    %26 = vector.load %arg0[%c13, %c0_26, %c0_27] : memref<16x2x64xf32, #tpu.memory_space<vmem>>, vector<1x2x64xf32>
    %27 = vector.shape_cast %26 : vector<1x2x64xf32> to vector<2x64xf32>
    %c14 = arith.constant 14 : index
    %c0_28 = arith.constant 0 : index
    %c0_29 = arith.constant 0 : index
    %28 = vector.load %arg0[%c14, %c0_28, %c0_29] : memref<16x2x64xf32, #tpu.memory_space<vmem>>, vector<1x2x64xf32>
    %29 = vector.shape_cast %28 : vector<1x2x64xf32> to vector<2x64xf32>
    %c15 = arith.constant 15 : index
    %c0_30 = arith.constant 0 : index
    %c0_31 = arith.constant 0 : index
    %30 = vector.load %arg0[%c15, %c0_30, %c0_31] : memref<16x2x64xf32, #tpu.memory_space<vmem>>, vector<1x2x64xf32>
    %31 = vector.shape_cast %30 : vector<1x2x64xf32> to vector<2x64xf32>
    %c0_32 = arith.constant 0 : index
    %c0_33 = arith.constant 0 : index
    %c0_34 = arith.constant 0 : index
    %32 = vector.load %arg2[%c0_32, %c0_33, %c0_34] : memref<3x64x64xf32, #tpu.memory_space<vmem>>, vector<1x64x64xf32>
    %33 = vector.shape_cast %32 : vector<1x64x64xf32> to vector<64x64xf32>
    %c1_35 = arith.constant 1 : index
    %c0_36 = arith.constant 0 : index
    %c0_37 = arith.constant 0 : index
    %34 = vector.load %arg2[%c1_35, %c0_36, %c0_37] : memref<3x64x64xf32, #tpu.memory_space<vmem>>, vector<1x64x64xf32>
    %35 = vector.shape_cast %34 : vector<1x64x64xf32> to vector<64x64xf32>
    %c2_38 = arith.constant 2 : index
    %c0_39 = arith.constant 0 : index
    %c0_40 = arith.constant 0 : index
    %36 = vector.load %arg2[%c2_38, %c0_39, %c0_40] : memref<3x64x64xf32, #tpu.memory_space<vmem>>, vector<1x64x64xf32>
    %37 = vector.shape_cast %36 : vector<1x64x64xf32> to vector<64x64xf32>
    %cst = arith.constant dense<0.000000e+00> : vector<2x64xf32>
    %38 = tpu.matmul %1, %35, %cst {dimension_numbers = #tpu.dot_dimension_numbers<[1], [0], [0], [1], [0, 0, 1, 1], [], []>} : vector<2x64xf32>, vector<64x64xf32>, vector<2x64xf32> -> vector<2x64xf32>
    %cst_41 = arith.constant dense<0.000000e+00> : vector<2x64xf32>
    %39 = tpu.matmul %3, %37, %cst_41 {dimension_numbers = #tpu.dot_dimension_numbers<[1], [0], [0], [1], [0, 0, 1, 1], [], []>} : vector<2x64xf32>, vector<64x64xf32>, vector<2x64xf32> -> vector<2x64xf32>
    %40 = arith.addf %38, %39 : vector<2x64xf32>
    %cst_42 = arith.constant dense<0.000000e+00> : vector<2x64xf32>
    %41 = tpu.matmul %3, %33, %cst_42 {dimension_numbers = #tpu.dot_dimension_numbers<[1], [0], [0], [1], [0, 0, 1, 1], [], []>} : vector<2x64xf32>, vector<64x64xf32>, vector<2x64xf32> -> vector<2x64xf32>
    %cst_43 = arith.constant dense<0.000000e+00> : vector<2x64xf32>
    %42 = tpu.matmul %5, %35, %cst_43 {dimension_numbers = #tpu.dot_dimension_numbers<[1], [0], [0], [1], [0, 0, 1, 1], [], []>} : vector<2x64xf32>, vector<64x64xf32>, vector<2x64xf32> -> vector<2x64xf32>
    %43 = arith.addf %41, %42 : vector<2x64xf32>
    %cst_44 = arith.constant dense<0.000000e+00> : vector<2x64xf32>
    %44 = tpu.matmul %7, %37, %cst_44 {dimension_numbers = #tpu.dot_dimension_numbers<[1], [0], [0], [1], [0, 0, 1, 1], [], []>} : vector<2x64xf32>, vector<64x64xf32>, vector<2x64xf32> -> vector<2x64xf32>
    %45 = arith.addf %43, %44 : vector<2x64xf32>
    %cst_45 = arith.constant dense<0.000000e+00> : vector<2x64xf32>
    %46 = tpu.matmul %7, %33, %cst_45 {dimension_numbers = #tpu.dot_dimension_numbers<[1], [0], [0], [1], [0, 0, 1, 1], [], []>} : vector<2x64xf32>, vector<64x64xf32>, vector<2x64xf32> -> vector<2x64xf32>
    %cst_46 = arith.constant dense<0.000000e+00> : vector<2x64xf32>
    %47 = tpu.matmul %9, %35, %cst_46 {dimension_numbers = #tpu.dot_dimension_numbers<[1], [0], [0], [1], [0, 0, 1, 1], [], []>} : vector<2x64xf32>, vector<64x64xf32>, vector<2x64xf32> -> vector<2x64xf32>
    %48 = arith.addf %46, %47 : vector<2x64xf32>
    %cst_47 = arith.constant dense<0.000000e+00> : vector<2x64xf32>
    %49 = tpu.matmul %11, %37, %cst_47 {dimension_numbers = #tpu.dot_dimension_numbers<[1], [0], [0], [1], [0, 0, 1, 1], [], []>} : vector<2x64xf32>, vector<64x64xf32>, vector<2x64xf32> -> vector<2x64xf32>
    %50 = arith.addf %48, %49 : vector<2x64xf32>
    %cst_48 = arith.constant dense<0.000000e+00> : vector<2x64xf32>
    %51 = tpu.matmul %11, %33, %cst_48 {dimension_numbers = #tpu.dot_dimension_numbers<[1], [0], [0], [1], [0, 0, 1, 1], [], []>} : vector<2x64xf32>, vector<64x64xf32>, vector<2x64xf32> -> vector<2x64xf32>
    %cst_49 = arith.constant dense<0.000000e+00> : vector<2x64xf32>
    %52 = tpu.matmul %13, %35, %cst_49 {dimension_numbers = #tpu.dot_dimension_numbers<[1], [0], [0], [1], [0, 0, 1, 1], [], []>} : vector<2x64xf32>, vector<64x64xf32>, vector<2x64xf32> -> vector<2x64xf32>
    %53 = arith.addf %51, %52 : vector<2x64xf32>
    %cst_50 = arith.constant dense<0.000000e+00> : vector<2x64xf32>
    %54 = tpu.matmul %15, %37, %cst_50 {dimension_numbers = #tpu.dot_dimension_numbers<[1], [0], [0], [1], [0, 0, 1, 1], [], []>} : vector<2x64xf32>, vector<64x64xf32>, vector<2x64xf32> -> vector<2x64xf32>
    %55 = arith.addf %53, %54 : vector<2x64xf32>
    %cst_51 = arith.constant dense<0.000000e+00> : vector<2x64xf32>
    %56 = tpu.matmul %15, %33, %cst_51 {dimension_numbers = #tpu.dot_dimension_numbers<[1], [0], [0], [1], [0, 0, 1, 1], [], []>} : vector<2x64xf32>, vector<64x64xf32>, vector<2x64xf32> -> vector<2x64xf32>
    %cst_52 = arith.constant dense<0.000000e+00> : vector<2x64xf32>
    %57 = tpu.matmul %17, %35, %cst_52 {dimension_numbers = #tpu.dot_dimension_numbers<[1], [0], [0], [1], [0, 0, 1, 1], [], []>} : vector<2x64xf32>, vector<64x64xf32>, vector<2x64xf32> -> vector<2x64xf32>
    %58 = arith.addf %56, %57 : vector<2x64xf32>
    %cst_53 = arith.constant dense<0.000000e+00> : vector<2x64xf32>
    %59 = tpu.matmul %19, %37, %cst_53 {dimension_numbers = #tpu.dot_dimension_numbers<[1], [0], [0], [1], [0, 0, 1, 1], [], []>} : vector<2x64xf32>, vector<64x64xf32>, vector<2x64xf32> -> vector<2x64xf32>
    %60 = arith.addf %58, %59 : vector<2x64xf32>
    %cst_54 = arith.constant dense<0.000000e+00> : vector<2x64xf32>
    %61 = tpu.matmul %19, %33, %cst_54 {dimension_numbers = #tpu.dot_dimension_numbers<[1], [0], [0], [1], [0, 0, 1, 1], [], []>} : vector<2x64xf32>, vector<64x64xf32>, vector<2x64xf32> -> vector<2x64xf32>
    %cst_55 = arith.constant dense<0.000000e+00> : vector<2x64xf32>
    %62 = tpu.matmul %21, %35, %cst_55 {dimension_numbers = #tpu.dot_dimension_numbers<[1], [0], [0], [1], [0, 0, 1, 1], [], []>} : vector<2x64xf32>, vector<64x64xf32>, vector<2x64xf32> -> vector<2x64xf32>
    %63 = arith.addf %61, %62 : vector<2x64xf32>
    %cst_56 = arith.constant dense<0.000000e+00> : vector<2x64xf32>
    %64 = tpu.matmul %23, %37, %cst_56 {dimension_numbers = #tpu.dot_dimension_numbers<[1], [0], [0], [1], [0, 0, 1, 1], [], []>} : vector<2x64xf32>, vector<64x64xf32>, vector<2x64xf32> -> vector<2x64xf32>
    %65 = arith.addf %63, %64 : vector<2x64xf32>
    %cst_57 = arith.constant dense<0.000000e+00> : vector<2x64xf32>
    %66 = tpu.matmul %23, %33, %cst_57 {dimension_numbers = #tpu.dot_dimension_numbers<[1], [0], [0], [1], [0, 0, 1, 1], [], []>} : vector<2x64xf32>, vector<64x64xf32>, vector<2x64xf32> -> vector<2x64xf32>
    %cst_58 = arith.constant dense<0.000000e+00> : vector<2x64xf32>
    %67 = tpu.matmul %25, %35, %cst_58 {dimension_numbers = #tpu.dot_dimension_numbers<[1], [0], [0], [1], [0, 0, 1, 1], [], []>} : vector<2x64xf32>, vector<64x64xf32>, vector<2x64xf32> -> vector<2x64xf32>
    %68 = arith.addf %66, %67 : vector<2x64xf32>
    %cst_59 = arith.constant dense<0.000000e+00> : vector<2x64xf32>
    %69 = tpu.matmul %27, %37, %cst_59 {dimension_numbers = #tpu.dot_dimension_numbers<[1], [0], [0], [1], [0, 0, 1, 1], [], []>} : vector<2x64xf32>, vector<64x64xf32>, vector<2x64xf32> -> vector<2x64xf32>
    %70 = arith.addf %68, %69 : vector<2x64xf32>
    %cst_60 = arith.constant dense<0.000000e+00> : vector<2x64xf32>
    %71 = tpu.matmul %27, %33, %cst_60 {dimension_numbers = #tpu.dot_dimension_numbers<[1], [0], [0], [1], [0, 0, 1, 1], [], []>} : vector<2x64xf32>, vector<64x64xf32>, vector<2x64xf32> -> vector<2x64xf32>
    %cst_61 = arith.constant dense<0.000000e+00> : vector<2x64xf32>
    %72 = tpu.matmul %29, %35, %cst_61 {dimension_numbers = #tpu.dot_dimension_numbers<[1], [0], [0], [1], [0, 0, 1, 1], [], []>} : vector<2x64xf32>, vector<64x64xf32>, vector<2x64xf32> -> vector<2x64xf32>
    %73 = arith.addf %71, %72 : vector<2x64xf32>
    %cst_62 = arith.constant dense<0.000000e+00> : vector<2x64xf32>
    %74 = tpu.matmul %31, %37, %cst_62 {dimension_numbers = #tpu.dot_dimension_numbers<[1], [0], [0], [1], [0, 0, 1, 1], [], []>} : vector<2x64xf32>, vector<64x64xf32>, vector<2x64xf32> -> vector<2x64xf32>
    %75 = arith.addf %73, %74 : vector<2x64xf32>
    %76 = arith.mulf %40, %40 : vector<2x64xf32>
    %77 = arith.addf %40, %45 : vector<2x64xf32>
    %78 = arith.mulf %45, %45 : vector<2x64xf32>
    %79 = arith.addf %76, %78 : vector<2x64xf32>
    %80 = arith.addf %77, %50 : vector<2x64xf32>
    %81 = arith.mulf %50, %50 : vector<2x64xf32>
    %82 = arith.addf %79, %81 : vector<2x64xf32>
    %83 = arith.addf %80, %55 : vector<2x64xf32>
    %84 = arith.mulf %55, %55 : vector<2x64xf32>
    %85 = arith.addf %82, %84 : vector<2x64xf32>
    %86 = arith.addf %83, %60 : vector<2x64xf32>
    %87 = arith.mulf %60, %60 : vector<2x64xf32>
    %88 = arith.addf %85, %87 : vector<2x64xf32>
    %89 = arith.addf %86, %65 : vector<2x64xf32>
    %90 = arith.mulf %65, %65 : vector<2x64xf32>
    %91 = arith.addf %88, %90 : vector<2x64xf32>
    %92 = arith.addf %89, %70 : vector<2x64xf32>
    %93 = arith.mulf %70, %70 : vector<2x64xf32>
    %94 = arith.addf %91, %93 : vector<2x64xf32>
    %95 = arith.addf %92, %75 : vector<2x64xf32>
    %96 = arith.mulf %75, %75 : vector<2x64xf32>
    %97 = arith.addf %94, %96 : vector<2x64xf32>
    %98 = vector.extract_strided_slice %95 {offsets = [0, 0], sizes = [2, 8], strides = [1, 1]} : vector<2x64xf32> to vector<2x8xf32>
    %99 = vector.extract_strided_slice %97 {offsets = [0, 0], sizes = [2, 8], strides = [1, 1]} : vector<2x64xf32> to vector<2x8xf32>
    %100 = vector.extract_strided_slice %95 {offsets = [0, 8], sizes = [2, 8], strides = [1, 1]} : vector<2x64xf32> to vector<2x8xf32>
    %101 = arith.addf %98, %100 : vector<2x8xf32>
    %102 = vector.extract_strided_slice %97 {offsets = [0, 8], sizes = [2, 8], strides = [1, 1]} : vector<2x64xf32> to vector<2x8xf32>
    %103 = arith.addf %99, %102 : vector<2x8xf32>
    %104 = vector.extract_strided_slice %95 {offsets = [0, 16], sizes = [2, 8], strides = [1, 1]} : vector<2x64xf32> to vector<2x8xf32>
    %105 = arith.addf %101, %104 : vector<2x8xf32>
    %106 = vector.extract_strided_slice %97 {offsets = [0, 16], sizes = [2, 8], strides = [1, 1]} : vector<2x64xf32> to vector<2x8xf32>
    %107 = arith.addf %103, %106 : vector<2x8xf32>
    %108 = vector.extract_strided_slice %95 {offsets = [0, 24], sizes = [2, 8], strides = [1, 1]} : vector<2x64xf32> to vector<2x8xf32>
    %109 = arith.addf %105, %108 : vector<2x8xf32>
    %110 = vector.extract_strided_slice %97 {offsets = [0, 24], sizes = [2, 8], strides = [1, 1]} : vector<2x64xf32> to vector<2x8xf32>
    %111 = arith.addf %107, %110 : vector<2x8xf32>
    %112 = vector.extract_strided_slice %95 {offsets = [0, 32], sizes = [2, 8], strides = [1, 1]} : vector<2x64xf32> to vector<2x8xf32>
    %113 = arith.addf %109, %112 : vector<2x8xf32>
    %114 = vector.extract_strided_slice %97 {offsets = [0, 32], sizes = [2, 8], strides = [1, 1]} : vector<2x64xf32> to vector<2x8xf32>
    %115 = arith.addf %111, %114 : vector<2x8xf32>
    %116 = vector.extract_strided_slice %95 {offsets = [0, 40], sizes = [2, 8], strides = [1, 1]} : vector<2x64xf32> to vector<2x8xf32>
    %117 = arith.addf %113, %116 : vector<2x8xf32>
    %118 = vector.extract_strided_slice %97 {offsets = [0, 40], sizes = [2, 8], strides = [1, 1]} : vector<2x64xf32> to vector<2x8xf32>
    %119 = arith.addf %115, %118 : vector<2x8xf32>
    %120 = vector.extract_strided_slice %95 {offsets = [0, 48], sizes = [2, 8], strides = [1, 1]} : vector<2x64xf32> to vector<2x8xf32>
    %121 = arith.addf %117, %120 : vector<2x8xf32>
    %122 = vector.extract_strided_slice %97 {offsets = [0, 48], sizes = [2, 8], strides = [1, 1]} : vector<2x64xf32> to vector<2x8xf32>
    %123 = arith.addf %119, %122 : vector<2x8xf32>
    %124 = vector.extract_strided_slice %95 {offsets = [0, 56], sizes = [2, 8], strides = [1, 1]} : vector<2x64xf32> to vector<2x8xf32>
    %125 = arith.addf %121, %124 : vector<2x8xf32>
    %126 = vector.extract_strided_slice %97 {offsets = [0, 56], sizes = [2, 8], strides = [1, 1]} : vector<2x64xf32> to vector<2x8xf32>
    %127 = arith.addf %123, %126 : vector<2x8xf32>
    %cst_63 = arith.constant dense<0.000000e+00> : vector<8xf32>
    %128 = vector.multi_reduction <add>, %125, %cst_63 [0] : vector<2x8xf32> to vector<8xf32>
    %129 = vector.shape_cast %128 : vector<8xf32> to vector<1x8xf32>
    %cst_64 = arith.constant dense<0.000000e+00> : vector<8xf32>
    %130 = vector.multi_reduction <add>, %127, %cst_64 [0] : vector<2x8xf32> to vector<8xf32>
    %131 = vector.shape_cast %130 : vector<8xf32> to vector<1x8xf32>
    %cst_65 = arith.constant 1.280000e+02 : f32
    %132 = vector.broadcast %cst_65 : f32 to vector<1x8xf32>
    %133 = arith.divf %129, %132 : vector<1x8xf32>
    %cst_66 = arith.constant 1.280000e+02 : f32
    %134 = vector.broadcast %cst_66 : f32 to vector<1x8xf32>
    %135 = arith.divf %131, %134 : vector<1x8xf32>
    %136 = arith.mulf %133, %133 : vector<1x8xf32>
    %137 = arith.subf %135, %136 : vector<1x8xf32>
    %c0_67 = arith.constant 0 : index
    %c0_68 = arith.constant 0 : index
    %138 = vector.load %arg3[%c0_67, %c0_68] : memref<1x8xf32, #tpu.memory_space<vmem>>, vector<1x8xf32>
    %cst_69 = arith.constant 9.99999974E-6 : f32
    %139 = vector.broadcast %cst_69 : f32 to vector<1x8xf32>
    %140 = arith.addf %137, %139 : vector<1x8xf32>
    %141 = math.rsqrt %140 : vector<1x8xf32>
    %142 = arith.mulf %138, %141 : vector<1x8xf32>
    %c0_70 = arith.constant 0 : index
    %c0_71 = arith.constant 0 : index
    %143 = vector.load %arg4[%c0_70, %c0_71] : memref<1x8xf32, #tpu.memory_space<vmem>>, vector<1x8xf32>
    %144 = arith.mulf %133, %142 : vector<1x8xf32>
    %145 = arith.subf %143, %144 : vector<1x8xf32>
    %146 = tpu.concatenate %142, %142, %142, %142, %142, %142, %142, %142 in 1 : vector<1x8xf32>, vector<1x8xf32>, vector<1x8xf32>, vector<1x8xf32>, vector<1x8xf32>, vector<1x8xf32>, vector<1x8xf32>, vector<1x8xf32> -> vector<1x64xf32>
    %147 = tpu.concatenate %145, %145, %145, %145, %145, %145, %145, %145 in 1 : vector<1x8xf32>, vector<1x8xf32>, vector<1x8xf32>, vector<1x8xf32>, vector<1x8xf32>, vector<1x8xf32>, vector<1x8xf32>, vector<1x8xf32> -> vector<1x64xf32>
    %148 = vector.broadcast %146 : vector<1x64xf32> to vector<2x64xf32>
    %149 = arith.mulf %40, %148 : vector<2x64xf32>
    %150 = vector.broadcast %147 : vector<1x64xf32> to vector<2x64xf32>
    %151 = arith.addf %149, %150 : vector<2x64xf32>
    %cst_72 = arith.constant 0.000000e+00 : f32
    %152 = vector.broadcast %cst_72 : f32 to vector<2x64xf32>
    %153 = arith.cmpf ogt, %151, %152 : vector<2x64xf32>
    %cst_73 = arith.constant 0.00999999977 : f32
    %154 = vector.broadcast %cst_73 : f32 to vector<2x64xf32>
    %155 = arith.mulf %154, %151 : vector<2x64xf32>
    %156 = arith.select %153, %151, %155 : vector<2x64xi1>, vector<2x64xf32>
    %157 = vector.broadcast %146 : vector<1x64xf32> to vector<2x64xf32>
    %158 = arith.mulf %45, %157 : vector<2x64xf32>
    %159 = vector.broadcast %147 : vector<1x64xf32> to vector<2x64xf32>
    %160 = arith.addf %158, %159 : vector<2x64xf32>
    %cst_74 = arith.constant 0.000000e+00 : f32
    %161 = vector.broadcast %cst_74 : f32 to vector<2x64xf32>
    %162 = arith.cmpf ogt, %160, %161 : vector<2x64xf32>
    %cst_75 = arith.constant 0.00999999977 : f32
    %163 = vector.broadcast %cst_75 : f32 to vector<2x64xf32>
    %164 = arith.mulf %163, %160 : vector<2x64xf32>
    %165 = arith.select %162, %160, %164 : vector<2x64xi1>, vector<2x64xf32>
    %166 = vector.broadcast %146 : vector<1x64xf32> to vector<2x64xf32>
    %167 = arith.mulf %50, %166 : vector<2x64xf32>
    %168 = vector.broadcast %147 : vector<1x64xf32> to vector<2x64xf32>
    %169 = arith.addf %167, %168 : vector<2x64xf32>
    %cst_76 = arith.constant 0.000000e+00 : f32
    %170 = vector.broadcast %cst_76 : f32 to vector<2x64xf32>
    %171 = arith.cmpf ogt, %169, %170 : vector<2x64xf32>
    %cst_77 = arith.constant 0.00999999977 : f32
    %172 = vector.broadcast %cst_77 : f32 to vector<2x64xf32>
    %173 = arith.mulf %172, %169 : vector<2x64xf32>
    %174 = arith.select %171, %169, %173 : vector<2x64xi1>, vector<2x64xf32>
    %175 = vector.broadcast %146 : vector<1x64xf32> to vector<2x64xf32>
    %176 = arith.mulf %55, %175 : vector<2x64xf32>
    %177 = vector.broadcast %147 : vector<1x64xf32> to vector<2x64xf32>
    %178 = arith.addf %176, %177 : vector<2x64xf32>
    %cst_78 = arith.constant 0.000000e+00 : f32
    %179 = vector.broadcast %cst_78 : f32 to vector<2x64xf32>
    %180 = arith.cmpf ogt, %178, %179 : vector<2x64xf32>
    %cst_79 = arith.constant 0.00999999977 : f32
    %181 = vector.broadcast %cst_79 : f32 to vector<2x64xf32>
    %182 = arith.mulf %181, %178 : vector<2x64xf32>
    %183 = arith.select %180, %178, %182 : vector<2x64xi1>, vector<2x64xf32>
    %184 = vector.broadcast %146 : vector<1x64xf32> to vector<2x64xf32>
    %185 = arith.mulf %60, %184 : vector<2x64xf32>
    %186 = vector.broadcast %147 : vector<1x64xf32> to vector<2x64xf32>
    %187 = arith.addf %185, %186 : vector<2x64xf32>
    %cst_80 = arith.constant 0.000000e+00 : f32
    %188 = vector.broadcast %cst_80 : f32 to vector<2x64xf32>
    %189 = arith.cmpf ogt, %187, %188 : vector<2x64xf32>
    %cst_81 = arith.constant 0.00999999977 : f32
    %190 = vector.broadcast %cst_81 : f32 to vector<2x64xf32>
    %191 = arith.mulf %190, %187 : vector<2x64xf32>
    %192 = arith.select %189, %187, %191 : vector<2x64xi1>, vector<2x64xf32>
    %193 = vector.broadcast %146 : vector<1x64xf32> to vector<2x64xf32>
    %194 = arith.mulf %65, %193 : vector<2x64xf32>
    %195 = vector.broadcast %147 : vector<1x64xf32> to vector<2x64xf32>
    %196 = arith.addf %194, %195 : vector<2x64xf32>
    %cst_82 = arith.constant 0.000000e+00 : f32
    %197 = vector.broadcast %cst_82 : f32 to vector<2x64xf32>
    %198 = arith.cmpf ogt, %196, %197 : vector<2x64xf32>
    %cst_83 = arith.constant 0.00999999977 : f32
    %199 = vector.broadcast %cst_83 : f32 to vector<2x64xf32>
    %200 = arith.mulf %199, %196 : vector<2x64xf32>
    %201 = arith.select %198, %196, %200 : vector<2x64xi1>, vector<2x64xf32>
    %202 = vector.broadcast %146 : vector<1x64xf32> to vector<2x64xf32>
    %203 = arith.mulf %70, %202 : vector<2x64xf32>
    %204 = vector.broadcast %147 : vector<1x64xf32> to vector<2x64xf32>
    %205 = arith.addf %203, %204 : vector<2x64xf32>
    %cst_84 = arith.constant 0.000000e+00 : f32
    %206 = vector.broadcast %cst_84 : f32 to vector<2x64xf32>
    %207 = arith.cmpf ogt, %205, %206 : vector<2x64xf32>
    %cst_85 = arith.constant 0.00999999977 : f32
    %208 = vector.broadcast %cst_85 : f32 to vector<2x64xf32>
    %209 = arith.mulf %208, %205 : vector<2x64xf32>
    %210 = arith.select %207, %205, %209 : vector<2x64xi1>, vector<2x64xf32>
    %211 = vector.broadcast %146 : vector<1x64xf32> to vector<2x64xf32>
    %212 = arith.mulf %75, %211 : vector<2x64xf32>
    %213 = vector.broadcast %147 : vector<1x64xf32> to vector<2x64xf32>
    %214 = arith.addf %212, %213 : vector<2x64xf32>
    %cst_86 = arith.constant 0.000000e+00 : f32
    %215 = vector.broadcast %cst_86 : f32 to vector<2x64xf32>
    %216 = arith.cmpf ogt, %214, %215 : vector<2x64xf32>
    %cst_87 = arith.constant 0.00999999977 : f32
    %217 = vector.broadcast %cst_87 : f32 to vector<2x64xf32>
    %218 = arith.mulf %217, %214 : vector<2x64xf32>
    %219 = arith.select %216, %214, %218 : vector<2x64xi1>, vector<2x64xf32>
    %c0_88 = arith.constant 0 : index
    %c0_89 = arith.constant 0 : index
    %c0_90 = arith.constant 0 : index
    %220 = vector.load %arg5[%c0_88, %c0_89, %c0_90] : memref<3x64x64xf32, #tpu.memory_space<vmem>>, vector<1x64x64xf32>
    %221 = vector.shape_cast %220 : vector<1x64x64xf32> to vector<64x64xf32>
    %c1_91 = arith.constant 1 : index
    %c0_92 = arith.constant 0 : index
    %c0_93 = arith.constant 0 : index
    %222 = vector.load %arg5[%c1_91, %c0_92, %c0_93] : memref<3x64x64xf32, #tpu.memory_space<vmem>>, vector<1x64x64xf32>
    %223 = vector.shape_cast %222 : vector<1x64x64xf32> to vector<64x64xf32>
    %c2_94 = arith.constant 2 : index
    %c0_95 = arith.constant 0 : index
    %c0_96 = arith.constant 0 : index
    %224 = vector.load %arg5[%c2_94, %c0_95, %c0_96] : memref<3x64x64xf32, #tpu.memory_space<vmem>>, vector<1x64x64xf32>
    %225 = vector.shape_cast %224 : vector<1x64x64xf32> to vector<64x64xf32>
    %cst_97 = arith.constant dense<0.000000e+00> : vector<2x64xf32>
    %226 = tpu.matmul %156, %223, %cst_97 {dimension_numbers = #tpu.dot_dimension_numbers<[1], [0], [0], [1], [0, 0, 1, 1], [], []>} : vector<2x64xf32>, vector<64x64xf32>, vector<2x64xf32> -> vector<2x64xf32>
    %cst_98 = arith.constant dense<0.000000e+00> : vector<2x64xf32>
    %227 = tpu.matmul %165, %225, %cst_98 {dimension_numbers = #tpu.dot_dimension_numbers<[1], [0], [0], [1], [0, 0, 1, 1], [], []>} : vector<2x64xf32>, vector<64x64xf32>, vector<2x64xf32> -> vector<2x64xf32>
    %228 = arith.addf %226, %227 : vector<2x64xf32>
    %cst_99 = arith.constant dense<0.000000e+00> : vector<2x64xf32>
    %229 = tpu.matmul %165, %221, %cst_99 {dimension_numbers = #tpu.dot_dimension_numbers<[1], [0], [0], [1], [0, 0, 1, 1], [], []>} : vector<2x64xf32>, vector<64x64xf32>, vector<2x64xf32> -> vector<2x64xf32>
    %cst_100 = arith.constant dense<0.000000e+00> : vector<2x64xf32>
    %230 = tpu.matmul %174, %223, %cst_100 {dimension_numbers = #tpu.dot_dimension_numbers<[1], [0], [0], [1], [0, 0, 1, 1], [], []>} : vector<2x64xf32>, vector<64x64xf32>, vector<2x64xf32> -> vector<2x64xf32>
    %231 = arith.addf %229, %230 : vector<2x64xf32>
    %cst_101 = arith.constant dense<0.000000e+00> : vector<2x64xf32>
    %232 = tpu.matmul %183, %225, %cst_101 {dimension_numbers = #tpu.dot_dimension_numbers<[1], [0], [0], [1], [0, 0, 1, 1], [], []>} : vector<2x64xf32>, vector<64x64xf32>, vector<2x64xf32> -> vector<2x64xf32>
    %233 = arith.addf %231, %232 : vector<2x64xf32>
    %cst_102 = arith.constant dense<0.000000e+00> : vector<2x64xf32>
    %234 = tpu.matmul %183, %221, %cst_102 {dimension_numbers = #tpu.dot_dimension_numbers<[1], [0], [0], [1], [0, 0, 1, 1], [], []>} : vector<2x64xf32>, vector<64x64xf32>, vector<2x64xf32> -> vector<2x64xf32>
    %cst_103 = arith.constant dense<0.000000e+00> : vector<2x64xf32>
    %235 = tpu.matmul %192, %223, %cst_103 {dimension_numbers = #tpu.dot_dimension_numbers<[1], [0], [0], [1], [0, 0, 1, 1], [], []>} : vector<2x64xf32>, vector<64x64xf32>, vector<2x64xf32> -> vector<2x64xf32>
    %236 = arith.addf %234, %235 : vector<2x64xf32>
    %cst_104 = arith.constant dense<0.000000e+00> : vector<2x64xf32>
    %237 = tpu.matmul %201, %225, %cst_104 {dimension_numbers = #tpu.dot_dimension_numbers<[1], [0], [0], [1], [0, 0, 1, 1], [], []>} : vector<2x64xf32>, vector<64x64xf32>, vector<2x64xf32> -> vector<2x64xf32>
    %238 = arith.addf %236, %237 : vector<2x64xf32>
    %cst_105 = arith.constant dense<0.000000e+00> : vector<2x64xf32>
    %239 = tpu.matmul %201, %221, %cst_105 {dimension_numbers = #tpu.dot_dimension_numbers<[1], [0], [0], [1], [0, 0, 1, 1], [], []>} : vector<2x64xf32>, vector<64x64xf32>, vector<2x64xf32> -> vector<2x64xf32>
    %cst_106 = arith.constant dense<0.000000e+00> : vector<2x64xf32>
    %240 = tpu.matmul %210, %223, %cst_106 {dimension_numbers = #tpu.dot_dimension_numbers<[1], [0], [0], [1], [0, 0, 1, 1], [], []>} : vector<2x64xf32>, vector<64x64xf32>, vector<2x64xf32> -> vector<2x64xf32>
    %241 = arith.addf %239, %240 : vector<2x64xf32>
    %cst_107 = arith.constant dense<0.000000e+00> : vector<2x64xf32>
    %242 = tpu.matmul %219, %225, %cst_107 {dimension_numbers = #tpu.dot_dimension_numbers<[1], [0], [0], [1], [0, 0, 1, 1], [], []>} : vector<2x64xf32>, vector<64x64xf32>, vector<2x64xf32> -> vector<2x64xf32>
    %243 = arith.addf %241, %242 : vector<2x64xf32>
    %244 = arith.mulf %228, %228 : vector<2x64xf32>
    %245 = arith.addf %228, %233 : vector<2x64xf32>
    %246 = arith.mulf %233, %233 : vector<2x64xf32>
    %247 = arith.addf %244, %246 : vector<2x64xf32>
    %248 = arith.addf %245, %238 : vector<2x64xf32>
    %249 = arith.mulf %238, %238 : vector<2x64xf32>
    %250 = arith.addf %247, %249 : vector<2x64xf32>
    %251 = arith.addf %248, %243 : vector<2x64xf32>
    %252 = arith.mulf %243, %243 : vector<2x64xf32>
    %253 = arith.addf %250, %252 : vector<2x64xf32>
    %254 = vector.extract_strided_slice %251 {offsets = [0, 0], sizes = [2, 16], strides = [1, 1]} : vector<2x64xf32> to vector<2x16xf32>
    %255 = vector.extract_strided_slice %253 {offsets = [0, 0], sizes = [2, 16], strides = [1, 1]} : vector<2x64xf32> to vector<2x16xf32>
    %256 = vector.extract_strided_slice %251 {offsets = [0, 16], sizes = [2, 16], strides = [1, 1]} : vector<2x64xf32> to vector<2x16xf32>
    %257 = arith.addf %254, %256 : vector<2x16xf32>
    %258 = vector.extract_strided_slice %253 {offsets = [0, 16], sizes = [2, 16], strides = [1, 1]} : vector<2x64xf32> to vector<2x16xf32>
    %259 = arith.addf %255, %258 : vector<2x16xf32>
    %260 = vector.extract_strided_slice %251 {offsets = [0, 32], sizes = [2, 16], strides = [1, 1]} : vector<2x64xf32> to vector<2x16xf32>
    %261 = arith.addf %257, %260 : vector<2x16xf32>
    %262 = vector.extract_strided_slice %253 {offsets = [0, 32], sizes = [2, 16], strides = [1, 1]} : vector<2x64xf32> to vector<2x16xf32>
    %263 = arith.addf %259, %262 : vector<2x16xf32>
    %264 = vector.extract_strided_slice %251 {offsets = [0, 48], sizes = [2, 16], strides = [1, 1]} : vector<2x64xf32> to vector<2x16xf32>
    %265 = arith.addf %261, %264 : vector<2x16xf32>
    %266 = vector.extract_strided_slice %253 {offsets = [0, 48], sizes = [2, 16], strides = [1, 1]} : vector<2x64xf32> to vector<2x16xf32>
    %267 = arith.addf %263, %266 : vector<2x16xf32>
    %cst_108 = arith.constant dense<0.000000e+00> : vector<16xf32>
    %268 = vector.multi_reduction <add>, %265, %cst_108 [0] : vector<2x16xf32> to vector<16xf32>
    %269 = vector.shape_cast %268 : vector<16xf32> to vector<1x16xf32>
    %cst_109 = arith.constant dense<0.000000e+00> : vector<16xf32>
    %270 = vector.multi_reduction <add>, %267, %cst_109 [0] : vector<2x16xf32> to vector<16xf32>
    %271 = vector.shape_cast %270 : vector<16xf32> to vector<1x16xf32>
    %cst_110 = arith.constant 3.200000e+01 : f32
    %272 = vector.broadcast %cst_110 : f32 to vector<1x16xf32>
    %273 = arith.divf %269, %272 : vector<1x16xf32>
    %cst_111 = arith.constant 3.200000e+01 : f32
    %274 = vector.broadcast %cst_111 : f32 to vector<1x16xf32>
    %275 = arith.divf %271, %274 : vector<1x16xf32>
    %276 = arith.mulf %273, %273 : vector<1x16xf32>
    %277 = arith.subf %275, %276 : vector<1x16xf32>
    %c0_112 = arith.constant 0 : index
    %c0_113 = arith.constant 0 : index
    %278 = vector.load %arg6[%c0_112, %c0_113] : memref<1x16xf32, #tpu.memory_space<vmem>>, vector<1x16xf32>
    %cst_114 = arith.constant 9.99999974E-6 : f32
    %279 = vector.broadcast %cst_114 : f32 to vector<1x16xf32>
    %280 = arith.addf %277, %279 : vector<1x16xf32>
    %281 = math.rsqrt %280 : vector<1x16xf32>
    %282 = arith.mulf %278, %281 : vector<1x16xf32>
    %c0_115 = arith.constant 0 : index
    %c0_116 = arith.constant 0 : index
    %283 = vector.load %arg7[%c0_115, %c0_116] : memref<1x16xf32, #tpu.memory_space<vmem>>, vector<1x16xf32>
    %284 = arith.mulf %273, %282 : vector<1x16xf32>
    %285 = arith.subf %283, %284 : vector<1x16xf32>
    %286 = tpu.concatenate %282, %282, %282, %282 in 1 : vector<1x16xf32>, vector<1x16xf32>, vector<1x16xf32>, vector<1x16xf32> -> vector<1x64xf32>
    %287 = tpu.concatenate %285, %285, %285, %285 in 1 : vector<1x16xf32>, vector<1x16xf32>, vector<1x16xf32>, vector<1x16xf32> -> vector<1x64xf32>
    %288 = vector.broadcast %286 : vector<1x64xf32> to vector<2x64xf32>
    %289 = arith.mulf %228, %288 : vector<2x64xf32>
    %290 = vector.broadcast %287 : vector<1x64xf32> to vector<2x64xf32>
    %291 = arith.addf %289, %290 : vector<2x64xf32>
    %cst_117 = arith.constant 0.000000e+00 : f32
    %292 = vector.broadcast %cst_117 : f32 to vector<2x64xf32>
    %293 = arith.cmpf ogt, %291, %292 : vector<2x64xf32>
    %cst_118 = arith.constant 0.00999999977 : f32
    %294 = vector.broadcast %cst_118 : f32 to vector<2x64xf32>
    %295 = arith.mulf %294, %291 : vector<2x64xf32>
    %296 = arith.select %293, %291, %295 : vector<2x64xi1>, vector<2x64xf32>
    %297 = vector.broadcast %286 : vector<1x64xf32> to vector<2x64xf32>
    %298 = arith.mulf %233, %297 : vector<2x64xf32>
    %299 = vector.broadcast %287 : vector<1x64xf32> to vector<2x64xf32>
    %300 = arith.addf %298, %299 : vector<2x64xf32>
    %cst_119 = arith.constant 0.000000e+00 : f32
    %301 = vector.broadcast %cst_119 : f32 to vector<2x64xf32>
    %302 = arith.cmpf ogt, %300, %301 : vector<2x64xf32>
    %cst_120 = arith.constant 0.00999999977 : f32
    %303 = vector.broadcast %cst_120 : f32 to vector<2x64xf32>
    %304 = arith.mulf %303, %300 : vector<2x64xf32>
    %305 = arith.select %302, %300, %304 : vector<2x64xi1>, vector<2x64xf32>
    %306 = vector.broadcast %286 : vector<1x64xf32> to vector<2x64xf32>
    %307 = arith.mulf %238, %306 : vector<2x64xf32>
    %308 = vector.broadcast %287 : vector<1x64xf32> to vector<2x64xf32>
    %309 = arith.addf %307, %308 : vector<2x64xf32>
    %cst_121 = arith.constant 0.000000e+00 : f32
    %310 = vector.broadcast %cst_121 : f32 to vector<2x64xf32>
    %311 = arith.cmpf ogt, %309, %310 : vector<2x64xf32>
    %cst_122 = arith.constant 0.00999999977 : f32
    %312 = vector.broadcast %cst_122 : f32 to vector<2x64xf32>
    %313 = arith.mulf %312, %309 : vector<2x64xf32>
    %314 = arith.select %311, %309, %313 : vector<2x64xi1>, vector<2x64xf32>
    %315 = vector.broadcast %286 : vector<1x64xf32> to vector<2x64xf32>
    %316 = arith.mulf %243, %315 : vector<2x64xf32>
    %317 = vector.broadcast %287 : vector<1x64xf32> to vector<2x64xf32>
    %318 = arith.addf %316, %317 : vector<2x64xf32>
    %cst_123 = arith.constant 0.000000e+00 : f32
    %319 = vector.broadcast %cst_123 : f32 to vector<2x64xf32>
    %320 = arith.cmpf ogt, %318, %319 : vector<2x64xf32>
    %cst_124 = arith.constant 0.00999999977 : f32
    %321 = vector.broadcast %cst_124 : f32 to vector<2x64xf32>
    %322 = arith.mulf %321, %318 : vector<2x64xf32>
    %323 = arith.select %320, %318, %322 : vector<2x64xi1>, vector<2x64xf32>
    %c0_125 = arith.constant 0 : index
    %c0_126 = arith.constant 0 : index
    %c0_127 = arith.constant 0 : index
    %324 = vector.load %arg8[%c0_125, %c0_126, %c0_127] : memref<3x64x64xf32, #tpu.memory_space<vmem>>, vector<1x64x64xf32>
    %325 = vector.shape_cast %324 : vector<1x64x64xf32> to vector<64x64xf32>
    %c1_128 = arith.constant 1 : index
    %c0_129 = arith.constant 0 : index
    %c0_130 = arith.constant 0 : index
    %326 = vector.load %arg8[%c1_128, %c0_129, %c0_130] : memref<3x64x64xf32, #tpu.memory_space<vmem>>, vector<1x64x64xf32>
    %327 = vector.shape_cast %326 : vector<1x64x64xf32> to vector<64x64xf32>
    %c2_131 = arith.constant 2 : index
    %c0_132 = arith.constant 0 : index
    %c0_133 = arith.constant 0 : index
    %328 = vector.load %arg8[%c2_131, %c0_132, %c0_133] : memref<3x64x64xf32, #tpu.memory_space<vmem>>, vector<1x64x64xf32>
    %329 = vector.shape_cast %328 : vector<1x64x64xf32> to vector<64x64xf32>
    %cst_134 = arith.constant dense<0.000000e+00> : vector<2x64xf32>
    %330 = tpu.matmul %296, %327, %cst_134 {dimension_numbers = #tpu.dot_dimension_numbers<[1], [0], [0], [1], [0, 0, 1, 1], [], []>} : vector<2x64xf32>, vector<64x64xf32>, vector<2x64xf32> -> vector<2x64xf32>
    %cst_135 = arith.constant dense<0.000000e+00> : vector<2x64xf32>
    %331 = tpu.matmul %305, %329, %cst_135 {dimension_numbers = #tpu.dot_dimension_numbers<[1], [0], [0], [1], [0, 0, 1, 1], [], []>} : vector<2x64xf32>, vector<64x64xf32>, vector<2x64xf32> -> vector<2x64xf32>
    %332 = arith.addf %330, %331 : vector<2x64xf32>
    %cst_136 = arith.constant dense<0.000000e+00> : vector<2x64xf32>
    %333 = tpu.matmul %305, %325, %cst_136 {dimension_numbers = #tpu.dot_dimension_numbers<[1], [0], [0], [1], [0, 0, 1, 1], [], []>} : vector<2x64xf32>, vector<64x64xf32>, vector<2x64xf32> -> vector<2x64xf32>
    %cst_137 = arith.constant dense<0.000000e+00> : vector<2x64xf32>
    %334 = tpu.matmul %314, %327, %cst_137 {dimension_numbers = #tpu.dot_dimension_numbers<[1], [0], [0], [1], [0, 0, 1, 1], [], []>} : vector<2x64xf32>, vector<64x64xf32>, vector<2x64xf32> -> vector<2x64xf32>
    %335 = arith.addf %333, %334 : vector<2x64xf32>
    %cst_138 = arith.constant dense<0.000000e+00> : vector<2x64xf32>
    %336 = tpu.matmul %323, %329, %cst_138 {dimension_numbers = #tpu.dot_dimension_numbers<[1], [0], [0], [1], [0, 0, 1, 1], [], []>} : vector<2x64xf32>, vector<64x64xf32>, vector<2x64xf32> -> vector<2x64xf32>
    %337 = arith.addf %335, %336 : vector<2x64xf32>
    %338 = arith.mulf %332, %332 : vector<2x64xf32>
    %339 = arith.addf %332, %337 : vector<2x64xf32>
    %340 = arith.mulf %337, %337 : vector<2x64xf32>
    %341 = arith.addf %338, %340 : vector<2x64xf32>
    %342 = vector.extract_strided_slice %339 {offsets = [0, 0], sizes = [2, 32], strides = [1, 1]} : vector<2x64xf32> to vector<2x32xf32>
    %343 = vector.extract_strided_slice %341 {offsets = [0, 0], sizes = [2, 32], strides = [1, 1]} : vector<2x64xf32> to vector<2x32xf32>
    %344 = vector.extract_strided_slice %339 {offsets = [0, 32], sizes = [2, 32], strides = [1, 1]} : vector<2x64xf32> to vector<2x32xf32>
    %345 = arith.addf %342, %344 : vector<2x32xf32>
    %346 = vector.extract_strided_slice %341 {offsets = [0, 32], sizes = [2, 32], strides = [1, 1]} : vector<2x64xf32> to vector<2x32xf32>
    %347 = arith.addf %343, %346 : vector<2x32xf32>
    %cst_139 = arith.constant dense<0.000000e+00> : vector<32xf32>
    %348 = vector.multi_reduction <add>, %345, %cst_139 [0] : vector<2x32xf32> to vector<32xf32>
    %349 = vector.shape_cast %348 : vector<32xf32> to vector<1x32xf32>
    %cst_140 = arith.constant dense<0.000000e+00> : vector<32xf32>
    %350 = vector.multi_reduction <add>, %347, %cst_140 [0] : vector<2x32xf32> to vector<32xf32>
    %351 = vector.shape_cast %350 : vector<32xf32> to vector<1x32xf32>
    %cst_141 = arith.constant 8.000000e+00 : f32
    %352 = vector.broadcast %cst_141 : f32 to vector<1x32xf32>
    %353 = arith.divf %349, %352 : vector<1x32xf32>
    %cst_142 = arith.constant 8.000000e+00 : f32
    %354 = vector.broadcast %cst_142 : f32 to vector<1x32xf32>
    %355 = arith.divf %351, %354 : vector<1x32xf32>
    %356 = arith.mulf %353, %353 : vector<1x32xf32>
    %357 = arith.subf %355, %356 : vector<1x32xf32>
    %c0_143 = arith.constant 0 : index
    %c0_144 = arith.constant 0 : index
    %358 = vector.load %arg9[%c0_143, %c0_144] : memref<1x32xf32, #tpu.memory_space<vmem>>, vector<1x32xf32>
    %cst_145 = arith.constant 9.99999974E-6 : f32
    %359 = vector.broadcast %cst_145 : f32 to vector<1x32xf32>
    %360 = arith.addf %357, %359 : vector<1x32xf32>
    %361 = math.rsqrt %360 : vector<1x32xf32>
    %362 = arith.mulf %358, %361 : vector<1x32xf32>
    %c0_146 = arith.constant 0 : index
    %c0_147 = arith.constant 0 : index
    %363 = vector.load %arg10[%c0_146, %c0_147] : memref<1x32xf32, #tpu.memory_space<vmem>>, vector<1x32xf32>
    %364 = arith.mulf %353, %362 : vector<1x32xf32>
    %365 = arith.subf %363, %364 : vector<1x32xf32>
    %366 = tpu.concatenate %362, %362 in 1 : vector<1x32xf32>, vector<1x32xf32> -> vector<1x64xf32>
    %367 = tpu.concatenate %365, %365 in 1 : vector<1x32xf32>, vector<1x32xf32> -> vector<1x64xf32>
    %368 = vector.broadcast %366 : vector<1x64xf32> to vector<2x64xf32>
    %369 = arith.mulf %332, %368 : vector<2x64xf32>
    %370 = vector.broadcast %367 : vector<1x64xf32> to vector<2x64xf32>
    %371 = arith.addf %369, %370 : vector<2x64xf32>
    %cst_148 = arith.constant 0.000000e+00 : f32
    %372 = vector.broadcast %cst_148 : f32 to vector<2x64xf32>
    %373 = arith.cmpf ogt, %371, %372 : vector<2x64xf32>
    %cst_149 = arith.constant 0.00999999977 : f32
    %374 = vector.broadcast %cst_149 : f32 to vector<2x64xf32>
    %375 = arith.mulf %374, %371 : vector<2x64xf32>
    %376 = arith.select %373, %371, %375 : vector<2x64xi1>, vector<2x64xf32>
    %377 = vector.broadcast %366 : vector<1x64xf32> to vector<2x64xf32>
    %378 = arith.mulf %337, %377 : vector<2x64xf32>
    %379 = vector.broadcast %367 : vector<1x64xf32> to vector<2x64xf32>
    %380 = arith.addf %378, %379 : vector<2x64xf32>
    %cst_150 = arith.constant 0.000000e+00 : f32
    %381 = vector.broadcast %cst_150 : f32 to vector<2x64xf32>
    %382 = arith.cmpf ogt, %380, %381 : vector<2x64xf32>
    %cst_151 = arith.constant 0.00999999977 : f32
    %383 = vector.broadcast %cst_151 : f32 to vector<2x64xf32>
    %384 = arith.mulf %383, %380 : vector<2x64xf32>
    %385 = arith.select %382, %380, %384 : vector<2x64xi1>, vector<2x64xf32>
    %c0_152 = arith.constant 0 : index
    %c0_153 = arith.constant 0 : index
    %386 = vector.load %arg12[%c0_152, %c0_153] : memref<1x32xf32, #tpu.memory_space<vmem>>, vector<1x32xf32>
    %c0_154 = arith.constant 0 : index
    %c0_155 = arith.constant 0 : index
    %c0_156 = arith.constant 0 : index
    %387 = vector.load %arg11[%c0_154, %c0_155, %c0_156] : memref<2x64x32xf32, #tpu.memory_space<vmem>>, vector<1x64x32xf32>
    %388 = vector.shape_cast %387 : vector<1x64x32xf32> to vector<64x32xf32>
    %cst_157 = arith.constant dense<0.000000e+00> : vector<2x32xf32>
    %389 = tpu.matmul %376, %388, %cst_157 {dimension_numbers = #tpu.dot_dimension_numbers<[1], [0], [0], [1], [0, 0, 1, 1], [], []>} : vector<2x64xf32>, vector<64x32xf32>, vector<2x32xf32> -> vector<2x32xf32>
    %390 = vector.broadcast %386 : vector<1x32xf32> to vector<2x32xf32>
    %391 = arith.addf %390, %389 : vector<2x32xf32>
    %c1_158 = arith.constant 1 : index
    %c0_159 = arith.constant 0 : index
    %c0_160 = arith.constant 0 : index
    %392 = vector.load %arg11[%c1_158, %c0_159, %c0_160] : memref<2x64x32xf32, #tpu.memory_space<vmem>>, vector<1x64x32xf32>
    %393 = vector.shape_cast %392 : vector<1x64x32xf32> to vector<64x32xf32>
    %cst_161 = arith.constant dense<0.000000e+00> : vector<2x32xf32>
    %394 = tpu.matmul %385, %393, %cst_161 {dimension_numbers = #tpu.dot_dimension_numbers<[1], [0], [0], [1], [0, 0, 1, 1], [], []>} : vector<2x64xf32>, vector<64x32xf32>, vector<2x32xf32> -> vector<2x32xf32>
    %395 = arith.addf %391, %394 : vector<2x32xf32>
    %396 = vector.extract_strided_slice %395 {offsets = [0, 0], sizes = [2, 16], strides = [1, 1]} : vector<2x32xf32> to vector<2x16xf32>
    %397 = vector.extract_strided_slice %395 {offsets = [0, 16], sizes = [2, 16], strides = [1, 1]} : vector<2x32xf32> to vector<2x16xf32>
    %c0_162 = arith.constant 0 : index
    %c0_163 = arith.constant 0 : index
    %398 = vector.load %arg1[%c0_162, %c0_163] : memref<2x16xf32, #tpu.memory_space<vmem>>, vector<2x16xf32>
    %cst_164 = arith.constant 5.000000e-01 : f32
    %399 = vector.broadcast %cst_164 : f32 to vector<2x16xf32>
    %400 = arith.mulf %399, %397 : vector<2x16xf32>
    %401 = math.exp %400 : vector<2x16xf32>
    %402 = arith.mulf %398, %401 : vector<2x16xf32>
    %403 = arith.addf %402, %396 : vector<2x16xf32>
    %c0_165 = arith.constant 0 : index
    %c0_166 = arith.constant 0 : index
    %404 = vector.load %arg27[%c0_165, %c0_166] : memref<2x16xf32, #tpu.memory_space<vmem>>, vector<2x16xf32>
    tpu.vector_store %arg27[%c0_165, %c0_166], %396 {strides = array<i32>} : memref<2x16xf32, #tpu.memory_space<vmem>>, vector<2x16xf32>,
    %c0_167 = arith.constant 0 : index
    %c0_168 = arith.constant 0 : index
    %405 = vector.load %arg28[%c0_167, %c0_168] : memref<2x16xf32, #tpu.memory_space<vmem>>, vector<2x16xf32>
    tpu.vector_store %arg28[%c0_167, %c0_168], %397 {strides = array<i32>} : memref<2x16xf32, #tpu.memory_space<vmem>>, vector<2x16xf32>,
    %c0_169 = arith.constant 0 : index
    %c0_170 = arith.constant 0 : index
    %c0_171 = arith.constant 0 : index
    %406 = vector.load %arg13[%c0_169, %c0_170, %c0_171] : memref<2x16x64xf32, #tpu.memory_space<vmem>>, vector<1x16x64xf32>
    %407 = vector.shape_cast %406 : vector<1x16x64xf32> to vector<16x64xf32>
    %cst_172 = arith.constant dense<0.000000e+00> : vector<2x64xf32>
    %408 = tpu.matmul %403, %407, %cst_172 {dimension_numbers = #tpu.dot_dimension_numbers<[1], [0], [0], [1], [0, 0, 1, 1], [], []>} : vector<2x16xf32>, vector<16x64xf32>, vector<2x64xf32> -> vector<2x64xf32>
    %c0_173 = arith.constant 0 : index
    %c0_174 = arith.constant 0 : index
    %c0_175 = arith.constant 0 : index
    %409 = vector.load %arg14[%c0_173, %c0_174, %c0_175] : memref<2x1x64xf32, #tpu.memory_space<vmem>>, vector<1x1x64xf32>
    %410 = vector.shape_cast %409 : vector<1x1x64xf32> to vector<1x64xf32>
    %411 = vector.broadcast %410 : vector<1x64xf32> to vector<2x64xf32>
    %412 = arith.addf %408, %411 : vector<2x64xf32>
    %c1_176 = arith.constant 1 : index
    %c0_177 = arith.constant 0 : index
    %c0_178 = arith.constant 0 : index
    %413 = vector.load %arg13[%c1_176, %c0_177, %c0_178] : memref<2x16x64xf32, #tpu.memory_space<vmem>>, vector<1x16x64xf32>
    %414 = vector.shape_cast %413 : vector<1x16x64xf32> to vector<16x64xf32>
    %cst_179 = arith.constant dense<0.000000e+00> : vector<2x64xf32>
    %415 = tpu.matmul %403, %414, %cst_179 {dimension_numbers = #tpu.dot_dimension_numbers<[1], [0], [0], [1], [0, 0, 1, 1], [], []>} : vector<2x16xf32>, vector<16x64xf32>, vector<2x64xf32> -> vector<2x64xf32>
    %c1_180 = arith.constant 1 : index
    %c0_181 = arith.constant 0 : index
    %c0_182 = arith.constant 0 : index
    %416 = vector.load %arg14[%c1_180, %c0_181, %c0_182] : memref<2x1x64xf32, #tpu.memory_space<vmem>>, vector<1x1x64xf32>
    %417 = vector.shape_cast %416 : vector<1x1x64xf32> to vector<1x64xf32>
    %418 = vector.broadcast %417 : vector<1x64xf32> to vector<2x64xf32>
    %419 = arith.addf %415, %418 : vector<2x64xf32>
    %c0_183 = arith.constant 0 : index
    %c0_184 = arith.constant 0 : index
    %c0_185 = arith.constant 0 : index
    %420 = vector.load %arg15[%c0_183, %c0_184, %c0_185] : memref<3x64x64xf32, #tpu.memory_space<vmem>>, vector<1x64x64xf32>
    %421 = vector.shape_cast %420 : vector<1x64x64xf32> to vector<64x64xf32>
    %c1_186 = arith.constant 1 : index
    %c0_187 = arith.constant 0 : index
    %c0_188 = arith.constant 0 : index
    %422 = vector.load %arg15[%c1_186, %c0_187, %c0_188] : memref<3x64x64xf32, #tpu.memory_space<vmem>>, vector<1x64x64xf32>
    %423 = vector.shape_cast %422 : vector<1x64x64xf32> to vector<64x64xf32>
    %c2_189 = arith.constant 2 : index
    %c0_190 = arith.constant 0 : index
    %c0_191 = arith.constant 0 : index
    %424 = vector.load %arg15[%c2_189, %c0_190, %c0_191] : memref<3x64x64xf32, #tpu.memory_space<vmem>>, vector<1x64x64xf32>
    %425 = vector.shape_cast %424 : vector<1x64x64xf32> to vector<64x64xf32>
    %cst_192 = arith.constant dense<0.000000e+00> : vector<2x64xf32>
    %426 = tpu.matmul %412, %423, %cst_192 {dimension_numbers = #tpu.dot_dimension_numbers<[1], [0], [0], [1], [0, 0, 1, 1], [], []>} : vector<2x64xf32>, vector<64x64xf32>, vector<2x64xf32> -> vector<2x64xf32>
    %cst_193 = arith.constant dense<0.000000e+00> : vector<2x64xf32>
    %427 = tpu.matmul %419, %421, %cst_193 {dimension_numbers = #tpu.dot_dimension_numbers<[1], [0], [0], [1], [0, 0, 1, 1], [], []>} : vector<2x64xf32>, vector<64x64xf32>, vector<2x64xf32> -> vector<2x64xf32>
    %cst_194 = arith.constant dense<0.000000e+00> : vector<2x64xf32>
    %428 = tpu.matmul %412, %425, %cst_194 {dimension_numbers = #tpu.dot_dimension_numbers<[1], [0], [0], [1], [0, 0, 1, 1], [], []>} : vector<2x64xf32>, vector<64x64xf32>, vector<2x64xf32> -> vector<2x64xf32>
    %429 = arith.addf %427, %428 : vector<2x64xf32>
    %cst_195 = arith.constant dense<0.000000e+00> : vector<2x64xf32>
    %430 = tpu.matmul %419, %423, %cst_195 {dimension_numbers = #tpu.dot_dimension_numbers<[1], [0], [0], [1], [0, 0, 1, 1], [], []>} : vector<2x64xf32>, vector<64x64xf32>, vector<2x64xf32> -> vector<2x64xf32>
    %cst_196 = arith.constant dense<0.000000e+00> : vector<2x64xf32>
    %431 = tpu.matmul %419, %425, %cst_196 {dimension_numbers = #tpu.dot_dimension_numbers<[1], [0], [0], [1], [0, 0, 1, 1], [], []>} : vector<2x64xf32>, vector<64x64xf32>, vector<2x64xf32> -> vector<2x64xf32>
    %432 = arith.mulf %426, %426 : vector<2x64xf32>
    %433 = arith.addf %426, %429 : vector<2x64xf32>
    %434 = arith.mulf %429, %429 : vector<2x64xf32>
    %435 = arith.addf %432, %434 : vector<2x64xf32>
    %436 = arith.addf %433, %430 : vector<2x64xf32>
    %437 = arith.mulf %430, %430 : vector<2x64xf32>
    %438 = arith.addf %435, %437 : vector<2x64xf32>
    %439 = arith.addf %436, %431 : vector<2x64xf32>
    %440 = arith.mulf %431, %431 : vector<2x64xf32>
    %441 = arith.addf %438, %440 : vector<2x64xf32>
    %442 = vector.extract_strided_slice %439 {offsets = [0, 0], sizes = [2, 16], strides = [1, 1]} : vector<2x64xf32> to vector<2x16xf32>
    %443 = vector.extract_strided_slice %441 {offsets = [0, 0], sizes = [2, 16], strides = [1, 1]} : vector<2x64xf32> to vector<2x16xf32>
    %444 = vector.extract_strided_slice %439 {offsets = [0, 16], sizes = [2, 16], strides = [1, 1]} : vector<2x64xf32> to vector<2x16xf32>
    %445 = arith.addf %442, %444 : vector<2x16xf32>
    %446 = vector.extract_strided_slice %441 {offsets = [0, 16], sizes = [2, 16], strides = [1, 1]} : vector<2x64xf32> to vector<2x16xf32>
    %447 = arith.addf %443, %446 : vector<2x16xf32>
    %448 = vector.extract_strided_slice %439 {offsets = [0, 32], sizes = [2, 16], strides = [1, 1]} : vector<2x64xf32> to vector<2x16xf32>
    %449 = arith.addf %445, %448 : vector<2x16xf32>
    %450 = vector.extract_strided_slice %441 {offsets = [0, 32], sizes = [2, 16], strides = [1, 1]} : vector<2x64xf32> to vector<2x16xf32>
    %451 = arith.addf %447, %450 : vector<2x16xf32>
    %452 = vector.extract_strided_slice %439 {offsets = [0, 48], sizes = [2, 16], strides = [1, 1]} : vector<2x64xf32> to vector<2x16xf32>
    %453 = arith.addf %449, %452 : vector<2x16xf32>
    %454 = vector.extract_strided_slice %441 {offsets = [0, 48], sizes = [2, 16], strides = [1, 1]} : vector<2x64xf32> to vector<2x16xf32>
    %455 = arith.addf %451, %454 : vector<2x16xf32>
    %cst_197 = arith.constant dense<0.000000e+00> : vector<16xf32>
    %456 = vector.multi_reduction <add>, %453, %cst_197 [0] : vector<2x16xf32> to vector<16xf32>
    %457 = vector.shape_cast %456 : vector<16xf32> to vector<1x16xf32>
    %cst_198 = arith.constant dense<0.000000e+00> : vector<16xf32>
    %458 = vector.multi_reduction <add>, %455, %cst_198 [0] : vector<2x16xf32> to vector<16xf32>
    %459 = vector.shape_cast %458 : vector<16xf32> to vector<1x16xf32>
    %cst_199 = arith.constant 3.200000e+01 : f32
    %460 = vector.broadcast %cst_199 : f32 to vector<1x16xf32>
    %461 = arith.divf %457, %460 : vector<1x16xf32>
    %cst_200 = arith.constant 3.200000e+01 : f32
    %462 = vector.broadcast %cst_200 : f32 to vector<1x16xf32>
    %463 = arith.divf %459, %462 : vector<1x16xf32>
    %464 = arith.mulf %461, %461 : vector<1x16xf32>
    %465 = arith.subf %463, %464 : vector<1x16xf32>
    %c0_201 = arith.constant 0 : index
    %c0_202 = arith.constant 0 : index
    %466 = vector.load %arg16[%c0_201, %c0_202] : memref<1x16xf32, #tpu.memory_space<vmem>>, vector<1x16xf32>
    %cst_203 = arith.constant 9.99999974E-6 : f32
    %467 = vector.broadcast %cst_203 : f32 to vector<1x16xf32>
    %468 = arith.addf %465, %467 : vector<1x16xf32>
    %469 = math.rsqrt %468 : vector<1x16xf32>
    %470 = arith.mulf %466, %469 : vector<1x16xf32>
    %c0_204 = arith.constant 0 : index
    %c0_205 = arith.constant 0 : index
    %471 = vector.load %arg17[%c0_204, %c0_205] : memref<1x16xf32, #tpu.memory_space<vmem>>, vector<1x16xf32>
    %472 = arith.mulf %461, %470 : vector<1x16xf32>
    %473 = arith.subf %471, %472 : vector<1x16xf32>
    %474 = tpu.concatenate %470, %470, %470, %470 in 1 : vector<1x16xf32>, vector<1x16xf32>, vector<1x16xf32>, vector<1x16xf32> -> vector<1x64xf32>
    %475 = tpu.concatenate %473, %473, %473, %473 in 1 : vector<1x16xf32>, vector<1x16xf32>, vector<1x16xf32>, vector<1x16xf32> -> vector<1x64xf32>
    %476 = vector.broadcast %474 : vector<1x64xf32> to vector<2x64xf32>
    %477 = arith.mulf %426, %476 : vector<2x64xf32>
    %478 = vector.broadcast %475 : vector<1x64xf32> to vector<2x64xf32>
    %479 = arith.addf %477, %478 : vector<2x64xf32>
    %cst_206 = arith.constant 0.000000e+00 : f32
    %480 = vector.broadcast %cst_206 : f32 to vector<2x64xf32>
    %481 = arith.cmpf ogt, %479, %480 : vector<2x64xf32>
    %cst_207 = arith.constant 0.00999999977 : f32
    %482 = vector.broadcast %cst_207 : f32 to vector<2x64xf32>
    %483 = arith.mulf %482, %479 : vector<2x64xf32>
    %484 = arith.select %481, %479, %483 : vector<2x64xi1>, vector<2x64xf32>
    %485 = vector.broadcast %474 : vector<1x64xf32> to vector<2x64xf32>
    %486 = arith.mulf %429, %485 : vector<2x64xf32>
    %487 = vector.broadcast %475 : vector<1x64xf32> to vector<2x64xf32>
    %488 = arith.addf %486, %487 : vector<2x64xf32>
    %cst_208 = arith.constant 0.000000e+00 : f32
    %489 = vector.broadcast %cst_208 : f32 to vector<2x64xf32>
    %490 = arith.cmpf ogt, %488, %489 : vector<2x64xf32>
    %cst_209 = arith.constant 0.00999999977 : f32
    %491 = vector.broadcast %cst_209 : f32 to vector<2x64xf32>
    %492 = arith.mulf %491, %488 : vector<2x64xf32>
    %493 = arith.select %490, %488, %492 : vector<2x64xi1>, vector<2x64xf32>
    %494 = vector.broadcast %474 : vector<1x64xf32> to vector<2x64xf32>
    %495 = arith.mulf %430, %494 : vector<2x64xf32>
    %496 = vector.broadcast %475 : vector<1x64xf32> to vector<2x64xf32>
    %497 = arith.addf %495, %496 : vector<2x64xf32>
    %cst_210 = arith.constant 0.000000e+00 : f32
    %498 = vector.broadcast %cst_210 : f32 to vector<2x64xf32>
    %499 = arith.cmpf ogt, %497, %498 : vector<2x64xf32>
    %cst_211 = arith.constant 0.00999999977 : f32
    %500 = vector.broadcast %cst_211 : f32 to vector<2x64xf32>
    %501 = arith.mulf %500, %497 : vector<2x64xf32>
    %502 = arith.select %499, %497, %501 : vector<2x64xi1>, vector<2x64xf32>
    %503 = vector.broadcast %474 : vector<1x64xf32> to vector<2x64xf32>
    %504 = arith.mulf %431, %503 : vector<2x64xf32>
    %505 = vector.broadcast %475 : vector<1x64xf32> to vector<2x64xf32>
    %506 = arith.addf %504, %505 : vector<2x64xf32>
    %cst_212 = arith.constant 0.000000e+00 : f32
    %507 = vector.broadcast %cst_212 : f32 to vector<2x64xf32>
    %508 = arith.cmpf ogt, %506, %507 : vector<2x64xf32>
    %cst_213 = arith.constant 0.00999999977 : f32
    %509 = vector.broadcast %cst_213 : f32 to vector<2x64xf32>
    %510 = arith.mulf %509, %506 : vector<2x64xf32>
    %511 = arith.select %508, %506, %510 : vector<2x64xi1>, vector<2x64xf32>
    %c0_214 = arith.constant 0 : index
    %c0_215 = arith.constant 0 : index
    %c0_216 = arith.constant 0 : index
    %512 = vector.load %arg18[%c0_214, %c0_215, %c0_216] : memref<3x64x64xf32, #tpu.memory_space<vmem>>, vector<1x64x64xf32>
    %513 = vector.shape_cast %512 : vector<1x64x64xf32> to vector<64x64xf32>
    %c1_217 = arith.constant 1 : index
    %c0_218 = arith.constant 0 : index
    %c0_219 = arith.constant 0 : index
    %514 = vector.load %arg18[%c1_217, %c0_218, %c0_219] : memref<3x64x64xf32, #tpu.memory_space<vmem>>, vector<1x64x64xf32>
    %515 = vector.shape_cast %514 : vector<1x64x64xf32> to vector<64x64xf32>
    %c2_220 = arith.constant 2 : index
    %c0_221 = arith.constant 0 : index
    %c0_222 = arith.constant 0 : index
    %516 = vector.load %arg18[%c2_220, %c0_221, %c0_222] : memref<3x64x64xf32, #tpu.memory_space<vmem>>, vector<1x64x64xf32>
    %517 = vector.shape_cast %516 : vector<1x64x64xf32> to vector<64x64xf32>
    %cst_223 = arith.constant dense<0.000000e+00> : vector<2x64xf32>
    %518 = tpu.matmul %484, %515, %cst_223 {dimension_numbers = #tpu.dot_dimension_numbers<[1], [0], [0], [1], [0, 0, 1, 1], [], []>} : vector<2x64xf32>, vector<64x64xf32>, vector<2x64xf32> -> vector<2x64xf32>
    %cst_224 = arith.constant dense<0.000000e+00> : vector<2x64xf32>
    %519 = tpu.matmul %493, %513, %cst_224 {dimension_numbers = #tpu.dot_dimension_numbers<[1], [0], [0], [1], [0, 0, 1, 1], [], []>} : vector<2x64xf32>, vector<64x64xf32>, vector<2x64xf32> -> vector<2x64xf32>
    %cst_225 = arith.constant dense<0.000000e+00> : vector<2x64xf32>
    %520 = tpu.matmul %484, %517, %cst_225 {dimension_numbers = #tpu.dot_dimension_numbers<[1], [0], [0], [1], [0, 0, 1, 1], [], []>} : vector<2x64xf32>, vector<64x64xf32>, vector<2x64xf32> -> vector<2x64xf32>
    %521 = arith.addf %519, %520 : vector<2x64xf32>
    %cst_226 = arith.constant dense<0.000000e+00> : vector<2x64xf32>
    %522 = tpu.matmul %493, %515, %cst_226 {dimension_numbers = #tpu.dot_dimension_numbers<[1], [0], [0], [1], [0, 0, 1, 1], [], []>} : vector<2x64xf32>, vector<64x64xf32>, vector<2x64xf32> -> vector<2x64xf32>
    %cst_227 = arith.constant dense<0.000000e+00> : vector<2x64xf32>
    %523 = tpu.matmul %502, %513, %cst_227 {dimension_numbers = #tpu.dot_dimension_numbers<[1], [0], [0], [1], [0, 0, 1, 1], [], []>} : vector<2x64xf32>, vector<64x64xf32>, vector<2x64xf32> -> vector<2x64xf32>
    %cst_228 = arith.constant dense<0.000000e+00> : vector<2x64xf32>
    %524 = tpu.matmul %493, %517, %cst_228 {dimension_numbers = #tpu.dot_dimension_numbers<[1], [0], [0], [1], [0, 0, 1, 1], [], []>} : vector<2x64xf32>, vector<64x64xf32>, vector<2x64xf32> -> vector<2x64xf32>
    %525 = arith.addf %523, %524 : vector<2x64xf32>
    %cst_229 = arith.constant dense<0.000000e+00> : vector<2x64xf32>
    %526 = tpu.matmul %502, %515, %cst_229 {dimension_numbers = #tpu.dot_dimension_numbers<[1], [0], [0], [1], [0, 0, 1, 1], [], []>} : vector<2x64xf32>, vector<64x64xf32>, vector<2x64xf32> -> vector<2x64xf32>
    %cst_230 = arith.constant dense<0.000000e+00> : vector<2x64xf32>
    %527 = tpu.matmul %511, %513, %cst_230 {dimension_numbers = #tpu.dot_dimension_numbers<[1], [0], [0], [1], [0, 0, 1, 1], [], []>} : vector<2x64xf32>, vector<64x64xf32>, vector<2x64xf32> -> vector<2x64xf32>
    %cst_231 = arith.constant dense<0.000000e+00> : vector<2x64xf32>
    %528 = tpu.matmul %502, %517, %cst_231 {dimension_numbers = #tpu.dot_dimension_numbers<[1], [0], [0], [1], [0, 0, 1, 1], [], []>} : vector<2x64xf32>, vector<64x64xf32>, vector<2x64xf32> -> vector<2x64xf32>
    %529 = arith.addf %527, %528 : vector<2x64xf32>
    %cst_232 = arith.constant dense<0.000000e+00> : vector<2x64xf32>
    %530 = tpu.matmul %511, %515, %cst_232 {dimension_numbers = #tpu.dot_dimension_numbers<[1], [0], [0], [1], [0, 0, 1, 1], [], []>} : vector<2x64xf32>, vector<64x64xf32>, vector<2x64xf32> -> vector<2x64xf32>
    %cst_233 = arith.constant dense<0.000000e+00> : vector<2x64xf32>
    %531 = tpu.matmul %511, %517, %cst_233 {dimension_numbers = #tpu.dot_dimension_numbers<[1], [0], [0], [1], [0, 0, 1, 1], [], []>} : vector<2x64xf32>, vector<64x64xf32>, vector<2x64xf32> -> vector<2x64xf32>
    %532 = arith.mulf %518, %518 : vector<2x64xf32>
    %533 = arith.addf %518, %521 : vector<2x64xf32>
    %534 = arith.mulf %521, %521 : vector<2x64xf32>
    %535 = arith.addf %532, %534 : vector<2x64xf32>
    %536 = arith.addf %533, %522 : vector<2x64xf32>
    %537 = arith.mulf %522, %522 : vector<2x64xf32>
    %538 = arith.addf %535, %537 : vector<2x64xf32>
    %539 = arith.addf %536, %525 : vector<2x64xf32>
    %540 = arith.mulf %525, %525 : vector<2x64xf32>
    %541 = arith.addf %538, %540 : vector<2x64xf32>
    %542 = arith.addf %539, %526 : vector<2x64xf32>
    %543 = arith.mulf %526, %526 : vector<2x64xf32>
    %544 = arith.addf %541, %543 : vector<2x64xf32>
    %545 = arith.addf %542, %529 : vector<2x64xf32>
    %546 = arith.mulf %529, %529 : vector<2x64xf32>
    %547 = arith.addf %544, %546 : vector<2x64xf32>
    %548 = arith.addf %545, %530 : vector<2x64xf32>
    %549 = arith.mulf %530, %530 : vector<2x64xf32>
    %550 = arith.addf %547, %549 : vector<2x64xf32>
    %551 = arith.addf %548, %531 : vector<2x64xf32>
    %552 = arith.mulf %531, %531 : vector<2x64xf32>
    %553 = arith.addf %550, %552 : vector<2x64xf32>
    %554 = vector.extract_strided_slice %551 {offsets = [0, 0], sizes = [2, 8], strides = [1, 1]} : vector<2x64xf32> to vector<2x8xf32>
    %555 = vector.extract_strided_slice %553 {offsets = [0, 0], sizes = [2, 8], strides = [1, 1]} : vector<2x64xf32> to vector<2x8xf32>
    %556 = vector.extract_strided_slice %551 {offsets = [0, 8], sizes = [2, 8], strides = [1, 1]} : vector<2x64xf32> to vector<2x8xf32>
    %557 = arith.addf %554, %556 : vector<2x8xf32>
    %558 = vector.extract_strided_slice %553 {offsets = [0, 8], sizes = [2, 8], strides = [1, 1]} : vector<2x64xf32> to vector<2x8xf32>
    %559 = arith.addf %555, %558 : vector<2x8xf32>
    %560 = vector.extract_strided_slice %551 {offsets = [0, 16], sizes = [2, 8], strides = [1, 1]} : vector<2x64xf32> to vector<2x8xf32>
    %561 = arith.addf %557, %560 : vector<2x8xf32>
    %562 = vector.extract_strided_slice %553 {offsets = [0, 16], sizes = [2, 8], strides = [1, 1]} : vector<2x64xf32> to vector<2x8xf32>
    %563 = arith.addf %559, %562 : vector<2x8xf32>
    %564 = vector.extract_strided_slice %551 {offsets = [0, 24], sizes = [2, 8], strides = [1, 1]} : vector<2x64xf32> to vector<2x8xf32>
    %565 = arith.addf %561, %564 : vector<2x8xf32>
    %566 = vector.extract_strided_slice %553 {offsets = [0, 24], sizes = [2, 8], strides = [1, 1]} : vector<2x64xf32> to vector<2x8xf32>
    %567 = arith.addf %563, %566 : vector<2x8xf32>
    %568 = vector.extract_strided_slice %551 {offsets = [0, 32], sizes = [2, 8], strides = [1, 1]} : vector<2x64xf32> to vector<2x8xf32>
    %569 = arith.addf %565, %568 : vector<2x8xf32>
    %570 = vector.extract_strided_slice %553 {offsets = [0, 32], sizes = [2, 8], strides = [1, 1]} : vector<2x64xf32> to vector<2x8xf32>
    %571 = arith.addf %567, %570 : vector<2x8xf32>
    %572 = vector.extract_strided_slice %551 {offsets = [0, 40], sizes = [2, 8], strides = [1, 1]} : vector<2x64xf32> to vector<2x8xf32>
    %573 = arith.addf %569, %572 : vector<2x8xf32>
    %574 = vector.extract_strided_slice %553 {offsets = [0, 40], sizes = [2, 8], strides = [1, 1]} : vector<2x64xf32> to vector<2x8xf32>
    %575 = arith.addf %571, %574 : vector<2x8xf32>
    %576 = vector.extract_strided_slice %551 {offsets = [0, 48], sizes = [2, 8], strides = [1, 1]} : vector<2x64xf32> to vector<2x8xf32>
    %577 = arith.addf %573, %576 : vector<2x8xf32>
    %578 = vector.extract_strided_slice %553 {offsets = [0, 48], sizes = [2, 8], strides = [1, 1]} : vector<2x64xf32> to vector<2x8xf32>
    %579 = arith.addf %575, %578 : vector<2x8xf32>
    %580 = vector.extract_strided_slice %551 {offsets = [0, 56], sizes = [2, 8], strides = [1, 1]} : vector<2x64xf32> to vector<2x8xf32>
    %581 = arith.addf %577, %580 : vector<2x8xf32>
    %582 = vector.extract_strided_slice %553 {offsets = [0, 56], sizes = [2, 8], strides = [1, 1]} : vector<2x64xf32> to vector<2x8xf32>
    %583 = arith.addf %579, %582 : vector<2x8xf32>
    %cst_234 = arith.constant dense<0.000000e+00> : vector<8xf32>
    %584 = vector.multi_reduction <add>, %581, %cst_234 [0] : vector<2x8xf32> to vector<8xf32>
    %585 = vector.shape_cast %584 : vector<8xf32> to vector<1x8xf32>
    %cst_235 = arith.constant dense<0.000000e+00> : vector<8xf32>
    %586 = vector.multi_reduction <add>, %583, %cst_235 [0] : vector<2x8xf32> to vector<8xf32>
    %587 = vector.shape_cast %586 : vector<8xf32> to vector<1x8xf32>
    %cst_236 = arith.constant 1.280000e+02 : f32
    %588 = vector.broadcast %cst_236 : f32 to vector<1x8xf32>
    %589 = arith.divf %585, %588 : vector<1x8xf32>
    %cst_237 = arith.constant 1.280000e+02 : f32
    %590 = vector.broadcast %cst_237 : f32 to vector<1x8xf32>
    %591 = arith.divf %587, %590 : vector<1x8xf32>
    %592 = arith.mulf %589, %589 : vector<1x8xf32>
    %593 = arith.subf %591, %592 : vector<1x8xf32>
    %c0_238 = arith.constant 0 : index
    %c0_239 = arith.constant 0 : index
    %594 = vector.load %arg19[%c0_238, %c0_239] : memref<1x8xf32, #tpu.memory_space<vmem>>, vector<1x8xf32>
    %cst_240 = arith.constant 9.99999974E-6 : f32
    %595 = vector.broadcast %cst_240 : f32 to vector<1x8xf32>
    %596 = arith.addf %593, %595 : vector<1x8xf32>
    %597 = math.rsqrt %596 : vector<1x8xf32>
    %598 = arith.mulf %594, %597 : vector<1x8xf32>
    %c0_241 = arith.constant 0 : index
    %c0_242 = arith.constant 0 : index
    %599 = vector.load %arg20[%c0_241, %c0_242] : memref<1x8xf32, #tpu.memory_space<vmem>>, vector<1x8xf32>
    %600 = arith.mulf %589, %598 : vector<1x8xf32>
    %601 = arith.subf %599, %600 : vector<1x8xf32>
    %602 = tpu.concatenate %598, %598, %598, %598, %598, %598, %598, %598 in 1 : vector<1x8xf32>, vector<1x8xf32>, vector<1x8xf32>, vector<1x8xf32>, vector<1x8xf32>, vector<1x8xf32>, vector<1x8xf32>, vector<1x8xf32> -> vector<1x64xf32>
    %603 = tpu.concatenate %601, %601, %601, %601, %601, %601, %601, %601 in 1 : vector<1x8xf32>, vector<1x8xf32>, vector<1x8xf32>, vector<1x8xf32>, vector<1x8xf32>, vector<1x8xf32>, vector<1x8xf32>, vector<1x8xf32> -> vector<1x64xf32>
    %604 = vector.broadcast %602 : vector<1x64xf32> to vector<2x64xf32>
    %605 = arith.mulf %518, %604 : vector<2x64xf32>
    %606 = vector.broadcast %603 : vector<1x64xf32> to vector<2x64xf32>
    %607 = arith.addf %605, %606 : vector<2x64xf32>
    %cst_243 = arith.constant 0.000000e+00 : f32
    %608 = vector.broadcast %cst_243 : f32 to vector<2x64xf32>
    %609 = arith.cmpf ogt, %607, %608 : vector<2x64xf32>
    %cst_244 = arith.constant 0.00999999977 : f32
    %610 = vector.broadcast %cst_244 : f32 to vector<2x64xf32>
    %611 = arith.mulf %610, %607 : vector<2x64xf32>
    %612 = arith.select %609, %607, %611 : vector<2x64xi1>, vector<2x64xf32>
    %613 = vector.broadcast %602 : vector<1x64xf32> to vector<2x64xf32>
    %614 = arith.mulf %521, %613 : vector<2x64xf32>
    %615 = vector.broadcast %603 : vector<1x64xf32> to vector<2x64xf32>
    %616 = arith.addf %614, %615 : vector<2x64xf32>
    %cst_245 = arith.constant 0.000000e+00 : f32
    %617 = vector.broadcast %cst_245 : f32 to vector<2x64xf32>
    %618 = arith.cmpf ogt, %616, %617 : vector<2x64xf32>
    %cst_246 = arith.constant 0.00999999977 : f32
    %619 = vector.broadcast %cst_246 : f32 to vector<2x64xf32>
    %620 = arith.mulf %619, %616 : vector<2x64xf32>
    %621 = arith.select %618, %616, %620 : vector<2x64xi1>, vector<2x64xf32>
    %622 = vector.broadcast %602 : vector<1x64xf32> to vector<2x64xf32>
    %623 = arith.mulf %522, %622 : vector<2x64xf32>
    %624 = vector.broadcast %603 : vector<1x64xf32> to vector<2x64xf32>
    %625 = arith.addf %623, %624 : vector<2x64xf32>
    %cst_247 = arith.constant 0.000000e+00 : f32
    %626 = vector.broadcast %cst_247 : f32 to vector<2x64xf32>
    %627 = arith.cmpf ogt, %625, %626 : vector<2x64xf32>
    %cst_248 = arith.constant 0.00999999977 : f32
    %628 = vector.broadcast %cst_248 : f32 to vector<2x64xf32>
    %629 = arith.mulf %628, %625 : vector<2x64xf32>
    %630 = arith.select %627, %625, %629 : vector<2x64xi1>, vector<2x64xf32>
    %631 = vector.broadcast %602 : vector<1x64xf32> to vector<2x64xf32>
    %632 = arith.mulf %525, %631 : vector<2x64xf32>
    %633 = vector.broadcast %603 : vector<1x64xf32> to vector<2x64xf32>
    %634 = arith.addf %632, %633 : vector<2x64xf32>
    %cst_249 = arith.constant 0.000000e+00 : f32
    %635 = vector.broadcast %cst_249 : f32 to vector<2x64xf32>
    %636 = arith.cmpf ogt, %634, %635 : vector<2x64xf32>
    %cst_250 = arith.constant 0.00999999977 : f32
    %637 = vector.broadcast %cst_250 : f32 to vector<2x64xf32>
    %638 = arith.mulf %637, %634 : vector<2x64xf32>
    %639 = arith.select %636, %634, %638 : vector<2x64xi1>, vector<2x64xf32>
    %640 = vector.broadcast %602 : vector<1x64xf32> to vector<2x64xf32>
    %641 = arith.mulf %526, %640 : vector<2x64xf32>
    %642 = vector.broadcast %603 : vector<1x64xf32> to vector<2x64xf32>
    %643 = arith.addf %641, %642 : vector<2x64xf32>
    %cst_251 = arith.constant 0.000000e+00 : f32
    %644 = vector.broadcast %cst_251 : f32 to vector<2x64xf32>
    %645 = arith.cmpf ogt, %643, %644 : vector<2x64xf32>
    %cst_252 = arith.constant 0.00999999977 : f32
    %646 = vector.broadcast %cst_252 : f32 to vector<2x64xf32>
    %647 = arith.mulf %646, %643 : vector<2x64xf32>
    %648 = arith.select %645, %643, %647 : vector<2x64xi1>, vector<2x64xf32>
    %649 = vector.broadcast %602 : vector<1x64xf32> to vector<2x64xf32>
    %650 = arith.mulf %529, %649 : vector<2x64xf32>
    %651 = vector.broadcast %603 : vector<1x64xf32> to vector<2x64xf32>
    %652 = arith.addf %650, %651 : vector<2x64xf32>
    %cst_253 = arith.constant 0.000000e+00 : f32
    %653 = vector.broadcast %cst_253 : f32 to vector<2x64xf32>
    %654 = arith.cmpf ogt, %652, %653 : vector<2x64xf32>
    %cst_254 = arith.constant 0.00999999977 : f32
    %655 = vector.broadcast %cst_254 : f32 to vector<2x64xf32>
    %656 = arith.mulf %655, %652 : vector<2x64xf32>
    %657 = arith.select %654, %652, %656 : vector<2x64xi1>, vector<2x64xf32>
    %658 = vector.broadcast %602 : vector<1x64xf32> to vector<2x64xf32>
    %659 = arith.mulf %530, %658 : vector<2x64xf32>
    %660 = vector.broadcast %603 : vector<1x64xf32> to vector<2x64xf32>
    %661 = arith.addf %659, %660 : vector<2x64xf32>
    %cst_255 = arith.constant 0.000000e+00 : f32
    %662 = vector.broadcast %cst_255 : f32 to vector<2x64xf32>
    %663 = arith.cmpf ogt, %661, %662 : vector<2x64xf32>
    %cst_256 = arith.constant 0.00999999977 : f32
    %664 = vector.broadcast %cst_256 : f32 to vector<2x64xf32>
    %665 = arith.mulf %664, %661 : vector<2x64xf32>
    %666 = arith.select %663, %661, %665 : vector<2x64xi1>, vector<2x64xf32>
    %667 = vector.broadcast %602 : vector<1x64xf32> to vector<2x64xf32>
    %668 = arith.mulf %531, %667 : vector<2x64xf32>
    %669 = vector.broadcast %603 : vector<1x64xf32> to vector<2x64xf32>
    %670 = arith.addf %668, %669 : vector<2x64xf32>
    %cst_257 = arith.constant 0.000000e+00 : f32
    %671 = vector.broadcast %cst_257 : f32 to vector<2x64xf32>
    %672 = arith.cmpf ogt, %670, %671 : vector<2x64xf32>
    %cst_258 = arith.constant 0.00999999977 : f32
    %673 = vector.broadcast %cst_258 : f32 to vector<2x64xf32>
    %674 = arith.mulf %673, %670 : vector<2x64xf32>
    %675 = arith.select %672, %670, %674 : vector<2x64xi1>, vector<2x64xf32>
    %c0_259 = arith.constant 0 : index
    %c0_260 = arith.constant 0 : index
    %c0_261 = arith.constant 0 : index
    %676 = vector.load %arg21[%c0_259, %c0_260, %c0_261] : memref<3x64x128xf32, #tpu.memory_space<vmem>>, vector<1x64x128xf32>
    %677 = vector.shape_cast %676 : vector<1x64x128xf32> to vector<64x128xf32>
    %c1_262 = arith.constant 1 : index
    %c0_263 = arith.constant 0 : index
    %c0_264 = arith.constant 0 : index
    %678 = vector.load %arg21[%c1_262, %c0_263, %c0_264] : memref<3x64x128xf32, #tpu.memory_space<vmem>>, vector<1x64x128xf32>
    %679 = vector.shape_cast %678 : vector<1x64x128xf32> to vector<64x128xf32>
    %c2_265 = arith.constant 2 : index
    %c0_266 = arith.constant 0 : index
    %c0_267 = arith.constant 0 : index
    %680 = vector.load %arg21[%c2_265, %c0_266, %c0_267] : memref<3x64x128xf32, #tpu.memory_space<vmem>>, vector<1x64x128xf32>
    %681 = vector.shape_cast %680 : vector<1x64x128xf32> to vector<64x128xf32>
    %cst_268 = arith.constant dense<0.000000e+00> : vector<2x128xf32>
    %682 = tpu.matmul %612, %679, %cst_268 {dimension_numbers = #tpu.dot_dimension_numbers<[1], [0], [0], [1], [0, 0, 1, 1], [], []>} : vector<2x64xf32>, vector<64x128xf32>, vector<2x128xf32> -> vector<2x128xf32>
    %cst_269 = arith.constant dense<0.000000e+00> : vector<2x128xf32>
    %683 = tpu.matmul %621, %677, %cst_269 {dimension_numbers = #tpu.dot_dimension_numbers<[1], [0], [0], [1], [0, 0, 1, 1], [], []>} : vector<2x64xf32>, vector<64x128xf32>, vector<2x128xf32> -> vector<2x128xf32>
    %cst_270 = arith.constant dense<0.000000e+00> : vector<2x128xf32>
    %684 = tpu.matmul %612, %681, %cst_270 {dimension_numbers = #tpu.dot_dimension_numbers<[1], [0], [0], [1], [0, 0, 1, 1], [], []>} : vector<2x64xf32>, vector<64x128xf32>, vector<2x128xf32> -> vector<2x128xf32>
    %685 = arith.addf %683, %684 : vector<2x128xf32>
    %cst_271 = arith.constant dense<0.000000e+00> : vector<2x128xf32>
    %686 = tpu.matmul %621, %679, %cst_271 {dimension_numbers = #tpu.dot_dimension_numbers<[1], [0], [0], [1], [0, 0, 1, 1], [], []>} : vector<2x64xf32>, vector<64x128xf32>, vector<2x128xf32> -> vector<2x128xf32>
    %cst_272 = arith.constant dense<0.000000e+00> : vector<2x128xf32>
    %687 = tpu.matmul %630, %677, %cst_272 {dimension_numbers = #tpu.dot_dimension_numbers<[1], [0], [0], [1], [0, 0, 1, 1], [], []>} : vector<2x64xf32>, vector<64x128xf32>, vector<2x128xf32> -> vector<2x128xf32>
    %cst_273 = arith.constant dense<0.000000e+00> : vector<2x128xf32>
    %688 = tpu.matmul %621, %681, %cst_273 {dimension_numbers = #tpu.dot_dimension_numbers<[1], [0], [0], [1], [0, 0, 1, 1], [], []>} : vector<2x64xf32>, vector<64x128xf32>, vector<2x128xf32> -> vector<2x128xf32>
    %689 = arith.addf %687, %688 : vector<2x128xf32>
    %cst_274 = arith.constant dense<0.000000e+00> : vector<2x128xf32>
    %690 = tpu.matmul %630, %679, %cst_274 {dimension_numbers = #tpu.dot_dimension_numbers<[1], [0], [0], [1], [0, 0, 1, 1], [], []>} : vector<2x64xf32>, vector<64x128xf32>, vector<2x128xf32> -> vector<2x128xf32>
    %cst_275 = arith.constant dense<0.000000e+00> : vector<2x128xf32>
    %691 = tpu.matmul %639, %677, %cst_275 {dimension_numbers = #tpu.dot_dimension_numbers<[1], [0], [0], [1], [0, 0, 1, 1], [], []>} : vector<2x64xf32>, vector<64x128xf32>, vector<2x128xf32> -> vector<2x128xf32>
    %cst_276 = arith.constant dense<0.000000e+00> : vector<2x128xf32>
    %692 = tpu.matmul %630, %681, %cst_276 {dimension_numbers = #tpu.dot_dimension_numbers<[1], [0], [0], [1], [0, 0, 1, 1], [], []>} : vector<2x64xf32>, vector<64x128xf32>, vector<2x128xf32> -> vector<2x128xf32>
    %693 = arith.addf %691, %692 : vector<2x128xf32>
    %cst_277 = arith.constant dense<0.000000e+00> : vector<2x128xf32>
    %694 = tpu.matmul %639, %679, %cst_277 {dimension_numbers = #tpu.dot_dimension_numbers<[1], [0], [0], [1], [0, 0, 1, 1], [], []>} : vector<2x64xf32>, vector<64x128xf32>, vector<2x128xf32> -> vector<2x128xf32>
    %cst_278 = arith.constant dense<0.000000e+00> : vector<2x128xf32>
    %695 = tpu.matmul %648, %677, %cst_278 {dimension_numbers = #tpu.dot_dimension_numbers<[1], [0], [0], [1], [0, 0, 1, 1], [], []>} : vector<2x64xf32>, vector<64x128xf32>, vector<2x128xf32> -> vector<2x128xf32>
    %cst_279 = arith.constant dense<0.000000e+00> : vector<2x128xf32>
    %696 = tpu.matmul %639, %681, %cst_279 {dimension_numbers = #tpu.dot_dimension_numbers<[1], [0], [0], [1], [0, 0, 1, 1], [], []>} : vector<2x64xf32>, vector<64x128xf32>, vector<2x128xf32> -> vector<2x128xf32>
    %697 = arith.addf %695, %696 : vector<2x128xf32>
    %cst_280 = arith.constant dense<0.000000e+00> : vector<2x128xf32>
    %698 = tpu.matmul %648, %679, %cst_280 {dimension_numbers = #tpu.dot_dimension_numbers<[1], [0], [0], [1], [0, 0, 1, 1], [], []>} : vector<2x64xf32>, vector<64x128xf32>, vector<2x128xf32> -> vector<2x128xf32>
    %cst_281 = arith.constant dense<0.000000e+00> : vector<2x128xf32>
    %699 = tpu.matmul %657, %677, %cst_281 {dimension_numbers = #tpu.dot_dimension_numbers<[1], [0], [0], [1], [0, 0, 1, 1], [], []>} : vector<2x64xf32>, vector<64x128xf32>, vector<2x128xf32> -> vector<2x128xf32>
    %cst_282 = arith.constant dense<0.000000e+00> : vector<2x128xf32>
    %700 = tpu.matmul %648, %681, %cst_282 {dimension_numbers = #tpu.dot_dimension_numbers<[1], [0], [0], [1], [0, 0, 1, 1], [], []>} : vector<2x64xf32>, vector<64x128xf32>, vector<2x128xf32> -> vector<2x128xf32>
    %701 = arith.addf %699, %700 : vector<2x128xf32>
    %cst_283 = arith.constant dense<0.000000e+00> : vector<2x128xf32>
    %702 = tpu.matmul %657, %679, %cst_283 {dimension_numbers = #tpu.dot_dimension_numbers<[1], [0], [0], [1], [0, 0, 1, 1], [], []>} : vector<2x64xf32>, vector<64x128xf32>, vector<2x128xf32> -> vector<2x128xf32>
    %cst_284 = arith.constant dense<0.000000e+00> : vector<2x128xf32>
    %703 = tpu.matmul %666, %677, %cst_284 {dimension_numbers = #tpu.dot_dimension_numbers<[1], [0], [0], [1], [0, 0, 1, 1], [], []>} : vector<2x64xf32>, vector<64x128xf32>, vector<2x128xf32> -> vector<2x128xf32>
    %cst_285 = arith.constant dense<0.000000e+00> : vector<2x128xf32>
    %704 = tpu.matmul %657, %681, %cst_285 {dimension_numbers = #tpu.dot_dimension_numbers<[1], [0], [0], [1], [0, 0, 1, 1], [], []>} : vector<2x64xf32>, vector<64x128xf32>, vector<2x128xf32> -> vector<2x128xf32>
    %705 = arith.addf %703, %704 : vector<2x128xf32>
    %cst_286 = arith.constant dense<0.000000e+00> : vector<2x128xf32>
    %706 = tpu.matmul %666, %679, %cst_286 {dimension_numbers = #tpu.dot_dimension_numbers<[1], [0], [0], [1], [0, 0, 1, 1], [], []>} : vector<2x64xf32>, vector<64x128xf32>, vector<2x128xf32> -> vector<2x128xf32>
    %cst_287 = arith.constant dense<0.000000e+00> : vector<2x128xf32>
    %707 = tpu.matmul %675, %677, %cst_287 {dimension_numbers = #tpu.dot_dimension_numbers<[1], [0], [0], [1], [0, 0, 1, 1], [], []>} : vector<2x64xf32>, vector<64x128xf32>, vector<2x128xf32> -> vector<2x128xf32>
    %cst_288 = arith.constant dense<0.000000e+00> : vector<2x128xf32>
    %708 = tpu.matmul %666, %681, %cst_288 {dimension_numbers = #tpu.dot_dimension_numbers<[1], [0], [0], [1], [0, 0, 1, 1], [], []>} : vector<2x64xf32>, vector<64x128xf32>, vector<2x128xf32> -> vector<2x128xf32>
    %709 = arith.addf %707, %708 : vector<2x128xf32>
    %cst_289 = arith.constant dense<0.000000e+00> : vector<2x128xf32>
    %710 = tpu.matmul %675, %679, %cst_289 {dimension_numbers = #tpu.dot_dimension_numbers<[1], [0], [0], [1], [0, 0, 1, 1], [], []>} : vector<2x64xf32>, vector<64x128xf32>, vector<2x128xf32> -> vector<2x128xf32>
    %cst_290 = arith.constant dense<0.000000e+00> : vector<2x128xf32>
    %711 = tpu.matmul %675, %681, %cst_290 {dimension_numbers = #tpu.dot_dimension_numbers<[1], [0], [0], [1], [0, 0, 1, 1], [], []>} : vector<2x64xf32>, vector<64x128xf32>, vector<2x128xf32> -> vector<2x128xf32>
    %712 = arith.mulf %682, %682 : vector<2x128xf32>
    %713 = arith.addf %682, %685 : vector<2x128xf32>
    %714 = arith.mulf %685, %685 : vector<2x128xf32>
    %715 = arith.addf %712, %714 : vector<2x128xf32>
    %716 = arith.addf %713, %686 : vector<2x128xf32>
    %717 = arith.mulf %686, %686 : vector<2x128xf32>
    %718 = arith.addf %715, %717 : vector<2x128xf32>
    %719 = arith.addf %716, %689 : vector<2x128xf32>
    %720 = arith.mulf %689, %689 : vector<2x128xf32>
    %721 = arith.addf %718, %720 : vector<2x128xf32>
    %722 = arith.addf %719, %690 : vector<2x128xf32>
    %723 = arith.mulf %690, %690 : vector<2x128xf32>
    %724 = arith.addf %721, %723 : vector<2x128xf32>
    %725 = arith.addf %722, %693 : vector<2x128xf32>
    %726 = arith.mulf %693, %693 : vector<2x128xf32>
    %727 = arith.addf %724, %726 : vector<2x128xf32>
    %728 = arith.addf %725, %694 : vector<2x128xf32>
    %729 = arith.mulf %694, %694 : vector<2x128xf32>
    %730 = arith.addf %727, %729 : vector<2x128xf32>
    %731 = arith.addf %728, %697 : vector<2x128xf32>
    %732 = arith.mulf %697, %697 : vector<2x128xf32>
    %733 = arith.addf %730, %732 : vector<2x128xf32>
    %734 = arith.addf %731, %698 : vector<2x128xf32>
    %735 = arith.mulf %698, %698 : vector<2x128xf32>
    %736 = arith.addf %733, %735 : vector<2x128xf32>
    %737 = arith.addf %734, %701 : vector<2x128xf32>
    %738 = arith.mulf %701, %701 : vector<2x128xf32>
    %739 = arith.addf %736, %738 : vector<2x128xf32>
    %740 = arith.addf %737, %702 : vector<2x128xf32>
    %741 = arith.mulf %702, %702 : vector<2x128xf32>
    %742 = arith.addf %739, %741 : vector<2x128xf32>
    %743 = arith.addf %740, %705 : vector<2x128xf32>
    %744 = arith.mulf %705, %705 : vector<2x128xf32>
    %745 = arith.addf %742, %744 : vector<2x128xf32>
    %746 = arith.addf %743, %706 : vector<2x128xf32>
    %747 = arith.mulf %706, %706 : vector<2x128xf32>
    %748 = arith.addf %745, %747 : vector<2x128xf32>
    %749 = arith.addf %746, %709 : vector<2x128xf32>
    %750 = arith.mulf %709, %709 : vector<2x128xf32>
    %751 = arith.addf %748, %750 : vector<2x128xf32>
    %752 = arith.addf %749, %710 : vector<2x128xf32>
    %753 = arith.mulf %710, %710 : vector<2x128xf32>
    %754 = arith.addf %751, %753 : vector<2x128xf32>
    %755 = arith.addf %752, %711 : vector<2x128xf32>
    %756 = arith.mulf %711, %711 : vector<2x128xf32>
    %757 = arith.addf %754, %756 : vector<2x128xf32>
    %758 = vector.extract_strided_slice %755 {offsets = [0, 0], sizes = [2, 8], strides = [1, 1]} : vector<2x128xf32> to vector<2x8xf32>
    %759 = vector.extract_strided_slice %757 {offsets = [0, 0], sizes = [2, 8], strides = [1, 1]} : vector<2x128xf32> to vector<2x8xf32>
    %760 = vector.extract_strided_slice %755 {offsets = [0, 8], sizes = [2, 8], strides = [1, 1]} : vector<2x128xf32> to vector<2x8xf32>
    %761 = arith.addf %758, %760 : vector<2x8xf32>
    %762 = vector.extract_strided_slice %757 {offsets = [0, 8], sizes = [2, 8], strides = [1, 1]} : vector<2x128xf32> to vector<2x8xf32>
    %763 = arith.addf %759, %762 : vector<2x8xf32>
    %764 = vector.extract_strided_slice %755 {offsets = [0, 16], sizes = [2, 8], strides = [1, 1]} : vector<2x128xf32> to vector<2x8xf32>
    %765 = arith.addf %761, %764 : vector<2x8xf32>
    %766 = vector.extract_strided_slice %757 {offsets = [0, 16], sizes = [2, 8], strides = [1, 1]} : vector<2x128xf32> to vector<2x8xf32>
    %767 = arith.addf %763, %766 : vector<2x8xf32>
    %768 = vector.extract_strided_slice %755 {offsets = [0, 24], sizes = [2, 8], strides = [1, 1]} : vector<2x128xf32> to vector<2x8xf32>
    %769 = arith.addf %765, %768 : vector<2x8xf32>
    %770 = vector.extract_strided_slice %757 {offsets = [0, 24], sizes = [2, 8], strides = [1, 1]} : vector<2x128xf32> to vector<2x8xf32>
    %771 = arith.addf %767, %770 : vector<2x8xf32>
    %772 = vector.extract_strided_slice %755 {offsets = [0, 32], sizes = [2, 8], strides = [1, 1]} : vector<2x128xf32> to vector<2x8xf32>
    %773 = arith.addf %769, %772 : vector<2x8xf32>
    %774 = vector.extract_strided_slice %757 {offsets = [0, 32], sizes = [2, 8], strides = [1, 1]} : vector<2x128xf32> to vector<2x8xf32>
    %775 = arith.addf %771, %774 : vector<2x8xf32>
    %776 = vector.extract_strided_slice %755 {offsets = [0, 40], sizes = [2, 8], strides = [1, 1]} : vector<2x128xf32> to vector<2x8xf32>
    %777 = arith.addf %773, %776 : vector<2x8xf32>
    %778 = vector.extract_strided_slice %757 {offsets = [0, 40], sizes = [2, 8], strides = [1, 1]} : vector<2x128xf32> to vector<2x8xf32>
    %779 = arith.addf %775, %778 : vector<2x8xf32>
    %780 = vector.extract_strided_slice %755 {offsets = [0, 48], sizes = [2, 8], strides = [1, 1]} : vector<2x128xf32> to vector<2x8xf32>
    %781 = arith.addf %777, %780 : vector<2x8xf32>
    %782 = vector.extract_strided_slice %757 {offsets = [0, 48], sizes = [2, 8], strides = [1, 1]} : vector<2x128xf32> to vector<2x8xf32>
    %783 = arith.addf %779, %782 : vector<2x8xf32>
    %784 = vector.extract_strided_slice %755 {offsets = [0, 56], sizes = [2, 8], strides = [1, 1]} : vector<2x128xf32> to vector<2x8xf32>
    %785 = arith.addf %781, %784 : vector<2x8xf32>
    %786 = vector.extract_strided_slice %757 {offsets = [0, 56], sizes = [2, 8], strides = [1, 1]} : vector<2x128xf32> to vector<2x8xf32>
    %787 = arith.addf %783, %786 : vector<2x8xf32>
    %788 = vector.extract_strided_slice %755 {offsets = [0, 64], sizes = [2, 8], strides = [1, 1]} : vector<2x128xf32> to vector<2x8xf32>
    %789 = arith.addf %785, %788 : vector<2x8xf32>
    %790 = vector.extract_strided_slice %757 {offsets = [0, 64], sizes = [2, 8], strides = [1, 1]} : vector<2x128xf32> to vector<2x8xf32>
    %791 = arith.addf %787, %790 : vector<2x8xf32>
    %792 = vector.extract_strided_slice %755 {offsets = [0, 72], sizes = [2, 8], strides = [1, 1]} : vector<2x128xf32> to vector<2x8xf32>
    %793 = arith.addf %789, %792 : vector<2x8xf32>
    %794 = vector.extract_strided_slice %757 {offsets = [0, 72], sizes = [2, 8], strides = [1, 1]} : vector<2x128xf32> to vector<2x8xf32>
    %795 = arith.addf %791, %794 : vector<2x8xf32>
    %796 = vector.extract_strided_slice %755 {offsets = [0, 80], sizes = [2, 8], strides = [1, 1]} : vector<2x128xf32> to vector<2x8xf32>
    %797 = arith.addf %793, %796 : vector<2x8xf32>
    %798 = vector.extract_strided_slice %757 {offsets = [0, 80], sizes = [2, 8], strides = [1, 1]} : vector<2x128xf32> to vector<2x8xf32>
    %799 = arith.addf %795, %798 : vector<2x8xf32>
    %800 = vector.extract_strided_slice %755 {offsets = [0, 88], sizes = [2, 8], strides = [1, 1]} : vector<2x128xf32> to vector<2x8xf32>
    %801 = arith.addf %797, %800 : vector<2x8xf32>
    %802 = vector.extract_strided_slice %757 {offsets = [0, 88], sizes = [2, 8], strides = [1, 1]} : vector<2x128xf32> to vector<2x8xf32>
    %803 = arith.addf %799, %802 : vector<2x8xf32>
    %804 = vector.extract_strided_slice %755 {offsets = [0, 96], sizes = [2, 8], strides = [1, 1]} : vector<2x128xf32> to vector<2x8xf32>
    %805 = arith.addf %801, %804 : vector<2x8xf32>
    %806 = vector.extract_strided_slice %757 {offsets = [0, 96], sizes = [2, 8], strides = [1, 1]} : vector<2x128xf32> to vector<2x8xf32>
    %807 = arith.addf %803, %806 : vector<2x8xf32>
    %808 = vector.extract_strided_slice %755 {offsets = [0, 104], sizes = [2, 8], strides = [1, 1]} : vector<2x128xf32> to vector<2x8xf32>
    %809 = arith.addf %805, %808 : vector<2x8xf32>
    %810 = vector.extract_strided_slice %757 {offsets = [0, 104], sizes = [2, 8], strides = [1, 1]} : vector<2x128xf32> to vector<2x8xf32>
    %811 = arith.addf %807, %810 : vector<2x8xf32>
    %812 = vector.extract_strided_slice %755 {offsets = [0, 112], sizes = [2, 8], strides = [1, 1]} : vector<2x128xf32> to vector<2x8xf32>
    %813 = arith.addf %809, %812 : vector<2x8xf32>
    %814 = vector.extract_strided_slice %757 {offsets = [0, 112], sizes = [2, 8], strides = [1, 1]} : vector<2x128xf32> to vector<2x8xf32>
    %815 = arith.addf %811, %814 : vector<2x8xf32>
    %816 = vector.extract_strided_slice %755 {offsets = [0, 120], sizes = [2, 8], strides = [1, 1]} : vector<2x128xf32> to vector<2x8xf32>
    %817 = arith.addf %813, %816 : vector<2x8xf32>
    %818 = vector.extract_strided_slice %757 {offsets = [0, 120], sizes = [2, 8], strides = [1, 1]} : vector<2x128xf32> to vector<2x8xf32>
    %819 = arith.addf %815, %818 : vector<2x8xf32>
    %cst_291 = arith.constant dense<0.000000e+00> : vector<8xf32>
    %820 = vector.multi_reduction <add>, %817, %cst_291 [0] : vector<2x8xf32> to vector<8xf32>
    %821 = vector.shape_cast %820 : vector<8xf32> to vector<1x8xf32>
    %cst_292 = arith.constant dense<0.000000e+00> : vector<8xf32>
    %822 = vector.multi_reduction <add>, %819, %cst_292 [0] : vector<2x8xf32> to vector<8xf32>
    %823 = vector.shape_cast %822 : vector<8xf32> to vector<1x8xf32>
    %cst_293 = arith.constant 5.120000e+02 : f32
    %824 = vector.broadcast %cst_293 : f32 to vector<1x8xf32>
    %825 = arith.divf %821, %824 : vector<1x8xf32>
    %cst_294 = arith.constant 5.120000e+02 : f32
    %826 = vector.broadcast %cst_294 : f32 to vector<1x8xf32>
    %827 = arith.divf %823, %826 : vector<1x8xf32>
    %828 = arith.mulf %825, %825 : vector<1x8xf32>
    %829 = arith.subf %827, %828 : vector<1x8xf32>
    %c0_295 = arith.constant 0 : index
    %c0_296 = arith.constant 0 : index
    %830 = vector.load %arg22[%c0_295, %c0_296] : memref<1x8xf32, #tpu.memory_space<vmem>>, vector<1x8xf32>
    %cst_297 = arith.constant 9.99999974E-6 : f32
    %831 = vector.broadcast %cst_297 : f32 to vector<1x8xf32>
    %832 = arith.addf %829, %831 : vector<1x8xf32>
    %833 = math.rsqrt %832 : vector<1x8xf32>
    %834 = arith.mulf %830, %833 : vector<1x8xf32>
    %c0_298 = arith.constant 0 : index
    %c0_299 = arith.constant 0 : index
    %835 = vector.load %arg23[%c0_298, %c0_299] : memref<1x8xf32, #tpu.memory_space<vmem>>, vector<1x8xf32>
    %836 = arith.mulf %825, %834 : vector<1x8xf32>
    %837 = arith.subf %835, %836 : vector<1x8xf32>
    %838 = tpu.concatenate %834, %834, %834, %834, %834, %834, %834, %834, %834, %834, %834, %834, %834, %834, %834, %834 in 1 : vector<1x8xf32>, vector<1x8xf32>, vector<1x8xf32>, vector<1x8xf32>, vector<1x8xf32>, vector<1x8xf32>, vector<1x8xf32>, vector<1x8xf32>, vector<1x8xf32>, vector<1x8xf32>, vector<1x8xf32>, vector<1x8xf32>, vector<1x8xf32>, vector<1x8xf32>, vector<1x8xf32>, vector<1x8xf32> -> vector<1x128xf32>
    %839 = tpu.concatenate %837, %837, %837, %837, %837, %837, %837, %837, %837, %837, %837, %837, %837, %837, %837, %837 in 1 : vector<1x8xf32>, vector<1x8xf32>, vector<1x8xf32>, vector<1x8xf32>, vector<1x8xf32>, vector<1x8xf32>, vector<1x8xf32>, vector<1x8xf32>, vector<1x8xf32>, vector<1x8xf32>, vector<1x8xf32>, vector<1x8xf32>, vector<1x8xf32>, vector<1x8xf32>, vector<1x8xf32>, vector<1x8xf32> -> vector<1x128xf32>
    %840 = vector.broadcast %838 : vector<1x128xf32> to vector<2x128xf32>
    %841 = arith.mulf %682, %840 : vector<2x128xf32>
    %842 = vector.broadcast %839 : vector<1x128xf32> to vector<2x128xf32>
    %843 = arith.addf %841, %842 : vector<2x128xf32>
    %cst_300 = arith.constant 0.000000e+00 : f32
    %844 = vector.broadcast %cst_300 : f32 to vector<2x128xf32>
    %845 = arith.cmpf ogt, %843, %844 : vector<2x128xf32>
    %cst_301 = arith.constant 0.00999999977 : f32
    %846 = vector.broadcast %cst_301 : f32 to vector<2x128xf32>
    %847 = arith.mulf %846, %843 : vector<2x128xf32>
    %848 = arith.select %845, %843, %847 : vector<2x128xi1>, vector<2x128xf32>
    %849 = vector.broadcast %838 : vector<1x128xf32> to vector<2x128xf32>
    %850 = arith.mulf %685, %849 : vector<2x128xf32>
    %851 = vector.broadcast %839 : vector<1x128xf32> to vector<2x128xf32>
    %852 = arith.addf %850, %851 : vector<2x128xf32>
    %cst_302 = arith.constant 0.000000e+00 : f32
    %853 = vector.broadcast %cst_302 : f32 to vector<2x128xf32>
    %854 = arith.cmpf ogt, %852, %853 : vector<2x128xf32>
    %cst_303 = arith.constant 0.00999999977 : f32
    %855 = vector.broadcast %cst_303 : f32 to vector<2x128xf32>
    %856 = arith.mulf %855, %852 : vector<2x128xf32>
    %857 = arith.select %854, %852, %856 : vector<2x128xi1>, vector<2x128xf32>
    %858 = vector.broadcast %838 : vector<1x128xf32> to vector<2x128xf32>
    %859 = arith.mulf %686, %858 : vector<2x128xf32>
    %860 = vector.broadcast %839 : vector<1x128xf32> to vector<2x128xf32>
    %861 = arith.addf %859, %860 : vector<2x128xf32>
    %cst_304 = arith.constant 0.000000e+00 : f32
    %862 = vector.broadcast %cst_304 : f32 to vector<2x128xf32>
    %863 = arith.cmpf ogt, %861, %862 : vector<2x128xf32>
    %cst_305 = arith.constant 0.00999999977 : f32
    %864 = vector.broadcast %cst_305 : f32 to vector<2x128xf32>
    %865 = arith.mulf %864, %861 : vector<2x128xf32>
    %866 = arith.select %863, %861, %865 : vector<2x128xi1>, vector<2x128xf32>
    %867 = vector.broadcast %838 : vector<1x128xf32> to vector<2x128xf32>
    %868 = arith.mulf %689, %867 : vector<2x128xf32>
    %869 = vector.broadcast %839 : vector<1x128xf32> to vector<2x128xf32>
    %870 = arith.addf %868, %869 : vector<2x128xf32>
    %cst_306 = arith.constant 0.000000e+00 : f32
    %871 = vector.broadcast %cst_306 : f32 to vector<2x128xf32>
    %872 = arith.cmpf ogt, %870, %871 : vector<2x128xf32>
    %cst_307 = arith.constant 0.00999999977 : f32
    %873 = vector.broadcast %cst_307 : f32 to vector<2x128xf32>
    %874 = arith.mulf %873, %870 : vector<2x128xf32>
    %875 = arith.select %872, %870, %874 : vector<2x128xi1>, vector<2x128xf32>
    %876 = vector.broadcast %838 : vector<1x128xf32> to vector<2x128xf32>
    %877 = arith.mulf %690, %876 : vector<2x128xf32>
    %878 = vector.broadcast %839 : vector<1x128xf32> to vector<2x128xf32>
    %879 = arith.addf %877, %878 : vector<2x128xf32>
    %cst_308 = arith.constant 0.000000e+00 : f32
    %880 = vector.broadcast %cst_308 : f32 to vector<2x128xf32>
    %881 = arith.cmpf ogt, %879, %880 : vector<2x128xf32>
    %cst_309 = arith.constant 0.00999999977 : f32
    %882 = vector.broadcast %cst_309 : f32 to vector<2x128xf32>
    %883 = arith.mulf %882, %879 : vector<2x128xf32>
    %884 = arith.select %881, %879, %883 : vector<2x128xi1>, vector<2x128xf32>
    %885 = vector.broadcast %838 : vector<1x128xf32> to vector<2x128xf32>
    %886 = arith.mulf %693, %885 : vector<2x128xf32>
    %887 = vector.broadcast %839 : vector<1x128xf32> to vector<2x128xf32>
    %888 = arith.addf %886, %887 : vector<2x128xf32>
    %cst_310 = arith.constant 0.000000e+00 : f32
    %889 = vector.broadcast %cst_310 : f32 to vector<2x128xf32>
    %890 = arith.cmpf ogt, %888, %889 : vector<2x128xf32>
    %cst_311 = arith.constant 0.00999999977 : f32
    %891 = vector.broadcast %cst_311 : f32 to vector<2x128xf32>
    %892 = arith.mulf %891, %888 : vector<2x128xf32>
    %893 = arith.select %890, %888, %892 : vector<2x128xi1>, vector<2x128xf32>
    %894 = vector.broadcast %838 : vector<1x128xf32> to vector<2x128xf32>
    %895 = arith.mulf %694, %894 : vector<2x128xf32>
    %896 = vector.broadcast %839 : vector<1x128xf32> to vector<2x128xf32>
    %897 = arith.addf %895, %896 : vector<2x128xf32>
    %cst_312 = arith.constant 0.000000e+00 : f32
    %898 = vector.broadcast %cst_312 : f32 to vector<2x128xf32>
    %899 = arith.cmpf ogt, %897, %898 : vector<2x128xf32>
    %cst_313 = arith.constant 0.00999999977 : f32
    %900 = vector.broadcast %cst_313 : f32 to vector<2x128xf32>
    %901 = arith.mulf %900, %897 : vector<2x128xf32>
    %902 = arith.select %899, %897, %901 : vector<2x128xi1>, vector<2x128xf32>
    %903 = vector.broadcast %838 : vector<1x128xf32> to vector<2x128xf32>
    %904 = arith.mulf %697, %903 : vector<2x128xf32>
    %905 = vector.broadcast %839 : vector<1x128xf32> to vector<2x128xf32>
    %906 = arith.addf %904, %905 : vector<2x128xf32>
    %cst_314 = arith.constant 0.000000e+00 : f32
    %907 = vector.broadcast %cst_314 : f32 to vector<2x128xf32>
    %908 = arith.cmpf ogt, %906, %907 : vector<2x128xf32>
    %cst_315 = arith.constant 0.00999999977 : f32
    %909 = vector.broadcast %cst_315 : f32 to vector<2x128xf32>
    %910 = arith.mulf %909, %906 : vector<2x128xf32>
    %911 = arith.select %908, %906, %910 : vector<2x128xi1>, vector<2x128xf32>
    %912 = vector.broadcast %838 : vector<1x128xf32> to vector<2x128xf32>
    %913 = arith.mulf %698, %912 : vector<2x128xf32>
    %914 = vector.broadcast %839 : vector<1x128xf32> to vector<2x128xf32>
    %915 = arith.addf %913, %914 : vector<2x128xf32>
    %cst_316 = arith.constant 0.000000e+00 : f32
    %916 = vector.broadcast %cst_316 : f32 to vector<2x128xf32>
    %917 = arith.cmpf ogt, %915, %916 : vector<2x128xf32>
    %cst_317 = arith.constant 0.00999999977 : f32
    %918 = vector.broadcast %cst_317 : f32 to vector<2x128xf32>
    %919 = arith.mulf %918, %915 : vector<2x128xf32>
    %920 = arith.select %917, %915, %919 : vector<2x128xi1>, vector<2x128xf32>
    %921 = vector.broadcast %838 : vector<1x128xf32> to vector<2x128xf32>
    %922 = arith.mulf %701, %921 : vector<2x128xf32>
    %923 = vector.broadcast %839 : vector<1x128xf32> to vector<2x128xf32>
    %924 = arith.addf %922, %923 : vector<2x128xf32>
    %cst_318 = arith.constant 0.000000e+00 : f32
    %925 = vector.broadcast %cst_318 : f32 to vector<2x128xf32>
    %926 = arith.cmpf ogt, %924, %925 : vector<2x128xf32>
    %cst_319 = arith.constant 0.00999999977 : f32
    %927 = vector.broadcast %cst_319 : f32 to vector<2x128xf32>
    %928 = arith.mulf %927, %924 : vector<2x128xf32>
    %929 = arith.select %926, %924, %928 : vector<2x128xi1>, vector<2x128xf32>
    %930 = vector.broadcast %838 : vector<1x128xf32> to vector<2x128xf32>
    %931 = arith.mulf %702, %930 : vector<2x128xf32>
    %932 = vector.broadcast %839 : vector<1x128xf32> to vector<2x128xf32>
    %933 = arith.addf %931, %932 : vector<2x128xf32>
    %cst_320 = arith.constant 0.000000e+00 : f32
    %934 = vector.broadcast %cst_320 : f32 to vector<2x128xf32>
    %935 = arith.cmpf ogt, %933, %934 : vector<2x128xf32>
    %cst_321 = arith.constant 0.00999999977 : f32
    %936 = vector.broadcast %cst_321 : f32 to vector<2x128xf32>
    %937 = arith.mulf %936, %933 : vector<2x128xf32>
    %938 = arith.select %935, %933, %937 : vector<2x128xi1>, vector<2x128xf32>
    %939 = vector.broadcast %838 : vector<1x128xf32> to vector<2x128xf32>
    %940 = arith.mulf %705, %939 : vector<2x128xf32>
    %941 = vector.broadcast %839 : vector<1x128xf32> to vector<2x128xf32>
    %942 = arith.addf %940, %941 : vector<2x128xf32>
    %cst_322 = arith.constant 0.000000e+00 : f32
    %943 = vector.broadcast %cst_322 : f32 to vector<2x128xf32>
    %944 = arith.cmpf ogt, %942, %943 : vector<2x128xf32>
    %cst_323 = arith.constant 0.00999999977 : f32
    %945 = vector.broadcast %cst_323 : f32 to vector<2x128xf32>
    %946 = arith.mulf %945, %942 : vector<2x128xf32>
    %947 = arith.select %944, %942, %946 : vector<2x128xi1>, vector<2x128xf32>
    %948 = vector.broadcast %838 : vector<1x128xf32> to vector<2x128xf32>
    %949 = arith.mulf %706, %948 : vector<2x128xf32>
    %950 = vector.broadcast %839 : vector<1x128xf32> to vector<2x128xf32>
    %951 = arith.addf %949, %950 : vector<2x128xf32>
    %cst_324 = arith.constant 0.000000e+00 : f32
    %952 = vector.broadcast %cst_324 : f32 to vector<2x128xf32>
    %953 = arith.cmpf ogt, %951, %952 : vector<2x128xf32>
    %cst_325 = arith.constant 0.00999999977 : f32
    %954 = vector.broadcast %cst_325 : f32 to vector<2x128xf32>
    %955 = arith.mulf %954, %951 : vector<2x128xf32>
    %956 = arith.select %953, %951, %955 : vector<2x128xi1>, vector<2x128xf32>
    %957 = vector.broadcast %838 : vector<1x128xf32> to vector<2x128xf32>
    %958 = arith.mulf %709, %957 : vector<2x128xf32>
    %959 = vector.broadcast %839 : vector<1x128xf32> to vector<2x128xf32>
    %960 = arith.addf %958, %959 : vector<2x128xf32>
    %cst_326 = arith.constant 0.000000e+00 : f32
    %961 = vector.broadcast %cst_326 : f32 to vector<2x128xf32>
    %962 = arith.cmpf ogt, %960, %961 : vector<2x128xf32>
    %cst_327 = arith.constant 0.00999999977 : f32
    %963 = vector.broadcast %cst_327 : f32 to vector<2x128xf32>
    %964 = arith.mulf %963, %960 : vector<2x128xf32>
    %965 = arith.select %962, %960, %964 : vector<2x128xi1>, vector<2x128xf32>
    %966 = vector.broadcast %838 : vector<1x128xf32> to vector<2x128xf32>
    %967 = arith.mulf %710, %966 : vector<2x128xf32>
    %968 = vector.broadcast %839 : vector<1x128xf32> to vector<2x128xf32>
    %969 = arith.addf %967, %968 : vector<2x128xf32>
    %cst_328 = arith.constant 0.000000e+00 : f32
    %970 = vector.broadcast %cst_328 : f32 to vector<2x128xf32>
    %971 = arith.cmpf ogt, %969, %970 : vector<2x128xf32>
    %cst_329 = arith.constant 0.00999999977 : f32
    %972 = vector.broadcast %cst_329 : f32 to vector<2x128xf32>
    %973 = arith.mulf %972, %969 : vector<2x128xf32>
    %974 = arith.select %971, %969, %973 : vector<2x128xi1>, vector<2x128xf32>
    %975 = vector.broadcast %838 : vector<1x128xf32> to vector<2x128xf32>
    %976 = arith.mulf %711, %975 : vector<2x128xf32>
    %977 = vector.broadcast %839 : vector<1x128xf32> to vector<2x128xf32>
    %978 = arith.addf %976, %977 : vector<2x128xf32>
    %cst_330 = arith.constant 0.000000e+00 : f32
    %979 = vector.broadcast %cst_330 : f32 to vector<2x128xf32>
    %980 = arith.cmpf ogt, %978, %979 : vector<2x128xf32>
    %cst_331 = arith.constant 0.00999999977 : f32
    %981 = vector.broadcast %cst_331 : f32 to vector<2x128xf32>
    %982 = arith.mulf %981, %978 : vector<2x128xf32>
    %983 = arith.select %980, %978, %982 : vector<2x128xi1>, vector<2x128xf32>
    %c0_332 = arith.constant 0 : index
    %c0_333 = arith.constant 0 : index
    %c0_334 = arith.constant 0 : index
    %984 = vector.load %arg24[%c0_332, %c0_333, %c0_334] : memref<3x128x64xf32, #tpu.memory_space<vmem>>, vector<1x128x64xf32>
    %985 = vector.shape_cast %984 : vector<1x128x64xf32> to vector<128x64xf32>
    %c1_335 = arith.constant 1 : index
    %c0_336 = arith.constant 0 : index
    %c0_337 = arith.constant 0 : index
    %986 = vector.load %arg24[%c1_335, %c0_336, %c0_337] : memref<3x128x64xf32, #tpu.memory_space<vmem>>, vector<1x128x64xf32>
    %987 = vector.shape_cast %986 : vector<1x128x64xf32> to vector<128x64xf32>
    %c2_338 = arith.constant 2 : index
    %c0_339 = arith.constant 0 : index
    %c0_340 = arith.constant 0 : index
    %988 = vector.load %arg24[%c2_338, %c0_339, %c0_340] : memref<3x128x64xf32, #tpu.memory_space<vmem>>, vector<1x128x64xf32>
    %989 = vector.shape_cast %988 : vector<1x128x64xf32> to vector<128x64xf32>
    %cst_341 = arith.constant dense<0.000000e+00> : vector<2x64xf32>
    %990 = tpu.matmul %848, %987, %cst_341 {dimension_numbers = #tpu.dot_dimension_numbers<[1], [0], [0], [1], [0, 0, 1, 1], [], []>} : vector<2x128xf32>, vector<128x64xf32>, vector<2x64xf32> -> vector<2x64xf32>
    %cst_342 = arith.constant dense<0.000000e+00> : vector<2x64xf32>
    %991 = tpu.matmul %857, %989, %cst_342 {dimension_numbers = #tpu.dot_dimension_numbers<[1], [0], [0], [1], [0, 0, 1, 1], [], []>} : vector<2x128xf32>, vector<128x64xf32>, vector<2x64xf32> -> vector<2x64xf32>
    %992 = arith.addf %990, %991 : vector<2x64xf32>
    %cst_343 = arith.constant dense<0.000000e+00> : vector<2x64xf32>
    %993 = tpu.matmul %848, %985, %cst_343 {dimension_numbers = #tpu.dot_dimension_numbers<[1], [0], [0], [1], [0, 0, 1, 1], [], []>} : vector<2x128xf32>, vector<128x64xf32>, vector<2x64xf32> -> vector<2x64xf32>
    %cst_344 = arith.constant dense<0.000000e+00> : vector<2x64xf32>
    %994 = tpu.matmul %857, %987, %cst_344 {dimension_numbers = #tpu.dot_dimension_numbers<[1], [0], [0], [1], [0, 0, 1, 1], [], []>} : vector<2x128xf32>, vector<128x64xf32>, vector<2x64xf32> -> vector<2x64xf32>
    %995 = arith.addf %993, %994 : vector<2x64xf32>
    %cst_345 = arith.constant dense<0.000000e+00> : vector<2x64xf32>
    %996 = tpu.matmul %866, %989, %cst_345 {dimension_numbers = #tpu.dot_dimension_numbers<[1], [0], [0], [1], [0, 0, 1, 1], [], []>} : vector<2x128xf32>, vector<128x64xf32>, vector<2x64xf32> -> vector<2x64xf32>
    %997 = arith.addf %995, %996 : vector<2x64xf32>
    %cst_346 = arith.constant dense<0.000000e+00> : vector<2x64xf32>
    %998 = tpu.matmul %857, %985, %cst_346 {dimension_numbers = #tpu.dot_dimension_numbers<[1], [0], [0], [1], [0, 0, 1, 1], [], []>} : vector<2x128xf32>, vector<128x64xf32>, vector<2x64xf32> -> vector<2x64xf32>
    %cst_347 = arith.constant dense<0.000000e+00> : vector<2x64xf32>
    %999 = tpu.matmul %866, %987, %cst_347 {dimension_numbers = #tpu.dot_dimension_numbers<[1], [0], [0], [1], [0, 0, 1, 1], [], []>} : vector<2x128xf32>, vector<128x64xf32>, vector<2x64xf32> -> vector<2x64xf32>
    %1000 = arith.addf %998, %999 : vector<2x64xf32>
    %cst_348 = arith.constant dense<0.000000e+00> : vector<2x64xf32>
    %1001 = tpu.matmul %875, %989, %cst_348 {dimension_numbers = #tpu.dot_dimension_numbers<[1], [0], [0], [1], [0, 0, 1, 1], [], []>} : vector<2x128xf32>, vector<128x64xf32>, vector<2x64xf32> -> vector<2x64xf32>
    %1002 = arith.addf %1000, %1001 : vector<2x64xf32>
    %cst_349 = arith.constant dense<0.000000e+00> : vector<2x64xf32>
    %1003 = tpu.matmul %866, %985, %cst_349 {dimension_numbers = #tpu.dot_dimension_numbers<[1], [0], [0], [1], [0, 0, 1, 1], [], []>} : vector<2x128xf32>, vector<128x64xf32>, vector<2x64xf32> -> vector<2x64xf32>
    %cst_350 = arith.constant dense<0.000000e+00> : vector<2x64xf32>
    %1004 = tpu.matmul %875, %987, %cst_350 {dimension_numbers = #tpu.dot_dimension_numbers<[1], [0], [0], [1], [0, 0, 1, 1], [], []>} : vector<2x128xf32>, vector<128x64xf32>, vector<2x64xf32> -> vector<2x64xf32>
    %1005 = arith.addf %1003, %1004 : vector<2x64xf32>
    %cst_351 = arith.constant dense<0.000000e+00> : vector<2x64xf32>
    %1006 = tpu.matmul %884, %989, %cst_351 {dimension_numbers = #tpu.dot_dimension_numbers<[1], [0], [0], [1], [0, 0, 1, 1], [], []>} : vector<2x128xf32>, vector<128x64xf32>, vector<2x64xf32> -> vector<2x64xf32>
    %1007 = arith.addf %1005, %1006 : vector<2x64xf32>
    %cst_352 = arith.constant dense<0.000000e+00> : vector<2x64xf32>
    %1008 = tpu.matmul %875, %985, %cst_352 {dimension_numbers = #tpu.dot_dimension_numbers<[1], [0], [0], [1], [0, 0, 1, 1], [], []>} : vector<2x128xf32>, vector<128x64xf32>, vector<2x64xf32> -> vector<2x64xf32>
    %cst_353 = arith.constant dense<0.000000e+00> : vector<2x64xf32>
    %1009 = tpu.matmul %884, %987, %cst_353 {dimension_numbers = #tpu.dot_dimension_numbers<[1], [0], [0], [1], [0, 0, 1, 1], [], []>} : vector<2x128xf32>, vector<128x64xf32>, vector<2x64xf32> -> vector<2x64xf32>
    %1010 = arith.addf %1008, %1009 : vector<2x64xf32>
    %cst_354 = arith.constant dense<0.000000e+00> : vector<2x64xf32>
    %1011 = tpu.matmul %893, %989, %cst_354 {dimension_numbers = #tpu.dot_dimension_numbers<[1], [0], [0], [1], [0, 0, 1, 1], [], []>} : vector<2x128xf32>, vector<128x64xf32>, vector<2x64xf32> -> vector<2x64xf32>
    %1012 = arith.addf %1010, %1011 : vector<2x64xf32>
    %cst_355 = arith.constant dense<0.000000e+00> : vector<2x64xf32>
    %1013 = tpu.matmul %884, %985, %cst_355 {dimension_numbers = #tpu.dot_dimension_numbers<[1], [0], [0], [1], [0, 0, 1, 1], [], []>} : vector<2x128xf32>, vector<128x64xf32>, vector<2x64xf32> -> vector<2x64xf32>
    %cst_356 = arith.constant dense<0.000000e+00> : vector<2x64xf32>
    %1014 = tpu.matmul %893, %987, %cst_356 {dimension_numbers = #tpu.dot_dimension_numbers<[1], [0], [0], [1], [0, 0, 1, 1], [], []>} : vector<2x128xf32>, vector<128x64xf32>, vector<2x64xf32> -> vector<2x64xf32>
    %1015 = arith.addf %1013, %1014 : vector<2x64xf32>
    %cst_357 = arith.constant dense<0.000000e+00> : vector<2x64xf32>
    %1016 = tpu.matmul %902, %989, %cst_357 {dimension_numbers = #tpu.dot_dimension_numbers<[1], [0], [0], [1], [0, 0, 1, 1], [], []>} : vector<2x128xf32>, vector<128x64xf32>, vector<2x64xf32> -> vector<2x64xf32>
    %1017 = arith.addf %1015, %1016 : vector<2x64xf32>
    %cst_358 = arith.constant dense<0.000000e+00> : vector<2x64xf32>
    %1018 = tpu.matmul %893, %985, %cst_358 {dimension_numbers = #tpu.dot_dimension_numbers<[1], [0], [0], [1], [0, 0, 1, 1], [], []>} : vector<2x128xf32>, vector<128x64xf32>, vector<2x64xf32> -> vector<2x64xf32>
    %cst_359 = arith.constant dense<0.000000e+00> : vector<2x64xf32>
    %1019 = tpu.matmul %902, %987, %cst_359 {dimension_numbers = #tpu.dot_dimension_numbers<[1], [0], [0], [1], [0, 0, 1, 1], [], []>} : vector<2x128xf32>, vector<128x64xf32>, vector<2x64xf32> -> vector<2x64xf32>
    %1020 = arith.addf %1018, %1019 : vector<2x64xf32>
    %cst_360 = arith.constant dense<0.000000e+00> : vector<2x64xf32>
    %1021 = tpu.matmul %911, %989, %cst_360 {dimension_numbers = #tpu.dot_dimension_numbers<[1], [0], [0], [1], [0, 0, 1, 1], [], []>} : vector<2x128xf32>, vector<128x64xf32>, vector<2x64xf32> -> vector<2x64xf32>
    %1022 = arith.addf %1020, %1021 : vector<2x64xf32>
    %cst_361 = arith.constant dense<0.000000e+00> : vector<2x64xf32>
    %1023 = tpu.matmul %902, %985, %cst_361 {dimension_numbers = #tpu.dot_dimension_numbers<[1], [0], [0], [1], [0, 0, 1, 1], [], []>} : vector<2x128xf32>, vector<128x64xf32>, vector<2x64xf32> -> vector<2x64xf32>
    %cst_362 = arith.constant dense<0.000000e+00> : vector<2x64xf32>
    %1024 = tpu.matmul %911, %987, %cst_362 {dimension_numbers = #tpu.dot_dimension_numbers<[1], [0], [0], [1], [0, 0, 1, 1], [], []>} : vector<2x128xf32>, vector<128x64xf32>, vector<2x64xf32> -> vector<2x64xf32>
    %1025 = arith.addf %1023, %1024 : vector<2x64xf32>
    %cst_363 = arith.constant dense<0.000000e+00> : vector<2x64xf32>
    %1026 = tpu.matmul %920, %989, %cst_363 {dimension_numbers = #tpu.dot_dimension_numbers<[1], [0], [0], [1], [0, 0, 1, 1], [], []>} : vector<2x128xf32>, vector<128x64xf32>, vector<2x64xf32> -> vector<2x64xf32>
    %1027 = arith.addf %1025, %1026 : vector<2x64xf32>
    %cst_364 = arith.constant dense<0.000000e+00> : vector<2x64xf32>
    %1028 = tpu.matmul %911, %985, %cst_364 {dimension_numbers = #tpu.dot_dimension_numbers<[1], [0], [0], [1], [0, 0, 1, 1], [], []>} : vector<2x128xf32>, vector<128x64xf32>, vector<2x64xf32> -> vector<2x64xf32>
    %cst_365 = arith.constant dense<0.000000e+00> : vector<2x64xf32>
    %1029 = tpu.matmul %920, %987, %cst_365 {dimension_numbers = #tpu.dot_dimension_numbers<[1], [0], [0], [1], [0, 0, 1, 1], [], []>} : vector<2x128xf32>, vector<128x64xf32>, vector<2x64xf32> -> vector<2x64xf32>
    %1030 = arith.addf %1028, %1029 : vector<2x64xf32>
    %cst_366 = arith.constant dense<0.000000e+00> : vector<2x64xf32>
    %1031 = tpu.matmul %929, %989, %cst_366 {dimension_numbers = #tpu.dot_dimension_numbers<[1], [0], [0], [1], [0, 0, 1, 1], [], []>} : vector<2x128xf32>, vector<128x64xf32>, vector<2x64xf32> -> vector<2x64xf32>
    %1032 = arith.addf %1030, %1031 : vector<2x64xf32>
    %cst_367 = arith.constant dense<0.000000e+00> : vector<2x64xf32>
    %1033 = tpu.matmul %920, %985, %cst_367 {dimension_numbers = #tpu.dot_dimension_numbers<[1], [0], [0], [1], [0, 0, 1, 1], [], []>} : vector<2x128xf32>, vector<128x64xf32>, vector<2x64xf32> -> vector<2x64xf32>
    %cst_368 = arith.constant dense<0.000000e+00> : vector<2x64xf32>
    %1034 = tpu.matmul %929, %987, %cst_368 {dimension_numbers = #tpu.dot_dimension_numbers<[1], [0], [0], [1], [0, 0, 1, 1], [], []>} : vector<2x128xf32>, vector<128x64xf32>, vector<2x64xf32> -> vector<2x64xf32>
    %1035 = arith.addf %1033, %1034 : vector<2x64xf32>
    %cst_369 = arith.constant dense<0.000000e+00> : vector<2x64xf32>
    %1036 = tpu.matmul %938, %989, %cst_369 {dimension_numbers = #tpu.dot_dimension_numbers<[1], [0], [0], [1], [0, 0, 1, 1], [], []>} : vector<2x128xf32>, vector<128x64xf32>, vector<2x64xf32> -> vector<2x64xf32>
    %1037 = arith.addf %1035, %1036 : vector<2x64xf32>
    %cst_370 = arith.constant dense<0.000000e+00> : vector<2x64xf32>
    %1038 = tpu.matmul %929, %985, %cst_370 {dimension_numbers = #tpu.dot_dimension_numbers<[1], [0], [0], [1], [0, 0, 1, 1], [], []>} : vector<2x128xf32>, vector<128x64xf32>, vector<2x64xf32> -> vector<2x64xf32>
    %cst_371 = arith.constant dense<0.000000e+00> : vector<2x64xf32>
    %1039 = tpu.matmul %938, %987, %cst_371 {dimension_numbers = #tpu.dot_dimension_numbers<[1], [0], [0], [1], [0, 0, 1, 1], [], []>} : vector<2x128xf32>, vector<128x64xf32>, vector<2x64xf32> -> vector<2x64xf32>
    %1040 = arith.addf %1038, %1039 : vector<2x64xf32>
    %cst_372 = arith.constant dense<0.000000e+00> : vector<2x64xf32>
    %1041 = tpu.matmul %947, %989, %cst_372 {dimension_numbers = #tpu.dot_dimension_numbers<[1], [0], [0], [1], [0, 0, 1, 1], [], []>} : vector<2x128xf32>, vector<128x64xf32>, vector<2x64xf32> -> vector<2x64xf32>
    %1042 = arith.addf %1040, %1041 : vector<2x64xf32>
    %cst_373 = arith.constant dense<0.000000e+00> : vector<2x64xf32>
    %1043 = tpu.matmul %938, %985, %cst_373 {dimension_numbers = #tpu.dot_dimension_numbers<[1], [0], [0], [1], [0, 0, 1, 1], [], []>} : vector<2x128xf32>, vector<128x64xf32>, vector<2x64xf32> -> vector<2x64xf32>
    %cst_374 = arith.constant dense<0.000000e+00> : vector<2x64xf32>
    %1044 = tpu.matmul %947, %987, %cst_374 {dimension_numbers = #tpu.dot_dimension_numbers<[1], [0], [0], [1], [0, 0, 1, 1], [], []>} : vector<2x128xf32>, vector<128x64xf32>, vector<2x64xf32> -> vector<2x64xf32>
    %1045 = arith.addf %1043, %1044 : vector<2x64xf32>
    %cst_375 = arith.constant dense<0.000000e+00> : vector<2x64xf32>
    %1046 = tpu.matmul %956, %989, %cst_375 {dimension_numbers = #tpu.dot_dimension_numbers<[1], [0], [0], [1], [0, 0, 1, 1], [], []>} : vector<2x128xf32>, vector<128x64xf32>, vector<2x64xf32> -> vector<2x64xf32>
    %1047 = arith.addf %1045, %1046 : vector<2x64xf32>
    %cst_376 = arith.constant dense<0.000000e+00> : vector<2x64xf32>
    %1048 = tpu.matmul %947, %985, %cst_376 {dimension_numbers = #tpu.dot_dimension_numbers<[1], [0], [0], [1], [0, 0, 1, 1], [], []>} : vector<2x128xf32>, vector<128x64xf32>, vector<2x64xf32> -> vector<2x64xf32>
    %cst_377 = arith.constant dense<0.000000e+00> : vector<2x64xf32>
    %1049 = tpu.matmul %956, %987, %cst_377 {dimension_numbers = #tpu.dot_dimension_numbers<[1], [0], [0], [1], [0, 0, 1, 1], [], []>} : vector<2x128xf32>, vector<128x64xf32>, vector<2x64xf32> -> vector<2x64xf32>
    %1050 = arith.addf %1048, %1049 : vector<2x64xf32>
    %cst_378 = arith.constant dense<0.000000e+00> : vector<2x64xf32>
    %1051 = tpu.matmul %965, %989, %cst_378 {dimension_numbers = #tpu.dot_dimension_numbers<[1], [0], [0], [1], [0, 0, 1, 1], [], []>} : vector<2x128xf32>, vector<128x64xf32>, vector<2x64xf32> -> vector<2x64xf32>
    %1052 = arith.addf %1050, %1051 : vector<2x64xf32>
    %cst_379 = arith.constant dense<0.000000e+00> : vector<2x64xf32>
    %1053 = tpu.matmul %956, %985, %cst_379 {dimension_numbers = #tpu.dot_dimension_numbers<[1], [0], [0], [1], [0, 0, 1, 1], [], []>} : vector<2x128xf32>, vector<128x64xf32>, vector<2x64xf32> -> vector<2x64xf32>
    %cst_380 = arith.constant dense<0.000000e+00> : vector<2x64xf32>
    %1054 = tpu.matmul %965, %987, %cst_380 {dimension_numbers = #tpu.dot_dimension_numbers<[1], [0], [0], [1], [0, 0, 1, 1], [], []>} : vector<2x128xf32>, vector<128x64xf32>, vector<2x64xf32> -> vector<2x64xf32>
    %1055 = arith.addf %1053, %1054 : vector<2x64xf32>
    %cst_381 = arith.constant dense<0.000000e+00> : vector<2x64xf32>
    %1056 = tpu.matmul %974, %989, %cst_381 {dimension_numbers = #tpu.dot_dimension_numbers<[1], [0], [0], [1], [0, 0, 1, 1], [], []>} : vector<2x128xf32>, vector<128x64xf32>, vector<2x64xf32> -> vector<2x64xf32>
    %1057 = arith.addf %1055, %1056 : vector<2x64xf32>
    %cst_382 = arith.constant dense<0.000000e+00> : vector<2x64xf32>
    %1058 = tpu.matmul %965, %985, %cst_382 {dimension_numbers = #tpu.dot_dimension_numbers<[1], [0], [0], [1], [0, 0, 1, 1], [], []>} : vector<2x128xf32>, vector<128x64xf32>, vector<2x64xf32> -> vector<2x64xf32>
    %cst_383 = arith.constant dense<0.000000e+00> : vector<2x64xf32>
    %1059 = tpu.matmul %974, %987, %cst_383 {dimension_numbers = #tpu.dot_dimension_numbers<[1], [0], [0], [1], [0, 0, 1, 1], [], []>} : vector<2x128xf32>, vector<128x64xf32>, vector<2x64xf32> -> vector<2x64xf32>
    %1060 = arith.addf %1058, %1059 : vector<2x64xf32>
    %cst_384 = arith.constant dense<0.000000e+00> : vector<2x64xf32>
    %1061 = tpu.matmul %983, %989, %cst_384 {dimension_numbers = #tpu.dot_dimension_numbers<[1], [0], [0], [1], [0, 0, 1, 1], [], []>} : vector<2x128xf32>, vector<128x64xf32>, vector<2x64xf32> -> vector<2x64xf32>
    %1062 = arith.addf %1060, %1061 : vector<2x64xf32>
    %cst_385 = arith.constant dense<0.000000e+00> : vector<2x64xf32>
    %1063 = tpu.matmul %974, %985, %cst_385 {dimension_numbers = #tpu.dot_dimension_numbers<[1], [0], [0], [1], [0, 0, 1, 1], [], []>} : vector<2x128xf32>, vector<128x64xf32>, vector<2x64xf32> -> vector<2x64xf32>
    %cst_386 = arith.constant dense<0.000000e+00> : vector<2x64xf32>
    %1064 = tpu.matmul %983, %987, %cst_386 {dimension_numbers = #tpu.dot_dimension_numbers<[1], [0], [0], [1], [0, 0, 1, 1], [], []>} : vector<2x128xf32>, vector<128x64xf32>, vector<2x64xf32> -> vector<2x64xf32>
    %1065 = arith.addf %1063, %1064 : vector<2x64xf32>
    %c0_387 = arith.constant 0 : index
    %c0_388 = arith.constant 0 : index
    %1066 = vector.load %arg25[%c0_387, %c0_388] : memref<1x64xf32, #tpu.memory_space<vmem>>, vector<1x64xf32>
    %1067 = vector.broadcast %1066 : vector<1x64xf32> to vector<2x64xf32>
    %1068 = arith.addf %992, %1067 : vector<2x64xf32>
    %1069 = math.tanh %1068 : vector<2x64xf32>
    %c0_389 = arith.constant 0 : index
    %c0_390 = arith.constant 0 : index
    %c0_391 = arith.constant 0 : index
    %1070 = vector.load %arg26[%c0_389, %c0_390, %c0_391] : memref<16x2x64xf32, #tpu.memory_space<vmem>>, vector<1x2x64xf32>
    %1071 = vector.shape_cast %1070 : vector<1x2x64xf32> to vector<2x64xf32>
    %1072 = vector.shape_cast %1069 : vector<2x64xf32> to vector<1x2x64xf32>
    tpu.vector_store %arg26[%c0_389, %c0_390, %c0_391], %1072 {strides = array<i32>} : memref<16x2x64xf32, #tpu.memory_space<vmem>>, vector<1x2x64xf32>,
    %1073 = vector.broadcast %1066 : vector<1x64xf32> to vector<2x64xf32>
    %1074 = arith.addf %997, %1073 : vector<2x64xf32>
    %1075 = math.tanh %1074 : vector<2x64xf32>
    %c1_392 = arith.constant 1 : index
    %c0_393 = arith.constant 0 : index
    %c0_394 = arith.constant 0 : index
    %1076 = vector.load %arg26[%c1_392, %c0_393, %c0_394] : memref<16x2x64xf32, #tpu.memory_space<vmem>>, vector<1x2x64xf32>
    %1077 = vector.shape_cast %1076 : vector<1x2x64xf32> to vector<2x64xf32>
    %1078 = vector.shape_cast %1075 : vector<2x64xf32> to vector<1x2x64xf32>
    tpu.vector_store %arg26[%c1_392, %c0_393, %c0_394], %1078 {strides = array<i32>} : memref<16x2x64xf32, #tpu.memory_space<vmem>>, vector<1x2x64xf32>,
    %1079 = vector.broadcast %1066 : vector<1x64xf32> to vector<2x64xf32>
    %1080 = arith.addf %1002, %1079 : vector<2x64xf32>
    %1081 = math.tanh %1080 : vector<2x64xf32>
    %c2_395 = arith.constant 2 : index
    %c0_396 = arith.constant 0 : index
    %c0_397 = arith.constant 0 : index
    %1082 = vector.load %arg26[%c2_395, %c0_396, %c0_397] : memref<16x2x64xf32, #tpu.memory_space<vmem>>, vector<1x2x64xf32>
    %1083 = vector.shape_cast %1082 : vector<1x2x64xf32> to vector<2x64xf32>
    %1084 = vector.shape_cast %1081 : vector<2x64xf32> to vector<1x2x64xf32>
    tpu.vector_store %arg26[%c2_395, %c0_396, %c0_397], %1084 {strides = array<i32>} : memref<16x2x64xf32, #tpu.memory_space<vmem>>, vector<1x2x64xf32>,
    %1085 = vector.broadcast %1066 : vector<1x64xf32> to vector<2x64xf32>
    %1086 = arith.addf %1007, %1085 : vector<2x64xf32>
    %1087 = math.tanh %1086 : vector<2x64xf32>
    %c3_398 = arith.constant 3 : index
    %c0_399 = arith.constant 0 : index
    %c0_400 = arith.constant 0 : index
    %1088 = vector.load %arg26[%c3_398, %c0_399, %c0_400] : memref<16x2x64xf32, #tpu.memory_space<vmem>>, vector<1x2x64xf32>
    %1089 = vector.shape_cast %1088 : vector<1x2x64xf32> to vector<2x64xf32>
    %1090 = vector.shape_cast %1087 : vector<2x64xf32> to vector<1x2x64xf32>
    tpu.vector_store %arg26[%c3_398, %c0_399, %c0_400], %1090 {strides = array<i32>} : memref<16x2x64xf32, #tpu.memory_space<vmem>>, vector<1x2x64xf32>,
    %1091 = vector.broadcast %1066 : vector<1x64xf32> to vector<2x64xf32>
    %1092 = arith.addf %1012, %1091 : vector<2x64xf32>
    %1093 = math.tanh %1092 : vector<2x64xf32>
    %c4_401 = arith.constant 4 : index
    %c0_402 = arith.constant 0 : index
    %c0_403 = arith.constant 0 : index
    %1094 = vector.load %arg26[%c4_401, %c0_402, %c0_403] : memref<16x2x64xf32, #tpu.memory_space<vmem>>, vector<1x2x64xf32>
    %1095 = vector.shape_cast %1094 : vector<1x2x64xf32> to vector<2x64xf32>
    %1096 = vector.shape_cast %1093 : vector<2x64xf32> to vector<1x2x64xf32>
    tpu.vector_store %arg26[%c4_401, %c0_402, %c0_403], %1096 {strides = array<i32>} : memref<16x2x64xf32, #tpu.memory_space<vmem>>, vector<1x2x64xf32>,
    %1097 = vector.broadcast %1066 : vector<1x64xf32> to vector<2x64xf32>
    %1098 = arith.addf %1017, %1097 : vector<2x64xf32>
    %1099 = math.tanh %1098 : vector<2x64xf32>
    %c5_404 = arith.constant 5 : index
    %c0_405 = arith.constant 0 : index
    %c0_406 = arith.constant 0 : index
    %1100 = vector.load %arg26[%c5_404, %c0_405, %c0_406] : memref<16x2x64xf32, #tpu.memory_space<vmem>>, vector<1x2x64xf32>
    %1101 = vector.shape_cast %1100 : vector<1x2x64xf32> to vector<2x64xf32>
    %1102 = vector.shape_cast %1099 : vector<2x64xf32> to vector<1x2x64xf32>
    tpu.vector_store %arg26[%c5_404, %c0_405, %c0_406], %1102 {strides = array<i32>} : memref<16x2x64xf32, #tpu.memory_space<vmem>>, vector<1x2x64xf32>,
    %1103 = vector.broadcast %1066 : vector<1x64xf32> to vector<2x64xf32>
    %1104 = arith.addf %1022, %1103 : vector<2x64xf32>
    %1105 = math.tanh %1104 : vector<2x64xf32>
    %c6_407 = arith.constant 6 : index
    %c0_408 = arith.constant 0 : index
    %c0_409 = arith.constant 0 : index
    %1106 = vector.load %arg26[%c6_407, %c0_408, %c0_409] : memref<16x2x64xf32, #tpu.memory_space<vmem>>, vector<1x2x64xf32>
    %1107 = vector.shape_cast %1106 : vector<1x2x64xf32> to vector<2x64xf32>
    %1108 = vector.shape_cast %1105 : vector<2x64xf32> to vector<1x2x64xf32>
    tpu.vector_store %arg26[%c6_407, %c0_408, %c0_409], %1108 {strides = array<i32>} : memref<16x2x64xf32, #tpu.memory_space<vmem>>, vector<1x2x64xf32>,
    %1109 = vector.broadcast %1066 : vector<1x64xf32> to vector<2x64xf32>
    %1110 = arith.addf %1027, %1109 : vector<2x64xf32>
    %1111 = math.tanh %1110 : vector<2x64xf32>
    %c7_410 = arith.constant 7 : index
    %c0_411 = arith.constant 0 : index
    %c0_412 = arith.constant 0 : index
    %1112 = vector.load %arg26[%c7_410, %c0_411, %c0_412] : memref<16x2x64xf32, #tpu.memory_space<vmem>>, vector<1x2x64xf32>
    %1113 = vector.shape_cast %1112 : vector<1x2x64xf32> to vector<2x64xf32>
    %1114 = vector.shape_cast %1111 : vector<2x64xf32> to vector<1x2x64xf32>
    tpu.vector_store %arg26[%c7_410, %c0_411, %c0_412], %1114 {strides = array<i32>} : memref<16x2x64xf32, #tpu.memory_space<vmem>>, vector<1x2x64xf32>,
    %1115 = vector.broadcast %1066 : vector<1x64xf32> to vector<2x64xf32>
    %1116 = arith.addf %1032, %1115 : vector<2x64xf32>
    %1117 = math.tanh %1116 : vector<2x64xf32>
    %c8_413 = arith.constant 8 : index
    %c0_414 = arith.constant 0 : index
    %c0_415 = arith.constant 0 : index
    %1118 = vector.load %arg26[%c8_413, %c0_414, %c0_415] : memref<16x2x64xf32, #tpu.memory_space<vmem>>, vector<1x2x64xf32>
    %1119 = vector.shape_cast %1118 : vector<1x2x64xf32> to vector<2x64xf32>
    %1120 = vector.shape_cast %1117 : vector<2x64xf32> to vector<1x2x64xf32>
    tpu.vector_store %arg26[%c8_413, %c0_414, %c0_415], %1120 {strides = array<i32>} : memref<16x2x64xf32, #tpu.memory_space<vmem>>, vector<1x2x64xf32>,
    %1121 = vector.broadcast %1066 : vector<1x64xf32> to vector<2x64xf32>
    %1122 = arith.addf %1037, %1121 : vector<2x64xf32>
    %1123 = math.tanh %1122 : vector<2x64xf32>
    %c9_416 = arith.constant 9 : index
    %c0_417 = arith.constant 0 : index
    %c0_418 = arith.constant 0 : index
    %1124 = vector.load %arg26[%c9_416, %c0_417, %c0_418] : memref<16x2x64xf32, #tpu.memory_space<vmem>>, vector<1x2x64xf32>
    %1125 = vector.shape_cast %1124 : vector<1x2x64xf32> to vector<2x64xf32>
    %1126 = vector.shape_cast %1123 : vector<2x64xf32> to vector<1x2x64xf32>
    tpu.vector_store %arg26[%c9_416, %c0_417, %c0_418], %1126 {strides = array<i32>} : memref<16x2x64xf32, #tpu.memory_space<vmem>>, vector<1x2x64xf32>,
    %1127 = vector.broadcast %1066 : vector<1x64xf32> to vector<2x64xf32>
    %1128 = arith.addf %1042, %1127 : vector<2x64xf32>
    %1129 = math.tanh %1128 : vector<2x64xf32>
    %c10_419 = arith.constant 10 : index
    %c0_420 = arith.constant 0 : index
    %c0_421 = arith.constant 0 : index
    %1130 = vector.load %arg26[%c10_419, %c0_420, %c0_421] : memref<16x2x64xf32, #tpu.memory_space<vmem>>, vector<1x2x64xf32>
    %1131 = vector.shape_cast %1130 : vector<1x2x64xf32> to vector<2x64xf32>
    %1132 = vector.shape_cast %1129 : vector<2x64xf32> to vector<1x2x64xf32>
    tpu.vector_store %arg26[%c10_419, %c0_420, %c0_421], %1132 {strides = array<i32>} : memref<16x2x64xf32, #tpu.memory_space<vmem>>, vector<1x2x64xf32>,
    %1133 = vector.broadcast %1066 : vector<1x64xf32> to vector<2x64xf32>
    %1134 = arith.addf %1047, %1133 : vector<2x64xf32>
    %1135 = math.tanh %1134 : vector<2x64xf32>
    %c11_422 = arith.constant 11 : index
    %c0_423 = arith.constant 0 : index
    %c0_424 = arith.constant 0 : index
    %1136 = vector.load %arg26[%c11_422, %c0_423, %c0_424] : memref<16x2x64xf32, #tpu.memory_space<vmem>>, vector<1x2x64xf32>
    %1137 = vector.shape_cast %1136 : vector<1x2x64xf32> to vector<2x64xf32>
    %1138 = vector.shape_cast %1135 : vector<2x64xf32> to vector<1x2x64xf32>
    tpu.vector_store %arg26[%c11_422, %c0_423, %c0_424], %1138 {strides = array<i32>} : memref<16x2x64xf32, #tpu.memory_space<vmem>>, vector<1x2x64xf32>,
    %1139 = vector.broadcast %1066 : vector<1x64xf32> to vector<2x64xf32>
    %1140 = arith.addf %1052, %1139 : vector<2x64xf32>
    %1141 = math.tanh %1140 : vector<2x64xf32>
    %c12_425 = arith.constant 12 : index
    %c0_426 = arith.constant 0 : index
    %c0_427 = arith.constant 0 : index
    %1142 = vector.load %arg26[%c12_425, %c0_426, %c0_427] : memref<16x2x64xf32, #tpu.memory_space<vmem>>, vector<1x2x64xf32>
    %1143 = vector.shape_cast %1142 : vector<1x2x64xf32> to vector<2x64xf32>
    %1144 = vector.shape_cast %1141 : vector<2x64xf32> to vector<1x2x64xf32>
    tpu.vector_store %arg26[%c12_425, %c0_426, %c0_427], %1144 {strides = array<i32>} : memref<16x2x64xf32, #tpu.memory_space<vmem>>, vector<1x2x64xf32>,
    %1145 = vector.broadcast %1066 : vector<1x64xf32> to vector<2x64xf32>
    %1146 = arith.addf %1057, %1145 : vector<2x64xf32>
    %1147 = math.tanh %1146 : vector<2x64xf32>
    %c13_428 = arith.constant 13 : index
    %c0_429 = arith.constant 0 : index
    %c0_430 = arith.constant 0 : index
    %1148 = vector.load %arg26[%c13_428, %c0_429, %c0_430] : memref<16x2x64xf32, #tpu.memory_space<vmem>>, vector<1x2x64xf32>
    %1149 = vector.shape_cast %1148 : vector<1x2x64xf32> to vector<2x64xf32>
    %1150 = vector.shape_cast %1147 : vector<2x64xf32> to vector<1x2x64xf32>
    tpu.vector_store %arg26[%c13_428, %c0_429, %c0_430], %1150 {strides = array<i32>} : memref<16x2x64xf32, #tpu.memory_space<vmem>>, vector<1x2x64xf32>,
    %1151 = vector.broadcast %1066 : vector<1x64xf32> to vector<2x64xf32>
    %1152 = arith.addf %1062, %1151 : vector<2x64xf32>
    %1153 = math.tanh %1152 : vector<2x64xf32>
    %c14_431 = arith.constant 14 : index
    %c0_432 = arith.constant 0 : index
    %c0_433 = arith.constant 0 : index
    %1154 = vector.load %arg26[%c14_431, %c0_432, %c0_433] : memref<16x2x64xf32, #tpu.memory_space<vmem>>, vector<1x2x64xf32>
    %1155 = vector.shape_cast %1154 : vector<1x2x64xf32> to vector<2x64xf32>
    %1156 = vector.shape_cast %1153 : vector<2x64xf32> to vector<1x2x64xf32>
    tpu.vector_store %arg26[%c14_431, %c0_432, %c0_433], %1156 {strides = array<i32>} : memref<16x2x64xf32, #tpu.memory_space<vmem>>, vector<1x2x64xf32>,
    %1157 = vector.broadcast %1066 : vector<1x64xf32> to vector<2x64xf32>
    %1158 = arith.addf %1065, %1157 : vector<2x64xf32>
    %1159 = math.tanh %1158 : vector<2x64xf32>
    %c15_434 = arith.constant 15 : index
    %c0_435 = arith.constant 0 : index
    %c0_436 = arith.constant 0 : index
    %1160 = vector.load %arg26[%c15_434, %c0_435, %c0_436] : memref<16x2x64xf32, #tpu.memory_space<vmem>>, vector<1x2x64xf32>
    %1161 = vector.shape_cast %1160 : vector<1x2x64xf32> to vector<2x64xf32>
    %1162 = vector.shape_cast %1159 : vector<2x64xf32> to vector<1x2x64xf32>
    tpu.vector_store %arg26[%c15_434, %c0_435, %c0_436], %1162 {strides = array<i32>} : memref<16x2x64xf32, #tpu.memory_space<vmem>>, vector<1x2x64xf32>,
    return
  }
}

</mosaic_0001>

<bundles_post_ra>
// kernel: beta_vae_forward.1
= control target key start
LH: loop header
LB: loop body
LE: loop exit
PB: predicated region body
PF: predicated region fallthrough
CT: control target
= control target key end

     0   :  { %s21947_s0 = inlined_call_operand.vmem [shape: f32[16,2,64], index: 0, kind: input, shape index: {}]   ;;  %s21948_s1 = inlined_call_operand.vmem [shape: f32[2,16], index: 1, kind: input, shape index: {}]   ;;  %s21949_s2 = inlined_call_operand.vmem [shape: f32[3,64,64], index: 2, kind: input, shape index: {}]   ;;  %s21950_s3 = inlined_call_operand.vmem [shape: f32[1,8], index: 3, kind: input, shape index: {}]   ;;  %s21951_s4 = inlined_call_operand.hbm [shape: f32[1,8], index: 4, kind: input, shape index: {}]   ;;  %s21952_s5 = inlined_call_operand.vmem [shape: f32[3,64,64], index: 5, kind: input, shape index: {}]   ;;  %s21953_s6 = inlined_call_operand.hbm [shape: f32[1,16], index: 6, kind: input, shape index: {}]   ;;  %s21954_s7 = inlined_call_operand.hbm [shape: f32[1,16], index: 7, kind: input, shape index: {}]   ;;  %s21955_s8 = inlined_call_operand.vmem [shape: f32[3,64,64], index: 8, kind: input, shape index: {}]   ;;  %s21956_s9 = inlined_call_operand.hbm [shape: f32[1,32], index: 9, kind: input, shape index: {}]   ;;  %s21957_s10 = inlined_call_operand.hbm [shape: f32[1,32], index: 10, kind: input, shape index: {}]   ;;  %s21958_s11 = inlined_call_operand.vmem [shape: f32[2,64,32], index: 11, kind: input, shape index: {}]   ;;  %s21959_s12 = inlined_call_operand.vmem [shape: f32[1,32], index: 12, kind: input, shape index: {}]   ;;  %s21960_s13 = inlined_call_operand.vmem [shape: f32[2,16,64], index: 13, kind: input, shape index: {}]   ;;  %s21961_s14 = inlined_call_operand.vmem [shape: f32[2,1,64], index: 14, kind: input, shape index: {}]   ;;  %s21962_s15 = inlined_call_operand.vmem [shape: f32[3,64,64], index: 15, kind: input, shape index: {}]   ;;  %s21963_s16 = inlined_call_operand.vmem [shape: f32[1,16], index: 16, kind: input, shape index: {}]   ;;  %s21964_s17 = inlined_call_operand.vmem [shape: f32[1,16], index: 17, kind: input, shape index: {}]   ;;  %s21965_s18 = inlined_call_operand.vmem [shape: f32[3,64,64], index: 18, kind: input, shape index: {}]   ;;  %s21966_s19 = inlined_call_operand.vmem [shape: f32[1,8], index: 19, kind: input, shape index: {}]   ;;  %s21967_s20 = inlined_call_operand.vmem [shape: f32[1,8], index: 20, kind: input, shape index: {}]   ;;  %s21968_s21 = inlined_call_operand.hbm [shape: f32[3,64,128], index: 21, kind: input, shape index: {}]   ;;  %s21969_s22 = inlined_call_operand.vmem [shape: f32[1,8], index: 22, kind: input, shape index: {}]   ;;  %s21970_s23 = inlined_call_operand.vmem [shape: f32[1,8], index: 23, kind: input, shape index: {}]   ;;  %s21971_s24 = inlined_call_operand.vmem [shape: f32[3,128,64], index: 24, kind: input, shape index: {}]   ;;  %s21972_s25 = inlined_call_operand.vmem [shape: f32[1,64], index: 25, kind: input, shape index: {}]   ;;  %s21973_s26 = inlined_call_operand.vmem [shape: f32[16,2,64], index: 26, kind: output, shape index: {0}]   ;;  %s21974_s27 = inlined_call_operand.hbm [shape: f32[2,16], index: 27, kind: output, shape index: {1}]   ;;  %s21975_s28 = inlined_call_operand.hbm [shape: f32[2,16], index: 28, kind: output, shape index: {2}]  }
   0x1   :  { %22035 = sst [smem:[#allocation42_spill]] %s21947_s0 }
   0x2   :  { %22036 = sst [smem:[#allocation43_spill]] %s21948_s1 }
   0x3   :  { %22037 = sst [smem:[#allocation44_spill]] %s21949_s2 }
   0x4   :  { %22038 = sst [smem:[#allocation45_spill]] %s21950_s3 }
   0x5   :  { %22039 = sst [smem:[#allocation46_spill]] %s21951_s4 }
   0x6   :  { %22040 = sst [smem:[#allocation47_spill]] %s21952_s5 }
   0x7   :  { %22041 = sst [smem:[#allocation48_spill]] %s21953_s6 }
   0x8   :  { %22042 = sst [smem:[#allocation49_spill]] %s21954_s7 }
   0x9   :  { %22043 = sst [smem:[#allocation50_spill]] %s21955_s8 }
   0xa   :  { %22044 = sst [smem:[#allocation51_spill]] %s21956_s9 }
   0xb   :  { %22045 = sst [smem:[#allocation52_spill]] %s21957_s10 }
   0xc   :  { %22046 = sst [smem:[#allocation53_spill]] %s21958_s11 }
   0xd   :  { %22047 = sst [smem:[#allocation54_spill]] %s21959_s12 }
   0xe   :  { %34 = vsyncpa [#allocation3], 0 }
   0xf   :  { %35 = vsyncpa [#allocation6], 0 }
  0x10   :  { %36 = vsyncpa [#allocation9], 0 }
  0x11   :  { %37 = vsyncpa [#allocation12], 0 }
  0x12   :  { %38 = vsyncpa [#allocation4], 0 }
  0x13   :  { %39 = vsyncpa [#allocation15], 0  ;;  %s16143_s8 = smov [#allocation5]   ;;  %s16144_s9 = smov [#allocation8]  }
  0x14   :  { %s66_s5 = sshll.u32 %s16143_s8, 4  ;;  %s88_s30 = sshll.u32 %s16144_s9, 4  ;;  %s67_s5 = int_to_ptr.vmem [resolvable:$true] %s66_s5  ;;  %s89_s30 = int_to_ptr.vmem [resolvable:$true] %s88_s30 }
  0x15   :  { %s15979_s3 = scalar_lea.vmem %s67_s5, 16  ;;  %s15983_s6 = scalar_lea.vmem %s67_s5, 32 }
  0x16   :  { %p15980_p0 = scmp.ne.s32.totalorder %s67_s5, %s15979_s3  ;;  %p15984_p1 = scmp.lt.s32.totalorder %s67_s5, %s67_s5 }
  0x17   :  { %p15985_p2 = scmp.lt.s32.totalorder %s15983_s6, %s15979_s3 }
  0x19   :  { %p15986_p3 = por %p15985_p2, %p15984_p1 }
  0x1b   :  { %p15987_p4 = pnand %p15986_p3, %p15980_p0 }
  0x1d   :  { %15990 = shalt.err (!%p15987_p4)
}
  0x1e   :  { %s22048_s11 = sld [smem:[#allocation48_spill]]  ;;  %s15999_s29 = scalar_lea.vmem %s89_s30, 16 }
  0x1f   :  { %p16000_p5 = scmp.ne.s32.totalorder %s89_s30, %s15999_s29  ;;  %s16003_s2 = scalar_lea.vmem %s89_s30, 32 }
  0x20   :  { %p16004_p6 = scmp.lt.s32.totalorder %s89_s30, %s89_s30  ;;  %p16005_p7 = scmp.lt.s32.totalorder %s16003_s2, %s15999_s29 }
  0x22   :  { %p16006_p8 = por %p16005_p7, %p16004_p6 }
  0x24   :  { %69 = dma.hbm_to_vmem [thread:$0]  %s22048_s11, 16, %s67_s5, [#allocation6]  }
  0x25   :  { %p16007_p9 = pnand %p16006_p8, %p16000_p5 }
  0x27   :  { %16010 = shalt.err (!%p16007_p9)
}
  0x28   :  { %s22049_s1 = sld [smem:[#allocation51_spill]]  ;;  %s16145_s4 = smov [#allocation2]  }
  0x29   :  { %s54_s8 = sshll.u32 %s16145_s4, 4  ;;  %s16146_s9 = smov [#allocation7]   ;;  %s55_s8 = int_to_ptr.vmem [resolvable:$true] %s54_s8 }
  0x2a   :  { %s76_s3 = sshll.u32 %s16146_s9, 4  ;;  %s16019_s6 = scalar_lea.vmem %s55_s8, 16  ;;  %s77_s3 = int_to_ptr.vmem [resolvable:$true] %s76_s3 }
  0x2b   :  { %p16020_p10 = scmp.ne.s32.totalorder %s55_s8, %s16019_s6  ;;  %s16023_s5 = scalar_lea.vmem %s55_s8, 32 }
  0x2c   :  { %p16024_p11 = scmp.lt.s32.totalorder %s55_s8, %s55_s8  ;;  %p16025_p12 = scmp.lt.s32.totalorder %s16023_s5, %s16019_s6 }
  0x2e   :  { %91 = dma.hbm_to_vmem [thread:$0]  %s22049_s1, 16, %s89_s30, [#allocation9]  }
  0x2f   :  { %p16026_p13 = por %p16025_p12, %p16024_p11 }
  0x31   :  { %p16027_p0 = pnand %p16026_p13, %p16020_p10 }
  0x33   :  { %16030 = shalt.err (!%p16027_p0)
}
  0x34   :  { %s22050_s11 = sld [smem:[#allocation46_spill]]  ;;  %s16039_s29 = scalar_lea.vmem %s77_s3, 16 }
  0x35   :  { %p16040_p1 = scmp.ne.s32.totalorder %s77_s3, %s16039_s29  ;;  %s16043_s30 = scalar_lea.vmem %s77_s3, 32 }
  0x36   :  { %p16044_p2 = scmp.lt.s32.totalorder %s77_s3, %s77_s3  ;;  %p16045_p3 = scmp.lt.s32.totalorder %s16043_s30, %s16039_s29 }
  0x38   :  { %p16046_p4 = por %p16045_p3, %p16044_p2 }
  0x3a   :  { %57 = dma.hbm_to_vmem [thread:$0]  %s22050_s11, 16, %s55_s8, [#allocation3]  }
  0x3b   :  { %p16047_p5 = pnand %p16046_p4, %p16040_p1 }
  0x3d   :  { %16050 = shalt.err (!%p16047_p5)
}
  0x3e   :  { %s22051_s12 = sld [smem:[#allocation49_spill]]  ;;  %s16147_s1 = smov [#allocation10]  }
  0x3f   :  { %s98_s4 = sshll.u32 %s16147_s1, 4  ;;  %s16148_s9 = smov [#allocation11]   ;;  %s99_s4 = int_to_ptr.vmem [resolvable:$true] %s98_s4 }
  0x40   :  { %s127_s6 = sshll.u32 %s16148_s9, 4  ;;  %s16059_s5 = scalar_lea.vmem %s99_s4, 16  ;;  %s128_s6 = int_to_ptr.vmem [resolvable:$true] %s127_s6 }
  0x41   :  { %p16060_p6 = scmp.ne.s32.totalorder %s99_s4, %s16059_s5  ;;  %s16063_s8 = scalar_lea.vmem %s99_s4, 32 }
  0x42   :  { %p16064_p7 = scmp.lt.s32.totalorder %s99_s4, %s99_s4  ;;  %p16065_p8 = scmp.lt.s32.totalorder %s16063_s8, %s16059_s5 }
  0x44   :  { %79 = dma.hbm_to_vmem [thread:$0]  %s22051_s12, 16, %s77_s3, [#allocation6]  }
  0x45   :  { %p16066_p9 = por %p16065_p8, %p16064_p7 }
  0x47   :  { %p16067_p10 = pnand %p16066_p9, %p16060_p6 }
  0x49   :  { %16070 = shalt.err (!%p16067_p10)
}
  0x4a   :  { %s22052_s11 = sld [smem:[#allocation52_spill]]  ;;  %s16079_s29 = scalar_lea.vmem %s128_s6, 3072 }
  0x4b   :  { %p16080_p11 = scmp.ne.s32.totalorder %s128_s6, %s16079_s29  ;;  %p16084_p12 = scmp.lt.s32.totalorder %s128_s6, %s128_s6 }
  0x4c   :  { %p16085_p13 = scmp.lt.s32.totalorder %s16079_s29, %s16079_s29 }
  0x4e   :  { %p16086_p0 = por %p16085_p13, %p16084_p12 }
  0x50   :  { %101 = dma.hbm_to_vmem [thread:$0]  %s22052_s11, 16, %s99_s4, [#allocation9]  }
  0x51   :  { %p16087_p1 = pnand %p16086_p0, %p16080_p11 }
  0x53   :  { %16090 = shalt.err (!%p16087_p1)
}
  0x54   :  { %s16149_s3 = smov 128   ;;  %s21989_s30 = smov 8  }
  0x55   :  { %133 = dma.hbm_to_vmem [thread:$0]  %s21968_s21, 3072, %s128_s6, [#allocation12], %s16149_s3, %s16149_s3, %s21989_s30  }
  0x56   :  { %16131 = dma.done.wait [#allocation3], 16  }
  0x57   :  { %16132 = vsyncadd [#allocation3], 4294967280 }
  0x58   :  { %16133 = dma.done.wait [#allocation6], 32  }
  0x59   :  { %16134 = vsyncadd [#allocation6], 4294967264 }
  0x5a   :  { %16135 = dma.done.wait [#allocation9], 32  }
  0x5b   :  { %16136 = vsyncadd [#allocation9], 4294967264 }
  0x5c   :  { %16137 = dma.done.wait [#allocation12], 3072  }
  0x5d   :  { %16138 = vsyncadd [#allocation12], 4294964224  ;;  %v22009_v0 = vmov 0.0   ;;  %vm16152_vm0 = vmmov 0   ;;  %s22053_s1 = sld [smem:[#allocation44_spill]]  ;;  %vm217_vm1 = vcmask 523264  }
  0x5e   :  { %12625 = vmatprep.subr.mxu0 %v22009_v0  ;;  %12644 = vmatprep.subr.mxu1 %v22009_v0  ;;  %s22054_s8 = sld [smem:[#allocation42_spill]]  ;;  %s16154_s2 = smov 120   ;;  %vm1963_vm2 = vcmask 58368   ;;  %vm2016_vm3 = vcmask 64512   ;;  %vm2018_vm4 = vcmask 130048   ;;  %vm2020_vm5 = vcmask 195584  }
  0x5f   :  { %12641 = vmatprep.mubr.msk.f32.mxu0 %vm16152_vm0, %v22009_v0  ;;  %12660 = vmatprep.mubr.msk.f32.mxu1 %vm16152_vm0, %v22009_v0  ;;  %s21985_s7 = smov 104   ;;  %s21983_s21 = smov 88   ;;  %vm2022_vm6 = vcmask 261120   ;;  %vm2024_vm7 = vcmask 326656   ;;  %vm2026_vm8 = vcmask 392192   ;;  %vm2028_vm9 = vcmask 457728  }
  0x60   :  { %s16158_s12 = smov 80   ;;  %s21981_s4 = smov 72  }
  0x61   :  { %s22055_s5 = sld [smem:[#allocation45_spill]]  ;;  %s16160_s10 = smov 16  }
  0x62   :  { %s22056_s29 = sld [smem:[#allocation47_spill]]  ;;  %s21987_s6 = smov 24  }
  0x63   :  { %v16342_v1 = vld [vmem:[%s22053_s1 + $0xb8] sm:$0xff]  ;;  %v16352_v3 = vld [vmem:[%s22053_s1 + $0xb0] sm:$0xff]  ;;  %v16366_v5 = vld [vmem:[%s22053_s1 + $0xa8] sm:$0xff]  ;;  %s16162_s11 = smov 32   ;;  %s21993_s0 = smov 40  }
  0x64   :  { %v16347_v2 = vld [vmem:[%s22053_s1 + $0x78] sm:$0xff]  ;;  %12626 = vmatpush3.msra.mxu0 %v16342_v1  ;;  %v16359_v4 = vld [vmem:[%s22053_s1 + $0x70] sm:$0xff]  ;;  %v16371_v6 = vld [vmem:[%s22053_s1 + $0x68] sm:$0xff]  ;;  %s16164_s3 = smov 48   ;;  %s22058_s9 = sld [smem:[#allocation53_spill]] }
  0x65   :  { %12645 = vmatpush3.msra.mxu1 %v16347_v2  ;;  %12627 = vmatprep.subr.mxu0 %v22009_v0  ;;  %v16380_v7 = vld [vmem:[%s22053_s1 + $0xa0] sm:$0xff]  ;;  %v16394_v9 = vld [vmem:[%s22053_s1 + $0x98] sm:$0xff]  ;;  %v16408_v11 = vld [vmem:[%s22053_s1 + $0x90] sm:$0xff] }
  0x66   :  { %12646 = vmatprep.subr.mxu1 %v22009_v0  ;;  %12628 = vmatpush3.msra.mxu0 %v16352_v3  ;;  %v16385_v8 = vld [vmem:[%s22053_s1 + $0x60] sm:$0xff]  ;;  %v16399_v10 = vld [vmem:[%s22053_s1 + $0x58] sm:$0xff]  ;;  %v16413_v12 = vld [vmem:[%s22053_s1 + $0x50] sm:$0xff] }
  0x67   :  { %12647 = vmatpush3.msra.mxu1 %v16359_v4  ;;  %12629 = vmatprep.subr.mxu0 %v22009_v0  ;;  %v16422_v13 = vld [vmem:[%s22053_s1 + $0x88] sm:$0xff]  ;;  %v16436_v15 = vld [vmem:[%s22053_s1 + $0x80] sm:$0xff]  ;;  %v16460_v19 = vld [vmem:[%s22053_s1 + $0x38] sm:$0xff] }
  0x68   :  { %12648 = vmatprep.subr.mxu1 %v22009_v0  ;;  %12630 = vmatpush3.msra.mxu0 %v16366_v5  ;;  %v16427_v14 = vld [vmem:[%s22053_s1 + $0x48] sm:$0xff]  ;;  %v16441_v16 = vld [vmem:[%s22053_s1 + $0x40] sm:$0xff]  ;;  %v16469_v20 = vld [vmem:[%s22053_s1 + $0x30] sm:$0xff] }
  0x69   :  { %12649 = vmatpush3.msra.mxu1 %v16371_v6  ;;  %12631 = vmatprep.subr.mxu0 %v22009_v0  ;;  %v10878_v17 = vld [vmem:[%s22054_s8 + $0x2] sm:$0x3]  ;;  %v160_v18 = vld [vmem:[%s22054_s8] sm:$0x3]  ;;  %v16478_v21 = vld [vmem:[%s22053_s1 + $0x28] sm:$0xff] }
  0x6a   :  { %12650 = vmatprep.subr.mxu1 %v22009_v0  ;;  %12632 = vmatpush3.msra.mxu0 %v16380_v7  ;;  %v16487_v22 = vld [vmem:[%s22053_s1 + $0x20] sm:$0xff]  ;;  %v16496_v23 = vld [vmem:[%s22053_s1 + $0x18] sm:$0xff]  ;;  %v16505_v24 = vld [vmem:[%s22053_s1 + $0x10] sm:$0xff] }
  0x6b   :  { %12651 = vmatpush3.msra.mxu1 %v16385_v8  ;;  %12633 = vmatprep.subr.mxu0 %v22009_v0  ;;  %v16514_v25 = vld [vmem:[%s22053_s1 + $0x8] sm:$0xff]  ;;  %v10879_v26 = vld [vmem:[%s22054_s8 + $0x4] sm:$0x3]  ;;  %v10880_v28 = vld [vmem:[%s22054_s8 + $0x6] sm:$0x3] }
  0x6c   :  { %12652 = vmatprep.subr.mxu1 %v22009_v0  ;;  %12634 = vmatpush3.msra.mxu0 %v16394_v9  ;;  %v16526_v27 = vld [vmem:[%s22053_s1] sm:$0xff]  ;;  %v10881_v29 = vld [vmem:[%s22054_s8 + $0x8] sm:$0x3]  ;;  %v10882_v30 = vld [vmem:[%s22054_s8 + $0xa] sm:$0x3]  ;;  %s16156_s1 = smov 96  }
  0x6d   :  { %12653 = vmatpush3.msra.mxu1 %v16399_v10  ;;  %12635 = vmatprep.subr.mxu0 %v22009_v0  ;;  %v10883_v31 = vld [vmem:[%s22054_s8 + $0xc] sm:$0x3]  ;;  %v10884_v32 = vld [vmem:[%s22054_s8 + $0xe] sm:$0x3]  ;;  %v10885_v33 = vld [vmem:[%s22054_s8 + $0x10] sm:$0x3] }
  0x6e   :  { %12654 = vmatprep.subr.mxu1 %v22009_v0  ;;  %12636 = vmatpush3.msra.mxu0 %v16408_v11  ;;  %v10886_v34 = vld [vmem:[%s22054_s8 + $0x12] sm:$0x3]  ;;  %v10887_v35 = vld [vmem:[%s22054_s8 + $0x14] sm:$0x3]  ;;  %v10888_v36 = vld [vmem:[%s22054_s8 + $0x16] sm:$0x3] }
  0x6f   :  { %12655 = vmatpush3.msra.mxu1 %v16413_v12  ;;  %12637 = vmatprep.subr.mxu0 %v22009_v0  ;;  %v10889_v37 = vld [vmem:[%s22054_s8 + $0x18] sm:$0x3]  ;;  %v10890_v38 = vld [vmem:[%s22054_s8 + $0x1a] sm:$0x3]  ;;  %v10891_v39 = vld [vmem:[%s22054_s8 + $0x1c] sm:$0x3] }
  0x70   :  { %12656 = vmatprep.subr.mxu1 %v22009_v0  ;;  %12638 = vmatpush3.msra.mxu0 %v16422_v13  ;;  %v10892_v41 = vld [vmem:[%s22054_s8 + $0x1e] sm:$0x3]  ;;  %s16153_s8 = smov 112  }
  0x71   :  { %12657 = vmatpush3.msra.mxu1 %v16427_v14  ;;  %12639 = vmatprep.subr.mxu0 %v22009_v0 }
  0x72   :  { %12658 = vmatprep.subr.mxu1 %v22009_v0  ;;  %12640 = vmatpush3.msra.mxu0 %v16436_v15 }
  0x73   :  { %12659 = vmatpush3.msra.mxu1 %v16441_v16  ;;  %12642 = vmatmul.mubr.msk.f32.vlgmr.msra.gmra.mxu0 %vm217_vm1, %v10878_v17 }
  0x74   :  { %12663 = vmatprep.subr.mxu0 %v22009_v0  ;;  %12661 = vmatmul.mubr.msk.f32.vlgmr.msra.gmra.mxu1 %vm217_vm1, %v160_v18 }
  0x75   :  { %12664 = vmatpush3.msra.mxu0 %v16347_v2  ;;  %12682 = vmatprep.subr.mxu1 %v22009_v0 }
  0x76   :  { %12665 = vmatprep.subr.mxu0 %v22009_v0  ;;  %12683 = vmatpush3.msra.mxu1 %v16460_v19 }
  0x77   :  { %12666 = vmatpush3.msra.mxu0 %v16359_v4  ;;  %12684 = vmatprep.subr.mxu1 %v22009_v0 }
  0x78   :  { %12667 = vmatprep.subr.mxu0 %v22009_v0  ;;  %12685 = vmatpush3.msra.mxu1 %v16469_v20 }
  0x79   :  { %12668 = vmatpush3.msra.mxu0 %v16371_v6  ;;  %12686 = vmatprep.subr.mxu1 %v22009_v0 }
  0x7a   :  { %12669 = vmatprep.subr.mxu0 %v22009_v0  ;;  %12687 = vmatpush3.msra.mxu1 %v16478_v21 }
  0x7b   :  { %12670 = vmatpush3.msra.mxu0 %v16385_v8  ;;  %12688 = vmatprep.subr.mxu1 %v22009_v0 }
  0x7c   :  { %12671 = vmatprep.subr.mxu0 %v22009_v0  ;;  %12689 = vmatpush3.msra.mxu1 %v16487_v22 }
  0x7d   :  { %12672 = vmatpush3.msra.mxu0 %v16399_v10  ;;  %12690 = vmatprep.subr.mxu1 %v22009_v0 }
  0x7e   :  { %12673 = vmatprep.subr.mxu0 %v22009_v0  ;;  %12691 = vmatpush3.msra.mxu1 %v16496_v23 }
  0x7f   :  { %12674 = vmatpush3.msra.mxu0 %v16413_v12  ;;  %12692 = vmatprep.subr.mxu1 %v22009_v0 }
  0x80   :  { %12675 = vmatprep.subr.mxu0 %v22009_v0  ;;  %12693 = vmatpush3.msra.mxu1 %v16505_v24 }
  0x81   :  { %12676 = vmatpush3.msra.mxu0 %v16427_v14  ;;  %12694 = vmatprep.subr.mxu1 %v22009_v0 }
  0x82   :  { %12677 = vmatprep.subr.mxu0 %v22009_v0  ;;  %12695 = vmatpush3.msra.mxu1 %v16514_v25 }
  0x83   :  { %12678 = vmatpush3.msra.mxu0 %v16441_v16  ;;  %12679 = vmatprep.mubr.msk.f32.mxu0 %vm16152_vm0, %v22009_v0 }
  0x84   :  { %12696 = vmatprep.subr.mxu1 %v22009_v0  ;;  %12680 = vmatmul.mubr.msk.f32.vlgmr.msra.gmra.mxu0 %vm217_vm1, %v10879_v26 }
  0x85   :  { %12697 = vmatpush3.msra.mxu1 %v16526_v27  ;;  %12698 = vmatprep.mubr.msk.f32.mxu1 %vm16152_vm0, %v22009_v0 }
  0x86   :  { %12701 = vmatprep.subr.mxu0 %v22009_v0  ;;  %12699 = vmatmul.mubr.msk.f32.vlgmr.msra.gmra.mxu1 %vm217_vm1, %v10878_v17 }
  0x87   :  { %12702 = vmatpush3.msra.mxu0 %v16342_v1  ;;  %12720 = vmatprep.subr.mxu1 %v22009_v0 }
  0x88   :  { %12703 = vmatprep.subr.mxu0 %v22009_v0  ;;  %12721 = vmatpush3.msra.mxu1 %v16347_v2 }
  0x89   :  { %12704 = vmatpush3.msra.mxu0 %v16352_v3  ;;  %12722 = vmatprep.subr.mxu1 %v22009_v0 }
  0x8a   :  { %12705 = vmatprep.subr.mxu0 %v22009_v0  ;;  %12723 = vmatpush3.msra.mxu1 %v16359_v4 }
  0x8b   :  { %12706 = vmatpush3.msra.mxu0 %v16366_v5  ;;  %12724 = vmatprep.subr.mxu1 %v22009_v0 }
  0x8c   :  { %12707 = vmatprep.subr.mxu0 %v22009_v0  ;;  %12725 = vmatpush3.msra.mxu1 %v16371_v6 }
  0x8d   :  { %12708 = vmatpush3.msra.mxu0 %v16380_v7  ;;  %12726 = vmatprep.subr.mxu1 %v22009_v0 }
  0x8e   :  { %12709 = vmatprep.subr.mxu0 %v22009_v0  ;;  %12727 = vmatpush3.msra.mxu1 %v16385_v8 }
  0x8f   :  { %12710 = vmatpush3.msra.mxu0 %v16394_v9  ;;  %12728 = vmatprep.subr.mxu1 %v22009_v0 }
  0x90   :  { %12711 = vmatprep.subr.mxu0 %v22009_v0  ;;  %12729 = vmatpush3.msra.mxu1 %v16399_v10 }
  0x91   :  { %12712 = vmatpush3.msra.mxu0 %v16408_v11  ;;  %12730 = vmatprep.subr.mxu1 %v22009_v0 }
  0x92   :  { %12713 = vmatprep.subr.mxu0 %v22009_v0  ;;  %12731 = vmatpush3.msra.mxu1 %v16413_v12 }
  0x93   :  { %12714 = vmatpush3.msra.mxu0 %v16422_v13  ;;  %12732 = vmatprep.subr.mxu1 %v22009_v0 }
  0x94   :  { %12715 = vmatprep.subr.mxu0 %v22009_v0  ;;  %12733 = vmatpush3.msra.mxu1 %v16427_v14 }
  0x95   :  { %12716 = vmatpush3.msra.mxu0 %v16436_v15  ;;  %12717 = vmatprep.mubr.msk.f32.mxu0 %vm16152_vm0, %v22009_v0 }
  0x96   :  { %12734 = vmatprep.subr.mxu1 %v22009_v0  ;;  %12718 = vmatmul.mubr.msk.f32.vlgmr.msra.gmra.mxu0 %vm217_vm1, %v10880_v28 }
  0x97   :  { %12735 = vmatpush3.msra.mxu1 %v16441_v16  ;;  %12739 = vmatprep.subr.mxu0 %v22009_v0 }
  0x98   :  { %12736 = vmatprep.mubr.msk.f32.mxu1 %vm16152_vm0, %v22009_v0  ;;  %12740 = vmatpush3.msra.mxu0 %v16460_v19 }
  0x99   :  { %12758 = vmatprep.subr.mxu1 %v22009_v0  ;;  %12737 = vmatmul.mubr.msk.f32.vlgmr.msra.gmra.mxu1 %vm217_vm1, %v10881_v29 }
  0x9a   :  { %12741 = vmatprep.subr.mxu0 %v22009_v0  ;;  %12759 = vmatpush3.msra.mxu1 %v16342_v1 }
  0x9b   :  { %12742 = vmatpush3.msra.mxu0 %v16469_v20  ;;  %12760 = vmatprep.subr.mxu1 %v22009_v0 }
  0x9c   :  { %12743 = vmatprep.subr.mxu0 %v22009_v0  ;;  %12761 = vmatpush3.msra.mxu1 %v16352_v3 }
  0x9d   :  { %12744 = vmatpush3.msra.mxu0 %v16478_v21  ;;  %12762 = vmatprep.subr.mxu1 %v22009_v0 }
  0x9e   :  { %12745 = vmatprep.subr.mxu0 %v22009_v0  ;;  %12763 = vmatpush3.msra.mxu1 %v16366_v5 }
  0x9f   :  { %12746 = vmatpush3.msra.mxu0 %v16487_v22  ;;  %12764 = vmatprep.subr.mxu1 %v22009_v0 }
  0xa0   :  { %12747 = vmatprep.subr.mxu0 %v22009_v0  ;;  %12765 = vmatpush3.msra.mxu1 %v16380_v7 }
  0xa1   :  { %12748 = vmatpush3.msra.mxu0 %v16496_v23  ;;  %12766 = vmatprep.subr.mxu1 %v22009_v0 }
  0xa2   :  { %12749 = vmatprep.subr.mxu0 %v22009_v0  ;;  %12767 = vmatpush3.msra.mxu1 %v16394_v9 }
  0xa3   :  { %12750 = vmatpush3.msra.mxu0 %v16505_v24  ;;  %12768 = vmatprep.subr.mxu1 %v22009_v0 }
  0xa4   :  { %12751 = vmatprep.subr.mxu0 %v22009_v0  ;;  %12769 = vmatpush3.msra.mxu1 %v16408_v11 }
  0xa5   :  { %12752 = vmatpush3.msra.mxu0 %v16514_v25  ;;  %12770 = vmatprep.subr.mxu1 %v22009_v0 }
  0xa6   :  { %12753 = vmatprep.subr.mxu0 %v22009_v0  ;;  %12771 = vmatpush3.msra.mxu1 %v16422_v13 }
  0xa7   :  { %12754 = vmatpush3.msra.mxu0 %v16526_v27  ;;  %12755 = vmatprep.mubr.msk.f32.mxu0 %vm16152_vm0, %v22009_v0 }
  0xa8   :  { %12772 = vmatprep.subr.mxu1 %v22009_v0  ;;  %12756 = vmatmul.mubr.msk.f32.vlgmr.msra.gmra.mxu0 %vm217_vm1, %v10880_v28 }
  0xa9   :  { %12773 = vmatpush3.msra.mxu1 %v16436_v15  ;;  %12777 = vmatprep.subr.mxu0 %v22009_v0 }
  0xaa   :  { %12774 = vmatprep.mubr.msk.f32.mxu1 %vm16152_vm0, %v22009_v0  ;;  %12778 = vmatpush3.msra.mxu0 %v16347_v2 }
  0xab   :  { %12796 = vmatprep.subr.mxu1 %v22009_v0  ;;  %12775 = vmatmul.mubr.msk.f32.vlgmr.msra.gmra.mxu1 %vm217_vm1, %v10882_v30 }
  0xac   :  { %12779 = vmatprep.subr.mxu0 %v22009_v0  ;;  %12797 = vmatpush3.msra.mxu1 %v16460_v19 }
  0xad   :  { %12780 = vmatpush3.msra.mxu0 %v16359_v4  ;;  %12798 = vmatprep.subr.mxu1 %v22009_v0 }
  0xae   :  { %12781 = vmatprep.subr.mxu0 %v22009_v0  ;;  %12799 = vmatpush3.msra.mxu1 %v16469_v20 }
  0xaf   :  { %12782 = vmatpush3.msra.mxu0 %v16371_v6  ;;  %12800 = vmatprep.subr.mxu1 %v22009_v0 }
  0xb0   :  { %12783 = vmatprep.subr.mxu0 %v22009_v0  ;;  %12801 = vmatpush3.msra.mxu1 %v16478_v21 }
  0xb1   :  { %12784 = vmatpush3.msra.mxu0 %v16385_v8  ;;  %12802 = vmatprep.subr.mxu1 %v22009_v0 }
  0xb2   :  { %12785 = vmatprep.subr.mxu0 %v22009_v0  ;;  %12803 = vmatpush3.msra.mxu1 %v16487_v22 }
  0xb3   :  { %12786 = vmatpush3.msra.mxu0 %v16399_v10  ;;  %12804 = vmatprep.subr.mxu1 %v22009_v0 }
  0xb4   :  { %12787 = vmatprep.subr.mxu0 %v22009_v0  ;;  %12805 = vmatpush3.msra.mxu1 %v16496_v23 }
  0xb5   :  { %12788 = vmatpush3.msra.mxu0 %v16413_v12  ;;  %12806 = vmatprep.subr.mxu1 %v22009_v0 }
  0xb6   :  { %12789 = vmatprep.subr.mxu0 %v22009_v0  ;;  %12807 = vmatpush3.msra.mxu1 %v16505_v24 }
  0xb7   :  { %12790 = vmatpush3.msra.mxu0 %v16427_v14  ;;  %12808 = vmatprep.subr.mxu1 %v22009_v0 }
  0xb8   :  { %12791 = vmatprep.subr.mxu0 %v22009_v0  ;;  %12809 = vmatpush3.msra.mxu1 %v16514_v25 }
  0xb9   :  { %12792 = vmatpush3.msra.mxu0 %v16441_v16  ;;  %12793 = vmatprep.mubr.msk.f32.mxu0 %vm16152_vm0, %v22009_v0 }
  0xba   :  { %12810 = vmatprep.subr.mxu1 %v22009_v0  ;;  %12794 = vmatmul.mubr.msk.f32.vlgmr.msra.gmra.mxu0 %vm217_vm1, %v10883_v31 }
  0xbb   :  { %12811 = vmatpush3.msra.mxu1 %v16526_v27  ;;  %12812 = vmatprep.mubr.msk.f32.mxu1 %vm16152_vm0, %v22009_v0 }
  0xbc   :  { %12815 = vmatprep.subr.mxu0 %v22009_v0  ;;  %12813 = vmatmul.mubr.msk.f32.vlgmr.msra.gmra.mxu1 %vm217_vm1, %v10882_v30 }
  0xbd   :  { %12816 = vmatpush3.msra.mxu0 %v16342_v1  ;;  %12834 = vmatprep.subr.mxu1 %v22009_v0 }
  0xbe   :  { %12817 = vmatprep.subr.mxu0 %v22009_v0  ;;  %12835 = vmatpush3.msra.mxu1 %v16347_v2 }
  0xbf   :  { %12818 = vmatpush3.msra.mxu0 %v16352_v3  ;;  %12836 = vmatprep.subr.mxu1 %v22009_v0 }
  0xc0   :  { %12819 = vmatprep.subr.mxu0 %v22009_v0  ;;  %12837 = vmatpush3.msra.mxu1 %v16359_v4 }
  0xc1   :  { %12820 = vmatpush3.msra.mxu0 %v16366_v5  ;;  %12838 = vmatprep.subr.mxu1 %v22009_v0 }
  0xc2   :  { %12821 = vmatprep.subr.mxu0 %v22009_v0  ;;  %12839 = vmatpush3.msra.mxu1 %v16371_v6 }
  0xc3   :  { %12822 = vmatpush3.msra.mxu0 %v16380_v7  ;;  %12840 = vmatprep.subr.mxu1 %v22009_v0 }
  0xc4   :  { %12823 = vmatprep.subr.mxu0 %v22009_v0  ;;  %12841 = vmatpush3.msra.mxu1 %v16385_v8 }
  0xc5   :  { %12824 = vmatpush3.msra.mxu0 %v16394_v9  ;;  %12842 = vmatprep.subr.mxu1 %v22009_v0 }
  0xc6   :  { %12825 = vmatprep.subr.mxu0 %v22009_v0  ;;  %12843 = vmatpush3.msra.mxu1 %v16399_v10 }
  0xc7   :  { %12826 = vmatpush3.msra.mxu0 %v16408_v11  ;;  %12844 = vmatprep.subr.mxu1 %v22009_v0 }
  0xc8   :  { %12827 = vmatprep.subr.mxu0 %v22009_v0  ;;  %12845 = vmatpush3.msra.mxu1 %v16413_v12 }
  0xc9   :  { %12828 = vmatpush3.msra.mxu0 %v16422_v13  ;;  %12846 = vmatprep.subr.mxu1 %v22009_v0 }
  0xca   :  { %12829 = vmatprep.subr.mxu0 %v22009_v0  ;;  %12847 = vmatpush3.msra.mxu1 %v16427_v14 }
  0xcb   :  { %12830 = vmatpush3.msra.mxu0 %v16436_v15  ;;  %12831 = vmatprep.mubr.msk.f32.mxu0 %vm16152_vm0, %v22009_v0 }
  0xcc   :  { %12848 = vmatprep.subr.mxu1 %v22009_v0  ;;  %12832 = vmatmul.mubr.msk.f32.vlgmr.msra.gmra.mxu0 %vm217_vm1, %v10884_v32 }
  0xcd   :  { %12849 = vmatpush3.msra.mxu1 %v16441_v16  ;;  %12853 = vmatprep.subr.mxu0 %v22009_v0 }
  0xce   :  { %12850 = vmatprep.mubr.msk.f32.mxu1 %vm16152_vm0, %v22009_v0  ;;  %12854 = vmatpush3.msra.mxu0 %v16460_v19 }
  0xcf   :  { %12872 = vmatprep.subr.mxu1 %v22009_v0  ;;  %12851 = vmatmul.mubr.msk.f32.vlgmr.msra.gmra.mxu1 %vm217_vm1, %v10885_v33 }
  0xd0   :  { %12855 = vmatprep.subr.mxu0 %v22009_v0  ;;  %12873 = vmatpush3.msra.mxu1 %v16342_v1 }
  0xd1   :  { %12856 = vmatpush3.msra.mxu0 %v16469_v20  ;;  %12874 = vmatprep.subr.mxu1 %v22009_v0 }
  0xd2   :  { %12857 = vmatprep.subr.mxu0 %v22009_v0  ;;  %12875 = vmatpush3.msra.mxu1 %v16352_v3 }
  0xd3   :  { %12858 = vmatpush3.msra.mxu0 %v16478_v21  ;;  %12876 = vmatprep.subr.mxu1 %v22009_v0 }
  0xd4   :  { %12859 = vmatprep.subr.mxu0 %v22009_v0  ;;  %12877 = vmatpush3.msra.mxu1 %v16366_v5 }
  0xd5   :  { %12860 = vmatpush3.msra.mxu0 %v16487_v22  ;;  %12878 = vmatprep.subr.mxu1 %v22009_v0 }
  0xd6   :  { %12861 = vmatprep.subr.mxu0 %v22009_v0  ;;  %12879 = vmatpush3.msra.mxu1 %v16380_v7 }
  0xd7   :  { %12862 = vmatpush3.msra.mxu0 %v16496_v23  ;;  %12880 = vmatprep.subr.mxu1 %v22009_v0 }
  0xd8   :  { %12863 = vmatprep.subr.mxu0 %v22009_v0  ;;  %12881 = vmatpush3.msra.mxu1 %v16394_v9 }
  0xd9   :  { %12864 = vmatpush3.msra.mxu0 %v16505_v24  ;;  %12882 = vmatprep.subr.mxu1 %v22009_v0 }
  0xda   :  { %12865 = vmatprep.subr.mxu0 %v22009_v0  ;;  %12883 = vmatpush3.msra.mxu1 %v16408_v11 }
  0xdb   :  { %12866 = vmatpush3.msra.mxu0 %v16514_v25  ;;  %12884 = vmatprep.subr.mxu1 %v22009_v0 }
  0xdc   :  { %12867 = vmatprep.subr.mxu0 %v22009_v0  ;;  %12885 = vmatpush3.msra.mxu1 %v16422_v13 }
  0xdd   :  { %12868 = vmatpush3.msra.mxu0 %v16526_v27  ;;  %12869 = vmatprep.mubr.msk.f32.mxu0 %vm16152_vm0, %v22009_v0 }
  0xde   :  { %12886 = vmatprep.subr.mxu1 %v22009_v0  ;;  %12870 = vmatmul.mubr.msk.f32.vlgmr.msra.gmra.mxu0 %vm217_vm1, %v10884_v32 }
  0xdf   :  { %12887 = vmatpush3.msra.mxu1 %v16436_v15  ;;  %12891 = vmatprep.subr.mxu0 %v22009_v0 }
  0xe0   :  { %12888 = vmatprep.mubr.msk.f32.mxu1 %vm16152_vm0, %v22009_v0  ;;  %12892 = vmatpush3.msra.mxu0 %v16347_v2 }
  0xe1   :  { %12910 = vmatprep.subr.mxu1 %v22009_v0  ;;  %12889 = vmatmul.mubr.msk.f32.vlgmr.msra.gmra.mxu1 %vm217_vm1, %v10886_v34 }
  0xe2   :  { %12893 = vmatprep.subr.mxu0 %v22009_v0  ;;  %12911 = vmatpush3.msra.mxu1 %v16460_v19 }
  0xe3   :  { %12894 = vmatpush3.msra.mxu0 %v16359_v4  ;;  %12912 = vmatprep.subr.mxu1 %v22009_v0 }
  0xe4   :  { %12895 = vmatprep.subr.mxu0 %v22009_v0  ;;  %12913 = vmatpush3.msra.mxu1 %v16469_v20 }
  0xe5   :  { %12896 = vmatpush3.msra.mxu0 %v16371_v6  ;;  %12914 = vmatprep.subr.mxu1 %v22009_v0 }
  0xe6   :  { %12897 = vmatprep.subr.mxu0 %v22009_v0  ;;  %12915 = vmatpush3.msra.mxu1 %v16478_v21 }
  0xe7   :  { %12898 = vmatpush3.msra.mxu0 %v16385_v8  ;;  %12916 = vmatprep.subr.mxu1 %v22009_v0 }
  0xe8   :  { %12899 = vmatprep.subr.mxu0 %v22009_v0  ;;  %12917 = vmatpush3.msra.mxu1 %v16487_v22 }
  0xe9   :  { %12900 = vmatpush3.msra.mxu0 %v16399_v10  ;;  %12918 = vmatprep.subr.mxu1 %v22009_v0 }
  0xea   :  { %12901 = vmatprep.subr.mxu0 %v22009_v0  ;;  %12919 = vmatpush3.msra.mxu1 %v16496_v23 }
  0xeb   :  { %12902 = vmatpush3.msra.mxu0 %v16413_v12  ;;  %12920 = vmatprep.subr.mxu1 %v22009_v0 }
  0xec   :  { %12903 = vmatprep.subr.mxu0 %v22009_v0  ;;  %12921 = vmatpush3.msra.mxu1 %v16505_v24 }
  0xed   :  { %12904 = vmatpush3.msra.mxu0 %v16427_v14  ;;  %12922 = vmatprep.subr.mxu1 %v22009_v0 }
  0xee   :  { %12905 = vmatprep.subr.mxu0 %v22009_v0  ;;  %12923 = vmatpush3.msra.mxu1 %v16514_v25 }
  0xef   :  { %12906 = vmatpush3.msra.mxu0 %v16441_v16  ;;  %12907 = vmatprep.mubr.msk.f32.mxu0 %vm16152_vm0, %v22009_v0 }
  0xf0   :  { %12924 = vmatprep.subr.mxu1 %v22009_v0  ;;  %12908 = vmatmul.mubr.msk.f32.vlgmr.msra.gmra.mxu0 %vm217_vm1, %v10887_v35 }
  0xf1   :  { %12925 = vmatpush3.msra.mxu1 %v16526_v27  ;;  %12926 = vmatprep.mubr.msk.f32.mxu1 %vm16152_vm0, %v22009_v0 }
  0xf2   :  { %12929 = vmatprep.subr.mxu0 %v22009_v0  ;;  %12927 = vmatmul.mubr.msk.f32.vlgmr.msra.gmra.mxu1 %vm217_vm1, %v10886_v34 }
  0xf3   :  { %12930 = vmatpush3.msra.mxu0 %v16342_v1  ;;  %12948 = vmatprep.subr.mxu1 %v22009_v0 }
  0xf4   :  { %12931 = vmatprep.subr.mxu0 %v22009_v0  ;;  %12949 = vmatpush3.msra.mxu1 %v16347_v2 }
  0xf5   :  { %12932 = vmatpush3.msra.mxu0 %v16352_v3  ;;  %12950 = vmatprep.subr.mxu1 %v22009_v0 }
  0xf6   :  { %12933 = vmatprep.subr.mxu0 %v22009_v0  ;;  %12951 = vmatpush3.msra.mxu1 %v16359_v4 }
  0xf7   :  { %12934 = vmatpush3.msra.mxu0 %v16366_v5  ;;  %12952 = vmatprep.subr.mxu1 %v22009_v0 }
  0xf8   :  { %12935 = vmatprep.subr.mxu0 %v22009_v0  ;;  %12953 = vmatpush3.msra.mxu1 %v16371_v6 }
  0xf9   :  { %12936 = vmatpush3.msra.mxu0 %v16380_v7  ;;  %12954 = vmatprep.subr.mxu1 %v22009_v0 }
  0xfa   :  { %12937 = vmatprep.subr.mxu0 %v22009_v0  ;;  %12955 = vmatpush3.msra.mxu1 %v16385_v8 }
  0xfb   :  { %12938 = vmatpush3.msra.mxu0 %v16394_v9  ;;  %12956 = vmatprep.subr.mxu1 %v22009_v0 }
  0xfc   :  { %12939 = vmatprep.subr.mxu0 %v22009_v0  ;;  %12957 = vmatpush3.msra.mxu1 %v16399_v10 }
  0xfd   :  { %12940 = vmatpush3.msra.mxu0 %v16408_v11  ;;  %12958 = vmatprep.subr.mxu1 %v22009_v0 }
  0xfe   :  { %12941 = vmatprep.subr.mxu0 %v22009_v0  ;;  %12959 = vmatpush3.msra.mxu1 %v16413_v12 }
  0xff   :  { %12942 = vmatpush3.msra.mxu0 %v16422_v13  ;;  %12960 = vmatprep.subr.mxu1 %v22009_v0 }
 0x100   :  { %12943 = vmatprep.subr.mxu0 %v22009_v0  ;;  %12961 = vmatpush3.msra.mxu1 %v16427_v14 }
 0x101   :  { %12944 = vmatpush3.msra.mxu0 %v16436_v15  ;;  %12945 = vmatprep.mubr.msk.f32.mxu0 %vm16152_vm0, %v22009_v0 }
 0x102   :  { %12962 = vmatprep.subr.mxu1 %v22009_v0  ;;  %12946 = vmatmul.mubr.msk.f32.vlgmr.msra.gmra.mxu0 %vm217_vm1, %v10888_v36 }
 0x103   :  { %12963 = vmatpush3.msra.mxu1 %v16441_v16  ;;  %12967 = vmatprep.subr.mxu0 %v22009_v0 }
 0x104   :  { %12964 = vmatprep.mubr.msk.f32.mxu1 %vm16152_vm0, %v22009_v0  ;;  %12968 = vmatpush3.msra.mxu0 %v16460_v19 }
 0x105   :  { %12986 = vmatprep.subr.mxu1 %v22009_v0  ;;  %12965 = vmatmul.mubr.msk.f32.vlgmr.msra.gmra.mxu1 %vm217_vm1, %v10889_v37 }
 0x106   :  { %12969 = vmatprep.subr.mxu0 %v22009_v0  ;;  %12987 = vmatpush3.msra.mxu1 %v16342_v1 }
 0x107   :  { %12970 = vmatpush3.msra.mxu0 %v16469_v20  ;;  %12988 = vmatprep.subr.mxu1 %v22009_v0 }
 0x108   :  { %12971 = vmatprep.subr.mxu0 %v22009_v0  ;;  %12989 = vmatpush3.msra.mxu1 %v16352_v3 }
 0x109   :  { %12972 = vmatpush3.msra.mxu0 %v16478_v21  ;;  %12990 = vmatprep.subr.mxu1 %v22009_v0 }
 0x10a   :  { %12973 = vmatprep.subr.mxu0 %v22009_v0  ;;  %12991 = vmatpush3.msra.mxu1 %v16366_v5 }
 0x10b   :  { %12974 = vmatpush3.msra.mxu0 %v16487_v22  ;;  %12992 = vmatprep.subr.mxu1 %v22009_v0 }
 0x10c   :  { %12975 = vmatprep.subr.mxu0 %v22009_v0  ;;  %12993 = vmatpush3.msra.mxu1 %v16380_v7 }
 0x10d   :  { %12976 = vmatpush3.msra.mxu0 %v16496_v23  ;;  %12994 = vmatprep.subr.mxu1 %v22009_v0 }
 0x10e   :  { %12977 = vmatprep.subr.mxu0 %v22009_v0  ;;  %12995 = vmatpush3.msra.mxu1 %v16394_v9 }
 0x10f   :  { %12978 = vmatpush3.msra.mxu0 %v16505_v24  ;;  %12996 = vmatprep.subr.mxu1 %v22009_v0 }
 0x110   :  { %12979 = vmatprep.subr.mxu0 %v22009_v0  ;;  %12997 = vmatpush3.msra.mxu1 %v16408_v11 }
 0x111   :  { %12980 = vmatpush3.msra.mxu0 %v16514_v25  ;;  %12998 = vmatprep.subr.mxu1 %v22009_v0 }
 0x112   :  { %12981 = vmatprep.subr.mxu0 %v22009_v0  ;;  %12999 = vmatpush3.msra.mxu1 %v16422_v13 }
 0x113   :  { %12982 = vmatpush3.msra.mxu0 %v16526_v27  ;;  %12983 = vmatprep.mubr.msk.f32.mxu0 %vm16152_vm0, %v22009_v0 }
 0x114   :  { %13000 = vmatprep.subr.mxu1 %v22009_v0  ;;  %12984 = vmatmul.mubr.msk.f32.vlgmr.msra.gmra.mxu0 %vm217_vm1, %v10888_v36 }
 0x115   :  { %13001 = vmatpush3.msra.mxu1 %v16436_v15  ;;  %13005 = vmatprep.subr.mxu0 %v22009_v0 }
 0x116   :  { %13002 = vmatprep.mubr.msk.f32.mxu1 %vm16152_vm0, %v22009_v0  ;;  %13006 = vmatpush3.msra.mxu0 %v16347_v2 }
 0x117   :  { %13024 = vmatprep.subr.mxu1 %v22009_v0  ;;  %13003 = vmatmul.mubr.msk.f32.vlgmr.msra.gmra.mxu1 %vm217_vm1, %v10890_v38 }
 0x118   :  { %13007 = vmatprep.subr.mxu0 %v22009_v0  ;;  %13025 = vmatpush3.msra.mxu1 %v16460_v19 }
 0x119   :  { %13008 = vmatpush3.msra.mxu0 %v16359_v4  ;;  %13026 = vmatprep.subr.mxu1 %v22009_v0 }
 0x11a   :  { %13009 = vmatprep.subr.mxu0 %v22009_v0  ;;  %13027 = vmatpush3.msra.mxu1 %v16469_v20 }
 0x11b   :  { %13010 = vmatpush3.msra.mxu0 %v16371_v6  ;;  %13028 = vmatprep.subr.mxu1 %v22009_v0 }
 0x11c   :  { %13011 = vmatprep.subr.mxu0 %v22009_v0  ;;  %13029 = vmatpush3.msra.mxu1 %v16478_v21 }
 0x11d   :  { %13012 = vmatpush3.msra.mxu0 %v16385_v8  ;;  %13030 = vmatprep.subr.mxu1 %v22009_v0 }
 0x11e   :  { %13013 = vmatprep.subr.mxu0 %v22009_v0  ;;  %13031 = vmatpush3.msra.mxu1 %v16487_v22 }
 0x11f   :  { %13014 = vmatpush3.msra.mxu0 %v16399_v10  ;;  %13032 = vmatprep.subr.mxu1 %v22009_v0 }
 0x120   :  { %13015 = vmatprep.subr.mxu0 %v22009_v0  ;;  %13033 = vmatpush3.msra.mxu1 %v16496_v23 }
 0x121   :  { %13016 = vmatpush3.msra.mxu0 %v16413_v12  ;;  %13034 = vmatprep.subr.mxu1 %v22009_v0 }
 0x122   :  { %13017 = vmatprep.subr.mxu0 %v22009_v0  ;;  %13035 = vmatpush3.msra.mxu1 %v16505_v24 }
 0x123   :  { %13018 = vmatpush3.msra.mxu0 %v16427_v14  ;;  %13036 = vmatprep.subr.mxu1 %v22009_v0 }
 0x124   :  { %13019 = vmatprep.subr.mxu0 %v22009_v0  ;;  %13037 = vmatpush3.msra.mxu1 %v16514_v25 }
 0x125   :  { %13020 = vmatpush3.msra.mxu0 %v16441_v16  ;;  %13021 = vmatprep.mubr.msk.f32.mxu0 %vm16152_vm0, %v22009_v0 }
 0x126   :  { %13038 = vmatprep.subr.mxu1 %v22009_v0  ;;  %13022 = vmatmul.mubr.msk.f32.vlgmr.msra.gmra.mxu0 %vm217_vm1, %v10891_v39 }
 0x127   :  { %13039 = vmatpush3.msra.mxu1 %v16526_v27  ;;  %13040 = vmatprep.mubr.msk.f32.mxu1 %vm16152_vm0, %v22009_v0 }
 0x128   :  { %13043 = vmatprep.subr.mxu0 %v22009_v0  ;;  %13041 = vmatmul.mubr.msk.f32.vlgmr.msra.gmra.mxu1 %vm217_vm1, %v10890_v38 }
 0x129   :  { %13044 = vmatpush3.msra.mxu0 %v16342_v1  ;;  %13059 = vmatprep.mubr.msk.f32.mxu0 %vm16152_vm0, %v22009_v0 }
 0x12a   :  { %13045 = vmatprep.subr.mxu0 %v22009_v0  ;;  %13062 = vmatprep.subr.mxu1 %v22009_v0 }
 0x12b   :  { %13046 = vmatpush3.msra.mxu0 %v16352_v3  ;;  %13078 = vmatprep.mubr.msk.f32.mxu1 %vm16152_vm0, %v22009_v0 }
 0x12c   :  { %13047 = vmatprep.subr.mxu0 %v22009_v0 }
 0x12d   :  { %13048 = vmatpush3.msra.mxu0 %v16366_v5 }
 0x12e   :  { %13049 = vmatprep.subr.mxu0 %v22009_v0 }
 0x12f   :  { %13050 = vmatpush3.msra.mxu0 %v16380_v7 }
 0x130   :  { %13051 = vmatprep.subr.mxu0 %v22009_v0 }
 0x131   :  { %13052 = vmatpush3.msra.mxu0 %v16394_v9 }
 0x132   :  { %13053 = vmatprep.subr.mxu0 %v22009_v0 }
 0x133   :  { %13054 = vmatpush3.msra.mxu0 %v16408_v11  ;;  %v287_v40 = vpop.f32.mrf.mxu0 }
 0x134   :  { %13055 = vmatprep.subr.mxu0 %v22009_v0  ;;  %v360_v42 = vpop.f32.mrf.mxu1 }
 0x135   :  { %13056 = vmatpush3.msra.mxu0 %v16422_v13  ;;  %v16939_v43 = vadd.f32 %v360_v42, %v287_v40  ;;  %v12643_v44 = vpop.f32.mrf.mxu0 }
 0x136   :  { %13057 = vmatprep.subr.mxu0 %v22009_v0  ;;  %v12662_v45 = vpop.f32.mrf.mxu1 }
 0x137   :  { %13058 = vmatpush3.msra.mxu0 %v16436_v15  ;;  %v1883_v33 = vmul.f32 %v16939_v43, %v16939_v43 }
 0x138   :  { %13060 = vmatmul.mubr.msk.f32.vlgmr.msra.gmra.mxu0 %vm217_vm1, %v10892_v41  ;;  %13081 = vmatprep.subr.mxu0 %v22009_v0 }
 0x139   :  { %13097 = vmatprep.mubr.msk.f32.mxu0 %vm16152_vm0, %v22009_v0 }
 0x144   :  { %v433_v46 = vpop.f32.mrf.mxu0 }
 0x146   :  { %v503_v47 = vpop.f32.mrf.mxu1  ;;  %v12681_v48 = vpop.f32.mrf.mxu0 }
 0x147   :  { %v504_v49 = vadd.f32 %v503_v47, %v433_v46 }
 0x148   :  { %v12700_v50 = vpop.f32.mrf.mxu1 }
 0x156   :  { %v576_v51 = vpop.f32.mrf.mxu0 }
 0x157   :  { %v16946_v52 = vadd.f32 %v576_v51, %v504_v49 }
 0x158   :  { %v12719_v53 = vpop.f32.mrf.mxu0 }
 0x159   :  { %v650_v54 = vpop.f32.mrf.mxu1  ;;  %v1884_v31 = vadd.f32 %v16946_v52, %v16939_v43  ;;  %v1885_v32 = vmul.f32 %v16946_v52, %v16946_v52 }
 0x15b   :  { %v12738_v55 = vpop.f32.mrf.mxu1  ;;  %v1886_v38 = vadd.f32 %v1885_v32, %v1883_v33 }
 0x168   :  { %v720_v56 = vpop.f32.mrf.mxu0 }
 0x169   :  { %v721_v57 = vadd.f32 %v720_v56, %v650_v54 }
 0x16a   :  { %v12757_v58 = vpop.f32.mrf.mxu0 }
 0x16b   :  { %v793_v59 = vpop.f32.mrf.mxu1 }
 0x16c   :  { %v16948_v60 = vadd.f32 %v793_v59, %v721_v57 }
 0x16d   :  { %v12776_v61 = vpop.f32.mrf.mxu1 }
 0x16e   :  { %v1887_v34 = vadd.f32 %v1884_v31, %v16948_v60  ;;  %v1888_v35 = vmul.f32 %v16948_v60, %v16948_v60 }
 0x170   :  { %v1889_v42 = vadd.f32 %v1888_v35, %v1886_v38 }
 0x17a   :  { %v867_v62 = vpop.f32.mrf.mxu0 }
 0x17c   :  { %v937_v63 = vpop.f32.mrf.mxu1  ;;  %v12795_v1 = vpop.f32.mrf.mxu0 }
 0x17d   :  { %v938_v2 = vadd.f32 %v937_v63, %v867_v62 }
 0x17e   :  { %v12814_v3 = vpop.f32.mrf.mxu1 }
 0x18c   :  { %v1010_v4 = vpop.f32.mrf.mxu0 }
 0x18d   :  { %v16950_v5 = vadd.f32 %v1010_v4, %v938_v2 }
 0x18e   :  { %v12833_v6 = vpop.f32.mrf.mxu0 }
 0x18f   :  { %v1084_v7 = vpop.f32.mrf.mxu1  ;;  %v1890_v39 = vadd.f32 %v1887_v34, %v16950_v5  ;;  %v1891_v40 = vmul.f32 %v16950_v5, %v16950_v5 }
 0x191   :  { %v12852_v8 = vpop.f32.mrf.mxu1  ;;  %v1892_v47 = vadd.f32 %v1891_v40, %v1889_v42 }
 0x19e   :  { %v1154_v9 = vpop.f32.mrf.mxu0 }
 0x19f   :  { %v1155_v10 = vadd.f32 %v1154_v9, %v1084_v7 }
 0x1a0   :  { %v12871_v11 = vpop.f32.mrf.mxu0 }
 0x1a1   :  { %v1227_v12 = vpop.f32.mrf.mxu1 }
 0x1a2   :  { %v16952_v13 = vadd.f32 %v1227_v12, %v1155_v10 }
 0x1a3   :  { %v12890_v14 = vpop.f32.mrf.mxu1 }
 0x1a4   :  { %v1893_v44 = vadd.f32 %v1890_v39, %v16952_v13  ;;  %v1894_v45 = vmul.f32 %v16952_v13, %v16952_v13 }
 0x1a6   :  { %v1895_v53 = vadd.f32 %v1894_v45, %v1892_v47 }
 0x1b0   :  { %v1301_v15 = vpop.f32.mrf.mxu0 }
 0x1b2   :  { %v1371_v16 = vpop.f32.mrf.mxu1  ;;  %v12909_v17 = vpop.f32.mrf.mxu0 }
 0x1b3   :  { %v1372_v36 = vadd.f32 %v1371_v16, %v1301_v15 }
 0x1b4   :  { %v12928_v18 = vpop.f32.mrf.mxu1 }
 0x1c2   :  { %v1444_v19 = vpop.f32.mrf.mxu0 }
 0x1c3   :  { %v16966_v41 = vadd.f32 %v1444_v19, %v1372_v36 }
 0x1c4   :  { %v12947_v20 = vpop.f32.mrf.mxu0 }
 0x1c5   :  { %v1518_v21 = vpop.f32.mrf.mxu1  ;;  %v1896_v48 = vadd.f32 %v1893_v44, %v16966_v41  ;;  %v1897_v49 = vmul.f32 %v16966_v41, %v16966_v41 }
 0x1c7   :  { %v12966_v22 = vpop.f32.mrf.mxu1  ;;  %v1898_v58 = vadd.f32 %v1897_v49, %v1895_v53 }
 0x1d4   :  { %v1588_v23 = vpop.f32.mrf.mxu0 }
 0x1d5   :  { %v1589_v37 = vadd.f32 %v1588_v23, %v1518_v21 }
 0x1d6   :  { %v12985_v24 = vpop.f32.mrf.mxu0 }
 0x1d7   :  { %v1661_v25 = vpop.f32.mrf.mxu1 }
 0x1d8   :  { %v16971_v46 = vadd.f32 %v1661_v25, %v1589_v37 }
 0x1d9   :  { %v13004_v26 = vpop.f32.mrf.mxu1 }
 0x1da   :  { %v1899_v54 = vadd.f32 %v1896_v48, %v16971_v46  ;;  %v1900_v55 = vmul.f32 %v16971_v46, %v16971_v46 }
 0x1dc   :  { %v1901_v62 = vadd.f32 %v1900_v55, %v1898_v58 }
 0x1e6   :  { %v1735_v27 = vpop.f32.mrf.mxu0 }
 0x1e8   :  { %v1805_v28 = vpop.f32.mrf.mxu1  ;;  %v13023_v29 = vpop.f32.mrf.mxu0 }
 0x1e9   :  { %v1806_v50 = vadd.f32 %v1805_v28, %v1735_v27 }
 0x1ea   :  { %v13042_v30 = vpop.f32.mrf.mxu1 }
 0x1f8   :  { %v1878_v51 = vpop.f32.mrf.mxu0 }
 0x1f9   :  { %v16979_v56 = vadd.f32 %v1878_v51, %v1806_v50 }
 0x1fa   :  { %v13061_v57 = vpop.f32.mrf.mxu0 }
 0x1fb   :  { %v1902_v59 = vadd.f32 %v1899_v54, %v16979_v56  ;;  %v1903_v61 = vmul.f32 %v16979_v56, %v16979_v56  ;;  %v1991_v54 = vlaneseq  ;;  %v1983_v57 = vld [vmem:[%s22055_s5] sm:$0x1]  ;;  %s22057_s5 = sld [smem:[#allocation50_spill]] }
 0x1fd   :  { %1915 = vrot.lane.b32.xlu1 %v1902_v59, %s16153_s8  ;;  %1906 = vrot.lane.b32.xlu0 %v1902_v59, %s16154_s2  ;;  %v1904_v63 = vadd.f32 %v1903_v61, %v1901_v62  ;;  %v1992_v55 = vshrl.u32 %v1991_v54, 7  ;;  %v1987_v62 = vld [vmem:[#allocation2] sm:$0x1] }
 0x1ff   :  { %v17003_v58 = vsub.s32 0, %v1992_v55 }
 0x201   :  { %1919 = vrot.lane.b32.xlu1 %v1904_v63, %s16153_s8  ;;  %1923 = vrot.lane.b32.xlu0 %v1902_v59, %s21985_s7 }
 0x205   :  { %1927 = vrot.lane.b32.xlu1 %v1904_v63, %s21985_s7  ;;  %1931 = vrot.lane.b32.xlu0 %v1902_v59, %s16156_s1  ;;  %s22064_s7 = smov 8  }
 0x209   :  { %1935 = vrot.lane.b32.xlu1 %v1904_v63, %s16156_s1  ;;  %1911 = vrot.lane.b32.xlu0 %v1904_v63, %s16154_s2 }
 0x20d   :  { %1943 = vrot.lane.b32.xlu1 %v1904_v63, %s21983_s21  ;;  %1939 = vrot.lane.b32.xlu0 %v1902_v59, %s21983_s21  ;;  %s21991_s21 = smov 56  }
 0x211   :  { %1951 = vrot.lane.b32.xlu1 %v1904_v63, %s16158_s12  ;;  %1947 = vrot.lane.b32.xlu0 %v1902_v59, %s16158_s12 }
 0x215   :  { %1959 = vrot.lane.b32.xlu1 %v1904_v63, %s21981_s4  ;;  %1955 = vrot.lane.b32.xlu0 %v1902_v59, %s21981_s4 }
 0x26f   :  { %v1916_v1 = vpop.permute.xlu1 %1915  ;;  %v1907_v2 = vpop.permute.xlu0 %1906 }
 0x270   :  { %v1909_v8 = vadd.f32 %v1907_v2, %v1902_v59 }
 0x272   :  { %v1918_v11 = vadd.f32 %v1916_v1, %v1909_v8  ;;  %v17036_v8 = vld [vmem:[%s22056_s29 + $0x70] sm:$0xff] }
 0x273   :  { %v1920_v3 = vpop.permute.xlu1 %1919  ;;  %v1924_v4 = vpop.permute.xlu0 %1923 }
 0x274   :  { %v1926_v17 = vadd.f32 %v1924_v4, %v1918_v11  ;;  %v17019_v4 = vld [vmem:[%s22056_s29 + $0xb8] sm:$0xff]  ;;  %v17063_v11 = vld [vmem:[%s22056_s29 + $0xa0] sm:$0xff] }
 0x275   :  { %13063 = vmatpush3.msra.mxu1 %v17019_v4 }
 0x276   :  { %13064 = vmatprep.subr.mxu1 %v22009_v0 }
 0x277   :  { %v1928_v6 = vpop.permute.xlu1 %1927  ;;  %v1932_v7 = vpop.permute.xlu0 %1931 }
 0x278   :  { %v1934_v19 = vadd.f32 %v1932_v7, %v1926_v17  ;;  %v17031_v7 = vld [vmem:[%s22056_s29 + $0xb0] sm:$0xff] }
 0x279   :  { %13065 = vmatpush3.msra.mxu1 %v17031_v7  ;;  %v17098_v17 = vld [vmem:[%s22056_s29 + $0x50] sm:$0xff] }
 0x27a   :  { %13066 = vmatprep.subr.mxu1 %v22009_v0 }
 0x27b   :  { %v1936_v9 = vpop.permute.xlu1 %1935  ;;  %v1912_v10 = vpop.permute.xlu0 %1911 }
 0x27c   :  { %v1914_v12 = vadd.f32 %v1912_v10, %v1904_v63  ;;  %v17052_v10 = vld [vmem:[%s22056_s29 + $0x68] sm:$0xff] }
 0x27e   :  { %v1922_v14 = vadd.f32 %v1920_v3, %v1914_v12  ;;  %v17068_v12 = vld [vmem:[%s22056_s29 + $0x60] sm:$0xff] }
 0x27f   :  { %v1944_v15 = vpop.permute.xlu1 %1943  ;;  %v1940_v16 = vpop.permute.xlu0 %1939 }
 0x280   :  { %v1930_v18 = vadd.f32 %v1928_v6, %v1922_v14  ;;  %v1942_v24 = vadd.f32 %v1940_v16, %v1934_v19  ;;  %v17024_v6 = vld [vmem:[%s22056_s29 + $0x78] sm:$0xff]  ;;  %v17093_v16 = vld [vmem:[%s22056_s29 + $0x90] sm:$0xff]  ;;  %v17114_v19 = vld [vmem:[%s22056_s29 + $0x48] sm:$0xff] }
 0x281   :  { %13082 = vmatpush3.msra.mxu0 %v17024_v6  ;;  %v17077_v14 = vld [vmem:[%s22056_s29 + $0x98] sm:$0xff] }
 0x282   :  { %v1938_v20 = vadd.f32 %v1936_v9, %v1930_v18  ;;  %13083 = vmatprep.subr.mxu0 %v22009_v0  ;;  %v17047_v9 = vld [vmem:[%s22056_s29 + $0xa8] sm:$0xff] }
 0x283   :  { %v1952_v21 = vpop.permute.xlu1 %1951  ;;  %v1948_v22 = vpop.permute.xlu0 %1947  ;;  %13084 = vmatpush3.msra.mxu0 %v17036_v8  ;;  %13067 = vmatpush3.msra.mxu1 %v17047_v9  ;;  %v17109_v18 = vld [vmem:[%s22056_s29 + $0x88] sm:$0xff] }
 0x284   :  { %v1946_v23 = vadd.f32 %v1944_v15, %v1938_v20  ;;  %v1950_v26 = vadd.f32 %v1948_v22, %v1942_v24  ;;  %13085 = vmatprep.subr.mxu0 %v22009_v0  ;;  %13068 = vmatprep.subr.mxu1 %v22009_v0  ;;  %v17082_v15 = vld [vmem:[%s22056_s29 + $0x58] sm:$0xff]  ;;  %v17123_v20 = vld [vmem:[%s22056_s29 + $0x80] sm:$0xff] }
 0x285   :  { %13086 = vmatpush3.msra.mxu0 %v17052_v10  ;;  %13069 = vmatpush3.msra.mxu1 %v17063_v11 }
 0x286   :  { %v1954_v25 = vadd.f32 %v1952_v21, %v1946_v23  ;;  %13087 = vmatprep.subr.mxu0 %v22009_v0  ;;  %13070 = vmatprep.subr.mxu1 %v22009_v0  ;;  %v17128_v21 = vld [vmem:[%s22056_s29 + $0x40] sm:$0xff] }
 0x287   :  { %v1960_v27 = vpop.permute.xlu1 %1959  ;;  %v1956_v28 = vpop.permute.xlu0 %1955  ;;  %13088 = vmatpush3.msra.mxu0 %v17068_v12  ;;  %13071 = vmatpush3.msra.mxu1 %v17077_v14 }
 0x288   :  { %v1962_v29 = vadd.f32 %v1960_v27, %v1954_v25  ;;  %v1958_v30 = vadd.f32 %v1956_v28, %v1950_v26  ;;  %13089 = vmatprep.subr.mxu0 %v22009_v0  ;;  %13072 = vmatprep.subr.mxu1 %v22009_v0 }
 0x289   :  { %13090 = vmatpush3.msra.mxu0 %v17082_v15  ;;  %13073 = vmatpush3.msra.mxu1 %v17093_v16 }
 0x28a   :  { %v1971_v31 = vsel %vm1963_vm2, %v1962_v29, 0.0  ;;  %v1964_v32 = vsel %vm1963_vm2, %v1958_v30, 0.0  ;;  %13091 = vmatprep.subr.mxu0 %v22009_v0  ;;  %13074 = vmatprep.subr.mxu1 %v22009_v0 }
 0x28b   :  { %v1972_v33 = vrot.slane %v1971_v31, 4  ;;  %v1965_v34 = vrot.slane %v1964_v32, 4  ;;  %13092 = vmatpush3.msra.mxu0 %v17098_v17  ;;  %13075 = vmatpush3.msra.mxu1 %v17109_v18 }
 0x28c   :  { %13093 = vmatprep.subr.mxu0 %v22009_v0  ;;  %13076 = vmatprep.subr.mxu1 %v22009_v0 }
 0x28d   :  { %v1973_v35 = vadd.f32 %v1972_v33, %v1971_v31  ;;  %v1966_v36 = vadd.f32 %v1965_v34, %v1964_v32  ;;  %13094 = vmatpush3.msra.mxu0 %v17114_v19  ;;  %13077 = vmatpush3.msra.mxu1 %v17123_v20 }
 0x28e   :  { %13095 = vmatprep.subr.mxu0 %v22009_v0  ;;  %13100 = vmatprep.subr.mxu1 %v22009_v0 }
 0x28f   :  { %v1974_v37 = vrot.slane %v1973_v35, 2  ;;  %v1967_v38 = vrot.slane %v1966_v36, 2  ;;  %13096 = vmatpush3.msra.mxu0 %v17128_v21 }
 0x290   :  { %13119 = vmatprep.subr.mxu0 %v22009_v0 }
 0x291   :  { %v1975_v39 = vadd.f32 %v1974_v37, %v1973_v35  ;;  %v1968_v40 = vadd.f32 %v1967_v38, %v1966_v36 }
 0x293   :  { %v1976_v42 = vrot.slane %v1975_v39, 1  ;;  %v1969_v44 = vrot.slane %v1968_v40, 1 }
 0x295   :  { %v1977_v45 = vadd.f32 %v1976_v42, %v1975_v39  ;;  %v1970_v47 = vadd.f32 %v1969_v44, %v1968_v40 }
 0x297   :  { %v1979_v48 = vmul.f32 0.0078125, %v1970_v47  ;;  %v1980_v49 = vmul.f32 0.0078125, %v1977_v45 }
 0x299   :  { %v1981_v50 = vmul.f32 %v1979_v48, %v1979_v48 }
 0x29b   :  { %v1982_v51 = vsub.f32 %v1980_v49, %v1981_v50 }
 0x29d   :  { %v1984_v53 = vadd.f32 1e-05, %v1982_v51 }
 0x29f   :  { %15795 = vrsqrt.f32 %v1984_v53 }
 0x2ac   :  { %v15796_v59 = vpop.eup %15795 }
 0x2ad   :  { %v17005_v61 = vmul.f32 %v15796_v59, %v1983_v57 }
 0x2af   :  { %v1988_v63 = vmul.f32 %v17005_v61, %v1979_v48  ;;  %v1994_v1 = vrot.slane %v17005_v61, %v17003_v58 }
 0x2b1   :  { %v17010_v2 = vsub.f32 %v1987_v62, %v1988_v63  ;;  %1998 = vrot.lane.b32.xlu1 %v1994_v1, %s16160_s10  ;;  %1995 = vrot.lane.b32.xlu0 %v1994_v1, %s21989_s30 }
 0x2b3   :  { %v2034_v3 = vrot.slane %v17010_v2, %v17003_v58 }
 0x2b5   :  { %2001 = vrot.lane.b32.xlu0 %v1994_v1, %s21987_s6  ;;  %2035 = vrot.lane.b32.xlu1 %v2034_v3, %s21989_s30 }
 0x2b9   :  { %2004 = vrot.lane.b32.xlu0 %v1994_v1, %s16162_s11  ;;  %2038 = vrot.lane.b32.xlu1 %v2034_v3, %s16160_s10 }
 0x2bd   :  { %2007 = vrot.lane.b32.xlu0 %v1994_v1, %s21993_s0  ;;  %2041 = vrot.lane.b32.xlu1 %v2034_v3, %s21987_s6  ;;  %s22062_s6 = smov 88  }
 0x2c1   :  { %2010 = vrot.lane.b32.xlu0 %v1994_v1, %s16164_s3  ;;  %2044 = vrot.lane.b32.xlu1 %v2034_v3, %s16162_s11 }
 0x2c5   :  { %2013 = vrot.lane.b32.xlu0 %v1994_v1, %s21991_s21  ;;  %2047 = vrot.lane.b32.xlu1 %v2034_v3, %s21993_s0 }
 0x2c9   :  { %2050 = vrot.lane.b32.xlu0 %v2034_v3, %s16164_s3  ;;  %2053 = vrot.lane.b32.xlu1 %v2034_v3, %s21991_s21  ;;  %s22060_s21 = sld [smem:[#allocation43_spill]] }
 0x323   :  { %v1999_v22 = vpop.permute.xlu1 %1998  ;;  %v1996_v23 = vpop.permute.xlu0 %1995 }
 0x324   :  { %v2017_v30 = vsel %vm2016_vm3, %v17005_v61, %v1996_v23  ;;  %v17188_v23 = vld [vmem:[%s22056_s29 + $0x30] sm:$0xff] }
 0x325   :  { %v2019_v31 = vsel %vm2018_vm4, %v2017_v30, %v1999_v22 }
 0x327   :  { %v2002_v24 = vpop.permute.xlu0 %2001  ;;  %v2036_v25 = vpop.permute.xlu1 %2035 }
 0x328   :  { %v2021_v34 = vsel %vm2020_vm5, %v2019_v31, %v2002_v24  ;;  %v2056_v37 = vsel %vm2016_vm3, %v17010_v2, %v2036_v25  ;;  %v17197_v24 = vld [vmem:[%s22056_s29 + $0x28] sm:$0xff]  ;;  %v17206_v25 = vld [vmem:[%s22056_s29 + $0x20] sm:$0xff] }
 0x329   :  { %v17247_v31 = vld [vmem:[%s22056_s29] sm:$0xff] }
 0x32b   :  { %v2005_v26 = vpop.permute.xlu0 %2004  ;;  %v2039_v27 = vpop.permute.xlu1 %2038 }
 0x32c   :  { %v2023_v35 = vsel %vm2022_vm6, %v2021_v34, %v2005_v26  ;;  %v2057_v42 = vsel %vm2018_vm4, %v2056_v37, %v2039_v27  ;;  %v17215_v26 = vld [vmem:[%s22056_s29 + $0x18] sm:$0xff] }
 0x32f   :  { %v2008_v28 = vpop.permute.xlu0 %2007  ;;  %v2042_v29 = vpop.permute.xlu1 %2041 }
 0x330   :  { %v2025_v36 = vsel %vm2024_vm7, %v2023_v35, %v2008_v28  ;;  %v2058_v45 = vsel %vm2020_vm5, %v2057_v42, %v2042_v29  ;;  %v17226_v28 = vld [vmem:[%s22056_s29 + $0x10] sm:$0xff] }
 0x333   :  { %v2011_v32 = vpop.permute.xlu0 %2010  ;;  %v2045_v33 = vpop.permute.xlu1 %2044 }
 0x334   :  { %v2027_v38 = vsel %vm2026_vm8, %v2025_v36, %v2011_v32  ;;  %v2059_v47 = vsel %vm2022_vm6, %v2058_v45, %v2045_v33 }
 0x337   :  { %v2014_v39 = vpop.permute.xlu0 %2013  ;;  %v2048_v40 = vpop.permute.xlu1 %2047 }
 0x338   :  { %v2029_v44 = vsel %vm2028_vm9, %v2027_v38, %v2014_v39  ;;  %v2060_v49 = vsel %vm2024_vm7, %v2059_v47, %v2048_v40 }
 0x339   :  { %v17154_v48 = vrot.slane %v2029_v44, %v17003_v58 }
 0x33b   :  { %v2051_v50 = vpop.permute.xlu0 %2050  ;;  %v2054_v51 = vpop.permute.xlu1 %2053  ;;  %v2076_v57 = vmul.f32 %v17154_v48, %v16946_v52  ;;  %v2067_v59 = vmul.f32 %v17154_v48, %v16939_v43  ;;  %v2101_v61 = vmul.f32 %v17154_v48, %v16971_v46  ;;  %v2106_v62 = vmul.f32 %v17154_v48, %v16979_v56  ;;  %v17181_v46 = vld [vmem:[%s22056_s29 + $0x38] sm:$0xff] }
 0x33c   :  { %v2061_v53 = vsel %vm2026_vm8, %v2060_v49, %v2051_v50  ;;  %v2081_v27 = vmul.f32 %v17154_v48, %v16948_v60  ;;  %v17236_v60 = vld [vmem:[%s22056_s29 + $0x8] sm:$0xff]  ;;  %v2086_v33 = vmul.f32 %v17154_v48, %v16950_v5  ;;  %v2091_v34 = vmul.f32 %v17154_v48, %v16952_v13  ;;  %s22059_s29 = sld [smem:[#allocation54_spill]] }
 0x33d   :  { %v2062_v54 = vsel %vm2028_vm9, %v2061_v53, %v2054_v51  ;;  %v2096_v39 = vmul.f32 %v17154_v48, %v16966_v41 }
 0x33e   :  { %v17160_v55 = vrot.slane %v2062_v54, %v17003_v58 }
 0x340   :  { %v2077_v63 = vadd.f32 %v2076_v57, %v17160_v55  ;;  %v2072_v1 = vadd.f32 %v17160_v55, %v2067_v59  ;;  %v17173_v2 = vadd.f32 %v2101_v61, %v17160_v55  ;;  %v17176_v3 = vadd.f32 %v2106_v62, %v17160_v55 }
 0x341   :  { %v2082_v29 = vadd.f32 %v2081_v27, %v17160_v55  ;;  %v2087_v35 = vadd.f32 %v2086_v33, %v17160_v55  ;;  %v2092_v36 = vadd.f32 %v2091_v34, %v17160_v55  ;;  %v2097_v40 = vadd.f32 %v2096_v39, %v17160_v55 }
 0x342   :  { %vm2078_vm10 = vcmp.gt.f32.partialorder %v2077_v63, 0.0  ;;  %v2079_v52 = vmul.f32 0.01, %v2077_v63  ;;  %vm2073_vm11 = vcmp.gt.f32.partialorder %v2072_v1, 0.0  ;;  %v2074_v43 = vmul.f32 0.01, %v2072_v1 }
 0x343   :  { %v2084_v30 = vmul.f32 0.01, %v2082_v29  ;;  %vm2083_vm12 = vcmp.gt.f32.partialorder %v2082_v29, 0.0  ;;  %v2089_v5 = vmul.f32 0.01, %v2087_v35  ;;  %vm2088_vm13 = vcmp.gt.f32.partialorder %v2087_v35, 0.0 }
 0x344   :  { %v2080_v56 = vsel %vm2078_vm10, %v2077_v63, %v2079_v52  ;;  %v2075_v22 = vsel %vm2073_vm11, %v2072_v1, %v2074_v43  ;;  %v2094_v13 = vmul.f32 0.01, %v2092_v36  ;;  %vm2093_vm14 = vcmp.gt.f32.partialorder %v2092_v36, 0.0 }
 0x345   :  { %13079 = vmatmul.mubr.msk.f32.vlgmr.msra.gmra.mxu1 %vm217_vm1, %v2080_v56  ;;  %13098 = vmatmul.mubr.msk.f32.vlgmr.msra.gmra.mxu0 %vm217_vm1, %v2075_v22  ;;  %v2085_v32 = vsel %vm2083_vm12, %v2082_v29, %v2084_v30  ;;  %v2090_v37 = vsel %vm2088_vm13, %v2087_v35, %v2089_v5  ;;  %v2099_v41 = vmul.f32 0.01, %v2097_v40  ;;  %vm2098_vm15 = vcmp.gt.f32.partialorder %v2097_v40, 0.0 }
 0x346   :  { %13101 = vmatpush3.msra.mxu1 %v17024_v6  ;;  %13120 = vmatpush3.msra.mxu0 %v17181_v46  ;;  %v2095_v38 = vsel %vm2093_vm14, %v2092_v36, %v2094_v13  ;;  %vm2103_vm10 = vcmp.gt.f32.partialorder %v17173_v2, 0.0  ;;  %vm2108_vm11 = vcmp.gt.f32.partialorder %v17176_v3, 0.0  ;;  %vm2970_vm12 = vcmask 123904  }
 0x347   :  { %13102 = vmatprep.subr.mxu1 %v22009_v0  ;;  %13121 = vmatprep.subr.mxu0 %v22009_v0  ;;  %v2100_v42 = vsel %vm2098_vm15, %v2097_v40, %v2099_v41 }
 0x348   :  { %13103 = vmatpush3.msra.mxu1 %v17036_v8  ;;  %13122 = vmatpush3.msra.mxu0 %v17188_v23 }
 0x349   :  { %13104 = vmatprep.subr.mxu1 %v22009_v0  ;;  %13123 = vmatprep.subr.mxu0 %v22009_v0 }
 0x34a   :  { %13105 = vmatpush3.msra.mxu1 %v17052_v10  ;;  %13124 = vmatpush3.msra.mxu0 %v17197_v24 }
 0x34b   :  { %13106 = vmatprep.subr.mxu1 %v22009_v0  ;;  %13125 = vmatprep.subr.mxu0 %v22009_v0 }
 0x34c   :  { %13107 = vmatpush3.msra.mxu1 %v17068_v12  ;;  %13126 = vmatpush3.msra.mxu0 %v17206_v25 }
 0x34d   :  { %13108 = vmatprep.subr.mxu1 %v22009_v0  ;;  %13127 = vmatprep.subr.mxu0 %v22009_v0 }
 0x34e   :  { %13109 = vmatpush3.msra.mxu1 %v17082_v15  ;;  %13128 = vmatpush3.msra.mxu0 %v17215_v26 }
 0x34f   :  { %13110 = vmatprep.subr.mxu1 %v22009_v0  ;;  %13129 = vmatprep.subr.mxu0 %v22009_v0 }
 0x350   :  { %13111 = vmatpush3.msra.mxu1 %v17098_v17  ;;  %13130 = vmatpush3.msra.mxu0 %v17226_v28 }
 0x351   :  { %13112 = vmatprep.subr.mxu1 %v22009_v0  ;;  %13131 = vmatprep.subr.mxu0 %v22009_v0 }
 0x352   :  { %13113 = vmatpush3.msra.mxu1 %v17114_v19  ;;  %13132 = vmatpush3.msra.mxu0 %v17236_v60 }
 0x353   :  { %13114 = vmatprep.subr.mxu1 %v22009_v0  ;;  %13133 = vmatprep.subr.mxu0 %v22009_v0 }
 0x354   :  { %13115 = vmatpush3.msra.mxu1 %v17128_v21  ;;  %13116 = vmatprep.mubr.msk.f32.mxu1 %vm16152_vm0, %v22009_v0 }
 0x355   :  { %13134 = vmatpush3.msra.mxu0 %v17247_v31  ;;  %13135 = vmatprep.mubr.msk.f32.mxu0 %vm16152_vm0, %v22009_v0 }
 0x356   :  { %13117 = vmatmul.mubr.msk.f32.vlgmr.msra.gmra.mxu1 %vm217_vm1, %v2085_v32  ;;  %13136 = vmatmul.mubr.msk.f32.vlgmr.msra.gmra.mxu0 %vm217_vm1, %v2080_v56 }
 0x357   :  { %13138 = vmatprep.subr.mxu1 %v22009_v0  ;;  %13157 = vmatprep.subr.mxu0 %v22009_v0 }
 0x358   :  { %13139 = vmatpush3.msra.mxu1 %v17019_v4  ;;  %13158 = vmatpush3.msra.mxu0 %v17024_v6 }
 0x359   :  { %13140 = vmatprep.subr.mxu1 %v22009_v0  ;;  %13159 = vmatprep.subr.mxu0 %v22009_v0 }
 0x35a   :  { %13141 = vmatpush3.msra.mxu1 %v17031_v7  ;;  %13160 = vmatpush3.msra.mxu0 %v17036_v8 }
 0x35b   :  { %13142 = vmatprep.subr.mxu1 %v22009_v0  ;;  %13161 = vmatprep.subr.mxu0 %v22009_v0 }
 0x35c   :  { %13143 = vmatpush3.msra.mxu1 %v17047_v9  ;;  %13162 = vmatpush3.msra.mxu0 %v17052_v10 }
 0x35d   :  { %13144 = vmatprep.subr.mxu1 %v22009_v0  ;;  %13163 = vmatprep.subr.mxu0 %v22009_v0 }
 0x35e   :  { %13145 = vmatpush3.msra.mxu1 %v17063_v11  ;;  %13164 = vmatpush3.msra.mxu0 %v17068_v12 }
 0x35f   :  { %13146 = vmatprep.subr.mxu1 %v22009_v0  ;;  %13165 = vmatprep.subr.mxu0 %v22009_v0 }
 0x360   :  { %13147 = vmatpush3.msra.mxu1 %v17077_v14  ;;  %13166 = vmatpush3.msra.mxu0 %v17082_v15 }
 0x361   :  { %13148 = vmatprep.subr.mxu1 %v22009_v0  ;;  %13167 = vmatprep.subr.mxu0 %v22009_v0 }
 0x362   :  { %13149 = vmatpush3.msra.mxu1 %v17093_v16  ;;  %13168 = vmatpush3.msra.mxu0 %v17098_v17 }
 0x363   :  { %13150 = vmatprep.subr.mxu1 %v22009_v0  ;;  %13169 = vmatprep.subr.mxu0 %v22009_v0 }
 0x364   :  { %13151 = vmatpush3.msra.mxu1 %v17109_v18  ;;  %13170 = vmatpush3.msra.mxu0 %v17114_v19 }
 0x365   :  { %13152 = vmatprep.subr.mxu1 %v22009_v0  ;;  %13171 = vmatprep.subr.mxu0 %v22009_v0 }
 0x366   :  { %13153 = vmatpush3.msra.mxu1 %v17123_v20  ;;  %13154 = vmatprep.mubr.msk.f32.mxu1 %vm16152_vm0, %v22009_v0 }
 0x367   :  { %13172 = vmatpush3.msra.mxu0 %v17128_v21  ;;  %13173 = vmatprep.mubr.msk.f32.mxu0 %vm16152_vm0, %v22009_v0 }
 0x368   :  { %13155 = vmatmul.mubr.msk.f32.vlgmr.msra.gmra.mxu1 %vm217_vm1, %v2090_v37  ;;  %13174 = vmatmul.mubr.msk.f32.vlgmr.msra.gmra.mxu0 %vm217_vm1, %v2095_v38 }
 0x369   :  { %13176 = vmatprep.subr.mxu1 %v22009_v0  ;;  %13195 = vmatprep.subr.mxu0 %v22009_v0 }
 0x36a   :  { %13177 = vmatpush3.msra.mxu1 %v17181_v46  ;;  %13196 = vmatpush3.msra.mxu0 %v17019_v4 }
 0x36b   :  { %13178 = vmatprep.subr.mxu1 %v22009_v0  ;;  %13197 = vmatprep.subr.mxu0 %v22009_v0 }
 0x36c   :  { %13179 = vmatpush3.msra.mxu1 %v17188_v23  ;;  %13198 = vmatpush3.msra.mxu0 %v17031_v7 }
 0x36d   :  { %13180 = vmatprep.subr.mxu1 %v22009_v0  ;;  %13199 = vmatprep.subr.mxu0 %v22009_v0 }
 0x36e   :  { %13181 = vmatpush3.msra.mxu1 %v17197_v24  ;;  %13200 = vmatpush3.msra.mxu0 %v17047_v9 }
 0x36f   :  { %13182 = vmatprep.subr.mxu1 %v22009_v0  ;;  %13201 = vmatprep.subr.mxu0 %v22009_v0 }
 0x370   :  { %13183 = vmatpush3.msra.mxu1 %v17206_v25  ;;  %13202 = vmatpush3.msra.mxu0 %v17063_v11 }
 0x371   :  { %13184 = vmatprep.subr.mxu1 %v22009_v0  ;;  %13203 = vmatprep.subr.mxu0 %v22009_v0 }
 0x372   :  { %13185 = vmatpush3.msra.mxu1 %v17215_v26  ;;  %13204 = vmatpush3.msra.mxu0 %v17077_v14 }
 0x373   :  { %13186 = vmatprep.subr.mxu1 %v22009_v0  ;;  %13205 = vmatprep.subr.mxu0 %v22009_v0 }
 0x374   :  { %13187 = vmatpush3.msra.mxu1 %v17226_v28  ;;  %13206 = vmatpush3.msra.mxu0 %v17093_v16 }
 0x375   :  { %13188 = vmatprep.subr.mxu1 %v22009_v0  ;;  %13207 = vmatprep.subr.mxu0 %v22009_v0 }
 0x376   :  { %13189 = vmatpush3.msra.mxu1 %v17236_v60  ;;  %13208 = vmatpush3.msra.mxu0 %v17109_v18 }
 0x377   :  { %13190 = vmatprep.subr.mxu1 %v22009_v0  ;;  %13209 = vmatprep.subr.mxu0 %v22009_v0 }
 0x378   :  { %13191 = vmatpush3.msra.mxu1 %v17247_v31  ;;  %13192 = vmatprep.mubr.msk.f32.mxu1 %vm16152_vm0, %v22009_v0 }
 0x379   :  { %13210 = vmatpush3.msra.mxu0 %v17123_v20  ;;  %13211 = vmatprep.mubr.msk.f32.mxu0 %vm16152_vm0, %v22009_v0 }
 0x37a   :  { %13193 = vmatmul.mubr.msk.f32.vlgmr.msra.gmra.mxu1 %vm217_vm1, %v2090_v37  ;;  %13212 = vmatmul.mubr.msk.f32.vlgmr.msra.gmra.mxu0 %vm217_vm1, %v2100_v42 }
 0x37b   :  { %13214 = vmatprep.subr.mxu1 %v22009_v0  ;;  %13233 = vmatprep.subr.mxu0 %v22009_v0 }
 0x37c   :  { %13215 = vmatpush3.msra.mxu1 %v17024_v6  ;;  %13234 = vmatpush3.msra.mxu0 %v17181_v46  ;;  %v2104_v6 = vmul.f32 0.01, %v17173_v2 }
 0x37d   :  { %13216 = vmatprep.subr.mxu1 %v22009_v0  ;;  %13235 = vmatprep.subr.mxu0 %v22009_v0 }
 0x37e   :  { %13217 = vmatpush3.msra.mxu1 %v17036_v8  ;;  %13236 = vmatpush3.msra.mxu0 %v17188_v23  ;;  %v2105_v8 = vsel %vm2103_vm10, %v17173_v2, %v2104_v6 }
 0x37f   :  { %13218 = vmatprep.subr.mxu1 %v22009_v0  ;;  %13237 = vmatprep.subr.mxu0 %v22009_v0 }
 0x380   :  { %13219 = vmatpush3.msra.mxu1 %v17052_v10  ;;  %13238 = vmatpush3.msra.mxu0 %v17197_v24 }
 0x381   :  { %13220 = vmatprep.subr.mxu1 %v22009_v0  ;;  %13239 = vmatprep.subr.mxu0 %v22009_v0 }
 0x382   :  { %13221 = vmatpush3.msra.mxu1 %v17068_v12  ;;  %13240 = vmatpush3.msra.mxu0 %v17206_v25 }
 0x383   :  { %13222 = vmatprep.subr.mxu1 %v22009_v0  ;;  %13241 = vmatprep.subr.mxu0 %v22009_v0 }
 0x384   :  { %13223 = vmatpush3.msra.mxu1 %v17082_v15  ;;  %13242 = vmatpush3.msra.mxu0 %v17215_v26 }
 0x385   :  { %13224 = vmatprep.subr.mxu1 %v22009_v0  ;;  %13243 = vmatprep.subr.mxu0 %v22009_v0 }
 0x386   :  { %13225 = vmatpush3.msra.mxu1 %v17098_v17  ;;  %13244 = vmatpush3.msra.mxu0 %v17226_v28 }
 0x387   :  { %13226 = vmatprep.subr.mxu1 %v22009_v0  ;;  %13245 = vmatprep.subr.mxu0 %v22009_v0 }
 0x388   :  { %13227 = vmatpush3.msra.mxu1 %v17114_v19  ;;  %13246 = vmatpush3.msra.mxu0 %v17236_v60 }
 0x389   :  { %13228 = vmatprep.subr.mxu1 %v22009_v0  ;;  %13247 = vmatprep.subr.mxu0 %v22009_v0 }
 0x38a   :  { %13229 = vmatpush3.msra.mxu1 %v17128_v21  ;;  %13230 = vmatprep.mubr.msk.f32.mxu1 %vm16152_vm0, %v22009_v0 }
 0x38b   :  { %13248 = vmatpush3.msra.mxu0 %v17247_v31  ;;  %13249 = vmatprep.mubr.msk.f32.mxu0 %vm16152_vm0, %v22009_v0 }
 0x38c   :  { %13231 = vmatmul.mubr.msk.f32.vlgmr.msra.gmra.mxu1 %vm217_vm1, %v2105_v8  ;;  %13250 = vmatmul.mubr.msk.f32.vlgmr.msra.gmra.mxu0 %vm217_vm1, %v2100_v42 }
 0x38d   :  { %13252 = vmatprep.subr.mxu1 %v22009_v0  ;;  %13268 = vmatprep.mubr.msk.f32.mxu1 %vm16152_vm0, %v22009_v0 }
 0x38e   :  { %13253 = vmatpush3.msra.mxu1 %v17019_v4  ;;  %13271 = vmatprep.subr.mxu0 %v22009_v0  ;;  %v2109_v4 = vmul.f32 0.01, %v17176_v3 }
 0x38f   :  { %13254 = vmatprep.subr.mxu1 %v22009_v0  ;;  %13287 = vmatprep.mubr.msk.f32.mxu0 %vm16152_vm0, %v22009_v0 }
 0x390   :  { %13255 = vmatpush3.msra.mxu1 %v17031_v7  ;;  %v2110_v7 = vsel %vm2108_vm11, %v17176_v3, %v2109_v4  ;;  %vm3462_vm11 = vcmask 254976  }
 0x391   :  { %13256 = vmatprep.subr.mxu1 %v22009_v0 }
 0x392   :  { %13257 = vmatpush3.msra.mxu1 %v17047_v9 }
 0x393   :  { %13258 = vmatprep.subr.mxu1 %v22009_v0 }
 0x394   :  { %13259 = vmatpush3.msra.mxu1 %v17063_v11 }
 0x395   :  { %13260 = vmatprep.subr.mxu1 %v22009_v0 }
 0x396   :  { %13261 = vmatpush3.msra.mxu1 %v17077_v14 }
 0x397   :  { %13262 = vmatprep.subr.mxu1 %v22009_v0 }
 0x398   :  { %13263 = vmatpush3.msra.mxu1 %v17093_v16 }
 0x399   :  { %13264 = vmatprep.subr.mxu1 %v22009_v0 }
 0x39a   :  { %13265 = vmatpush3.msra.mxu1 %v17109_v18 }
 0x39b   :  { %13266 = vmatprep.subr.mxu1 %v22009_v0 }
 0x39c   :  { %13267 = vmatpush3.msra.mxu1 %v17123_v20 }
 0x39d   :  { %13269 = vmatmul.mubr.msk.f32.vlgmr.msra.gmra.mxu1 %vm217_vm1, %v2110_v7  ;;  %13290 = vmatprep.subr.mxu1 %v22009_v0 }
 0x39e   :  { %13306 = vmatprep.mubr.msk.f32.mxu1 %vm16152_vm0, %v22009_v0 }
 0x405   :  { %v2206_v9 = vpop.f32.mrf.mxu1  ;;  %v2279_v10 = vpop.f32.mrf.mxu0 }
 0x406   :  { %v17413_v11 = vadd.f32 %v2279_v10, %v2206_v9 }
 0x407   :  { %v13080_v12 = vpop.f32.mrf.mxu1  ;;  %v13099_v14 = vpop.f32.mrf.mxu0 }
 0x408   :  { %v2934_v63 = vmul.f32 %v17413_v11, %v17413_v11 }
 0x416   :  { %v2352_v15 = vpop.f32.mrf.mxu1  ;;  %v2422_v16 = vpop.f32.mrf.mxu0 }
 0x417   :  { %v2423_v17 = vadd.f32 %v2422_v16, %v2352_v15 }
 0x418   :  { %v13118_v18 = vpop.f32.mrf.mxu1  ;;  %v13137_v19 = vpop.f32.mrf.mxu0 }
 0x419   :  { %v17444_v19 = vld [vmem:[%s22057_s5 + $0xb8] sm:$0xff] }
 0x41a   :  { %13272 = vmatpush3.msra.mxu0 %v17444_v19 }
 0x41b   :  { %13273 = vmatprep.subr.mxu0 %v22009_v0 }
 0x428   :  { %v2495_v20 = vpop.f32.mrf.mxu1  ;;  %v2569_v21 = vpop.f32.mrf.mxu0 }
 0x429   :  { %v17415_v59 = vadd.f32 %v2495_v20, %v2423_v17  ;;  %v17449_v20 = vld [vmem:[%s22057_s5 + $0x78] sm:$0xff] }
 0x42a   :  { %v13156_v44 = vpop.f32.mrf.mxu1  ;;  %v13175_v45 = vpop.f32.mrf.mxu0  ;;  %13291 = vmatpush3.msra.mxu1 %v17449_v20 }
 0x42b   :  { %v2936_v62 = vmul.f32 %v17415_v59, %v17415_v59  ;;  %v2935_v1 = vadd.f32 %v17415_v59, %v17413_v11  ;;  %v17461_v44 = vld [vmem:[%s22057_s5 + $0x70] sm:$0xff]  ;;  %13292 = vmatprep.subr.mxu1 %v22009_v0  ;;  %v17472_v45 = vld [vmem:[%s22057_s5 + $0xa8] sm:$0xff] }
 0x42c   :  { %13293 = vmatpush3.msra.mxu1 %v17461_v44 }
 0x42d   :  { %v2937_v43 = vadd.f32 %v2936_v62, %v2934_v63  ;;  %13294 = vmatprep.subr.mxu1 %v22009_v0  ;;  %v17514_v62 = vld [vmem:[%s22057_s5 + $0x90] sm:$0xff] }
 0x42e   :  { %v17519_v63 = vld [vmem:[%s22057_s5 + $0x50] sm:$0xff] }
 0x43a   :  { %v2639_v47 = vpop.f32.mrf.mxu1  ;;  %v2712_v48 = vpop.f32.mrf.mxu0 }
 0x43b   :  { %v2640_v57 = vadd.f32 %v2639_v47, %v2569_v21  ;;  %v17454_v21 = vld [vmem:[%s22057_s5 + $0xb0] sm:$0xff]  ;;  %v17477_v47 = vld [vmem:[%s22057_s5 + $0x68] sm:$0xff] }
 0x43c   :  { %v13194_v49 = vpop.f32.mrf.mxu1  ;;  %v13213_v50 = vpop.f32.mrf.mxu0  ;;  %13274 = vmatpush3.msra.mxu0 %v17454_v21  ;;  %13295 = vmatpush3.msra.mxu1 %v17477_v47 }
 0x43d   :  { %v17417_v61 = vadd.f32 %v2712_v48, %v2640_v57  ;;  %13275 = vmatprep.subr.mxu0 %v22009_v0  ;;  %v2990_v48 = vld [vmem:[#allocation5] sm:$0x1]  ;;  %13296 = vmatprep.subr.mxu1 %v22009_v0  ;;  %v2994_v57 = vld [vmem:[#allocation7] sm:$0x1] }
 0x43e   :  { %13276 = vmatpush3.msra.mxu0 %v17472_v45  ;;  %v17486_v49 = vld [vmem:[%s22057_s5 + $0xa0] sm:$0xff] }
 0x43f   :  { %v2939_v2 = vmul.f32 %v17417_v61, %v17417_v61  ;;  %v2938_v46 = vadd.f32 %v2935_v1, %v17417_v61  ;;  %13277 = vmatprep.subr.mxu0 %v22009_v0  ;;  %v17491_v50 = vld [vmem:[%s22057_s5 + $0x60] sm:$0xff] }
 0x440   :  { %13278 = vmatpush3.msra.mxu0 %v17486_v49  ;;  %13297 = vmatpush3.msra.mxu1 %v17491_v50 }
 0x441   :  { %v2940_v23 = vadd.f32 %v2939_v2, %v2937_v43  ;;  %13279 = vmatprep.subr.mxu0 %v22009_v0  ;;  %13298 = vmatprep.subr.mxu1 %v22009_v0 }
 0x44c   :  { %v2786_v51 = vpop.f32.mrf.mxu1  ;;  %v2856_v53 = vpop.f32.mrf.mxu0 }
 0x44d   :  { %v2857_v3 = vadd.f32 %v2856_v53, %v2786_v51  ;;  %v17500_v53 = vld [vmem:[%s22057_s5 + $0x98] sm:$0xff] }
 0x44e   :  { %v13232_v54 = vpop.f32.mrf.mxu1  ;;  %v13251_v55 = vpop.f32.mrf.mxu0  ;;  %13280 = vmatpush3.msra.mxu0 %v17500_v53 }
 0x44f   :  { %v17505_v54 = vld [vmem:[%s22057_s5 + $0x58] sm:$0xff]  ;;  %13281 = vmatprep.subr.mxu0 %v22009_v0 }
 0x450   :  { %13299 = vmatpush3.msra.mxu1 %v17505_v54  ;;  %13282 = vmatpush3.msra.mxu0 %v17514_v62 }
 0x451   :  { %13300 = vmatprep.subr.mxu1 %v22009_v0  ;;  %13283 = vmatprep.subr.mxu0 %v22009_v0 }
 0x452   :  { %13301 = vmatpush3.msra.mxu1 %v17519_v63 }
 0x453   :  { %13302 = vmatprep.subr.mxu1 %v22009_v0 }
 0x45d   :  { %v2929_v52 = vpop.f32.mrf.mxu1 }
 0x45e   :  { %v17428_v56 = vadd.f32 %v2929_v52, %v2857_v3  ;;  %v17527_v3 = vld [vmem:[%s22057_s5 + $0x88] sm:$0xff] }
 0x45f   :  { %v13270_v22 = vpop.f32.mrf.mxu1  ;;  %v17532_v52 = vld [vmem:[%s22057_s5 + $0x48] sm:$0xff]  ;;  %13284 = vmatpush3.msra.mxu0 %v17527_v3 }
 0x460   :  { %v2941_v24 = vadd.f32 %v2938_v46, %v17428_v56  ;;  %v2942_v25 = vmul.f32 %v17428_v56, %v17428_v56  ;;  %v17541_v46 = vld [vmem:[%s22057_s5 + $0x80] sm:$0xff]  ;;  %13303 = vmatpush3.msra.mxu1 %v17532_v52  ;;  %13285 = vmatprep.subr.mxu0 %v22009_v0 }
 0x461   :  { %v17546_v22 = vld [vmem:[%s22057_s5 + $0x40] sm:$0xff]  ;;  %13304 = vmatprep.subr.mxu1 %v22009_v0  ;;  %13286 = vmatpush3.msra.mxu0 %v17541_v46 }
 0x462   :  { %v2943_v26 = vadd.f32 %v2942_v25, %v2940_v23  ;;  %2945 = vrot.lane.b32.xlu0 %v2941_v24, %s16153_s8  ;;  %13305 = vmatpush3.msra.mxu1 %v17546_v22 }
 0x463   :  { %13309 = vmatprep.subr.mxu0 %v22009_v0  ;;  %13328 = vmatprep.subr.mxu1 %v22009_v0 }
 0x464   :  { %2950 = vrot.lane.b32.xlu1 %v2943_v26, %s16153_s8 }
 0x466   :  { %2954 = vrot.lane.b32.xlu0 %v2941_v24, %s16156_s1 }
 0x468   :  { %2958 = vrot.lane.b32.xlu1 %v2943_v26, %s16156_s1 }
 0x46a   :  { %2962 = vrot.lane.b32.xlu0 %v2941_v24, %s16158_s12 }
 0x46c   :  { %2966 = vrot.lane.b32.xlu1 %v2943_v26, %s16158_s12 }
 0x4d4   :  { %v2946_v27 = vpop.permute.xlu0 %2945 }
 0x4d5   :  { %v2948_v60 = vadd.f32 %v2946_v27, %v2941_v24 }
 0x4d6   :  { %v2951_v28 = vpop.permute.xlu1 %2950 }
 0x4d7   :  { %v2953_v31 = vadd.f32 %v2951_v28, %v2943_v26 }
 0x4d8   :  { %v2955_v29 = vpop.permute.xlu0 %2954 }
 0x4d9   :  { %v2957_v32 = vadd.f32 %v2955_v29, %v2948_v60 }
 0x4da   :  { %v2959_v30 = vpop.permute.xlu1 %2958 }
 0x4db   :  { %v2961_v34 = vadd.f32 %v2959_v30, %v2953_v31 }
 0x4dc   :  { %v2963_v33 = vpop.permute.xlu0 %2962 }
 0x4dd   :  { %v2965_v35 = vadd.f32 %v2963_v33, %v2957_v32 }
 0x4de   :  { %v2967_v36 = vpop.permute.xlu1 %2966 }
 0x4df   :  { %v2971_v5 = vsel %vm2970_vm12, %v2965_v35, 0.0  ;;  %v2969_v13 = vadd.f32 %v2967_v36, %v2961_v34 }
 0x4e0   :  { %v2972_v37 = vrot.slane %v2971_v5, 4 }
 0x4e1   :  { %v2978_v38 = vsel %vm2970_vm12, %v2969_v13, 0.0 }
 0x4e2   :  { %v2973_v39 = vadd.f32 %v2972_v37, %v2971_v5  ;;  %v2979_v40 = vrot.slane %v2978_v38, 4 }
 0x4e4   :  { %v2974_v41 = vrot.slane %v2973_v39, 2  ;;  %v2980_v42 = vadd.f32 %v2979_v40, %v2978_v38 }
 0x4e6   :  { %v2975_v6 = vadd.f32 %v2974_v41, %v2973_v39  ;;  %v2981_v8 = vrot.slane %v2980_v42, 2  ;;  %v3066_v41 = vld [vmem:[%s22057_s5 + $0x38] sm:$0xff] }
 0x4e8   :  { %v2976_v4 = vrot.slane %v2975_v6, 1  ;;  %v2982_v7 = vadd.f32 %v2981_v8, %v2980_v42  ;;  %v3063_v8 = vld [vmem:[%s22057_s5 + $0x20] sm:$0xff] }
 0x4ea   :  { %v2977_v9 = vadd.f32 %v2976_v4, %v2975_v6  ;;  %v2983_v10 = vrot.slane %v2982_v7, 1  ;;  %v3064_v6 = vld [vmem:[%s22057_s5 + $0x28] sm:$0xff] }
 0x4ec   :  { %v2986_v12 = vmul.f32 0.03125, %v2977_v9  ;;  %v2984_v14 = vadd.f32 %v2983_v10, %v2982_v7  ;;  %v3062_v7 = vld [vmem:[%s22057_s5 + $0x18] sm:$0xff]  ;;  %v3061_v9 = vld [vmem:[%s22057_s5 + $0x10] sm:$0xff]  ;;  %v3060_v10 = vld [vmem:[%s22057_s5 + $0x8] sm:$0xff] }
 0x4ee   :  { %v2988_v15 = vmul.f32 %v2986_v12, %v2986_v12  ;;  %v2987_v16 = vmul.f32 0.03125, %v2984_v14  ;;  %v3059_v14 = vld [vmem:[%s22057_s5] sm:$0xff] }
 0x4f0   :  { %v2989_v17 = vsub.f32 %v2987_v16, %v2988_v15 }
 0x4f2   :  { %v2991_v18 = vadd.f32 1e-05, %v2989_v17 }
 0x4f4   :  { %15797 = vrsqrt.f32 %v2991_v18 }
 0x501   :  { %v15798_v51 = vpop.eup %15797 }
 0x502   :  { %v2993_v55 = vmul.f32 %v15798_v51, %v2990_v48 }
 0x504   :  { %v3001_v1 = vrot.slane %v2993_v55, %v17003_v58  ;;  %v2995_v2 = vmul.f32 %v2993_v55, %v2986_v12 }
 0x506   :  { %3005 = vrot.lane.b32.xlu1 %v3001_v1, %s16162_s11  ;;  %3002 = vrot.lane.b32.xlu0 %v3001_v1, %s16160_s10  ;;  %v2996_v43 = vsub.f32 %v2994_v57, %v2995_v2  ;;  %v3533_v2 = vld [vmem:[%s22058_s9 + $0x38] sm:$0xff] }
 0x508   :  { %v3018_v23 = vrot.slane %v2996_v43, %v17003_v58 }
 0x50a   :  { %3008 = vrot.lane.b32.xlu0 %v3001_v1, %s16164_s3  ;;  %3019 = vrot.lane.b32.xlu1 %v3018_v23, %s16160_s10 }
 0x50e   :  { %3022 = vrot.lane.b32.xlu0 %v3018_v23, %s16162_s11  ;;  %3025 = vrot.lane.b32.xlu1 %v3018_v23, %s16164_s3 }
 0x578   :  { %v3006_v24 = vpop.permute.xlu1 %3005  ;;  %v3003_v25 = vpop.permute.xlu0 %3002 }
 0x579   :  { %v3011_v26 = vsel %vm2018_vm4, %v2993_v55, %v3003_v25 }
 0x57a   :  { %v3012_v27 = vsel %vm2022_vm6, %v3011_v26, %v3006_v24 }
 0x57c   :  { %v3009_v28 = vpop.permute.xlu0 %3008  ;;  %v3020_v29 = vpop.permute.xlu1 %3019 }
 0x57d   :  { %v3013_v60 = vsel %vm2026_vm8, %v3012_v27, %v3009_v28  ;;  %v3028_v31 = vsel %vm2018_vm4, %v2996_v43, %v3020_v29  ;;  %v10988_v43 = vld [vmem:[%s22058_s9 + $0x70] sm:$0xff] }
 0x57e   :  { %v17565_v30 = vrot.slane %v3013_v60, %v17003_v58 }
 0x580   :  { %v3023_v32 = vpop.permute.xlu0 %3022  ;;  %v3026_v33 = vpop.permute.xlu1 %3025  ;;  %v3035_v36 = vmul.f32 %v17565_v30, %v17413_v11  ;;  %v3044_v5 = vmul.f32 %v17565_v30, %v17415_v59  ;;  %v3065_v59 = vld [vmem:[%s22057_s5 + $0x30] sm:$0xff]  ;;  %v3049_v4 = vmul.f32 %v17565_v30, %v17417_v61  ;;  %v3054_v16 = vmul.f32 %v17565_v30, %v17428_v56 }
 0x581   :  { %v3029_v34 = vsel %vm2022_vm6, %v3028_v31, %v3023_v32 }
 0x582   :  { %v3030_v35 = vsel %vm2026_vm8, %v3029_v34, %v3026_v33 }
 0x583   :  { %v17575_v13 = vrot.slane %v3030_v35, %v17003_v58 }
 0x585   :  { %v3045_v37 = vadd.f32 %v3044_v5, %v17575_v13  ;;  %v3040_v38 = vadd.f32 %v17575_v13, %v3035_v36  ;;  %v3050_v61 = vadd.f32 %v3049_v4, %v17575_v13  ;;  %v3055_v17 = vadd.f32 %v3054_v16, %v17575_v13  ;;  %v3482_v4 = vld [vmem:[#allocation8] sm:$0x1] }
 0x586   :  { %v10982_v16 = vld [vmem:[%s22058_s9 + $0x40] sm:$0xff] }
 0x587   :  { %vm3046_vm13 = vcmp.gt.f32.partialorder %v3045_v37, 0.0  ;;  %v3047_v39 = vmul.f32 0.01, %v3045_v37  ;;  %vm3041_vm14 = vcmp.gt.f32.partialorder %v3040_v38, 0.0  ;;  %v3042_v40 = vmul.f32 0.01, %v3040_v38 }
 0x588   :  { %v3052_v12 = vmul.f32 0.01, %v3050_v61  ;;  %vm3051_vm15 = vcmp.gt.f32.partialorder %v3050_v61, 0.0  ;;  %v3057_v18 = vmul.f32 0.01, %v3055_v17  ;;  %vm3056_vm10 = vcmp.gt.f32.partialorder %v3055_v17, 0.0 }
 0x589   :  { %v3048_v42 = vsel %vm3046_vm13, %v3045_v37, %v3047_v39  ;;  %v3043_v11 = vsel %vm3041_vm14, %v3040_v38, %v3042_v40 }
 0x58a   :  { %13288 = vmatmul.mubr.msk.f32.vlgmr.msra.gmra.mxu0 %vm217_vm1, %v3048_v42  ;;  %13307 = vmatmul.mubr.msk.f32.vlgmr.msra.gmra.mxu1 %vm217_vm1, %v3043_v11  ;;  %v3053_v15 = vsel %vm3051_vm15, %v3050_v61, %v3052_v12  ;;  %v3058_v56 = vsel %vm3056_vm10, %v3055_v17, %v3057_v18  ;;  %v3530_v11 = vld [vmem:[%s22058_s9 + $0x20] sm:$0xff]  ;;  %v10983_v12 = vld [vmem:[%s22058_s9 + $0x48] sm:$0xff] }
 0x58b   :  { %13310 = vmatpush3.msra.mxu0 %v17449_v20  ;;  %13329 = vmatpush3.msra.mxu1 %v3066_v41  ;;  %v3531_v41 = vld [vmem:[%s22058_s9 + $0x28] sm:$0xff] }
 0x58c   :  { %13311 = vmatprep.subr.mxu0 %v22009_v0  ;;  %13330 = vmatprep.subr.mxu1 %v22009_v0  ;;  %v3486_v17 = vld [vmem:[#allocation10] sm:$0x1] }
 0x58d   :  { %13312 = vmatpush3.msra.mxu0 %v17461_v44  ;;  %13331 = vmatpush3.msra.mxu1 %v3065_v59  ;;  %v10986_v59 = vld [vmem:[%s22058_s9 + $0x60] sm:$0xff] }
 0x58e   :  { %13313 = vmatprep.subr.mxu0 %v22009_v0  ;;  %13332 = vmatprep.subr.mxu1 %v22009_v0 }
 0x58f   :  { %13314 = vmatpush3.msra.mxu0 %v17477_v47  ;;  %13333 = vmatpush3.msra.mxu1 %v3064_v6  ;;  %v3529_v6 = vld [vmem:[%s22058_s9 + $0x18] sm:$0xff] }
 0x590   :  { %13315 = vmatprep.subr.mxu0 %v22009_v0  ;;  %13334 = vmatprep.subr.mxu1 %v22009_v0 }
 0x591   :  { %13316 = vmatpush3.msra.mxu0 %v17491_v50  ;;  %13335 = vmatpush3.msra.mxu1 %v3063_v8  ;;  %v10985_v8 = vld [vmem:[%s22058_s9 + $0x58] sm:$0xff] }
 0x592   :  { %13317 = vmatprep.subr.mxu0 %v22009_v0  ;;  %13336 = vmatprep.subr.mxu1 %v22009_v0 }
 0x593   :  { %13318 = vmatpush3.msra.mxu0 %v17505_v54  ;;  %13337 = vmatpush3.msra.mxu1 %v3062_v7  ;;  %v3528_v7 = vld [vmem:[%s22058_s9 + $0x10] sm:$0xff] }
 0x594   :  { %13319 = vmatprep.subr.mxu0 %v22009_v0  ;;  %13338 = vmatprep.subr.mxu1 %v22009_v0 }
 0x595   :  { %13320 = vmatpush3.msra.mxu0 %v17519_v63  ;;  %13339 = vmatpush3.msra.mxu1 %v3061_v9  ;;  %v10984_v9 = vld [vmem:[%s22058_s9 + $0x50] sm:$0xff] }
 0x596   :  { %13321 = vmatprep.subr.mxu0 %v22009_v0  ;;  %13340 = vmatprep.subr.mxu1 %v22009_v0 }
 0x597   :  { %13322 = vmatpush3.msra.mxu0 %v17532_v52  ;;  %13341 = vmatpush3.msra.mxu1 %v3060_v10  ;;  %v3532_v52 = vld [vmem:[%s22058_s9 + $0x30] sm:$0xff]  ;;  %v3527_v10 = vld [vmem:[%s22058_s9 + $0x8] sm:$0xff] }
 0x598   :  { %13323 = vmatprep.subr.mxu0 %v22009_v0  ;;  %13342 = vmatprep.subr.mxu1 %v22009_v0 }
 0x599   :  { %13324 = vmatpush3.msra.mxu0 %v17546_v22  ;;  %13325 = vmatprep.mubr.msk.f32.mxu0 %vm16152_vm0, %v22009_v0 }
 0x59a   :  { %13343 = vmatpush3.msra.mxu1 %v3059_v14  ;;  %13344 = vmatprep.mubr.msk.f32.mxu1 %vm16152_vm0, %v22009_v0 }
 0x59b   :  { %13326 = vmatmul.mubr.msk.f32.vlgmr.msra.gmra.mxu0 %vm217_vm1, %v3053_v15  ;;  %13345 = vmatmul.mubr.msk.f32.vlgmr.msra.gmra.mxu1 %vm217_vm1, %v3048_v42  ;;  %v10987_v42 = vld [vmem:[%s22058_s9 + $0x68] sm:$0xff]  ;;  %v3526_v15 = vld [vmem:[%s22058_s9] sm:$0xff] }
 0x59c   :  { %13347 = vmatprep.subr.mxu0 %v22009_v0  ;;  %13363 = vmatprep.mubr.msk.f32.mxu0 %vm16152_vm0, %v22009_v0 }
 0x59d   :  { %13348 = vmatpush3.msra.mxu0 %v17444_v19  ;;  %13366 = vmatprep.subr.mxu1 %v22009_v0 }
 0x59e   :  { %13349 = vmatprep.subr.mxu0 %v22009_v0  ;;  %13382 = vmatprep.mubr.msk.f32.mxu1 %vm16152_vm0, %v22009_v0 }
 0x59f   :  { %13350 = vmatpush3.msra.mxu0 %v17454_v21  ;;  %13367 = vmatpush3.msra.mxu1 %v3533_v2 }
 0x5a0   :  { %13351 = vmatprep.subr.mxu0 %v22009_v0  ;;  %13368 = vmatprep.subr.mxu1 %v22009_v0 }
 0x5a1   :  { %13352 = vmatpush3.msra.mxu0 %v17472_v45  ;;  %13369 = vmatpush3.msra.mxu1 %v3532_v52 }
 0x5a2   :  { %13353 = vmatprep.subr.mxu0 %v22009_v0  ;;  %13370 = vmatprep.subr.mxu1 %v22009_v0 }
 0x5a3   :  { %13354 = vmatpush3.msra.mxu0 %v17486_v49  ;;  %13371 = vmatpush3.msra.mxu1 %v3531_v41  ;;  %v11000_v41 = vld [vmem:[%s21962_s15 + $0x50] sm:$0xff] }
 0x5a4   :  { %13355 = vmatprep.subr.mxu0 %v22009_v0  ;;  %13372 = vmatprep.subr.mxu1 %v22009_v0 }
 0x5a5   :  { %13356 = vmatpush3.msra.mxu0 %v17500_v53  ;;  %13373 = vmatpush3.msra.mxu1 %v3530_v11  ;;  %v10999_v11 = vld [vmem:[%s21962_s15 + $0x48] sm:$0xff] }
 0x5a6   :  { %13357 = vmatprep.subr.mxu0 %v22009_v0  ;;  %13374 = vmatprep.subr.mxu1 %v22009_v0 }
 0x5a7   :  { %13358 = vmatpush3.msra.mxu0 %v17514_v62  ;;  %13375 = vmatpush3.msra.mxu1 %v3529_v6  ;;  %v10998_v6 = vld [vmem:[%s21962_s15 + $0x40] sm:$0xff] }
 0x5a8   :  { %13359 = vmatprep.subr.mxu0 %v22009_v0  ;;  %13376 = vmatprep.subr.mxu1 %v22009_v0 }
 0x5a9   :  { %13360 = vmatpush3.msra.mxu0 %v17527_v3  ;;  %v10989_v3 = vld [vmem:[%s22058_s9 + $0x78] sm:$0xff]  ;;  %13377 = vmatpush3.msra.mxu1 %v3528_v7  ;;  %s22067_s9 = smov 56  }
 0x5aa   :  { %13361 = vmatprep.subr.mxu0 %v22009_v0  ;;  %13378 = vmatprep.subr.mxu1 %v22009_v0 }
 0x5ab   :  { %13362 = vmatpush3.msra.mxu0 %v17541_v46  ;;  %13379 = vmatpush3.msra.mxu1 %v3527_v10  ;;  %v3883_v10 = vld [vmem:[%s21962_s15 + $0x38] sm:$0xff] }
 0x5ac   :  { %13364 = vmatmul.mubr.msk.f32.vlgmr.msra.gmra.mxu0 %vm217_vm1, %v3058_v56  ;;  %13385 = vmatprep.subr.mxu0 %v22009_v0 }
 0x5ad   :  { %13401 = vmatprep.mubr.msk.f32.mxu0 %vm16152_vm0, %v22009_v0  ;;  %13386 = vmatpush3.msra.mxu0 %v10989_v3 }
 0x5ae   :  { %13387 = vmatprep.subr.mxu0 %v22009_v0  ;;  %13380 = vmatprep.subr.mxu1 %v22009_v0 }
 0x5af   :  { %13388 = vmatpush3.msra.mxu0 %v10988_v43  ;;  %13381 = vmatpush3.msra.mxu1 %v3526_v15  ;;  %v3882_v15 = vld [vmem:[%s21962_s15 + $0x30] sm:$0xff] }
 0x5b0   :  { %13389 = vmatprep.subr.mxu0 %v22009_v0  ;;  %13411 = vmatprep.subr.mxu1 %v22009_v0 }
 0x5b1   :  { %13390 = vmatpush3.msra.mxu0 %v10987_v42  ;;  %v17848_v42 = vld [vmem:[%s21962_s15 + $0x90] sm:$0xff] }
 0x5b2   :  { %13391 = vmatprep.subr.mxu0 %v22009_v0 }
 0x5b3   :  { %13392 = vmatpush3.msra.mxu0 %v10986_v59  ;;  %v17859_v59 = vld [vmem:[%s21962_s15 + $0x88] sm:$0xff] }
 0x5b4   :  { %13393 = vmatprep.subr.mxu0 %v22009_v0 }
 0x5b5   :  { %13394 = vmatpush3.msra.mxu0 %v10985_v8  ;;  %v17877_v8 = vld [vmem:[%s21962_s15 + $0x80] sm:$0xff] }
 0x5b6   :  { %13395 = vmatprep.subr.mxu0 %v22009_v0 }
 0x5b7   :  { %13396 = vmatpush3.msra.mxu0 %v10984_v9 }
 0x5b8   :  { %13397 = vmatprep.subr.mxu0 %v22009_v0 }
 0x5b9   :  { %13398 = vmatpush3.msra.mxu0 %v10983_v12 }
 0x5ba   :  { %13399 = vmatprep.subr.mxu0 %v22009_v0 }
 0x5bb   :  { %13400 = vmatpush3.msra.mxu0 %v10982_v16  ;;  %v3881_v16 = vld [vmem:[%s21962_s15 + $0x28] sm:$0xff] }
 0x5bc   :  { %13404 = vmatprep.subr.mxu0 %v22009_v0 }
 0x64a   :  { %v3154_v19 = vpop.f32.mrf.mxu0  ;;  %v3227_v20 = vpop.f32.mrf.mxu1 }
 0x64b   :  { %v17664_v50 = vadd.f32 %v3227_v20, %v3154_v19 }
 0x64c   :  { %v13289_v21 = vpop.f32.mrf.mxu0  ;;  %v13308_v44 = vpop.f32.mrf.mxu1 }
 0x64d   :  { %v3448_v57 = vmul.f32 %v17664_v50, %v17664_v50 }
 0x65b   :  { %v3300_v45 = vpop.f32.mrf.mxu0  ;;  %v3370_v47 = vpop.f32.mrf.mxu1 }
 0x65c   :  { %v3371_v51 = vadd.f32 %v3370_v47, %v3300_v45 }
 0x65d   :  { %v13327_v48 = vpop.f32.mrf.mxu0  ;;  %v13346_v49 = vpop.f32.mrf.mxu1 }
 0x66c   :  { %v3443_v53 = vpop.f32.mrf.mxu0 }
 0x66d   :  { %v17666_v54 = vadd.f32 %v3443_v53, %v3371_v51 }
 0x66e   :  { %v13365_v55 = vpop.f32.mrf.mxu0 }
 0x66f   :  { %v3450_v62 = vmul.f32 %v17666_v54, %v17666_v54  ;;  %v3449_v63 = vadd.f32 %v17666_v54, %v17664_v50 }
 0x671   :  { %3453 = vrot.lane.b32.xlu0 %v3449_v63, %s16156_s1  ;;  %v3451_v1 = vadd.f32 %v3450_v62, %v3448_v57 }
 0x673   :  { %3458 = vrot.lane.b32.xlu1 %v3451_v1, %s16156_s1 }
 0x6e3   :  { %v3454_v46 = vpop.permute.xlu0 %3453 }
 0x6e4   :  { %v3456_v22 = vadd.f32 %v3454_v46, %v3449_v63 }
 0x6e5   :  { %v3459_v23 = vpop.permute.xlu1 %3458 }
 0x6e6   :  { %v3463_v24 = vsel %vm3462_vm11, %v3456_v22, 0.0  ;;  %v3461_v25 = vadd.f32 %v3459_v23, %v3451_v1 }
 0x6e7   :  { %v3464_v26 = vrot.slane %v3463_v24, 4 }
 0x6e8   :  { %v3470_v27 = vsel %vm3462_vm11, %v3461_v25, 0.0  ;;  %v3714_v25 = vld [vmem:[%s21960_s13 + $0x8] sm:$0xff] }
 0x6e9   :  { %v3465_v28 = vadd.f32 %v3464_v26, %v3463_v24  ;;  %v3471_v29 = vrot.slane %v3470_v27, 4  ;;  %v10994_v26 = vld [vmem:[%s21960_s13 + $0x18] sm:$0xff] }
 0x6eb   :  { %v3466_v60 = vrot.slane %v3465_v28, 2  ;;  %v3472_v30 = vadd.f32 %v3471_v29, %v3470_v27  ;;  %v3713_v27 = vld [vmem:[%s21960_s13] sm:$0xff] }
 0x6ed   :  { %v3467_v31 = vadd.f32 %v3466_v60, %v3465_v28  ;;  %v3473_v32 = vrot.slane %v3472_v30, 2  ;;  %v10993_v28 = vld [vmem:[%s21960_s13 + $0x10] sm:$0xff]  ;;  %v3697_v60 = vld [vmem:[%s22060_s21] sm:$0x3]  ;;  %s16168_s13 = smov [#allocation14]  }
 0x6ef   :  { %v3468_v33 = vrot.slane %v3467_v31, 1  ;;  %v3474_v34 = vadd.f32 %v3473_v32, %v3472_v30 }
 0x6f1   :  { %v3469_v35 = vadd.f32 %v3468_v33, %v3467_v31  ;;  %v3475_v36 = vrot.slane %v3474_v34, 1  ;;  %v11005_v33 = vld [vmem:[%s21962_s15 + $0x78] sm:$0xff] }
 0x6f3   :  { %v3478_v5 = vmul.f32 0.125, %v3469_v35  ;;  %v3476_v13 = vadd.f32 %v3475_v36, %v3474_v34  ;;  %v17791_v34 = vld [vmem:[%s21962_s15 + $0xb8] sm:$0xff]  ;;  %v17798_v35 = vld [vmem:[%s21962_s15 + $0x70] sm:$0xff] }
 0x6f4   :  { %v17803_v36 = vld [vmem:[%s21962_s15 + $0xb0] sm:$0xff] }
 0x6f5   :  { %v3480_v37 = vmul.f32 %v3478_v5, %v3478_v5  ;;  %v3479_v38 = vmul.f32 0.125, %v3476_v13  ;;  %v17814_v13 = vld [vmem:[%s21962_s15 + $0xa8] sm:$0xff] }
 0x6f7   :  { %v3481_v39 = vsub.f32 %v3479_v38, %v3480_v37  ;;  %v11002_v37 = vld [vmem:[%s21962_s15 + $0x60] sm:$0xff] }
 0x6f8   :  { %v17826_v38 = vld [vmem:[%s21962_s15 + $0xa0] sm:$0xff] }
 0x6f9   :  { %v3483_v40 = vadd.f32 1e-05, %v3481_v39  ;;  %v11001_v39 = vld [vmem:[%s21962_s15 + $0x58] sm:$0xff] }
 0x6fb   :  { %15799 = vrsqrt.f32 %v3483_v40  ;;  %v17837_v40 = vld [vmem:[%s21962_s15 + $0x98] sm:$0xff] }
 0x708   :  { %v15800_v61 = vpop.eup %15799 }
 0x709   :  { %v3485_v14 = vmul.f32 %v15800_v61, %v3482_v4  ;;  %v10991_v4 = vld [vmem:[%s21961_s14] ss:$0 sm:$0xff] }
 0x70b   :  { %v3493_v18 = vrot.slane %v3485_v14, %v17003_v58  ;;  %v3487_v56 = vmul.f32 %v3485_v14, %v3478_v5  ;;  %v11003_v5 = vld [vmem:[%s21962_s15 + $0x68] sm:$0xff] }
 0x70d   :  { %3494 = vrot.lane.b32.xlu0 %v3493_v18, %s16162_s11  ;;  %v3488_v19 = vsub.f32 %v3486_v17, %v3487_v56  ;;  %v3880_v17 = vld [vmem:[%s21962_s15 + $0x20] sm:$0xff]  ;;  %v3879_v18 = vld [vmem:[%s21962_s15 + $0x18] sm:$0xff]  ;;  %v3878_v56 = vld [vmem:[%s21962_s15 + $0x10] sm:$0xff] }
 0x70f   :  { %v3502_v20 = vrot.slane %v3488_v19, %v17003_v58 }
 0x711   :  { %3503 = vrot.lane.b32.xlu1 %v3502_v20, %s16162_s11  ;;  %v10996_v20 = vld [vmem:[%s21961_s14 + $0x1] ss:$0 sm:$0xff]  ;;  %s22063_s14 = smov 72  }
 0x77f   :  { %v3495_v21 = vpop.permute.xlu0 %3494 }
 0x780   :  { %v3497_v44 = vsel %vm2022_vm6, %v3485_v14, %v3495_v21  ;;  %v3876_v21 = vld [vmem:[%s21962_s15] sm:$0xff] }
 0x781   :  { %v3510_v45 = vrot.slane %v3497_v44, %v17003_v58 }
 0x783   :  { %v3504_v47 = vpop.permute.xlu1 %3503  ;;  %v3511_v49 = vmul.f32 %v3510_v45, %v17664_v50  ;;  %v3520_v51 = vmul.f32 %v3510_v45, %v17666_v54  ;;  %v10981_v50 = vld [vmem:[%s22059_s29] ss:$0 sm:$0xff] }
 0x784   :  { %v3506_v48 = vsel %vm2022_vm6, %v3488_v19, %v3504_v47  ;;  %v3877_v19 = vld [vmem:[%s21962_s15 + $0x8] sm:$0xff] }
 0x785   :  { %v3515_v53 = vrot.slane %v3506_v48, %v17003_v58 }
 0x787   :  { %v3516_v55 = vadd.f32 %v3515_v53, %v3511_v49  ;;  %v3521_v57 = vadd.f32 %v3520_v51, %v3515_v53 }
 0x789   :  { %v3518_v62 = vmul.f32 0.01, %v3516_v55  ;;  %v3523_v63 = vmul.f32 0.01, %v3521_v57  ;;  %vm3517_vm13 = vcmp.gt.f32.partialorder %v3516_v55, 0.0  ;;  %vm3522_vm14 = vcmp.gt.f32.partialorder %v3521_v57, 0.0 }
 0x78b   :  { %v3519_v1 = vsel %vm3517_vm13, %v3516_v55, %v3518_v62  ;;  %v3524_v2 = vsel %vm3522_vm14, %v3521_v57, %v3523_v63 }
 0x78c   :  { %13383 = vmatmul.mubr.msk.f32.vlgmr.msra.gmra.mxu1 %vm217_vm1, %v3519_v1  ;;  %13402 = vmatmul.mubr.msk.f32.vlgmr.msra.gmra.mxu0 %vm217_vm1, %v3524_v2 }
 0x78d   :  { %13408 = vmatprep.mubr.msk.f32.mxu0 %vm16152_vm0, %v22009_v0  ;;  %13415 = vmatprep.mubr.msk.f32.mxu1 %vm16152_vm0, %v22009_v0 }
 0x78e   :  { %13405 = vmatpush3.msra.mxu0 %v3714_v25  ;;  %13412 = vmatpush3.msra.mxu1 %v10994_v26 }
 0x78f   :  { %13406 = vmatprep.subr.mxu0 %v22009_v0  ;;  %13413 = vmatprep.subr.mxu1 %v22009_v0 }
 0x790   :  { %13407 = vmatpush3.msra.mxu0 %v3713_v27  ;;  %13414 = vmatpush3.msra.mxu1 %v10993_v28 }
 0x791   :  { %13418 = vmatprep.subr.mxu1 %v22009_v0  ;;  %13437 = vmatprep.subr.mxu0 %v22009_v0 }
 0x84c   :  { %v3603_v54 = vpop.f32.mrf.mxu1  ;;  %v3692_v3 = vpop.f32.mrf.mxu0 }
 0x84d   :  { %v3613_v52 = vadd.f32 %v10981_v50, %v3603_v54 }
 0x84e   :  { %v13384_v43 = vpop.f32.mrf.mxu1  ;;  %v13403_v46 = vpop.f32.mrf.mxu0 }
 0x84f   :  { %v17759_v22 = vadd.f32 %v3692_v3, %v3613_v52 }
 0x851   :  { %v3698_v23 = vmul.f32 0.5, %v17759_v22  ;;  %3707 = vst.msk [vmem:[#allocation13] sm:$0x3] %vm2970_vm12, %v17759_v22 }
 0x853   :  { %v3699_v24 = vmul.f32 1.442695, %v3698_v23 }
 0x855   :  { %15801 = vpow2.f32 %v3699_v24 }
 0x862   :  { %v15802_v29 = vpop.eup %15801 }
 0x863   :  { %3702 = vrot.lane.b32.xlu0 %v15802_v29, %s16153_s8 }
 0x8d5   :  { %v3703_v30 = vpop.permute.xlu0 %3702 }
 0x8d6   :  { %v3705_v31 = vmul.f32 %v3703_v30, %v3697_v60 }
 0x8d8   :  { %v3706_v32 = vadd.f32 %v3705_v31, %v17759_v22 }
 0x8da   :  { %13409 = vmatmul.mubr.msk.f32.vlgmr.msra.gmra.mxu0 %vm2018_vm4, %v3706_v32  ;;  %13416 = vmatmul.mubr.msk.f32.vlgmr.msra.gmra.mxu1 %vm2018_vm4, %v3706_v32 }
 0x8db   :  { %13419 = vmatpush3.msra.mxu1 %v11005_v33  ;;  %13438 = vmatpush3.msra.mxu0 %v17791_v34 }
 0x8dc   :  { %13420 = vmatprep.subr.mxu1 %v22009_v0  ;;  %13439 = vmatprep.subr.mxu0 %v22009_v0 }
 0x8dd   :  { %13421 = vmatpush3.msra.mxu1 %v17798_v35  ;;  %13440 = vmatpush3.msra.mxu0 %v17803_v36 }
 0x8de   :  { %13422 = vmatprep.subr.mxu1 %v22009_v0  ;;  %13441 = vmatprep.subr.mxu0 %v22009_v0 }
 0x8df   :  { %13423 = vmatpush3.msra.mxu1 %v11003_v5  ;;  %13442 = vmatpush3.msra.mxu0 %v17814_v13 }
 0x8e0   :  { %13424 = vmatprep.subr.mxu1 %v22009_v0  ;;  %13443 = vmatprep.subr.mxu0 %v22009_v0 }
 0x8e1   :  { %13425 = vmatpush3.msra.mxu1 %v11002_v37  ;;  %13444 = vmatpush3.msra.mxu0 %v17826_v38 }
 0x8e2   :  { %13426 = vmatprep.subr.mxu1 %v22009_v0  ;;  %13445 = vmatprep.subr.mxu0 %v22009_v0 }
 0x8e3   :  { %13427 = vmatpush3.msra.mxu1 %v11001_v39  ;;  %13446 = vmatpush3.msra.mxu0 %v17837_v40 }
 0x8e4   :  { %13428 = vmatprep.subr.mxu1 %v22009_v0  ;;  %13447 = vmatprep.subr.mxu0 %v22009_v0 }
 0x8e5   :  { %13429 = vmatpush3.msra.mxu1 %v11000_v41  ;;  %13448 = vmatpush3.msra.mxu0 %v17848_v42 }
 0x8e6   :  { %13430 = vmatprep.subr.mxu1 %v22009_v0  ;;  %13449 = vmatprep.subr.mxu0 %v22009_v0 }
 0x8e7   :  { %13431 = vmatpush3.msra.mxu1 %v10999_v11  ;;  %13450 = vmatpush3.msra.mxu0 %v17859_v59 }
 0x8e8   :  { %13432 = vmatprep.subr.mxu1 %v22009_v0  ;;  %13451 = vmatprep.subr.mxu0 %v22009_v0 }
 0x8e9   :  { %13434 = vmatprep.mubr.msk.f32.mxu1 %vm16152_vm0, %v22009_v0  ;;  %13453 = vmatprep.mubr.msk.f32.mxu0 %vm16152_vm0, %v22009_v0 }
 0x8ea   :  { %13433 = vmatpush3.msra.mxu1 %v10998_v6  ;;  %13452 = vmatpush3.msra.mxu0 %v17877_v8 }
 0x8eb   :  { %13456 = vmatprep.subr.mxu1 %v22009_v0  ;;  %13475 = vmatprep.subr.mxu0 %v22009_v0 }
 0x99a   :  { %v3791_v7 = vpop.f32.mrf.mxu0  ;;  %v3872_v9 = vpop.f32.mrf.mxu1 }
 0x99b   :  { %v3792_v61 = vadd.f32 %v10991_v4, %v3791_v7  ;;  %v3873_v44 = vadd.f32 %v10996_v20, %v3872_v9  ;;  %v4312_v20 = vld [vmem:[%s21963_s16] sm:$0x1]  ;;  %s16166_s16 = smov 64  }
 0x99c   :  { %v13410_v12 = vpop.f32.mrf.mxu0  ;;  %v13417_v14 = vpop.f32.mrf.mxu1 }
 0x99d   :  { %13435 = vmatmul.mubr.msk.f32.vlgmr.msra.gmra.mxu1 %vm217_vm1, %v3792_v61  ;;  %13454 = vmatmul.mubr.msk.f32.vlgmr.msra.gmra.mxu0 %vm217_vm1, %v3792_v61 }
 0x99e   :  { %13457 = vmatpush3.msra.mxu1 %v3883_v10  ;;  %13476 = vmatpush3.msra.mxu0 %v11005_v33 }
 0x99f   :  { %13458 = vmatprep.subr.mxu1 %v22009_v0  ;;  %13477 = vmatprep.subr.mxu0 %v22009_v0 }
 0x9a0   :  { %13459 = vmatpush3.msra.mxu1 %v3882_v15  ;;  %13478 = vmatpush3.msra.mxu0 %v17798_v35  ;;  %v17991_v15 = vld [vmem:[%s21965_s18 + $0x78] sm:$0xff] }
 0x9a1   :  { %13460 = vmatprep.subr.mxu1 %v22009_v0  ;;  %13479 = vmatprep.subr.mxu0 %v22009_v0 }
 0x9a2   :  { %13461 = vmatpush3.msra.mxu1 %v3881_v16  ;;  %13480 = vmatpush3.msra.mxu0 %v11003_v5  ;;  %v17996_v16 = vld [vmem:[%s21965_s18 + $0xb8] sm:$0xff] }
 0x9a3   :  { %13462 = vmatprep.subr.mxu1 %v22009_v0  ;;  %13481 = vmatprep.subr.mxu0 %v22009_v0 }
 0x9a4   :  { %13463 = vmatpush3.msra.mxu1 %v3880_v17  ;;  %13482 = vmatpush3.msra.mxu0 %v11002_v37  ;;  %v18001_v17 = vld [vmem:[%s21965_s18 + $0x70] sm:$0xff] }
 0x9a5   :  { %13464 = vmatprep.subr.mxu1 %v22009_v0  ;;  %13483 = vmatprep.subr.mxu0 %v22009_v0 }
 0x9a6   :  { %13465 = vmatpush3.msra.mxu1 %v3879_v18  ;;  %13484 = vmatpush3.msra.mxu0 %v11001_v39  ;;  %v18008_v18 = vld [vmem:[%s21965_s18 + $0xb0] sm:$0xff] }
 0x9a7   :  { %13466 = vmatprep.subr.mxu1 %v22009_v0  ;;  %13485 = vmatprep.subr.mxu0 %v22009_v0 }
 0x9a8   :  { %13467 = vmatpush3.msra.mxu1 %v3878_v56  ;;  %13486 = vmatpush3.msra.mxu0 %v11000_v41  ;;  %v18019_v56 = vld [vmem:[%s21965_s18 + $0x68] sm:$0xff] }
 0x9a9   :  { %13468 = vmatprep.subr.mxu1 %v22009_v0  ;;  %13487 = vmatprep.subr.mxu0 %v22009_v0 }
 0x9aa   :  { %13469 = vmatpush3.msra.mxu1 %v3877_v19  ;;  %13488 = vmatpush3.msra.mxu0 %v10999_v11  ;;  %v18024_v19 = vld [vmem:[%s21965_s18 + $0xa8] sm:$0xff] }
 0x9ab   :  { %13470 = vmatprep.subr.mxu1 %v22009_v0  ;;  %13489 = vmatprep.subr.mxu0 %v22009_v0 }
 0x9ac   :  { %13471 = vmatpush3.msra.mxu1 %v3876_v21  ;;  %13472 = vmatprep.mubr.msk.f32.mxu1 %vm16152_vm0, %v22009_v0  ;;  %v18036_v21 = vld [vmem:[%s21965_s18 + $0x60] sm:$0xff] }
 0x9ad   :  { %13490 = vmatpush3.msra.mxu0 %v10998_v6  ;;  %13491 = vmatprep.mubr.msk.f32.mxu0 %vm16152_vm0, %v22009_v0 }
 0x9ae   :  { %13473 = vmatmul.mubr.msk.f32.vlgmr.msra.gmra.mxu1 %vm217_vm1, %v3873_v44  ;;  %13492 = vmatmul.mubr.msk.f32.vlgmr.msra.gmra.mxu0 %vm217_vm1, %v3873_v44 }
 0x9af   :  { %13494 = vmatprep.subr.mxu1 %v22009_v0  ;;  %13510 = vmatprep.mubr.msk.f32.mxu1 %vm16152_vm0, %v22009_v0 }
 0x9b0   :  { %13495 = vmatpush3.msra.mxu1 %v17791_v34  ;;  %13513 = vmatprep.subr.mxu0 %v22009_v0 }
 0x9b1   :  { %13496 = vmatprep.subr.mxu1 %v22009_v0  ;;  %13529 = vmatprep.mubr.msk.f32.mxu0 %vm16152_vm0, %v22009_v0 }
 0x9b2   :  { %13497 = vmatpush3.msra.mxu1 %v17803_v36  ;;  %13514 = vmatpush3.msra.mxu0 %v17991_v15 }
 0x9b3   :  { %13498 = vmatprep.subr.mxu1 %v22009_v0  ;;  %13515 = vmatprep.subr.mxu0 %v22009_v0 }
 0x9b4   :  { %13499 = vmatpush3.msra.mxu1 %v17814_v13  ;;  %13516 = vmatpush3.msra.mxu0 %v18001_v17 }
 0x9b5   :  { %13500 = vmatprep.subr.mxu1 %v22009_v0  ;;  %13517 = vmatprep.subr.mxu0 %v22009_v0 }
 0x9b6   :  { %13501 = vmatpush3.msra.mxu1 %v17826_v38  ;;  %13518 = vmatpush3.msra.mxu0 %v18019_v56 }
 0x9b7   :  { %13502 = vmatprep.subr.mxu1 %v22009_v0  ;;  %13519 = vmatprep.subr.mxu0 %v22009_v0 }
 0x9b8   :  { %13503 = vmatpush3.msra.mxu1 %v17837_v40  ;;  %13520 = vmatpush3.msra.mxu0 %v18036_v21 }
 0x9b9   :  { %13504 = vmatprep.subr.mxu1 %v22009_v0  ;;  %13521 = vmatprep.subr.mxu0 %v22009_v0 }
 0x9ba   :  { %13505 = vmatpush3.msra.mxu1 %v17848_v42 }
 0x9bb   :  { %13506 = vmatprep.subr.mxu1 %v22009_v0 }
 0x9bc   :  { %13507 = vmatpush3.msra.mxu1 %v17859_v59 }
 0x9bd   :  { %13508 = vmatprep.subr.mxu1 %v22009_v0 }
 0x9be   :  { %13509 = vmatpush3.msra.mxu1 %v17877_v8 }
 0x9bf   :  { %13511 = vmatmul.mubr.msk.f32.vlgmr.msra.gmra.mxu1 %vm217_vm1, %v3873_v44  ;;  %13532 = vmatprep.subr.mxu1 %v22009_v0  ;;  %v18041_v44 = vld [vmem:[%s21965_s18 + $0xa0] sm:$0xff] }
 0x9c0   :  { %13548 = vmatprep.mubr.msk.f32.mxu1 %vm16152_vm0, %v22009_v0  ;;  %13533 = vmatpush3.msra.mxu1 %v17996_v16 }
 0x9c1   :  { %13534 = vmatprep.subr.mxu1 %v22009_v0 }
 0x9c2   :  { %13535 = vmatpush3.msra.mxu1 %v18008_v18 }
 0x9c3   :  { %13536 = vmatprep.subr.mxu1 %v22009_v0 }
 0x9c4   :  { %13537 = vmatpush3.msra.mxu1 %v18024_v19 }
 0x9c5   :  { %13538 = vmatprep.subr.mxu1 %v22009_v0 }
 0x9c6   :  { %13539 = vmatpush3.msra.mxu1 %v18041_v44 }
 0x9c7   :  { %13540 = vmatprep.subr.mxu1 %v22009_v0 }
 0xa5d   :  { %v17960_v45 = vpop.f32.mrf.mxu1  ;;  %v4041_v47 = vpop.f32.mrf.mxu0 }
 0xa5e   :  { %v4258_v1 = vmul.f32 %v17960_v45, %v17960_v45 }
 0xa5f   :  { %v13436_v48 = vpop.f32.mrf.mxu1  ;;  %v13455_v49 = vpop.f32.mrf.mxu0 }
 0xa60   :  { %v18050_v48 = vld [vmem:[%s21965_s18 + $0x58] sm:$0xff] }
 0xa61   :  { %v18055_v49 = vld [vmem:[%s21965_s18 + $0x98] sm:$0xff]  ;;  %13522 = vmatpush3.msra.mxu0 %v18050_v48 }
 0xa62   :  { %13541 = vmatpush3.msra.mxu1 %v18055_v49  ;;  %13523 = vmatprep.subr.mxu0 %v22009_v0 }
 0xa63   :  { %13542 = vmatprep.subr.mxu1 %v22009_v0 }
 0xa6e   :  { %v4114_v51 = vpop.f32.mrf.mxu1  ;;  %v17962_v53 = vpop.f32.mrf.mxu0 }
 0xa6f   :  { %v17964_v62 = vadd.f32 %v4114_v51, %v4041_v47  ;;  %v4263_v3 = vmul.f32 %v17962_v53, %v17962_v53 }
 0xa70   :  { %v13474_v55 = vpop.f32.mrf.mxu1  ;;  %v13493_v57 = vpop.f32.mrf.mxu0 }
 0xa71   :  { %v4260_v63 = vmul.f32 %v17964_v62, %v17964_v62  ;;  %v4259_v2 = vadd.f32 %v17964_v62, %v17960_v45  ;;  %v4316_v55 = vld [vmem:[%s21964_s17] sm:$0x1]  ;;  %v18067_v57 = vld [vmem:[%s21965_s18 + $0x50] sm:$0xff] }
 0xa72   :  { %13524 = vmatpush3.msra.mxu0 %v18067_v57 }
 0xa73   :  { %v4261_v50 = vadd.f32 %v4260_v63, %v4258_v1  ;;  %v4262_v54 = vadd.f32 %v4259_v2, %v17962_v53  ;;  %v18072_v63 = vld [vmem:[%s21965_s18 + $0x90] sm:$0xff]  ;;  %13525 = vmatprep.subr.mxu0 %v22009_v0 }
 0xa74   :  { %13543 = vmatpush3.msra.mxu1 %v18072_v63 }
 0xa75   :  { %v4264_v43 = vadd.f32 %v4263_v3, %v4261_v50  ;;  %v18080_v50 = vld [vmem:[%s21965_s18 + $0x48] sm:$0xff]  ;;  %13544 = vmatprep.subr.mxu1 %v22009_v0 }
 0xa76   :  { %13526 = vmatpush3.msra.mxu0 %v18080_v50 }
 0xa77   :  { %13527 = vmatprep.subr.mxu0 %v22009_v0 }
 0xa7f   :  { %v17975_v52 = vpop.f32.mrf.mxu1 }
 0xa80   :  { %v4265_v46 = vadd.f32 %v4262_v54, %v17975_v52  ;;  %v4266_v23 = vmul.f32 %v17975_v52, %v17975_v52  ;;  %v18085_v54 = vld [vmem:[%s21965_s18 + $0x88] sm:$0xff] }
 0xa81   :  { %v13512_v24 = vpop.f32.mrf.mxu1  ;;  %13545 = vmatpush3.msra.mxu1 %v18085_v54 }
 0xa82   :  { %v4267_v25 = vadd.f32 %v4266_v23, %v4264_v43  ;;  %4269 = vrot.lane.b32.xlu1 %v4265_v46, %s16153_s8  ;;  %v18094_v43 = vld [vmem:[%s21965_s18 + $0x40] sm:$0xff]  ;;  %13546 = vmatprep.subr.mxu1 %v22009_v0 }
 0xa83   :  { %13528 = vmatpush3.msra.mxu0 %v18094_v43 }
 0xa84   :  { %4274 = vrot.lane.b32.xlu0 %v4267_v25, %s16153_s8  ;;  %13551 = vmatprep.subr.mxu0 %v22009_v0 }
 0xa86   :  { %4278 = vrot.lane.b32.xlu1 %v4265_v46, %s16156_s1 }
 0xa88   :  { %4282 = vrot.lane.b32.xlu0 %v4267_v25, %s16156_s1 }
 0xa8a   :  { %4286 = vrot.lane.b32.xlu1 %v4265_v46, %s16158_s12 }
 0xa8c   :  { %4290 = vrot.lane.b32.xlu0 %v4267_v25, %s16158_s12 }
 0xaf4   :  { %v4270_v26 = vpop.permute.xlu1 %4269 }
 0xaf5   :  { %v4272_v29 = vadd.f32 %v4270_v26, %v4265_v46  ;;  %v18099_v46 = vld [vmem:[%s21965_s18 + $0x80] sm:$0xff] }
 0xaf6   :  { %v4275_v27 = vpop.permute.xlu0 %4274  ;;  %13547 = vmatpush3.msra.mxu1 %v18099_v46 }
 0xaf7   :  { %v4277_v30 = vadd.f32 %v4275_v27, %v4267_v25  ;;  %13570 = vmatprep.subr.mxu1 %v22009_v0 }
 0xaf8   :  { %v4279_v28 = vpop.permute.xlu1 %4278 }
 0xaf9   :  { %v4281_v31 = vadd.f32 %v4279_v28, %v4272_v29 }
 0xafa   :  { %v4283_v60 = vpop.permute.xlu0 %4282 }
 0xafb   :  { %v4285_v33 = vadd.f32 %v4283_v60, %v4277_v30 }
 0xafc   :  { %v4287_v32 = vpop.permute.xlu1 %4286 }
 0xafd   :  { %v4289_v34 = vadd.f32 %v4287_v32, %v4281_v31 }
 0xafe   :  { %v4291_v35 = vpop.permute.xlu0 %4290 }
 0xaff   :  { %v4294_v36 = vsel %vm2970_vm12, %v4289_v34, 0.0  ;;  %v4293_v5 = vadd.f32 %v4291_v35, %v4285_v33 }
 0xb00   :  { %v4295_v13 = vrot.slane %v4294_v36, 4 }
 0xb01   :  { %v4301_v37 = vsel %vm2970_vm12, %v4293_v5, 0.0 }
 0xb02   :  { %v4296_v38 = vadd.f32 %v4295_v13, %v4294_v36  ;;  %v4302_v39 = vrot.slane %v4301_v37, 4 }
 0xb04   :  { %v4297_v40 = vrot.slane %v4296_v38, 2  ;;  %v4303_v41 = vadd.f32 %v4302_v39, %v4301_v37 }
 0xb06   :  { %v4298_v42 = vadd.f32 %v4297_v40, %v4296_v38  ;;  %v4304_v11 = vrot.slane %v4303_v41, 2  ;;  %v18137_v40 = vld [vmem:[%s21965_s18 + $0x38] sm:$0xff] }
 0xb08   :  { %v4299_v59 = vrot.slane %v4298_v42, 1  ;;  %v4305_v6 = vadd.f32 %v4304_v11, %v4303_v41 }
 0xb0a   :  { %v4300_v8 = vadd.f32 %v4299_v59, %v4298_v42  ;;  %v4306_v4 = vrot.slane %v4305_v6, 1  ;;  %v18162_v42 = vld [vmem:[%s21965_s18 + $0x20] sm:$0xff]  ;;  %v18173_v59 = vld [vmem:[%s21965_s18 + $0x18] sm:$0xff] }
 0xb0c   :  { %v4308_v7 = vmul.f32 0.03125, %v4300_v8  ;;  %v4307_v9 = vadd.f32 %v4306_v4, %v4305_v6  ;;  %v18192_v8 = vld [vmem:[%s21965_s18 + $0x8] sm:$0xff]  ;;  %v18201_v4 = vld [vmem:[%s21965_s18] sm:$0xff] }
 0xb0e   :  { %v4310_v61 = vmul.f32 %v4308_v7, %v4308_v7  ;;  %v4309_v10 = vmul.f32 0.03125, %v4307_v9 }
 0xb10   :  { %v4311_v12 = vsub.f32 %v4309_v10, %v4310_v61 }
 0xb12   :  { %v4313_v14 = vadd.f32 1e-05, %v4311_v12 }
 0xb14   :  { %15803 = vrsqrt.f32 %v4313_v14 }
 0xb21   :  { %v15804_v47 = vpop.eup %15803 }
 0xb22   :  { %v4315_v51 = vmul.f32 %v15804_v47, %v4312_v20 }
 0xb24   :  { %v4323_v1 = vrot.slane %v4315_v51, %v17003_v58  ;;  %v4317_v2 = vmul.f32 %v4315_v51, %v4308_v7 }
 0xb26   :  { %4327 = vrot.lane.b32.xlu0 %v4323_v1, %s16162_s11  ;;  %4324 = vrot.lane.b32.xlu1 %v4323_v1, %s16160_s10  ;;  %v4318_v3 = vsub.f32 %v4316_v55, %v4317_v2 }
 0xb28   :  { %v4340_v23 = vrot.slane %v4318_v3, %v17003_v58 }
 0xb2a   :  { %4330 = vrot.lane.b32.xlu1 %v4323_v1, %s16164_s3  ;;  %4341 = vrot.lane.b32.xlu0 %v4340_v23, %s16160_s10 }
 0xb2e   :  { %4344 = vrot.lane.b32.xlu1 %v4340_v23, %s16162_s11  ;;  %4347 = vrot.lane.b32.xlu0 %v4340_v23, %s16164_s3 }
 0xb98   :  { %v4328_v24 = vpop.permute.xlu0 %4327  ;;  %v4325_v25 = vpop.permute.xlu1 %4324 }
 0xb99   :  { %v4333_v26 = vsel %vm2018_vm4, %v4315_v51, %v4325_v25 }
 0xb9a   :  { %v4334_v27 = vsel %vm2022_vm6, %v4333_v26, %v4328_v24 }
 0xb9c   :  { %v4331_v28 = vpop.permute.xlu1 %4330  ;;  %v4342_v29 = vpop.permute.xlu0 %4341 }
 0xb9d   :  { %v4335_v60 = vsel %vm2026_vm8, %v4334_v27, %v4331_v28  ;;  %v4350_v31 = vsel %vm2018_vm4, %v4318_v3, %v4342_v29 }
 0xb9e   :  { %v18118_v30 = vrot.slane %v4335_v60, %v17003_v58 }
 0xba0   :  { %v4345_v32 = vpop.permute.xlu1 %4344  ;;  %v4348_v33 = vpop.permute.xlu0 %4347  ;;  %v4357_v36 = vmul.f32 %v18118_v30, %v17960_v45  ;;  %v4376_v5 = vmul.f32 %v18118_v30, %v17975_v52  ;;  %v18144_v45 = vld [vmem:[%s21965_s18 + $0x30] sm:$0xff]  ;;  %v18153_v52 = vld [vmem:[%s21965_s18 + $0x28] sm:$0xff]  ;;  %v4366_v11 = vmul.f32 %v18118_v30, %v17964_v62  ;;  %v4371_v61 = vmul.f32 %v18118_v30, %v17962_v53 }
 0xba1   :  { %v4351_v34 = vsel %vm2022_vm6, %v4350_v31, %v4345_v32  ;;  %v18182_v62 = vld [vmem:[%s21965_s18 + $0x10] sm:$0xff]  ;;  %s22061_s18 = smov 104  }
 0xba2   :  { %v4352_v35 = vsel %vm2026_vm8, %v4351_v34, %v4348_v33 }
 0xba3   :  { %v18128_v13 = vrot.slane %v4352_v35, %v17003_v58 }
 0xba5   :  { %v4362_v37 = vadd.f32 %v18128_v13, %v4357_v36  ;;  %v18132_v38 = vadd.f32 %v4376_v5, %v18128_v13  ;;  %v4367_v6 = vadd.f32 %v4366_v11, %v18128_v13  ;;  %v4372_v10 = vadd.f32 %v4371_v61, %v18128_v13 }
 0xba7   :  { %vm4363_vm15 = vcmp.gt.f32.partialorder %v4362_v37, 0.0  ;;  %v4364_v39 = vmul.f32 0.01, %v4362_v37  ;;  %v4369_v7 = vmul.f32 0.01, %v4367_v6  ;;  %vm4368_vm10 = vcmp.gt.f32.partialorder %v4367_v6, 0.0 }
 0xba8   :  { %v4374_v53 = vmul.f32 0.01, %v4372_v10  ;;  %vm4373_vm11 = vcmp.gt.f32.partialorder %v4372_v10, 0.0  ;;  %v4379_v14 = vmul.f32 0.01, %v18132_v38  ;;  %vm4378_vm13 = vcmp.gt.f32.partialorder %v18132_v38, 0.0 }
 0xba9   :  { %v4365_v41 = vsel %vm4363_vm15, %v4362_v37, %v4364_v39  ;;  %v4370_v9 = vsel %vm4368_vm10, %v4367_v6, %v4369_v7 }
 0xbaa   :  { %13530 = vmatmul.mubr.msk.f32.vlgmr.msra.gmra.mxu0 %vm217_vm1, %v4365_v41  ;;  %13549 = vmatmul.mubr.msk.f32.vlgmr.msra.gmra.mxu1 %vm217_vm1, %v4365_v41  ;;  %v4375_v12 = vsel %vm4373_vm11, %v4372_v10, %v4374_v53 }
 0xbab   :  { %13552 = vmatpush3.msra.mxu0 %v18137_v40  ;;  %13571 = vmatpush3.msra.mxu1 %v17991_v15 }
 0xbac   :  { %13553 = vmatprep.subr.mxu0 %v22009_v0  ;;  %13572 = vmatprep.subr.mxu1 %v22009_v0 }
 0xbad   :  { %13554 = vmatpush3.msra.mxu0 %v18144_v45  ;;  %13573 = vmatpush3.msra.mxu1 %v18001_v17 }
 0xbae   :  { %13555 = vmatprep.subr.mxu0 %v22009_v0  ;;  %13574 = vmatprep.subr.mxu1 %v22009_v0 }
 0xbaf   :  { %13556 = vmatpush3.msra.mxu0 %v18153_v52  ;;  %13575 = vmatpush3.msra.mxu1 %v18019_v56 }
 0xbb0   :  { %13557 = vmatprep.subr.mxu0 %v22009_v0  ;;  %13576 = vmatprep.subr.mxu1 %v22009_v0 }
 0xbb1   :  { %13558 = vmatpush3.msra.mxu0 %v18162_v42  ;;  %13577 = vmatpush3.msra.mxu1 %v18036_v21 }
 0xbb2   :  { %13559 = vmatprep.subr.mxu0 %v22009_v0  ;;  %13578 = vmatprep.subr.mxu1 %v22009_v0 }
 0xbb3   :  { %13560 = vmatpush3.msra.mxu0 %v18173_v59  ;;  %13579 = vmatpush3.msra.mxu1 %v18050_v48 }
 0xbb4   :  { %13561 = vmatprep.subr.mxu0 %v22009_v0  ;;  %13580 = vmatprep.subr.mxu1 %v22009_v0 }
 0xbb5   :  { %13562 = vmatpush3.msra.mxu0 %v18182_v62  ;;  %13581 = vmatpush3.msra.mxu1 %v18067_v57 }
 0xbb6   :  { %13563 = vmatprep.subr.mxu0 %v22009_v0  ;;  %13582 = vmatprep.subr.mxu1 %v22009_v0 }
 0xbb7   :  { %13564 = vmatpush3.msra.mxu0 %v18192_v8  ;;  %13583 = vmatpush3.msra.mxu1 %v18080_v50 }
 0xbb8   :  { %13565 = vmatprep.subr.mxu0 %v22009_v0  ;;  %13584 = vmatprep.subr.mxu1 %v22009_v0 }
 0xbb9   :  { %13566 = vmatpush3.msra.mxu0 %v18201_v4  ;;  %13567 = vmatprep.mubr.msk.f32.mxu0 %vm16152_vm0, %v22009_v0 }
 0xbba   :  { %13585 = vmatpush3.msra.mxu1 %v18094_v43  ;;  %13586 = vmatprep.mubr.msk.f32.mxu1 %vm16152_vm0, %v22009_v0 }
 0xbbb   :  { %13568 = vmatmul.mubr.msk.f32.vlgmr.msra.gmra.mxu0 %vm217_vm1, %v4370_v9  ;;  %13587 = vmatmul.mubr.msk.f32.vlgmr.msra.gmra.mxu1 %vm217_vm1, %v4370_v9 }
 0xbbc   :  { %13589 = vmatprep.subr.mxu0 %v22009_v0  ;;  %13608 = vmatprep.subr.mxu1 %v22009_v0 }
 0xbbd   :  { %13590 = vmatpush3.msra.mxu0 %v17996_v16  ;;  %13609 = vmatpush3.msra.mxu1 %v18137_v40 }
 0xbbe   :  { %13591 = vmatprep.subr.mxu0 %v22009_v0  ;;  %13610 = vmatprep.subr.mxu1 %v22009_v0 }
 0xbbf   :  { %13592 = vmatpush3.msra.mxu0 %v18008_v18  ;;  %13611 = vmatpush3.msra.mxu1 %v18144_v45 }
 0xbc0   :  { %13593 = vmatprep.subr.mxu0 %v22009_v0  ;;  %13612 = vmatprep.subr.mxu1 %v22009_v0 }
 0xbc1   :  { %13594 = vmatpush3.msra.mxu0 %v18024_v19  ;;  %13613 = vmatpush3.msra.mxu1 %v18153_v52 }
 0xbc2   :  { %13595 = vmatprep.subr.mxu0 %v22009_v0  ;;  %13614 = vmatprep.subr.mxu1 %v22009_v0 }
 0xbc3   :  { %13596 = vmatpush3.msra.mxu0 %v18041_v44  ;;  %13615 = vmatpush3.msra.mxu1 %v18162_v42 }
 0xbc4   :  { %13597 = vmatprep.subr.mxu0 %v22009_v0  ;;  %13616 = vmatprep.subr.mxu1 %v22009_v0 }
 0xbc5   :  { %13598 = vmatpush3.msra.mxu0 %v18055_v49  ;;  %13617 = vmatpush3.msra.mxu1 %v18173_v59 }
 0xbc6   :  { %13599 = vmatprep.subr.mxu0 %v22009_v0  ;;  %13618 = vmatprep.subr.mxu1 %v22009_v0 }
 0xbc7   :  { %13600 = vmatpush3.msra.mxu0 %v18072_v63  ;;  %13619 = vmatpush3.msra.mxu1 %v18182_v62 }
 0xbc8   :  { %13601 = vmatprep.subr.mxu0 %v22009_v0  ;;  %13620 = vmatprep.subr.mxu1 %v22009_v0 }
 0xbc9   :  { %13602 = vmatpush3.msra.mxu0 %v18085_v54  ;;  %13621 = vmatpush3.msra.mxu1 %v18192_v8 }
 0xbca   :  { %13603 = vmatprep.subr.mxu0 %v22009_v0  ;;  %13622 = vmatprep.subr.mxu1 %v22009_v0 }
 0xbcb   :  { %13604 = vmatpush3.msra.mxu0 %v18099_v46  ;;  %13605 = vmatprep.mubr.msk.f32.mxu0 %vm16152_vm0, %v22009_v0 }
 0xbcc   :  { %13623 = vmatpush3.msra.mxu1 %v18201_v4  ;;  %13624 = vmatprep.mubr.msk.f32.mxu1 %vm16152_vm0, %v22009_v0 }
 0xbcd   :  { %13606 = vmatmul.mubr.msk.f32.vlgmr.msra.gmra.mxu0 %vm217_vm1, %v4370_v9  ;;  %13625 = vmatmul.mubr.msk.f32.vlgmr.msra.gmra.mxu1 %vm217_vm1, %v4375_v12 }
 0xbce   :  { %13627 = vmatprep.subr.mxu0 %v22009_v0  ;;  %13646 = vmatprep.subr.mxu1 %v22009_v0 }
 0xbcf   :  { %13628 = vmatpush3.msra.mxu0 %v17991_v15  ;;  %13647 = vmatpush3.msra.mxu1 %v17996_v16 }
 0xbd0   :  { %13629 = vmatprep.subr.mxu0 %v22009_v0  ;;  %13648 = vmatprep.subr.mxu1 %v22009_v0 }
 0xbd1   :  { %13630 = vmatpush3.msra.mxu0 %v18001_v17  ;;  %13649 = vmatpush3.msra.mxu1 %v18008_v18 }
 0xbd2   :  { %13631 = vmatprep.subr.mxu0 %v22009_v0  ;;  %13650 = vmatprep.subr.mxu1 %v22009_v0 }
 0xbd3   :  { %13632 = vmatpush3.msra.mxu0 %v18019_v56  ;;  %13651 = vmatpush3.msra.mxu1 %v18024_v19 }
 0xbd4   :  { %13633 = vmatprep.subr.mxu0 %v22009_v0  ;;  %13652 = vmatprep.subr.mxu1 %v22009_v0 }
 0xbd5   :  { %13634 = vmatpush3.msra.mxu0 %v18036_v21  ;;  %13653 = vmatpush3.msra.mxu1 %v18041_v44 }
 0xbd6   :  { %13635 = vmatprep.subr.mxu0 %v22009_v0  ;;  %13654 = vmatprep.subr.mxu1 %v22009_v0 }
 0xbd7   :  { %13636 = vmatpush3.msra.mxu0 %v18050_v48  ;;  %13655 = vmatpush3.msra.mxu1 %v18055_v49 }
 0xbd8   :  { %13637 = vmatprep.subr.mxu0 %v22009_v0  ;;  %13656 = vmatprep.subr.mxu1 %v22009_v0 }
 0xbd9   :  { %13638 = vmatpush3.msra.mxu0 %v18067_v57  ;;  %13657 = vmatpush3.msra.mxu1 %v18072_v63 }
 0xbda   :  { %13639 = vmatprep.subr.mxu0 %v22009_v0  ;;  %13658 = vmatprep.subr.mxu1 %v22009_v0 }
 0xbdb   :  { %13640 = vmatpush3.msra.mxu0 %v18080_v50  ;;  %13659 = vmatpush3.msra.mxu1 %v18085_v54 }
 0xbdc   :  { %13641 = vmatprep.subr.mxu0 %v22009_v0  ;;  %13660 = vmatprep.subr.mxu1 %v22009_v0 }
 0xbdd   :  { %13642 = vmatpush3.msra.mxu0 %v18094_v43  ;;  %13643 = vmatprep.mubr.msk.f32.mxu0 %vm16152_vm0, %v22009_v0 }
 0xbde   :  { %13661 = vmatpush3.msra.mxu1 %v18099_v46  ;;  %13662 = vmatprep.mubr.msk.f32.mxu1 %vm16152_vm0, %v22009_v0 }
 0xbdf   :  { %13644 = vmatmul.mubr.msk.f32.vlgmr.msra.gmra.mxu0 %vm217_vm1, %v4375_v12  ;;  %13663 = vmatmul.mubr.msk.f32.vlgmr.msra.gmra.mxu1 %vm217_vm1, %v4375_v12 }
 0xbe0   :  { %13665 = vmatprep.subr.mxu0 %v22009_v0  ;;  %13684 = vmatprep.subr.mxu1 %v22009_v0 }
 0xbe1   :  { %13666 = vmatpush3.msra.mxu0 %v18137_v40  ;;  %13685 = vmatpush3.msra.mxu1 %v17991_v15  ;;  %v4380_v15 = vsel %vm4378_vm13, %v18132_v38, %v4379_v14 }
 0xbe2   :  { %13667 = vmatprep.subr.mxu0 %v22009_v0  ;;  %13686 = vmatprep.subr.mxu1 %v22009_v0 }
 0xbe3   :  { %13668 = vmatpush3.msra.mxu0 %v18144_v45  ;;  %13687 = vmatpush3.msra.mxu1 %v18001_v17 }
 0xbe4   :  { %13669 = vmatprep.subr.mxu0 %v22009_v0  ;;  %13688 = vmatprep.subr.mxu1 %v22009_v0 }
 0xbe5   :  { %13670 = vmatpush3.msra.mxu0 %v18153_v52  ;;  %13689 = vmatpush3.msra.mxu1 %v18019_v56 }
 0xbe6   :  { %13671 = vmatprep.subr.mxu0 %v22009_v0  ;;  %13690 = vmatprep.subr.mxu1 %v22009_v0 }
 0xbe7   :  { %13672 = vmatpush3.msra.mxu0 %v18162_v42  ;;  %13691 = vmatpush3.msra.mxu1 %v18036_v21 }
 0xbe8   :  { %13673 = vmatprep.subr.mxu0 %v22009_v0  ;;  %13692 = vmatprep.subr.mxu1 %v22009_v0 }
 0xbe9   :  { %13674 = vmatpush3.msra.mxu0 %v18173_v59  ;;  %13693 = vmatpush3.msra.mxu1 %v18050_v48 }
 0xbea   :  { %13675 = vmatprep.subr.mxu0 %v22009_v0  ;;  %13694 = vmatprep.subr.mxu1 %v22009_v0 }
 0xbeb   :  { %13676 = vmatpush3.msra.mxu0 %v18182_v62  ;;  %13695 = vmatpush3.msra.mxu1 %v18067_v57 }
 0xbec   :  { %13677 = vmatprep.subr.mxu0 %v22009_v0  ;;  %13696 = vmatprep.subr.mxu1 %v22009_v0 }
 0xbed   :  { %13678 = vmatpush3.msra.mxu0 %v18192_v8  ;;  %13697 = vmatpush3.msra.mxu1 %v18080_v50 }
 0xbee   :  { %13679 = vmatprep.subr.mxu0 %v22009_v0  ;;  %13698 = vmatprep.subr.mxu1 %v22009_v0 }
 0xbef   :  { %13680 = vmatpush3.msra.mxu0 %v18201_v4  ;;  %13681 = vmatprep.mubr.msk.f32.mxu0 %vm16152_vm0, %v22009_v0 }
 0xbf0   :  { %13699 = vmatpush3.msra.mxu1 %v18094_v43  ;;  %13700 = vmatprep.mubr.msk.f32.mxu1 %vm16152_vm0, %v22009_v0 }
 0xbf1   :  { %13682 = vmatmul.mubr.msk.f32.vlgmr.msra.gmra.mxu0 %vm217_vm1, %v4380_v15  ;;  %13701 = vmatmul.mubr.msk.f32.vlgmr.msra.gmra.mxu1 %vm217_vm1, %v4380_v15 }
 0xbf2   :  { %13703 = vmatprep.subr.mxu0 %v22009_v0  ;;  %13719 = vmatprep.mubr.msk.f32.mxu0 %vm16152_vm0, %v22009_v0 }
 0xbf3   :  { %13704 = vmatpush3.msra.mxu0 %v17996_v16  ;;  %13722 = vmatprep.subr.mxu1 %v22009_v0 }
 0xbf4   :  { %13705 = vmatprep.subr.mxu0 %v22009_v0  ;;  %13738 = vmatprep.mubr.msk.f32.mxu1 %vm16152_vm0, %v22009_v0 }
 0xbf5   :  { %13706 = vmatpush3.msra.mxu0 %v18008_v18 }
 0xbf6   :  { %13707 = vmatprep.subr.mxu0 %v22009_v0 }
 0xbf7   :  { %13708 = vmatpush3.msra.mxu0 %v18024_v19 }
 0xbf8   :  { %13709 = vmatprep.subr.mxu0 %v22009_v0 }
 0xbf9   :  { %13710 = vmatpush3.msra.mxu0 %v18041_v44 }
 0xbfa   :  { %13711 = vmatprep.subr.mxu0 %v22009_v0 }
 0xbfb   :  { %13712 = vmatpush3.msra.mxu0 %v18055_v49 }
 0xbfc   :  { %13713 = vmatprep.subr.mxu0 %v22009_v0 }
 0xbfd   :  { %13714 = vmatpush3.msra.mxu0 %v18072_v63 }
 0xbfe   :  { %13715 = vmatprep.subr.mxu0 %v22009_v0 }
 0xbff   :  { %13716 = vmatpush3.msra.mxu0 %v18085_v54 }
 0xc00   :  { %13717 = vmatprep.subr.mxu0 %v22009_v0 }
 0xc01   :  { %13718 = vmatpush3.msra.mxu0 %v18099_v46 }
 0xc02   :  { %13720 = vmatmul.mubr.msk.f32.vlgmr.msra.gmra.mxu0 %vm217_vm1, %v4380_v15  ;;  %13741 = vmatprep.subr.mxu0 %v22009_v0 }
 0xc03   :  { %13757 = vmatprep.mubr.msk.f32.mxu0 %vm16152_vm0, %v22009_v0 }
 0xc6a   :  { %v18360_v16 = vpop.f32.mrf.mxu0  ;;  %v4546_v17 = vpop.f32.mrf.mxu1 }
 0xc6b   :  { %v5189_v43 = vmul.f32 %v18360_v16, %v18360_v16 }
 0xc6c   :  { %v13531_v18 = vpop.f32.mrf.mxu0  ;;  %v13550_v56 = vpop.f32.mrf.mxu1 }
 0xc7b   :  { %v4619_v19 = vpop.f32.mrf.mxu0  ;;  %v18362_v20 = vpop.f32.mrf.mxu1 }
 0xc7c   :  { %v18366_v2 = vadd.f32 %v4619_v19, %v4546_v17  ;;  %v5194_v28 = vmul.f32 %v18362_v20, %v18362_v20 }
 0xc7d   :  { %v13569_v21 = vpop.f32.mrf.mxu0  ;;  %v13588_v44 = vpop.f32.mrf.mxu1 }
 0xc7e   :  { %v5191_v50 = vmul.f32 %v18366_v2, %v18366_v2  ;;  %v5190_v46 = vadd.f32 %v18366_v2, %v18360_v16 }
 0xc80   :  { %v5192_v26 = vadd.f32 %v5191_v50, %v5189_v43  ;;  %v5193_v27 = vadd.f32 %v5190_v46, %v18362_v20 }
 0xc82   :  { %v5195_v30 = vadd.f32 %v5194_v28, %v5192_v26 }
 0xc8d   :  { %v4759_v47 = vpop.f32.mrf.mxu0  ;;  %v4832_v48 = vpop.f32.mrf.mxu1 }
 0xc8e   :  { %v18376_v23 = vadd.f32 %v4832_v48, %v4759_v47 }
 0xc8f   :  { %v13607_v49 = vpop.f32.mrf.mxu0  ;;  %v13626_v51 = vpop.f32.mrf.mxu1 }
 0xc90   :  { %v5197_v29 = vmul.f32 %v18376_v23, %v18376_v23  ;;  %v5196_v31 = vadd.f32 %v5193_v27, %v18376_v23 }
 0xc92   :  { %v5198_v33 = vadd.f32 %v5197_v29, %v5195_v30 }
 0xc9f   :  { %v18364_v55 = vpop.f32.mrf.mxu0  ;;  %v4972_v57 = vpop.f32.mrf.mxu1 }
 0xca0   :  { %v5200_v32 = vmul.f32 %v18364_v55, %v18364_v55  ;;  %v5199_v34 = vadd.f32 %v5196_v31, %v18364_v55 }
 0xca1   :  { %v13645_v63 = vpop.f32.mrf.mxu0  ;;  %v13664_v1 = vpop.f32.mrf.mxu1 }
 0xca2   :  { %v5201_v36 = vadd.f32 %v5200_v32, %v5198_v33 }
 0xcb1   :  { %v5045_v54 = vpop.f32.mrf.mxu0  ;;  %v18370_v3 = vpop.f32.mrf.mxu1 }
 0xcb2   :  { %v18383_v60 = vadd.f32 %v5045_v54, %v4972_v57  ;;  %v5206_v38 = vmul.f32 %v18370_v3, %v18370_v3 }
 0xcb3   :  { %v13683_v24 = vpop.f32.mrf.mxu0  ;;  %v13702_v25 = vpop.f32.mrf.mxu1 }
 0xcb4   :  { %v5203_v35 = vmul.f32 %v18383_v60, %v18383_v60  ;;  %v5202_v5 = vadd.f32 %v5199_v34, %v18383_v60 }
 0xcb6   :  { %v5204_v13 = vadd.f32 %v5203_v35, %v5201_v36  ;;  %v5205_v37 = vadd.f32 %v5202_v5, %v18370_v3 }
 0xcb8   :  { %v5207_v40 = vadd.f32 %v5206_v38, %v5204_v13  ;;  %v5287_v38 = vld [vmem:[%s21966_s19] sm:$0x1]  ;;  %s22065_s19 = smov 24  }
 0xcc2   :  { %v18395_v39 = vpop.f32.mrf.mxu0 }
 0xcc3   :  { %v5208_v41 = vadd.f32 %v5205_v37, %v18395_v39  ;;  %v5209_v45 = vmul.f32 %v18395_v39, %v18395_v39 }
 0xcc4   :  { %v13721_v52 = vpop.f32.mrf.mxu0 }
 0xcc5   :  { %v5210_v42 = vadd.f32 %v5209_v45, %v5207_v40  ;;  %5212 = vrot.lane.b32.xlu1 %v5208_v41, %s16154_s2  ;;  %v5291_v45 = vld [vmem:[%s21967_s20] sm:$0x1]  ;;  %s22066_s20 = smov 40  }
 0xcc7   :  { %5217 = vrot.lane.b32.xlu0 %v5210_v42, %s16154_s2 }
 0xcc9   :  { %5221 = vrot.lane.b32.xlu1 %v5208_v41, %s16153_s8 }
 0xccb   :  { %5225 = vrot.lane.b32.xlu0 %v5210_v42, %s16153_s8 }
 0xccd   :  { %5229 = vrot.lane.b32.xlu1 %v5208_v41, %s22061_s18 }
 0xccf   :  { %5233 = vrot.lane.b32.xlu0 %v5210_v42, %s22061_s18 }
 0xcd1   :  { %5237 = vrot.lane.b32.xlu1 %v5208_v41, %s16156_s1 }
 0xcd3   :  { %5241 = vrot.lane.b32.xlu0 %v5210_v42, %s16156_s1 }
 0xcd5   :  { %5245 = vrot.lane.b32.xlu1 %v5208_v41, %s22062_s6 }
 0xcd7   :  { %5249 = vrot.lane.b32.xlu0 %v5210_v42, %s22062_s6 }
 0xcd9   :  { %5253 = vrot.lane.b32.xlu1 %v5208_v41, %s16158_s12 }
 0xcdb   :  { %5257 = vrot.lane.b32.xlu0 %v5210_v42, %s16158_s12 }
 0xcdd   :  { %5261 = vrot.lane.b32.xlu1 %v5208_v41, %s22063_s14 }
 0xcdf   :  { %5265 = vrot.lane.b32.xlu0 %v5210_v42, %s22063_s14 }
 0xd37   :  { %v5213_v11 = vpop.permute.xlu1 %5212 }
 0xd38   :  { %v5215_v9 = vadd.f32 %v5213_v11, %v5208_v41 }
 0xd39   :  { %v5218_v59 = vpop.permute.xlu0 %5217 }
 0xd3a   :  { %v5220_v10 = vadd.f32 %v5218_v59, %v5210_v42 }
 0xd3b   :  { %v5222_v62 = vpop.permute.xlu1 %5221 }
 0xd3c   :  { %v5224_v53 = vadd.f32 %v5222_v62, %v5215_v9  ;;  %v18433_v62 = vld [vmem:[#allocation11 + $0x78] sm:$0xff]  ;;  %v18451_v9 = vld [vmem:[#allocation11 + $0xa8] sm:$0xff] }
 0xd3d   :  { %v5226_v6 = vpop.permute.xlu0 %5225  ;;  %13723 = vmatpush3.msra.mxu1 %v18433_v62 }
 0xd3e   :  { %v5228_v14 = vadd.f32 %v5226_v6, %v5220_v10  ;;  %v18435_v6 = vld [vmem:[#allocation11 + $0xb8] sm:$0xff]  ;;  %13724 = vmatprep.subr.mxu1 %v22009_v0  ;;  %v18461_v10 = vld [vmem:[#allocation11 + $0xa0] sm:$0xff] }
 0xd3f   :  { %v5230_v8 = vpop.permute.xlu1 %5229  ;;  %13742 = vmatpush3.msra.mxu0 %v18435_v6 }
 0xd40   :  { %v5232_v15 = vadd.f32 %v5230_v8, %v5224_v53  ;;  %v18439_v8 = vld [vmem:[#allocation11 + $0x70] sm:$0xff]  ;;  %13743 = vmatprep.subr.mxu0 %v22009_v0  ;;  %v18467_v53 = vld [vmem:[#allocation11 + $0x58] sm:$0xff] }
 0xd41   :  { %v5234_v4 = vpop.permute.xlu0 %5233  ;;  %13725 = vmatpush3.msra.mxu1 %v18439_v8 }
 0xd42   :  { %v5236_v18 = vadd.f32 %v5234_v4, %v5228_v14  ;;  %v18441_v4 = vld [vmem:[#allocation11 + $0xb0] sm:$0xff]  ;;  %13726 = vmatprep.subr.mxu1 %v22009_v0 }
 0xd43   :  { %v5238_v7 = vpop.permute.xlu1 %5237  ;;  %13744 = vmatpush3.msra.mxu0 %v18441_v4  ;;  %v18477_v14 = vld [vmem:[#allocation11 + $0x50] sm:$0xff] }
 0xd44   :  { %v5240_v56 = vadd.f32 %v5238_v7, %v5232_v15  ;;  %v18449_v7 = vld [vmem:[#allocation11 + $0x68] sm:$0xff]  ;;  %13745 = vmatprep.subr.mxu0 %v22009_v0  ;;  %v18479_v15 = vld [vmem:[#allocation11 + $0x90] sm:$0xff] }
 0xd45   :  { %v5242_v61 = vpop.permute.xlu0 %5241  ;;  %13727 = vmatpush3.msra.mxu1 %v18449_v7  ;;  %13746 = vmatpush3.msra.mxu0 %v18451_v9 }
 0xd46   :  { %v5244_v21 = vadd.f32 %v5242_v61, %v5236_v18  ;;  %v18459_v61 = vld [vmem:[#allocation11 + $0x60] sm:$0xff]  ;;  %13728 = vmatprep.subr.mxu1 %v22009_v0  ;;  %13747 = vmatprep.subr.mxu0 %v22009_v0  ;;  %v18489_v18 = vld [vmem:[#allocation11 + $0x88] sm:$0xff] }
 0xd47   :  { %v5246_v12 = vpop.permute.xlu1 %5245  ;;  %13729 = vmatpush3.msra.mxu1 %v18459_v61  ;;  %13748 = vmatpush3.msra.mxu0 %v18461_v10 }
 0xd48   :  { %v5248_v44 = vadd.f32 %v5246_v12, %v5240_v56  ;;  %v18469_v12 = vld [vmem:[#allocation11 + $0x98] sm:$0xff]  ;;  %13730 = vmatprep.subr.mxu1 %v22009_v0  ;;  %13749 = vmatprep.subr.mxu0 %v22009_v0  ;;  %v18495_v56 = vld [vmem:[#allocation11 + $0x40] sm:$0xff] }
 0xd49   :  { %v5250_v17 = vpop.permute.xlu0 %5249  ;;  %13731 = vmatpush3.msra.mxu1 %v18467_v53  ;;  %13750 = vmatpush3.msra.mxu0 %v18469_v12 }
 0xd4a   :  { %v5252_v48 = vadd.f32 %v5250_v17, %v5244_v21  ;;  %13732 = vmatprep.subr.mxu1 %v22009_v0  ;;  %13751 = vmatprep.subr.mxu0 %v22009_v0  ;;  %v18487_v17 = vld [vmem:[#allocation11 + $0x48] sm:$0xff] }
 0xd4b   :  { %v5254_v19 = vpop.permute.xlu1 %5253  ;;  %13733 = vmatpush3.msra.mxu1 %v18477_v14  ;;  %13752 = vmatpush3.msra.mxu0 %v18479_v15 }
 0xd4c   :  { %v5256_v49 = vadd.f32 %v5254_v19, %v5248_v44  ;;  %13734 = vmatprep.subr.mxu1 %v22009_v0  ;;  %13753 = vmatprep.subr.mxu0 %v22009_v0  ;;  %v18497_v19 = vld [vmem:[#allocation11 + $0x80] sm:$0xff] }
 0xd4d   :  { %v5258_v47 = vpop.permute.xlu0 %5257  ;;  %13735 = vmatpush3.msra.mxu1 %v18487_v17  ;;  %13754 = vmatpush3.msra.mxu0 %v18489_v18 }
 0xd4e   :  { %v5260_v57 = vadd.f32 %v5258_v47, %v5252_v48  ;;  %13736 = vmatprep.subr.mxu1 %v22009_v0  ;;  %13755 = vmatprep.subr.mxu0 %v22009_v0 }
 0xd4f   :  { %v5262_v51 = vpop.permute.xlu1 %5261  ;;  %13737 = vmatpush3.msra.mxu1 %v18495_v56  ;;  %13756 = vmatpush3.msra.mxu0 %v18497_v19 }
 0xd50   :  { %v5264_v63 = vadd.f32 %v5262_v51, %v5256_v49  ;;  %13760 = vmatprep.subr.mxu1 %v22009_v0  ;;  %13779 = vmatprep.subr.mxu0 %v22009_v0 }
 0xd51   :  { %v5266_v1 = vpop.permute.xlu0 %5265 }
 0xd52   :  { %v5269_v50 = vsel %vm1963_vm2, %v5264_v63, 0.0  ;;  %v5268_v54 = vadd.f32 %v5266_v1, %v5260_v57 }
 0xd53   :  { %v5270_v43 = vrot.slane %v5269_v50, 4 }
 0xd54   :  { %v5276_v46 = vsel %vm1963_vm2, %v5268_v54, 0.0 }
 0xd55   :  { %v5271_v24 = vadd.f32 %v5270_v43, %v5269_v50  ;;  %v5277_v25 = vrot.slane %v5276_v46, 4 }
 0xd57   :  { %v5272_v26 = vrot.slane %v5271_v24, 2  ;;  %v5278_v27 = vadd.f32 %v5277_v25, %v5276_v46 }
 0xd59   :  { %v5273_v28 = vadd.f32 %v5272_v26, %v5271_v24  ;;  %v5279_v29 = vrot.slane %v5278_v27, 2 }
 0xd5b   :  { %v5274_v30 = vrot.slane %v5273_v28, 1  ;;  %v5280_v31 = vadd.f32 %v5279_v29, %v5278_v27 }
 0xd5d   :  { %v5275_v32 = vadd.f32 %v5274_v30, %v5273_v28  ;;  %v5281_v33 = vrot.slane %v5280_v31, 1 }
 0xd5f   :  { %v5283_v34 = vmul.f32 0.0078125, %v5275_v32  ;;  %v5282_v35 = vadd.f32 %v5281_v33, %v5280_v31 }
 0xd61   :  { %v5285_v36 = vmul.f32 %v5283_v34, %v5283_v34  ;;  %v5284_v5 = vmul.f32 0.0078125, %v5282_v35 }
 0xd63   :  { %v5286_v13 = vsub.f32 %v5284_v5, %v5285_v36 }
 0xd65   :  { %v5288_v37 = vadd.f32 1e-05, %v5286_v13 }
 0xd67   :  { %15805 = vrsqrt.f32 %v5288_v37 }
 0xd74   :  { %v15806_v40 = vpop.eup %15805 }
 0xd75   :  { %v18419_v41 = vmul.f32 %v15806_v40, %v5287_v38 }
 0xd77   :  { %v5298_v52 = vrot.slane %v18419_v41, %v17003_v58  ;;  %v5292_v42 = vmul.f32 %v18419_v41, %v5283_v34 }
 0xd79   :  { %5302 = vrot.lane.b32.xlu0 %v5298_v52, %s16160_s10  ;;  %5299 = vrot.lane.b32.xlu1 %v5298_v52, %s22064_s7  ;;  %v18429_v11 = vsub.f32 %v5291_v45, %v5292_v42 }
 0xd7b   :  { %v5331_v59 = vrot.slane %v18429_v11, %v17003_v58 }
 0xd7d   :  { %5305 = vrot.lane.b32.xlu1 %v5298_v52, %s22065_s19  ;;  %5332 = vrot.lane.b32.xlu0 %v5331_v59, %s22064_s7 }
 0xd81   :  { %5308 = vrot.lane.b32.xlu1 %v5298_v52, %s16162_s11  ;;  %5335 = vrot.lane.b32.xlu0 %v5331_v59, %s16160_s10 }
 0xd85   :  { %5311 = vrot.lane.b32.xlu1 %v5298_v52, %s22066_s20  ;;  %5338 = vrot.lane.b32.xlu0 %v5331_v59, %s22065_s19 }
 0xd89   :  { %5314 = vrot.lane.b32.xlu1 %v5298_v52, %s16164_s3  ;;  %5341 = vrot.lane.b32.xlu0 %v5331_v59, %s16162_s11 }
 0xd8d   :  { %5317 = vrot.lane.b32.xlu1 %v5298_v52, %s22067_s9  ;;  %5344 = vrot.lane.b32.xlu0 %v5331_v59, %s22066_s20 }
 0xd91   :  { %5347 = vrot.lane.b32.xlu1 %v5331_v59, %s16164_s3  ;;  %5350 = vrot.lane.b32.xlu0 %v5331_v59, %s22067_s9 }
 0xdeb   :  { %v5303_v21 = vpop.permute.xlu0 %5302  ;;  %v5300_v44 = vpop.permute.xlu1 %5299 }
 0xdec   :  { %v5320_v1 = vsel %vm2016_vm3, %v18419_v41, %v5300_v44 }
 0xded   :  { %v5321_v50 = vsel %vm2018_vm4, %v5320_v1, %v5303_v21 }
 0xdef   :  { %v5306_v47 = vpop.permute.xlu1 %5305  ;;  %v5333_v48 = vpop.permute.xlu0 %5332 }
 0xdf0   :  { %v5322_v46 = vsel %vm2020_vm5, %v5321_v50, %v5306_v47  ;;  %v5353_v26 = vsel %vm2016_vm3, %v18429_v11, %v5333_v48  ;;  %v18563_v47 = vld [vmem:[#allocation11 + $0x30] sm:$0xff]  ;;  %v18569_v48 = vld [vmem:[#allocation11 + $0x28] sm:$0xff]  ;;  %v18602_v50 = vld [vmem:[#allocation11] sm:$0xff] }
 0xdf3   :  { %v5309_v49 = vpop.permute.xlu1 %5308  ;;  %v5336_v51 = vpop.permute.xlu0 %5335 }
 0xdf4   :  { %v5323_v24 = vsel %vm2022_vm6, %v5322_v46, %v5309_v49  ;;  %v5354_v30 = vsel %vm2018_vm4, %v5353_v26, %v5336_v51  ;;  %v18575_v49 = vld [vmem:[#allocation11 + $0x20] sm:$0xff]  ;;  %v18581_v51 = vld [vmem:[#allocation11 + $0x18] sm:$0xff] }
 0xdf7   :  { %v5312_v57 = vpop.permute.xlu1 %5311  ;;  %v5339_v63 = vpop.permute.xlu0 %5338 }
 0xdf8   :  { %v5324_v25 = vsel %vm2024_vm7, %v5323_v24, %v5312_v57  ;;  %v5355_v32 = vsel %vm2020_vm5, %v5354_v30, %v5339_v63  ;;  %v18589_v63 = vld [vmem:[#allocation11 + $0x10] sm:$0xff] }
 0xdfb   :  { %v5315_v54 = vpop.permute.xlu1 %5314  ;;  %v5342_v43 = vpop.permute.xlu0 %5341 }
 0xdfc   :  { %v5325_v27 = vsel %vm2026_vm8, %v5324_v25, %v5315_v54  ;;  %v5356_v33 = vsel %vm2022_vm6, %v5355_v32, %v5342_v43 }
 0xdff   :  { %v5318_v28 = vpop.permute.xlu1 %5317  ;;  %v5345_v29 = vpop.permute.xlu0 %5344 }
 0xe00   :  { %v5326_v31 = vsel %vm2028_vm9, %v5325_v27, %v5318_v28  ;;  %v5357_v35 = vsel %vm2024_vm7, %v5356_v33, %v5345_v29 }
 0xe01   :  { %v18523_v34 = vrot.slane %v5326_v31, %v17003_v58 }
 0xe03   :  { %v5348_v36 = vpop.permute.xlu1 %5347  ;;  %v5351_v5 = vpop.permute.xlu0 %5350  ;;  %v5364_v40 = vmul.f32 %v18523_v34, %v18360_v16  ;;  %v5383_v41 = vmul.f32 %v18523_v34, %v18376_v23  ;;  %v5388_v45 = vmul.f32 %v18523_v34, %v18364_v55  ;;  %v5393_v52 = vmul.f32 %v18523_v34, %v18383_v60 }
 0xe04   :  { %v5358_v13 = vsel %vm2026_vm8, %v5357_v35, %v5348_v36  ;;  %v5398_v42 = vmul.f32 %v18523_v34, %v18370_v3  ;;  %v5403_v11 = vmul.f32 %v18523_v34, %v18395_v39  ;;  %v18559_v39 = vld [vmem:[#allocation11 + $0x38] sm:$0xff]  ;;  %v5373_v57 = vmul.f32 %v18523_v34, %v18366_v2  ;;  %v18596_v2 = vld [vmem:[#allocation11 + $0x8] sm:$0xff] }
 0xe05   :  { %v5359_v37 = vsel %vm2028_vm9, %v5358_v13, %v5351_v5  ;;  %v5378_v46 = vmul.f32 %v18523_v34, %v18362_v20 }
 0xe06   :  { %v18529_v38 = vrot.slane %v5359_v37, %v17003_v58 }
 0xe08   :  { %v5369_v59 = vadd.f32 %v18529_v38, %v5364_v40  ;;  %v18545_v21 = vadd.f32 %v5383_v41, %v18529_v38  ;;  %v18548_v16 = vadd.f32 %v5388_v45, %v18529_v38  ;;  %v18551_v23 = vadd.f32 %v5393_v52, %v18529_v38 }
 0xe09   :  { %v18554_v55 = vadd.f32 %v5398_v42, %v18529_v38  ;;  %v18557_v60 = vadd.f32 %v5403_v11, %v18529_v38  ;;  %v5374_v1 = vadd.f32 %v5373_v57, %v18529_v38  ;;  %v5379_v24 = vadd.f32 %v5378_v46, %v18529_v38 }
 0xe0a   :  { %vm5370_vm14 = vcmp.gt.f32.partialorder %v5369_v59, 0.0  ;;  %v5371_v3 = vmul.f32 0.01, %v5369_v59  ;;  %v5386_v26 = vmul.f32 0.01, %v18545_v21  ;;  %vm5385_vm11 = vcmp.gt.f32.partialorder %v18545_v21, 0.0 }
 0xe0b   :  { %v5376_v54 = vmul.f32 0.01, %v5374_v1  ;;  %vm5375_vm15 = vcmp.gt.f32.partialorder %v5374_v1, 0.0  ;;  %v5381_v20 = vmul.f32 0.01, %v5379_v24  ;;  %vm5380_vm10 = vcmp.gt.f32.partialorder %v5379_v24, 0.0 }
 0xe0c   :  { %v5372_v44 = vsel %vm5370_vm14, %v5369_v59, %v5371_v3  ;;  %v5387_v27 = vsel %vm5385_vm11, %v18545_v21, %v5386_v26  ;;  %v5391_v28 = vmul.f32 0.01, %v18548_v16  ;;  %vm5390_vm13 = vcmp.gt.f32.partialorder %v18548_v16, 0.0 }
 0xe0d   :  { %13739 = vmatmul.mubr.msk.f32.vlgmr.msra.gmra.mxu1 %vm217_vm1, %v5372_v44  ;;  %13758 = vmatmul.mubr.msk.f32.vlgmr.msra.gmra.mxu0 %vm217_vm1, %v5372_v44  ;;  %v5377_v43 = vsel %vm5375_vm15, %v5374_v1, %v5376_v54  ;;  %v5382_v25 = vsel %vm5380_vm10, %v5379_v24, %v5381_v20  ;;  %v5396_v30 = vmul.f32 0.01, %v18551_v23  ;;  %vm5395_vm14 = vcmp.gt.f32.partialorder %v18551_v23, 0.0 }
 0xe0e   :  { %13761 = vmatpush3.msra.mxu1 %v18559_v39  ;;  %13780 = vmatpush3.msra.mxu0 %v18433_v62  ;;  %v5392_v29 = vsel %vm5390_vm13, %v18548_v16, %v5391_v28  ;;  %v5401_v32 = vmul.f32 0.01, %v18554_v55  ;;  %vm5400_vm15 = vcmp.gt.f32.partialorder %v18554_v55, 0.0  ;;  %vm5405_vm10 = vcmp.gt.f32.partialorder %v18557_v60, 0.0 }
 0xe0f   :  { %13762 = vmatprep.subr.mxu1 %v22009_v0  ;;  %13781 = vmatprep.subr.mxu0 %v22009_v0  ;;  %v5397_v31 = vsel %vm5395_vm14, %v18551_v23, %v5396_v30  ;;  %vm7322_vm11 = vcmask 654336   ;;  %vm7324_vm13 = vcmask 719872   ;;  %vm7328_vm14 = vcmask 850944  }
 0xe10   :  { %13763 = vmatpush3.msra.mxu1 %v18563_v47  ;;  %13782 = vmatpush3.msra.mxu0 %v18439_v8  ;;  %v5402_v33 = vsel %vm5400_vm15, %v18554_v55, %v5401_v32  ;;  %vm10780_vm15 = vcmask 517120  }
 0xe11   :  { %13764 = vmatprep.subr.mxu1 %v22009_v0  ;;  %13783 = vmatprep.subr.mxu0 %v22009_v0 }
 0xe12   :  { %13765 = vmatpush3.msra.mxu1 %v18569_v48  ;;  %13784 = vmatpush3.msra.mxu0 %v18449_v7 }
 0xe13   :  { %13766 = vmatprep.subr.mxu1 %v22009_v0  ;;  %13785 = vmatprep.subr.mxu0 %v22009_v0 }
 0xe14   :  { %13767 = vmatpush3.msra.mxu1 %v18575_v49  ;;  %13786 = vmatpush3.msra.mxu0 %v18459_v61 }
 0xe15   :  { %13768 = vmatprep.subr.mxu1 %v22009_v0  ;;  %13787 = vmatprep.subr.mxu0 %v22009_v0 }
 0xe16   :  { %13769 = vmatpush3.msra.mxu1 %v18581_v51  ;;  %13788 = vmatpush3.msra.mxu0 %v18467_v53 }
 0xe17   :  { %13770 = vmatprep.subr.mxu1 %v22009_v0  ;;  %13789 = vmatprep.subr.mxu0 %v22009_v0 }
 0xe18   :  { %13771 = vmatpush3.msra.mxu1 %v18589_v63  ;;  %13790 = vmatpush3.msra.mxu0 %v18477_v14 }
 0xe19   :  { %13772 = vmatprep.subr.mxu1 %v22009_v0  ;;  %13791 = vmatprep.subr.mxu0 %v22009_v0 }
 0xe1a   :  { %13773 = vmatpush3.msra.mxu1 %v18596_v2  ;;  %13792 = vmatpush3.msra.mxu0 %v18487_v17 }
 0xe1b   :  { %13774 = vmatprep.subr.mxu1 %v22009_v0  ;;  %13793 = vmatprep.subr.mxu0 %v22009_v0 }
 0xe1c   :  { %13775 = vmatpush3.msra.mxu1 %v18602_v50  ;;  %13776 = vmatprep.mubr.msk.f32.mxu1 %vm16152_vm0, %v22009_v0 }
 0xe1d   :  { %13794 = vmatpush3.msra.mxu0 %v18495_v56  ;;  %13795 = vmatprep.mubr.msk.f32.mxu0 %vm16152_vm0, %v22009_v0 }
 0xe1e   :  { %13777 = vmatmul.mubr.msk.f32.vlgmr.msra.gmra.mxu1 %vm217_vm1, %v5377_v43  ;;  %13796 = vmatmul.mubr.msk.f32.vlgmr.msra.gmra.mxu0 %vm217_vm1, %v5377_v43 }
 0xe1f   :  { %13798 = vmatprep.subr.mxu1 %v22009_v0  ;;  %13817 = vmatprep.subr.mxu0 %v22009_v0 }
 0xe20   :  { %13799 = vmatpush3.msra.mxu1 %v18435_v6  ;;  %13818 = vmatpush3.msra.mxu0 %v18559_v39 }
 0xe21   :  { %13800 = vmatprep.subr.mxu1 %v22009_v0  ;;  %13819 = vmatprep.subr.mxu0 %v22009_v0 }
 0xe22   :  { %13801 = vmatpush3.msra.mxu1 %v18441_v4  ;;  %13820 = vmatpush3.msra.mxu0 %v18563_v47 }
 0xe23   :  { %13802 = vmatprep.subr.mxu1 %v22009_v0  ;;  %13821 = vmatprep.subr.mxu0 %v22009_v0 }
 0xe24   :  { %13803 = vmatpush3.msra.mxu1 %v18451_v9  ;;  %13822 = vmatpush3.msra.mxu0 %v18569_v48 }
 0xe25   :  { %13804 = vmatprep.subr.mxu1 %v22009_v0  ;;  %13823 = vmatprep.subr.mxu0 %v22009_v0 }
 0xe26   :  { %13805 = vmatpush3.msra.mxu1 %v18461_v10  ;;  %13824 = vmatpush3.msra.mxu0 %v18575_v49 }
 0xe27   :  { %13806 = vmatprep.subr.mxu1 %v22009_v0  ;;  %13825 = vmatprep.subr.mxu0 %v22009_v0 }
 0xe28   :  { %13807 = vmatpush3.msra.mxu1 %v18469_v12  ;;  %13826 = vmatpush3.msra.mxu0 %v18581_v51 }
 0xe29   :  { %13808 = vmatprep.subr.mxu1 %v22009_v0  ;;  %13827 = vmatprep.subr.mxu0 %v22009_v0 }
 0xe2a   :  { %13809 = vmatpush3.msra.mxu1 %v18479_v15  ;;  %13828 = vmatpush3.msra.mxu0 %v18589_v63 }
 0xe2b   :  { %13810 = vmatprep.subr.mxu1 %v22009_v0  ;;  %13829 = vmatprep.subr.mxu0 %v22009_v0 }
 0xe2c   :  { %13811 = vmatpush3.msra.mxu1 %v18489_v18  ;;  %13830 = vmatpush3.msra.mxu0 %v18596_v2 }
 0xe2d   :  { %13812 = vmatprep.subr.mxu1 %v22009_v0  ;;  %13831 = vmatprep.subr.mxu0 %v22009_v0 }
 0xe2e   :  { %13813 = vmatpush3.msra.mxu1 %v18497_v19  ;;  %13814 = vmatprep.mubr.msk.f32.mxu1 %vm16152_vm0, %v22009_v0 }
 0xe2f   :  { %13832 = vmatpush3.msra.mxu0 %v18602_v50  ;;  %13833 = vmatprep.mubr.msk.f32.mxu0 %vm16152_vm0, %v22009_v0 }
 0xe30   :  { %13815 = vmatmul.mubr.msk.f32.vlgmr.msra.gmra.mxu1 %vm217_vm1, %v5377_v43  ;;  %13834 = vmatmul.mubr.msk.f32.vlgmr.msra.gmra.mxu0 %vm217_vm1, %v5382_v25 }
 0xe31   :  { %13836 = vmatprep.subr.mxu1 %v22009_v0  ;;  %13855 = vmatprep.subr.mxu0 %v22009_v0 }
 0xe32   :  { %13837 = vmatpush3.msra.mxu1 %v18433_v62  ;;  %13856 = vmatpush3.msra.mxu0 %v18435_v6 }
 0xe33   :  { %13838 = vmatprep.subr.mxu1 %v22009_v0  ;;  %13857 = vmatprep.subr.mxu0 %v22009_v0 }
 0xe34   :  { %13839 = vmatpush3.msra.mxu1 %v18439_v8  ;;  %13858 = vmatpush3.msra.mxu0 %v18441_v4 }
 0xe35   :  { %13840 = vmatprep.subr.mxu1 %v22009_v0  ;;  %13859 = vmatprep.subr.mxu0 %v22009_v0 }
 0xe36   :  { %13841 = vmatpush3.msra.mxu1 %v18449_v7  ;;  %13860 = vmatpush3.msra.mxu0 %v18451_v9 }
 0xe37   :  { %13842 = vmatprep.subr.mxu1 %v22009_v0  ;;  %13861 = vmatprep.subr.mxu0 %v22009_v0 }
 0xe38   :  { %13843 = vmatpush3.msra.mxu1 %v18459_v61  ;;  %13862 = vmatpush3.msra.mxu0 %v18461_v10 }
 0xe39   :  { %13844 = vmatprep.subr.mxu1 %v22009_v0  ;;  %13863 = vmatprep.subr.mxu0 %v22009_v0 }
 0xe3a   :  { %13845 = vmatpush3.msra.mxu1 %v18467_v53  ;;  %13864 = vmatpush3.msra.mxu0 %v18469_v12 }
 0xe3b   :  { %13846 = vmatprep.subr.mxu1 %v22009_v0  ;;  %13865 = vmatprep.subr.mxu0 %v22009_v0 }
 0xe3c   :  { %13847 = vmatpush3.msra.mxu1 %v18477_v14  ;;  %13866 = vmatpush3.msra.mxu0 %v18479_v15 }
 0xe3d   :  { %13848 = vmatprep.subr.mxu1 %v22009_v0  ;;  %13867 = vmatprep.subr.mxu0 %v22009_v0 }
 0xe3e   :  { %13849 = vmatpush3.msra.mxu1 %v18487_v17  ;;  %13868 = vmatpush3.msra.mxu0 %v18489_v18 }
 0xe3f   :  { %13850 = vmatprep.subr.mxu1 %v22009_v0  ;;  %13869 = vmatprep.subr.mxu0 %v22009_v0 }
 0xe40   :  { %13851 = vmatpush3.msra.mxu1 %v18495_v56  ;;  %13852 = vmatprep.mubr.msk.f32.mxu1 %vm16152_vm0, %v22009_v0 }
 0xe41   :  { %13870 = vmatpush3.msra.mxu0 %v18497_v19  ;;  %13871 = vmatprep.mubr.msk.f32.mxu0 %vm16152_vm0, %v22009_v0 }
 0xe42   :  { %13853 = vmatmul.mubr.msk.f32.vlgmr.msra.gmra.mxu1 %vm217_vm1, %v5382_v25  ;;  %13872 = vmatmul.mubr.msk.f32.vlgmr.msra.gmra.mxu0 %vm217_vm1, %v5382_v25 }
 0xe43   :  { %13874 = vmatprep.subr.mxu1 %v22009_v0  ;;  %13893 = vmatprep.subr.mxu0 %v22009_v0 }
 0xe44   :  { %13875 = vmatpush3.msra.mxu1 %v18559_v39  ;;  %13894 = vmatpush3.msra.mxu0 %v18433_v62 }
 0xe45   :  { %13876 = vmatprep.subr.mxu1 %v22009_v0  ;;  %13895 = vmatprep.subr.mxu0 %v22009_v0 }
 0xe46   :  { %13877 = vmatpush3.msra.mxu1 %v18563_v47  ;;  %13896 = vmatpush3.msra.mxu0 %v18439_v8 }
 0xe47   :  { %13878 = vmatprep.subr.mxu1 %v22009_v0  ;;  %13897 = vmatprep.subr.mxu0 %v22009_v0 }
 0xe48   :  { %13879 = vmatpush3.msra.mxu1 %v18569_v48  ;;  %13898 = vmatpush3.msra.mxu0 %v18449_v7 }
 0xe49   :  { %13880 = vmatprep.subr.mxu1 %v22009_v0  ;;  %13899 = vmatprep.subr.mxu0 %v22009_v0 }
 0xe4a   :  { %13881 = vmatpush3.msra.mxu1 %v18575_v49  ;;  %13900 = vmatpush3.msra.mxu0 %v18459_v61 }
 0xe4b   :  { %13882 = vmatprep.subr.mxu1 %v22009_v0  ;;  %13901 = vmatprep.subr.mxu0 %v22009_v0 }
 0xe4c   :  { %13883 = vmatpush3.msra.mxu1 %v18581_v51  ;;  %13902 = vmatpush3.msra.mxu0 %v18467_v53 }
 0xe4d   :  { %13884 = vmatprep.subr.mxu1 %v22009_v0  ;;  %13903 = vmatprep.subr.mxu0 %v22009_v0 }
 0xe4e   :  { %13885 = vmatpush3.msra.mxu1 %v18589_v63  ;;  %13904 = vmatpush3.msra.mxu0 %v18477_v14 }
 0xe4f   :  { %13886 = vmatprep.subr.mxu1 %v22009_v0  ;;  %13905 = vmatprep.subr.mxu0 %v22009_v0 }
 0xe50   :  { %13887 = vmatpush3.msra.mxu1 %v18596_v2  ;;  %13906 = vmatpush3.msra.mxu0 %v18487_v17 }
 0xe51   :  { %13888 = vmatprep.subr.mxu1 %v22009_v0  ;;  %13907 = vmatprep.subr.mxu0 %v22009_v0 }
 0xe52   :  { %13889 = vmatpush3.msra.mxu1 %v18602_v50  ;;  %13890 = vmatprep.mubr.msk.f32.mxu1 %vm16152_vm0, %v22009_v0 }
 0xe53   :  { %13908 = vmatpush3.msra.mxu0 %v18495_v56  ;;  %13909 = vmatprep.mubr.msk.f32.mxu0 %vm16152_vm0, %v22009_v0 }
 0xe54   :  { %13891 = vmatmul.mubr.msk.f32.vlgmr.msra.gmra.mxu1 %vm217_vm1, %v5387_v27  ;;  %13910 = vmatmul.mubr.msk.f32.vlgmr.msra.gmra.mxu0 %vm217_vm1, %v5387_v27 }
 0xe55   :  { %13912 = vmatprep.subr.mxu1 %v22009_v0  ;;  %13931 = vmatprep.subr.mxu0 %v22009_v0 }
 0xe56   :  { %13913 = vmatpush3.msra.mxu1 %v18435_v6  ;;  %13932 = vmatpush3.msra.mxu0 %v18559_v39 }
 0xe57   :  { %13914 = vmatprep.subr.mxu1 %v22009_v0  ;;  %13933 = vmatprep.subr.mxu0 %v22009_v0 }
 0xe58   :  { %13915 = vmatpush3.msra.mxu1 %v18441_v4  ;;  %13934 = vmatpush3.msra.mxu0 %v18563_v47 }
 0xe59   :  { %13916 = vmatprep.subr.mxu1 %v22009_v0  ;;  %13935 = vmatprep.subr.mxu0 %v22009_v0 }
 0xe5a   :  { %13917 = vmatpush3.msra.mxu1 %v18451_v9  ;;  %13936 = vmatpush3.msra.mxu0 %v18569_v48 }
 0xe5b   :  { %13918 = vmatprep.subr.mxu1 %v22009_v0  ;;  %13937 = vmatprep.subr.mxu0 %v22009_v0 }
 0xe5c   :  { %13919 = vmatpush3.msra.mxu1 %v18461_v10  ;;  %13938 = vmatpush3.msra.mxu0 %v18575_v49 }
 0xe5d   :  { %13920 = vmatprep.subr.mxu1 %v22009_v0  ;;  %13939 = vmatprep.subr.mxu0 %v22009_v0 }
 0xe5e   :  { %13921 = vmatpush3.msra.mxu1 %v18469_v12  ;;  %13940 = vmatpush3.msra.mxu0 %v18581_v51 }
 0xe5f   :  { %13922 = vmatprep.subr.mxu1 %v22009_v0  ;;  %13941 = vmatprep.subr.mxu0 %v22009_v0 }
 0xe60   :  { %13923 = vmatpush3.msra.mxu1 %v18479_v15  ;;  %13942 = vmatpush3.msra.mxu0 %v18589_v63 }
 0xe61   :  { %13924 = vmatprep.subr.mxu1 %v22009_v0  ;;  %13943 = vmatprep.subr.mxu0 %v22009_v0 }
 0xe62   :  { %13925 = vmatpush3.msra.mxu1 %v18489_v18  ;;  %13944 = vmatpush3.msra.mxu0 %v18596_v2 }
 0xe63   :  { %13926 = vmatprep.subr.mxu1 %v22009_v0  ;;  %13945 = vmatprep.subr.mxu0 %v22009_v0 }
 0xe64   :  { %13927 = vmatpush3.msra.mxu1 %v18497_v19  ;;  %13928 = vmatprep.mubr.msk.f32.mxu1 %vm16152_vm0, %v22009_v0 }
 0xe65   :  { %13946 = vmatpush3.msra.mxu0 %v18602_v50  ;;  %13947 = vmatprep.mubr.msk.f32.mxu0 %vm16152_vm0, %v22009_v0 }
 0xe66   :  { %13929 = vmatmul.mubr.msk.f32.vlgmr.msra.gmra.mxu1 %vm217_vm1, %v5387_v27  ;;  %13948 = vmatmul.mubr.msk.f32.vlgmr.msra.gmra.mxu0 %vm217_vm1, %v5392_v29 }
 0xe67   :  { %13950 = vmatprep.subr.mxu1 %v22009_v0  ;;  %13969 = vmatprep.subr.mxu0 %v22009_v0 }
 0xe68   :  { %13951 = vmatpush3.msra.mxu1 %v18433_v62  ;;  %13970 = vmatpush3.msra.mxu0 %v18435_v6 }
 0xe69   :  { %13952 = vmatprep.subr.mxu1 %v22009_v0  ;;  %13971 = vmatprep.subr.mxu0 %v22009_v0 }
 0xe6a   :  { %13953 = vmatpush3.msra.mxu1 %v18439_v8  ;;  %13972 = vmatpush3.msra.mxu0 %v18441_v4 }
 0xe6b   :  { %13954 = vmatprep.subr.mxu1 %v22009_v0  ;;  %13973 = vmatprep.subr.mxu0 %v22009_v0 }
 0xe6c   :  { %13955 = vmatpush3.msra.mxu1 %v18449_v7  ;;  %13974 = vmatpush3.msra.mxu0 %v18451_v9 }
 0xe6d   :  { %13956 = vmatprep.subr.mxu1 %v22009_v0  ;;  %13975 = vmatprep.subr.mxu0 %v22009_v0 }
 0xe6e   :  { %13957 = vmatpush3.msra.mxu1 %v18459_v61  ;;  %13976 = vmatpush3.msra.mxu0 %v18461_v10 }
 0xe6f   :  { %13958 = vmatprep.subr.mxu1 %v22009_v0  ;;  %13977 = vmatprep.subr.mxu0 %v22009_v0 }
 0xe70   :  { %13959 = vmatpush3.msra.mxu1 %v18467_v53  ;;  %13978 = vmatpush3.msra.mxu0 %v18469_v12 }
 0xe71   :  { %13960 = vmatprep.subr.mxu1 %v22009_v0  ;;  %13979 = vmatprep.subr.mxu0 %v22009_v0 }
 0xe72   :  { %13961 = vmatpush3.msra.mxu1 %v18477_v14  ;;  %13980 = vmatpush3.msra.mxu0 %v18479_v15 }
 0xe73   :  { %13962 = vmatprep.subr.mxu1 %v22009_v0  ;;  %13981 = vmatprep.subr.mxu0 %v22009_v0 }
 0xe74   :  { %13963 = vmatpush3.msra.mxu1 %v18487_v17  ;;  %13982 = vmatpush3.msra.mxu0 %v18489_v18 }
 0xe75   :  { %13964 = vmatprep.subr.mxu1 %v22009_v0  ;;  %13983 = vmatprep.subr.mxu0 %v22009_v0 }
 0xe76   :  { %13965 = vmatpush3.msra.mxu1 %v18495_v56  ;;  %13966 = vmatprep.mubr.msk.f32.mxu1 %vm16152_vm0, %v22009_v0 }
 0xe77   :  { %13984 = vmatpush3.msra.mxu0 %v18497_v19  ;;  %13985 = vmatprep.mubr.msk.f32.mxu0 %vm16152_vm0, %v22009_v0 }
 0xe78   :  { %13967 = vmatmul.mubr.msk.f32.vlgmr.msra.gmra.mxu1 %vm217_vm1, %v5392_v29  ;;  %13986 = vmatmul.mubr.msk.f32.vlgmr.msra.gmra.mxu0 %vm217_vm1, %v5392_v29 }
 0xe79   :  { %13988 = vmatprep.subr.mxu1 %v22009_v0  ;;  %14007 = vmatprep.subr.mxu0 %v22009_v0 }
 0xe7a   :  { %13989 = vmatpush3.msra.mxu1 %v18559_v39  ;;  %14008 = vmatpush3.msra.mxu0 %v18433_v62 }
 0xe7b   :  { %13990 = vmatprep.subr.mxu1 %v22009_v0  ;;  %14009 = vmatprep.subr.mxu0 %v22009_v0 }
 0xe7c   :  { %13991 = vmatpush3.msra.mxu1 %v18563_v47  ;;  %14010 = vmatpush3.msra.mxu0 %v18439_v8 }
 0xe7d   :  { %13992 = vmatprep.subr.mxu1 %v22009_v0  ;;  %14011 = vmatprep.subr.mxu0 %v22009_v0 }
 0xe7e   :  { %13993 = vmatpush3.msra.mxu1 %v18569_v48  ;;  %14012 = vmatpush3.msra.mxu0 %v18449_v7 }
 0xe7f   :  { %13994 = vmatprep.subr.mxu1 %v22009_v0  ;;  %14013 = vmatprep.subr.mxu0 %v22009_v0 }
 0xe80   :  { %13995 = vmatpush3.msra.mxu1 %v18575_v49  ;;  %14014 = vmatpush3.msra.mxu0 %v18459_v61 }
 0xe81   :  { %13996 = vmatprep.subr.mxu1 %v22009_v0  ;;  %14015 = vmatprep.subr.mxu0 %v22009_v0 }
 0xe82   :  { %13997 = vmatpush3.msra.mxu1 %v18581_v51  ;;  %14016 = vmatpush3.msra.mxu0 %v18467_v53 }
 0xe83   :  { %13998 = vmatprep.subr.mxu1 %v22009_v0  ;;  %14017 = vmatprep.subr.mxu0 %v22009_v0 }
 0xe84   :  { %13999 = vmatpush3.msra.mxu1 %v18589_v63  ;;  %14018 = vmatpush3.msra.mxu0 %v18477_v14 }
 0xe85   :  { %14000 = vmatprep.subr.mxu1 %v22009_v0  ;;  %14019 = vmatprep.subr.mxu0 %v22009_v0 }
 0xe86   :  { %14001 = vmatpush3.msra.mxu1 %v18596_v2  ;;  %14020 = vmatpush3.msra.mxu0 %v18487_v17 }
 0xe87   :  { %14002 = vmatprep.subr.mxu1 %v22009_v0  ;;  %14021 = vmatprep.subr.mxu0 %v22009_v0 }
 0xe88   :  { %14003 = vmatpush3.msra.mxu1 %v18602_v50  ;;  %14004 = vmatprep.mubr.msk.f32.mxu1 %vm16152_vm0, %v22009_v0 }
 0xe89   :  { %14022 = vmatpush3.msra.mxu0 %v18495_v56  ;;  %14023 = vmatprep.mubr.msk.f32.mxu0 %vm16152_vm0, %v22009_v0 }
 0xe8a   :  { %14005 = vmatmul.mubr.msk.f32.vlgmr.msra.gmra.mxu1 %vm217_vm1, %v5397_v31  ;;  %14024 = vmatmul.mubr.msk.f32.vlgmr.msra.gmra.mxu0 %vm217_vm1, %v5397_v31 }
 0xe8b   :  { %14026 = vmatprep.subr.mxu1 %v22009_v0  ;;  %14045 = vmatprep.subr.mxu0 %v22009_v0 }
 0xe8c   :  { %14027 = vmatpush3.msra.mxu1 %v18435_v6  ;;  %14046 = vmatpush3.msra.mxu0 %v18559_v39 }
 0xe8d   :  { %14028 = vmatprep.subr.mxu1 %v22009_v0  ;;  %14047 = vmatprep.subr.mxu0 %v22009_v0 }
 0xe8e   :  { %14029 = vmatpush3.msra.mxu1 %v18441_v4  ;;  %14048 = vmatpush3.msra.mxu0 %v18563_v47 }
 0xe8f   :  { %14030 = vmatprep.subr.mxu1 %v22009_v0  ;;  %14049 = vmatprep.subr.mxu0 %v22009_v0 }
 0xe90   :  { %14031 = vmatpush3.msra.mxu1 %v18451_v9  ;;  %14050 = vmatpush3.msra.mxu0 %v18569_v48 }
 0xe91   :  { %14032 = vmatprep.subr.mxu1 %v22009_v0  ;;  %14051 = vmatprep.subr.mxu0 %v22009_v0 }
 0xe92   :  { %14033 = vmatpush3.msra.mxu1 %v18461_v10  ;;  %14052 = vmatpush3.msra.mxu0 %v18575_v49 }
 0xe93   :  { %14034 = vmatprep.subr.mxu1 %v22009_v0  ;;  %14053 = vmatprep.subr.mxu0 %v22009_v0 }
 0xe94   :  { %14035 = vmatpush3.msra.mxu1 %v18469_v12  ;;  %14054 = vmatpush3.msra.mxu0 %v18581_v51 }
 0xe95   :  { %14036 = vmatprep.subr.mxu1 %v22009_v0  ;;  %14055 = vmatprep.subr.mxu0 %v22009_v0 }
 0xe96   :  { %14037 = vmatpush3.msra.mxu1 %v18479_v15  ;;  %14056 = vmatpush3.msra.mxu0 %v18589_v63 }
 0xe97   :  { %14038 = vmatprep.subr.mxu1 %v22009_v0  ;;  %14057 = vmatprep.subr.mxu0 %v22009_v0 }
 0xe98   :  { %14039 = vmatpush3.msra.mxu1 %v18489_v18  ;;  %14058 = vmatpush3.msra.mxu0 %v18596_v2 }
 0xe99   :  { %14040 = vmatprep.subr.mxu1 %v22009_v0  ;;  %14059 = vmatprep.subr.mxu0 %v22009_v0 }
 0xe9a   :  { %14041 = vmatpush3.msra.mxu1 %v18497_v19  ;;  %14042 = vmatprep.mubr.msk.f32.mxu1 %vm16152_vm0, %v22009_v0 }
 0xe9b   :  { %14060 = vmatpush3.msra.mxu0 %v18602_v50  ;;  %14061 = vmatprep.mubr.msk.f32.mxu0 %vm16152_vm0, %v22009_v0 }
 0xe9c   :  { %14043 = vmatmul.mubr.msk.f32.vlgmr.msra.gmra.mxu1 %vm217_vm1, %v5397_v31  ;;  %14062 = vmatmul.mubr.msk.f32.vlgmr.msra.gmra.mxu0 %vm217_vm1, %v5402_v33 }
 0xe9d   :  { %14064 = vmatprep.subr.mxu1 %v22009_v0  ;;  %14083 = vmatprep.subr.mxu0 %v22009_v0 }
 0xe9e   :  { %14065 = vmatpush3.msra.mxu1 %v18433_v62  ;;  %14084 = vmatpush3.msra.mxu0 %v18435_v6 }
 0xe9f   :  { %14066 = vmatprep.subr.mxu1 %v22009_v0  ;;  %14085 = vmatprep.subr.mxu0 %v22009_v0 }
 0xea0   :  { %14067 = vmatpush3.msra.mxu1 %v18439_v8  ;;  %14086 = vmatpush3.msra.mxu0 %v18441_v4 }
 0xea1   :  { %14068 = vmatprep.subr.mxu1 %v22009_v0  ;;  %14087 = vmatprep.subr.mxu0 %v22009_v0 }
 0xea2   :  { %14069 = vmatpush3.msra.mxu1 %v18449_v7  ;;  %14088 = vmatpush3.msra.mxu0 %v18451_v9 }
 0xea3   :  { %14070 = vmatprep.subr.mxu1 %v22009_v0  ;;  %14089 = vmatprep.subr.mxu0 %v22009_v0 }
 0xea4   :  { %14071 = vmatpush3.msra.mxu1 %v18459_v61  ;;  %14090 = vmatpush3.msra.mxu0 %v18461_v10 }
 0xea5   :  { %14072 = vmatprep.subr.mxu1 %v22009_v0  ;;  %14091 = vmatprep.subr.mxu0 %v22009_v0 }
 0xea6   :  { %14073 = vmatpush3.msra.mxu1 %v18467_v53  ;;  %14092 = vmatpush3.msra.mxu0 %v18469_v12 }
 0xea7   :  { %14074 = vmatprep.subr.mxu1 %v22009_v0  ;;  %14093 = vmatprep.subr.mxu0 %v22009_v0 }
 0xea8   :  { %14075 = vmatpush3.msra.mxu1 %v18477_v14  ;;  %14094 = vmatpush3.msra.mxu0 %v18479_v15 }
 0xea9   :  { %14076 = vmatprep.subr.mxu1 %v22009_v0  ;;  %14095 = vmatprep.subr.mxu0 %v22009_v0 }
 0xeaa   :  { %14077 = vmatpush3.msra.mxu1 %v18487_v17  ;;  %14096 = vmatpush3.msra.mxu0 %v18489_v18 }
 0xeab   :  { %14078 = vmatprep.subr.mxu1 %v22009_v0  ;;  %14097 = vmatprep.subr.mxu0 %v22009_v0 }
 0xeac   :  { %14079 = vmatpush3.msra.mxu1 %v18495_v56  ;;  %14080 = vmatprep.mubr.msk.f32.mxu1 %vm16152_vm0, %v22009_v0 }
 0xead   :  { %14098 = vmatpush3.msra.mxu0 %v18497_v19  ;;  %14099 = vmatprep.mubr.msk.f32.mxu0 %vm16152_vm0, %v22009_v0 }
 0xeae   :  { %14081 = vmatmul.mubr.msk.f32.vlgmr.msra.gmra.mxu1 %vm217_vm1, %v5402_v33  ;;  %14100 = vmatmul.mubr.msk.f32.vlgmr.msra.gmra.mxu0 %vm217_vm1, %v5402_v33 }
 0xeaf   :  { %14102 = vmatprep.subr.mxu1 %v22009_v0  ;;  %14121 = vmatprep.subr.mxu0 %v22009_v0 }
 0xeb0   :  { %14103 = vmatpush3.msra.mxu1 %v18559_v39  ;;  %14122 = vmatpush3.msra.mxu0 %v18433_v62  ;;  %v5406_v62 = vmul.f32 0.01, %v18557_v60 }
 0xeb1   :  { %14104 = vmatprep.subr.mxu1 %v22009_v0  ;;  %14123 = vmatprep.subr.mxu0 %v22009_v0 }
 0xeb2   :  { %14105 = vmatpush3.msra.mxu1 %v18563_v47  ;;  %14124 = vmatpush3.msra.mxu0 %v18439_v8  ;;  %v5407_v8 = vsel %vm5405_vm10, %v18557_v60, %v5406_v62 }
 0xeb3   :  { %14106 = vmatprep.subr.mxu1 %v22009_v0  ;;  %14125 = vmatprep.subr.mxu0 %v22009_v0 }
 0xeb4   :  { %14107 = vmatpush3.msra.mxu1 %v18569_v48  ;;  %14126 = vmatpush3.msra.mxu0 %v18449_v7 }
 0xeb5   :  { %14108 = vmatprep.subr.mxu1 %v22009_v0  ;;  %14127 = vmatprep.subr.mxu0 %v22009_v0 }
 0xeb6   :  { %14109 = vmatpush3.msra.mxu1 %v18575_v49  ;;  %14128 = vmatpush3.msra.mxu0 %v18459_v61 }
 0xeb7   :  { %14110 = vmatprep.subr.mxu1 %v22009_v0  ;;  %14129 = vmatprep.subr.mxu0 %v22009_v0 }
 0xeb8   :  { %14111 = vmatpush3.msra.mxu1 %v18581_v51  ;;  %14130 = vmatpush3.msra.mxu0 %v18467_v53 }
 0xeb9   :  { %14112 = vmatprep.subr.mxu1 %v22009_v0  ;;  %14131 = vmatprep.subr.mxu0 %v22009_v0 }
 0xeba   :  { %14113 = vmatpush3.msra.mxu1 %v18589_v63  ;;  %14132 = vmatpush3.msra.mxu0 %v18477_v14 }
 0xebb   :  { %14114 = vmatprep.subr.mxu1 %v22009_v0  ;;  %14133 = vmatprep.subr.mxu0 %v22009_v0 }
 0xebc   :  { %14115 = vmatpush3.msra.mxu1 %v18596_v2  ;;  %14134 = vmatpush3.msra.mxu0 %v18487_v17 }
 0xebd   :  { %14116 = vmatprep.subr.mxu1 %v22009_v0  ;;  %14135 = vmatprep.subr.mxu0 %v22009_v0 }
 0xebe   :  { %14117 = vmatpush3.msra.mxu1 %v18602_v50  ;;  %14118 = vmatprep.mubr.msk.f32.mxu1 %vm16152_vm0, %v22009_v0 }
 0xebf   :  { %14136 = vmatpush3.msra.mxu0 %v18495_v56  ;;  %14137 = vmatprep.mubr.msk.f32.mxu0 %vm16152_vm0, %v22009_v0 }
 0xec0   :  { %14119 = vmatmul.mubr.msk.f32.vlgmr.msra.gmra.mxu1 %vm217_vm1, %v5407_v8  ;;  %14138 = vmatmul.mubr.msk.f32.vlgmr.msra.gmra.mxu0 %vm217_vm1, %v5407_v8 }
 0xec1   :  { %14140 = vmatprep.subr.mxu1 %v22009_v0  ;;  %14156 = vmatprep.mubr.msk.f32.mxu1 %vm16152_vm0, %v22009_v0 }
 0xec2   :  { %14141 = vmatpush3.msra.mxu1 %v18435_v6  ;;  %14159 = vmatprep.subr.mxu0 %v22009_v0 }
 0xec3   :  { %14142 = vmatprep.subr.mxu1 %v22009_v0  ;;  %14191 = vmatprep.mubr.msk.f32.mxu0 %vm16152_vm0, %v22009_v0 }
 0xec4   :  { %14143 = vmatpush3.msra.mxu1 %v18441_v4 }
 0xec5   :  { %14144 = vmatprep.subr.mxu1 %v22009_v0 }
 0xec6   :  { %14145 = vmatpush3.msra.mxu1 %v18451_v9 }
 0xec7   :  { %14146 = vmatprep.subr.mxu1 %v22009_v0 }
 0xec8   :  { %14147 = vmatpush3.msra.mxu1 %v18461_v10 }
 0xec9   :  { %14148 = vmatprep.subr.mxu1 %v22009_v0 }
 0xeca   :  { %14149 = vmatpush3.msra.mxu1 %v18469_v12 }
 0xecb   :  { %14150 = vmatprep.subr.mxu1 %v22009_v0 }
 0xecc   :  { %14151 = vmatpush3.msra.mxu1 %v18479_v15 }
 0xecd   :  { %14152 = vmatprep.subr.mxu1 %v22009_v0  ;;  %v18994_v6 = vpop.f32.mrf.mxu1  ;;  %v5573_v4 = vpop.f32.mrf.mxu0 }
 0xece   :  { %14153 = vmatpush3.msra.mxu1 %v18489_v18  ;;  %v7068_v63 = vmul.f32 %v18994_v6, %v18994_v6 }
 0xecf   :  { %14154 = vmatprep.subr.mxu1 %v22009_v0  ;;  %v13740_v7 = vpop.f32.mrf.mxu1  ;;  %v13759_v9 = vpop.f32.mrf.mxu0 }
 0xed0   :  { %14155 = vmatpush3.msra.mxu1 %v18497_v19 }
 0xed1   :  { %14157 = vmatmul.mubr.msk.f32.vlgmr.msra.gmra.mxu1 %vm217_vm1, %v5407_v8  ;;  %14194 = vmatprep.subr.mxu1 %v22009_v0 }
 0xed2   :  { %14226 = vmatprep.mubr.msk.f32.mxu1 %vm16152_vm0, %v22009_v0 }
 0xede   :  { %v5646_v61 = vpop.f32.mrf.mxu1  ;;  %v19003_v10 = vpop.f32.mrf.mxu0 }
 0xedf   :  { %v19005_v53 = vadd.f32 %v5646_v61, %v5573_v4  ;;  %v7073_v20 = vmul.f32 %v19003_v10, %v19003_v10 }
 0xee0   :  { %v13778_v12 = vpop.f32.mrf.mxu1  ;;  %v13797_v14 = vpop.f32.mrf.mxu0 }
 0xee1   :  { %v7070_v57 = vmul.f32 %v19005_v53, %v19005_v53  ;;  %v7069_v1 = vadd.f32 %v19005_v53, %v18994_v6 }
 0xee3   :  { %v7071_v54 = vadd.f32 %v7070_v57, %v7068_v63  ;;  %v7072_v24 = vadd.f32 %v7069_v1, %v19003_v10 }
 0xee5   :  { %v7074_v26 = vadd.f32 %v7073_v20, %v7071_v54 }
 0xef0   :  { %v5786_v15 = vpop.f32.mrf.mxu1  ;;  %v5859_v17 = vpop.f32.mrf.mxu0 }
 0xef1   :  { %v19007_v18 = vadd.f32 %v5859_v17, %v5786_v15 }
 0xef2   :  { %v13816_v56 = vpop.f32.mrf.mxu1  ;;  %v13835_v19 = vpop.f32.mrf.mxu0 }
 0xef3   :  { %v7076_v25 = vmul.f32 %v19007_v18, %v19007_v18  ;;  %v7075_v27 = vadd.f32 %v7072_v24, %v19007_v18 }
 0xef5   :  { %v7077_v29 = vadd.f32 %v7076_v25, %v7074_v26 }
 0xf02   :  { %v19009_v34 = vpop.f32.mrf.mxu1  ;;  %v5999_v35 = vpop.f32.mrf.mxu0 }
 0xf03   :  { %v7079_v28 = vmul.f32 %v19009_v34, %v19009_v34  ;;  %v7078_v30 = vadd.f32 %v7075_v27, %v19009_v34 }
 0xf04   :  { %v13854_v36 = vpop.f32.mrf.mxu1  ;;  %v13873_v5 = vpop.f32.mrf.mxu0 }
 0xf05   :  { %v7080_v32 = vadd.f32 %v7079_v28, %v7077_v29 }
 0xf14   :  { %v6072_v13 = vpop.f32.mrf.mxu1  ;;  %v19011_v37 = vpop.f32.mrf.mxu0 }
 0xf15   :  { %v19013_v38 = vadd.f32 %v6072_v13, %v5999_v35  ;;  %v7085_v4 = vmul.f32 %v19011_v37, %v19011_v37 }
 0xf16   :  { %v13892_v40 = vpop.f32.mrf.mxu1  ;;  %v13911_v41 = vpop.f32.mrf.mxu0 }
 0xf17   :  { %v7082_v31 = vmul.f32 %v19013_v38, %v19013_v38  ;;  %v7081_v33 = vadd.f32 %v7078_v30, %v19013_v38 }
 0xf19   :  { %v7083_v62 = vadd.f32 %v7082_v31, %v7080_v32  ;;  %v7084_v8 = vadd.f32 %v7081_v33, %v19011_v37 }
 0xf1b   :  { %v7086_v61 = vadd.f32 %v7085_v4, %v7083_v62 }
 0xf26   :  { %v6212_v45 = vpop.f32.mrf.mxu1  ;;  %v6285_v52 = vpop.f32.mrf.mxu0 }
 0xf27   :  { %v19015_v42 = vadd.f32 %v6285_v52, %v6212_v45 }
 0xf28   :  { %v13930_v11 = vpop.f32.mrf.mxu1  ;;  %v13949_v59 = vpop.f32.mrf.mxu0 }
 0xf29   :  { %v7088_v7 = vmul.f32 %v19015_v42, %v19015_v42  ;;  %v7087_v12 = vadd.f32 %v7084_v8, %v19015_v42 }
 0xf2b   :  { %v7089_v15 = vadd.f32 %v7088_v7, %v7086_v61 }
 0xf38   :  { %v19017_v21 = vpop.f32.mrf.mxu1  ;;  %v6425_v16 = vpop.f32.mrf.mxu0 }
 0xf39   :  { %v7091_v14 = vmul.f32 %v19017_v21, %v19017_v21  ;;  %v7090_v17 = vadd.f32 %v7087_v12, %v19017_v21 }
 0xf3a   :  { %v13968_v23 = vpop.f32.mrf.mxu1  ;;  %v13987_v55 = vpop.f32.mrf.mxu0 }
 0xf3b   :  { %v7092_v36 = vadd.f32 %v7091_v14, %v7089_v15 }
 0xf4a   :  { %v6498_v60 = vpop.f32.mrf.mxu1  ;;  %v19019_v3 = vpop.f32.mrf.mxu0 }
 0xf4b   :  { %v19046_v9 = vadd.f32 %v6498_v60, %v6425_v16  ;;  %v7097_v11 = vmul.f32 %v19019_v3, %v19019_v3 }
 0xf4c   :  { %v14006_v39 = vpop.f32.mrf.mxu1  ;;  %v14025_v44 = vpop.f32.mrf.mxu0 }
 0xf4d   :  { %v7094_v56 = vmul.f32 %v19046_v9, %v19046_v9  ;;  %v7093_v5 = vadd.f32 %v7090_v17, %v19046_v9 }
 0xf4f   :  { %v7095_v45 = vadd.f32 %v7094_v56, %v7092_v36  ;;  %v7096_v52 = vadd.f32 %v7093_v5, %v19019_v3 }
 0xf51   :  { %v7098_v23 = vadd.f32 %v7097_v11, %v7095_v45 }
 0xf5c   :  { %v6638_v47 = vpop.f32.mrf.mxu1  ;;  %v6711_v48 = vpop.f32.mrf.mxu0 }
 0xf5d   :  { %v19057_v13 = vadd.f32 %v6711_v48, %v6638_v47 }
 0xf5e   :  { %v14044_v49 = vpop.f32.mrf.mxu1  ;;  %v14063_v51 = vpop.f32.mrf.mxu0 }
 0xf5f   :  { %v7100_v59 = vmul.f32 %v19057_v13, %v19057_v13  ;;  %v7099_v55 = vadd.f32 %v7096_v52, %v19057_v13 }
 0xf61   :  { %v7101_v39 = vadd.f32 %v7100_v59, %v7098_v23 }
 0xf6e   :  { %v19027_v2 = vpop.f32.mrf.mxu1  ;;  %v6851_v50 = vpop.f32.mrf.mxu0 }
 0xf6f   :  { %v7103_v60 = vmul.f32 %v19027_v2, %v19027_v2  ;;  %v7102_v44 = vadd.f32 %v7099_v55, %v19027_v2 }
 0xf70   :  { %v14082_v43 = vpop.f32.mrf.mxu1  ;;  %v14101_v46 = vpop.f32.mrf.mxu0 }
 0xf71   :  { %v7104_v48 = vadd.f32 %v7103_v60, %v7101_v39 }
 0xf80   :  { %v6924_v19 = vpop.f32.mrf.mxu1  ;;  %v19054_v35 = vpop.f32.mrf.mxu0 }
 0xf81   :  { %v19064_v16 = vadd.f32 %v6924_v19, %v6851_v50  ;;  %v7109_v63 = vmul.f32 %v19054_v35, %v19054_v35 }
 0xf82   :  { %v14120_v40 = vpop.f32.mrf.mxu1  ;;  %v14139_v41 = vpop.f32.mrf.mxu0 }
 0xf83   :  { %v7106_v47 = vmul.f32 %v19064_v16, %v19064_v16  ;;  %v7105_v49 = vadd.f32 %v7102_v44, %v19064_v16 }
 0xf85   :  { %v7107_v51 = vadd.f32 %v7106_v47, %v7104_v48  ;;  %v7108_v57 = vadd.f32 %v7105_v49, %v19054_v35 }
 0xf87   :  { %v7110_v50 = vadd.f32 %v7109_v63, %v7107_v51 }
 0xf91   :  { %v19076_v1 = vpop.f32.mrf.mxu1 }
 0xf92   :  { %v7111_v54 = vadd.f32 %v7108_v57, %v19076_v1  ;;  %v7112_v43 = vmul.f32 %v19076_v1, %v19076_v1 }
 0xf93   :  { %v14158_v46 = vpop.f32.mrf.mxu1 }
 0xf94   :  { %v7113_v24 = vadd.f32 %v7112_v43, %v7110_v50  ;;  %7115 = vrot.lane.b32.xlu1 %v7111_v54, %s16154_s2 }
 0xf96   :  { %7120 = vrot.lane.b32.xlu0 %v7113_v24, %s16154_s2 }
 0xf98   :  { %7124 = vrot.lane.b32.xlu1 %v7111_v54, %s16153_s8 }
 0xf9a   :  { %7128 = vrot.lane.b32.xlu0 %v7113_v24, %s16153_s8 }
 0xf9c   :  { %7132 = vrot.lane.b32.xlu1 %v7111_v54, %s22061_s18 }
 0xf9e   :  { %7136 = vrot.lane.b32.xlu0 %v7113_v24, %s22061_s18 }
 0xfa0   :  { %7140 = vrot.lane.b32.xlu1 %v7111_v54, %s16156_s1 }
 0xfa2   :  { %7144 = vrot.lane.b32.xlu0 %v7113_v24, %s16156_s1 }
 0xfa4   :  { %7148 = vrot.lane.b32.xlu1 %v7111_v54, %s22062_s6 }
 0xfa6   :  { %7152 = vrot.lane.b32.xlu0 %v7113_v24, %s22062_s6 }
 0xfa8   :  { %7156 = vrot.lane.b32.xlu1 %v7111_v54, %s16158_s12 }
 0xfaa   :  { %7160 = vrot.lane.b32.xlu0 %v7113_v24, %s16158_s12 }
 0xfac   :  { %7164 = vrot.lane.b32.xlu1 %v7111_v54, %s22063_s14 }
 0xfae   :  { %7168 = vrot.lane.b32.xlu0 %v7113_v24, %s22063_s14 }
 0xfb0   :  { %7172 = vrot.lane.b32.xlu1 %v7111_v54, %s16166_s16 }
 0xfb2   :  { %7176 = vrot.lane.b32.xlu0 %v7113_v24, %s16166_s16 }
 0xfb4   :  { %7180 = vrot.lane.b32.xlu1 %v7111_v54, %s22067_s9 }
 0xfb6   :  { %7184 = vrot.lane.b32.xlu0 %v7113_v24, %s22067_s9 }
 0xfb8   :  { %7188 = vrot.lane.b32.xlu1 %v7111_v54, %s16164_s3 }
 0xfba   :  { %7192 = vrot.lane.b32.xlu0 %v7113_v24, %s16164_s3 }
 0xfbc   :  { %7196 = vrot.lane.b32.xlu1 %v7111_v54, %s22066_s20 }
 0xfbe   :  { %7200 = vrot.lane.b32.xlu0 %v7113_v24, %s22066_s20 }
 0xfc0   :  { %7204 = vrot.lane.b32.xlu1 %v7111_v54, %s16162_s11 }
 0xfc2   :  { %7208 = vrot.lane.b32.xlu0 %v7113_v24, %s16162_s11 }
 0xfc4   :  { %7212 = vrot.lane.b32.xlu1 %v7111_v54, %s22065_s19 }
 0xfc6   :  { %7216 = vrot.lane.b32.xlu0 %v7113_v24, %s22065_s19 }
 0xfc8   :  { %7220 = vrot.lane.b32.xlu1 %v7111_v54, %s16160_s10 }
 0xfca   :  { %7224 = vrot.lane.b32.xlu0 %v7113_v24, %s16160_s10 }
 0xfcc   :  { %7228 = vrot.lane.b32.xlu1 %v7111_v54, %s22064_s7 }
 0xfce   :  { %7232 = vrot.lane.b32.xlu0 %v7113_v24, %s22064_s7 }
0x1006   :  { %v7116_v20 = vpop.permute.xlu1 %7115 }
0x1007   :  { %v7118_v12 = vadd.f32 %v7116_v20, %v7111_v54 }
0x1008   :  { %v7121_v25 = vpop.permute.xlu0 %7120 }
0x1009   :  { %v7123_v15 = vadd.f32 %v7121_v25, %v7113_v24 }
0x100a   :  { %v7125_v26 = vpop.permute.xlu1 %7124 }
0x100b   :  { %v7127_v17 = vadd.f32 %v7125_v26, %v7118_v12 }
0x100c   :  { %v7129_v27 = vpop.permute.xlu0 %7128 }
0x100d   :  { %v7131_v19 = vadd.f32 %v7129_v27, %v7123_v15 }
0x100e   :  { %v7133_v28 = vpop.permute.xlu1 %7132 }
0x100f   :  { %v7135_v36 = vadd.f32 %v7133_v28, %v7127_v17 }
0x1010   :  { %v7137_v29 = vpop.permute.xlu0 %7136 }
0x1011   :  { %v7139_v40 = vadd.f32 %v7137_v29, %v7131_v19 }
0x1012   :  { %v7141_v30 = vpop.permute.xlu1 %7140 }
0x1013   :  { %v7143_v41 = vadd.f32 %v7141_v30, %v7135_v36 }
0x1014   :  { %v7145_v31 = vpop.permute.xlu0 %7144 }
0x1015   :  { %v7147_v52 = vadd.f32 %v7145_v31, %v7139_v40 }
0x1016   :  { %v7149_v32 = vpop.permute.xlu1 %7148 }
0x1017   :  { %v7151_v11 = vadd.f32 %v7149_v32, %v7143_v41 }
0x1018   :  { %v7153_v33 = vpop.permute.xlu0 %7152 }
0x1019   :  { %v7155_v23 = vadd.f32 %v7153_v33, %v7147_v52 }
0x101a   :  { %v7157_v62 = vpop.permute.xlu1 %7156 }
0x101b   :  { %v7159_v55 = vadd.f32 %v7157_v62, %v7151_v11 }
0x101c   :  { %v7161_v8 = vpop.permute.xlu0 %7160 }
0x101d   :  { %v7163_v39 = vadd.f32 %v7161_v8, %v7155_v23 }
0x101e   :  { %v7165_v4 = vpop.permute.xlu1 %7164 }
0x101f   :  { %v7167_v44 = vadd.f32 %v7165_v4, %v7159_v55 }
0x1020   :  { %v7169_v7 = vpop.permute.xlu0 %7168 }
0x1021   :  { %v7171_v48 = vadd.f32 %v7169_v7, %v7163_v39 }
0x1022   :  { %v7173_v61 = vpop.permute.xlu1 %7172 }
0x1023   :  { %v7175_v49 = vadd.f32 %v7173_v61, %v7167_v44 }
0x1024   :  { %v7177_v14 = vpop.permute.xlu0 %7176 }
0x1025   :  { %v7179_v57 = vadd.f32 %v7177_v14, %v7171_v48 }
0x1026   :  { %v7181_v56 = vpop.permute.xlu1 %7180 }
0x1027   :  { %v7183_v63 = vadd.f32 %v7181_v56, %v7175_v49 }
0x1028   :  { %v7185_v5 = vpop.permute.xlu0 %7184 }
0x1029   :  { %v7187_v54 = vadd.f32 %v7185_v5, %v7179_v57 }
0x102a   :  { %v7189_v45 = vpop.permute.xlu1 %7188 }
0x102b   :  { %v7191_v43 = vadd.f32 %v7189_v45, %v7183_v63 }
0x102c   :  { %v7193_v59 = vpop.permute.xlu0 %7192 }
0x102d   :  { %v7195_v24 = vadd.f32 %v7193_v59, %v7187_v54 }
0x102e   :  { %v7197_v60 = vpop.permute.xlu1 %7196 }
0x102f   :  { %v7199_v20 = vadd.f32 %v7197_v60, %v7191_v43  ;;  %v19155_v43 = vld [vmem:[%s21971_s24 + $0x178] sm:$0xff] }
0x1030   :  { %v7201_v47 = vpop.permute.xlu0 %7200  ;;  %22068 = vst [vmem:[#allocation22_spill] sm:$0xff] %v19155_v43  ;;  %14160 = vmatpush3.msra.mxu0 %v19155_v43 }
0x1031   :  { %v7203_v26 = vadd.f32 %v7201_v47, %v7195_v24  ;;  %v7255_v47 = vld [vmem:[%s21969_s22] sm:$0x1]  ;;  %v19169_v24 = vld [vmem:[%s21971_s24 + $0x170] sm:$0xff]  ;;  %14161 = vmatprep.subr.mxu0 %v22009_v0 }
0x1032   :  { %v7205_v51 = vpop.permute.xlu1 %7204  ;;  %22069 = vst [vmem:[#allocation23_spill] sm:$0xff] %v19169_v24  ;;  %14162 = vmatpush3.msra.mxu0 %v19169_v24 }
0x1033   :  { %v7207_v27 = vadd.f32 %v7205_v51, %v7199_v20  ;;  %v7259_v51 = vld [vmem:[%s21970_s23] sm:$0x1]  ;;  %v19174_v20 = vld [vmem:[%s21971_s24 + $0xf0] sm:$0xff]  ;;  %14163 = vmatprep.subr.mxu0 %v22009_v0 }
0x1034   :  { %v7209_v50 = vpop.permute.xlu0 %7208 }
0x1035   :  { %v7211_v29 = vadd.f32 %v7209_v50, %v7203_v26  ;;  %v19190_v26 = vld [vmem:[%s21971_s24 + $0xe8] sm:$0xff] }
0x1036   :  { %v7213_v46 = vpop.permute.xlu1 %7212 }
0x1037   :  { %v7215_v30 = vadd.f32 %v7213_v46, %v7207_v27  ;;  %v19160_v46 = vld [vmem:[%s21971_s24 + $0xf8] sm:$0xff]  ;;  %v19203_v27 = vld [vmem:[%s21971_s24 + $0x160] sm:$0xff] }
0x1038   :  { %v7217_v25 = vpop.permute.xlu0 %7216  ;;  %14195 = vmatpush3.msra.mxu1 %v19160_v46  ;;  %22071 = vst [vmem:[#allocation25_spill] sm:$0xff] %v19203_v27 }
0x1039   :  { %v7219_v32 = vadd.f32 %v7217_v25, %v7211_v29  ;;  %14196 = vmatprep.subr.mxu1 %v22009_v0  ;;  %v19185_v25 = vld [vmem:[%s21971_s24 + $0x168] sm:$0xff]  ;;  %v19219_v29 = vld [vmem:[%s21971_s24 + $0x158] sm:$0xff] }
0x103a   :  { %v7221_v28 = vpop.permute.xlu1 %7220  ;;  %14197 = vmatpush3.msra.mxu1 %v19174_v20  ;;  %22070 = vst [vmem:[#allocation24_spill] sm:$0xff] %v19185_v25  ;;  %14164 = vmatpush3.msra.mxu0 %v19185_v25  ;;  %22072 = vst [vmem:[#allocation26_spill] sm:$0xff] %v19219_v29 }
0x103b   :  { %v7223_v33 = vadd.f32 %v7221_v28, %v7215_v30  ;;  %14198 = vmatprep.subr.mxu1 %v22009_v0  ;;  %v19208_v28 = vld [vmem:[%s21971_s24 + $0xe0] sm:$0xff]  ;;  %14165 = vmatprep.subr.mxu0 %v22009_v0  ;;  %v19224_v30 = vld [vmem:[%s21971_s24 + $0xd8] sm:$0xff] }
0x103c   :  { %v7225_v31 = vpop.permute.xlu0 %7224  ;;  %14199 = vmatpush3.msra.mxu1 %v19190_v26  ;;  %14166 = vmatpush3.msra.mxu0 %v19203_v27 }
0x103d   :  { %v7227_v8 = vadd.f32 %v7225_v31, %v7219_v32  ;;  %14200 = vmatprep.subr.mxu1 %v22009_v0  ;;  %14167 = vmatprep.subr.mxu0 %v22009_v0  ;;  %v19235_v31 = vld [vmem:[%s21971_s24 + $0x150] sm:$0xff] }
0x103e   :  { %v7229_v62 = vpop.permute.xlu1 %7228  ;;  %14201 = vmatpush3.msra.mxu1 %v19208_v28  ;;  %14168 = vmatpush3.msra.mxu0 %v19219_v29  ;;  %22073 = vst [vmem:[#allocation27_spill] sm:$0xff] %v19235_v31  ;;  %v19240_v32 = vld [vmem:[%s21971_s24 + $0xd0] sm:$0xff] }
0x103f   :  { %v7231_v4 = vadd.f32 %v7229_v62, %v7223_v33  ;;  %14202 = vmatprep.subr.mxu1 %v22009_v0  ;;  %14169 = vmatprep.subr.mxu0 %v22009_v0  ;;  %v19253_v33 = vld [vmem:[%s21971_s24 + $0x148] sm:$0xff] }
0x1040   :  { %v7233_v7 = vpop.permute.xlu0 %7232  ;;  %14203 = vmatpush3.msra.mxu1 %v19224_v30  ;;  %14170 = vmatpush3.msra.mxu0 %v19235_v31  ;;  %22074 = vst [vmem:[#allocation28_spill] sm:$0xff] %v19253_v33  ;;  %v19258_v62 = vld [vmem:[%s21971_s24 + $0xc8] sm:$0xff] }
0x1041   :  { %v7236_v61 = vsel %vm1963_vm2, %v7231_v4, 0.0  ;;  %v7235_v12 = vadd.f32 %v7233_v7, %v7227_v8  ;;  %14204 = vmatprep.subr.mxu1 %v22009_v0  ;;  %14171 = vmatprep.subr.mxu0 %v22009_v0  ;;  %v19269_v8 = vld [vmem:[%s21971_s24 + $0x140] sm:$0xff]  ;;  %v19285_v7 = vld [vmem:[%s21971_s24 + $0x138] sm:$0xff] }
0x1042   :  { %v7237_v14 = vrot.slane %v7236_v61, 4  ;;  %14205 = vmatpush3.msra.mxu1 %v19240_v32  ;;  %22075 = vst [vmem:[#allocation29_spill] sm:$0xff] %v19269_v8  ;;  %v19274_v4 = vld [vmem:[%s21971_s24 + $0xc0] sm:$0xff]  ;;  %14172 = vmatpush3.msra.mxu0 %v19253_v33  ;;  %22076 = vst [vmem:[#allocation30_spill] sm:$0xff] %v19285_v7 }
0x1043   :  { %v7243_v15 = vsel %vm1963_vm2, %v7235_v12, 0.0  ;;  %14206 = vmatprep.subr.mxu1 %v22009_v0  ;;  %14173 = vmatprep.subr.mxu0 %v22009_v0  ;;  %v19303_v12 = vld [vmem:[%s21971_s24 + $0x130] sm:$0xff]  ;;  %vm7320_vm2 = vcmask 588800  }
0x1044   :  { %v7238_v17 = vadd.f32 %v7237_v14, %v7236_v61  ;;  %v7244_v56 = vrot.slane %v7243_v15, 4  ;;  %14207 = vmatpush3.msra.mxu1 %v19258_v62  ;;  %14174 = vmatpush3.msra.mxu0 %v19269_v8  ;;  %v19290_v61 = vld [vmem:[%s21971_s24 + $0xb8] sm:$0xff]  ;;  %22077 = vst [vmem:[#allocation31_spill] sm:$0xff] %v19303_v12  ;;  %v19308_v14 = vld [vmem:[%s21971_s24 + $0xb0] sm:$0xff] }
0x1045   :  { %14208 = vmatprep.subr.mxu1 %v22009_v0  ;;  %14175 = vmatprep.subr.mxu0 %v22009_v0 }
0x1046   :  { %v7239_v19 = vrot.slane %v7238_v17, 2  ;;  %v7245_v36 = vadd.f32 %v7244_v56, %v7243_v15  ;;  %14209 = vmatpush3.msra.mxu1 %v19274_v4  ;;  %14176 = vmatpush3.msra.mxu0 %v19285_v7  ;;  %v19319_v15 = vld [vmem:[%s21971_s24 + $0x128] sm:$0xff]  ;;  %v19335_v56 = vld [vmem:[%s21971_s24 + $0x120] sm:$0xff] }
0x1047   :  { %14210 = vmatprep.subr.mxu1 %v22009_v0  ;;  %14177 = vmatprep.subr.mxu0 %v22009_v0  ;;  %22078 = vst [vmem:[#allocation32_spill] sm:$0xff] %v19319_v15  ;;  %22079 = vst [vmem:[#allocation33_spill] sm:$0xff] %v19335_v56 }
0x1048   :  { %v7240_v5 = vadd.f32 %v7239_v19, %v7238_v17  ;;  %v7246_v40 = vrot.slane %v7245_v36, 2  ;;  %14211 = vmatpush3.msra.mxu1 %v19290_v61  ;;  %v19324_v17 = vld [vmem:[%s21971_s24 + $0xa8] sm:$0xff]  ;;  %14178 = vmatpush3.msra.mxu0 %v19303_v12  ;;  %v19340_v19 = vld [vmem:[%s21971_s24 + $0xa0] sm:$0xff] }
0x1049   :  { %14212 = vmatprep.subr.mxu1 %v22009_v0  ;;  %14179 = vmatprep.subr.mxu0 %v22009_v0 }
0x104a   :  { %v7241_v41 = vrot.slane %v7240_v5, 1  ;;  %v7247_v45 = vadd.f32 %v7246_v40, %v7245_v36  ;;  %14213 = vmatpush3.msra.mxu1 %v19308_v14  ;;  %14180 = vmatpush3.msra.mxu0 %v19319_v15  ;;  %v19353_v36 = vld [vmem:[%s21971_s24 + $0x118] sm:$0xff]  ;;  %v19369_v40 = vld [vmem:[%s21971_s24 + $0x110] sm:$0xff] }
0x104b   :  { %14214 = vmatprep.subr.mxu1 %v22009_v0  ;;  %14181 = vmatprep.subr.mxu0 %v22009_v0  ;;  %22080 = vst [vmem:[#allocation34_spill] sm:$0xff] %v19353_v36  ;;  %22081 = vst [vmem:[#allocation35_spill] sm:$0xff] %v19369_v40 }
0x104c   :  { %v7242_v52 = vadd.f32 %v7241_v41, %v7240_v5  ;;  %v7248_v11 = vrot.slane %v7247_v45, 1  ;;  %14215 = vmatpush3.msra.mxu1 %v19324_v17  ;;  %14182 = vmatpush3.msra.mxu0 %v19335_v56  ;;  %v19358_v5 = vld [vmem:[%s21971_s24 + $0x98] sm:$0xff]  ;;  %v19374_v41 = vld [vmem:[%s21971_s24 + $0x90] sm:$0xff] }
0x104d   :  { %14216 = vmatprep.subr.mxu1 %v22009_v0  ;;  %14183 = vmatprep.subr.mxu0 %v22009_v0 }
0x104e   :  { %v7251_v59 = vmul.f32 0.001953125, %v7242_v52  ;;  %v7249_v23 = vadd.f32 %v7248_v11, %v7247_v45  ;;  %14217 = vmatpush3.msra.mxu1 %v19340_v19  ;;  %14184 = vmatpush3.msra.mxu0 %v19353_v36  ;;  %v19385_v45 = vld [vmem:[%s21971_s24 + $0x108] sm:$0xff]  ;;  %v19401_v11 = vld [vmem:[%s21971_s24 + $0x100] sm:$0xff] }
0x104f   :  { %14218 = vmatprep.subr.mxu1 %v22009_v0  ;;  %14185 = vmatprep.subr.mxu0 %v22009_v0  ;;  %22082 = vst [vmem:[#allocation36_spill] sm:$0xff] %v19385_v45  ;;  %v19390_v52 = vld [vmem:[%s21971_s24 + $0x88] sm:$0xff]  ;;  %22084 = vst [vmem:[#allocation38_spill] sm:$0xff] %v19401_v11 }
0x1050   :  { %v7253_v55 = vmul.f32 %v7251_v59, %v7251_v59  ;;  %v7252_v60 = vmul.f32 0.001953125, %v7249_v23  ;;  %14219 = vmatpush3.msra.mxu1 %v19358_v5  ;;  %14186 = vmatpush3.msra.mxu0 %v19369_v40  ;;  %22083 = vst [vmem:[#allocation37_spill] sm:$0xff] %v19390_v52 }
0x1051   :  { %14220 = vmatprep.subr.mxu1 %v22009_v0  ;;  %14187 = vmatprep.subr.mxu0 %v22009_v0 }
0x1052   :  { %v7254_v39 = vsub.f32 %v7252_v60, %v7253_v55  ;;  %14221 = vmatpush3.msra.mxu1 %v19374_v41  ;;  %14188 = vmatpush3.msra.mxu0 %v19385_v45 }
0x1053   :  { %14222 = vmatprep.subr.mxu1 %v22009_v0  ;;  %14189 = vmatprep.subr.mxu0 %v22009_v0 }
0x1054   :  { %v7256_v44 = vadd.f32 1e-05, %v7254_v39  ;;  %14223 = vmatpush3.msra.mxu1 %v19390_v52  ;;  %14190 = vmatpush3.msra.mxu0 %v19401_v11 }
0x1055   :  { %14224 = vmatprep.subr.mxu1 %v22009_v0  ;;  %14229 = vmatprep.subr.mxu0 %v22009_v0 }
0x1056   :  { %15807 = vrsqrt.f32 %v7256_v44 }
0x1063   :  { %v15808_v48 = vpop.eup %15807 }
0x1064   :  { %v19116_v49 = vmul.f32 %v15808_v48, %v7255_v47 }
0x1066   :  { %v7260_v57 = vmul.f32 %v19116_v49, %v7251_v59  ;;  %v19124_v63 = vrot.slane %v19116_v49, %v17003_v58  ;;  %v19408_v59 = vld [vmem:[%s21971_s24 + $0x80] sm:$0xff] }
0x1067   :  { %22085 = vst [vmem:[#allocation39_spill] sm:$0xff] %v19408_v59  ;;  %14225 = vmatpush3.msra.mxu1 %v19408_v59 }
0x1068   :  { %v19126_v50 = vsub.f32 %v7259_v51, %v7260_v57  ;;  %7270 = vrot.lane.b32.xlu0 %v19124_v63, %s16160_s10  ;;  %7267 = vrot.lane.b32.xlu1 %v19124_v63, %s22064_s7 }
0x1069   :  { %14264 = vmatprep.subr.mxu1 %v22009_v0 }
0x106a   :  { %v19134_v54 = vrot.slane %v19126_v50, %v17003_v58 }
0x106c   :  { %7273 = vrot.lane.b32.xlu1 %v19124_v63, %s22065_s19  ;;  %7339 = vrot.lane.b32.xlu0 %v19134_v54, %s22064_s7 }
0x1070   :  { %7276 = vrot.lane.b32.xlu1 %v19124_v63, %s16162_s11  ;;  %7342 = vrot.lane.b32.xlu0 %v19134_v54, %s16160_s10  ;;  %s16167_s10 = smov [#allocation13]  }
0x1074   :  { %7279 = vrot.lane.b32.xlu1 %v19124_v63, %s22066_s20  ;;  %7345 = vrot.lane.b32.xlu0 %v19134_v54, %s22065_s19 }
0x1078   :  { %7282 = vrot.lane.b32.xlu1 %v19124_v63, %s16164_s3  ;;  %7348 = vrot.lane.b32.xlu0 %v19134_v54, %s16162_s11  ;;  %s10860_s11 = sshll.u32 %s16168_s13, 4  ;;  %s10861_s11 = int_to_ptr.vmem [resolvable:$true] %s10860_s11 }
0x107c   :  { %7285 = vrot.lane.b32.xlu1 %v19124_v63, %s22067_s9  ;;  %7351 = vrot.lane.b32.xlu0 %v19134_v54, %s22066_s20 }
0x1080   :  { %7288 = vrot.lane.b32.xlu1 %v19124_v63, %s16166_s16  ;;  %7354 = vrot.lane.b32.xlu0 %v19134_v54, %s16164_s3 }
0x1084   :  { %7291 = vrot.lane.b32.xlu1 %v19124_v63, %s22063_s14  ;;  %7357 = vrot.lane.b32.xlu0 %v19134_v54, %s22067_s9 }
0x1088   :  { %7294 = vrot.lane.b32.xlu1 %v19124_v63, %s16158_s12  ;;  %7360 = vrot.lane.b32.xlu0 %v19134_v54, %s16166_s16 }
0x108c   :  { %7297 = vrot.lane.b32.xlu1 %v19124_v63, %s22062_s6  ;;  %7363 = vrot.lane.b32.xlu0 %v19134_v54, %s22063_s14 }
0x1090   :  { %7300 = vrot.lane.b32.xlu1 %v19124_v63, %s16156_s1  ;;  %7366 = vrot.lane.b32.xlu0 %v19134_v54, %s16158_s12 }
0x1094   :  { %7303 = vrot.lane.b32.xlu1 %v19124_v63, %s22061_s18  ;;  %7369 = vrot.lane.b32.xlu0 %v19134_v54, %s22062_s6  ;;  %s10850_s6 = sshll.u32 %s16167_s10, 4  ;;  %s10851_s6 = int_to_ptr.vmem [resolvable:$true] %s10850_s6 }
0x1095   :  { %s16091_s17 = scalar_lea.vmem %s10851_s6, 32  ;;  %p16096_p3 = scmp.lt.s32.totalorder %s10851_s6, %s10851_s6 }
0x1096   :  { %p16092_p2 = scmp.ne.s32.totalorder %s10851_s6, %s16091_s17  ;;  %p16097_p4 = scmp.lt.s32.totalorder %s16091_s17, %s16091_s17 }
0x1098   :  { %7306 = vrot.lane.b32.xlu1 %v19124_v63, %s16153_s8  ;;  %7372 = vrot.lane.b32.xlu0 %v19134_v54, %s16156_s1  ;;  %p16098_p5 = por %p16097_p4, %p16096_p3 }
0x109a   :  { %p16099_p6 = pnand %p16098_p5, %p16092_p2 }
0x109c   :  { %7309 = vrot.lane.b32.xlu1 %v19124_v63, %s16154_s2  ;;  %7375 = vrot.lane.b32.xlu0 %v19134_v54, %s22061_s18 }
0x10a0   :  { %7378 = vrot.lane.b32.xlu1 %v19134_v54, %s16153_s8  ;;  %7381 = vrot.lane.b32.xlu0 %v19134_v54, %s16154_s2 }
0x10a4   :  { %3709 = vrot.lane.b32.xlu1 %v17759_v22, %s16153_s8 }
0x10da   :  { %v7271_v23 = vpop.permute.xlu0 %7270  ;;  %v7268_v55 = vpop.permute.xlu1 %7267 }
0x10db   :  { %v7312_v7 = vsel %vm2016_vm3, %v19116_v49, %v7268_v55 }
0x10dc   :  { %v7313_v8 = vsel %vm2018_vm4, %v7312_v7, %v7271_v23 }
0x10de   :  { %v7274_v60 = vpop.permute.xlu1 %7273  ;;  %v7340_v39 = vpop.permute.xlu0 %7339 }
0x10df   :  { %v7314_v29 = vsel %vm2020_vm5, %v7313_v8, %v7274_v60  ;;  %v7384_v24 = vsel %vm2016_vm3, %v19126_v50, %v7340_v39  ;;  %vm7326_vm3 = vcmask 785408  }
0x10e2   :  { %v7277_v44 = vpop.permute.xlu1 %7276  ;;  %v7343_v47 = vpop.permute.xlu0 %7342 }
0x10e3   :  { %v7315_v27 = vsel %vm2022_vm6, %v7314_v29, %v7277_v44  ;;  %v7385_v49 = vsel %vm2018_vm4, %v7384_v24, %v7343_v47  ;;  %vm7330_vm4 = vcmask 916480  }
0x10e6   :  { %v7280_v48 = vpop.permute.xlu1 %7279  ;;  %v7346_v51 = vpop.permute.xlu0 %7345 }
0x10e7   :  { %v7316_v25 = vsel %vm2024_vm7, %v7315_v27, %v7280_v48  ;;  %v7386_v23 = vsel %vm2020_vm5, %v7385_v49, %v7346_v51  ;;  %vm7332_vm5 = vcmask 982016  }
0x10ea   :  { %v7283_v57 = vpop.permute.xlu1 %7282  ;;  %v7349_v63 = vpop.permute.xlu0 %7348 }
0x10eb   :  { %v7317_v43 = vsel %vm2026_vm8, %v7316_v25, %v7283_v57  ;;  %v7387_v27 = vsel %vm2022_vm6, %v7386_v23, %v7349_v63 }
0x10ee   :  { %v7286_v54 = vpop.permute.xlu1 %7285  ;;  %v7352_v22 = vpop.permute.xlu0 %7351 }
0x10ef   :  { %v7318_v7 = vsel %vm2028_vm9, %v7317_v43, %v7286_v54  ;;  %v7388_v50 = vsel %vm2024_vm7, %v7387_v27, %v7352_v22 }
0x10f2   :  { %v7289_v45 = vpop.permute.xlu1 %7288  ;;  %v7355_v11 = vpop.permute.xlu0 %7354 }
0x10f3   :  { %v7319_v8 = vsel %vm217_vm1, %v7318_v7, %v7289_v45  ;;  %v7389_v43 = vsel %vm2026_vm8, %v7388_v50, %v7355_v11 }
0x10f6   :  { %v7292_v40 = vpop.permute.xlu1 %7291  ;;  %v7358_v36 = vpop.permute.xlu0 %7357 }
0x10f7   :  { %v7321_v29 = vsel %vm7320_vm2, %v7319_v8, %v7292_v40  ;;  %v7390_v45 = vsel %vm2028_vm9, %v7389_v43, %v7358_v36 }
0x10fa   :  { %v7295_v56 = vpop.permute.xlu1 %7294  ;;  %v7361_v15 = vpop.permute.xlu0 %7360 }
0x10fb   :  { %v7323_v25 = vsel %vm7322_vm11, %v7321_v29, %v7295_v56  ;;  %v7391_v40 = vsel %vm217_vm1, %v7390_v45, %v7361_v15 }
0x10fe   :  { %v7298_v12 = vpop.permute.xlu1 %7297  ;;  %v7364_v0 = vpop.permute.xlu0 %7363 }
0x10ff   :  { %v7325_v60 = vsel %vm7324_vm13, %v7323_v25, %v7298_v12  ;;  %v7392_v47 = vsel %vm7320_vm2, %v7391_v40, %v7364_v0 }
0x1102   :  { %v7301_v33 = vpop.permute.xlu1 %7300  ;;  %v7367_v31 = vpop.permute.xlu0 %7366 }
0x1103   :  { %v7327_v39 = vsel %vm7326_vm3, %v7325_v60, %v7301_v33  ;;  %v7393_v11 = vsel %vm7322_vm11, %v7392_v47, %v7367_v31  ;;  %v19507_v60 = vld [vmem:[%s21971_s24 + $0x70] sm:$0xff]  ;;  %v22086_v47 = vmov 0.0  }
0x1106   :  { %v7304_v59 = vpop.permute.xlu1 %7303  ;;  %v7370_v52 = vpop.permute.xlu0 %7369 }
0x1107   :  { %v7329_v44 = vsel %vm7328_vm14, %v7327_v39, %v7304_v59  ;;  %v7394_v57 = vsel %vm7324_vm13, %v7393_v11, %v7370_v52 }
0x110a   :  { %v7307_v55 = vpop.permute.xlu1 %7306  ;;  %v7373_v24 = vpop.permute.xlu0 %7372 }
0x110b   :  { %v7331_v56 = vsel %vm7330_vm4, %v7329_v44, %v7307_v55  ;;  %v7395_v33 = vsel %vm7326_vm3, %v7394_v57, %v7373_v24  ;;  %v19496_v55 = vld [vmem:[%s21971_s24 + $0x78] sm:$0xff] }
0x110c   :  { %v19560_v57 = vld [vmem:[%s21971_s24 + $0x58] sm:$0xff] }
0x110e   :  { %v7310_v48 = vpop.permute.xlu1 %7309  ;;  %v7376_v51 = vpop.permute.xlu0 %7375 }
0x110f   :  { %v7333_v12 = vsel %vm7332_vm5, %v7331_v56, %v7310_v48  ;;  %v7396_v15 = vsel %vm7328_vm14, %v7395_v33, %v7376_v51  ;;  %v19545_v48 = vld [vmem:[%s21971_s24 + $0x60] sm:$0xff] }
0x1110   :  { %v19447_v36 = vrot.slane %v7333_v12, %v17003_v58 }
0x1112   :  { %v7379_v59 = vpop.permute.xlu1 %7378  ;;  %v7382_v63 = vpop.permute.xlu0 %7381  ;;  %v7412_v31 = vmul.f32 %v19447_v36, %v19005_v53  ;;  %v7403_v52 = vmul.f32 %v19447_v36, %v18994_v6  ;;  %v7417_v49 = vmul.f32 %v19447_v36, %v19003_v10  ;;  %v7422_v7 = vmul.f32 %v19447_v36, %v19007_v18 }
0x1113   :  { %v7397_v0 = vsel %vm7330_vm4, %v7396_v15, %v7379_v59  ;;  %v7427_v8 = vmul.f32 %v19447_v36, %v19009_v34  ;;  %v7432_v27 = vmul.f32 %v19447_v36, %v19013_v38  ;;  %v7442_v53 = vmul.f32 %v19447_v36, %v19015_v42  ;;  %v19580_v15 = vld [vmem:[%s21971_s24 + $0x50] sm:$0xff] }
0x1114   :  { %v7398_v54 = vsel %vm7332_vm5, %v7397_v0, %v7382_v63  ;;  %v7447_v45 = vmul.f32 %v19447_v36, %v19017_v21  ;;  %v7452_v39 = vmul.f32 %v19447_v36, %v19046_v9  ;;  %v7457_v40 = vmul.f32 %v19447_v36, %v19019_v3  ;;  %v19524_v21 = vld [vmem:[%s21971_s24 + $0x68] sm:$0xff]  ;;  %v19610_v63 = vld [vmem:[%s21971_s24 + $0x38] sm:$0xff]  ;;  %v19619_v0 = vld [vmem:[%s21971_s24 + $0x30] sm:$0xff] }
0x1115   :  { %v19456_v22 = vrot.slane %v7398_v54, %v17003_v58  ;;  %v7437_v58 = vmul.f32 %v19447_v36, %v19011_v37  ;;  %v7462_v44 = vmul.f32 %v19447_v36, %v19057_v13  ;;  %v7467_v51 = vmul.f32 %v19447_v36, %v19027_v2  ;;  %v19628_v54 = vld [vmem:[%s21971_s24 + $0x28] sm:$0xff] }
0x1116   :  { %v3710_v23 = vpop.permute.xlu1 %3709  ;;  %v7472_v11 = vmul.f32 %v19447_v36, %v19064_v16  ;;  %v7477_v12 = vmul.f32 %v19447_v36, %v19054_v35  ;;  %v7482_v33 = vmul.f32 %v19447_v36, %v19076_v1  ;;  %v19592_v1 = vld [vmem:[%s21971_s24 + $0x48] sm:$0xff]  ;;  %v19601_v36 = vld [vmem:[%s21971_s24 + $0x40] sm:$0xff] }
0x1117   :  { %3712 = vst.msk [vmem:[#allocation14] sm:$0x3] %vm2970_vm12, %v3710_v23  ;;  %v7413_v6 = vadd.f32 %v7412_v31, %v19456_v22  ;;  %v7408_v10 = vadd.f32 %v19456_v22, %v7403_v52  ;;  %v19476_v18 = vadd.f32 %v7417_v49, %v19456_v22  ;;  %v19479_v34 = vadd.f32 %v7422_v7, %v19456_v22  ;;  %v19637_v31 = vld [vmem:[%s21971_s24 + $0x20] sm:$0xff]  ;;  %v19655_v52 = vld [vmem:[%s21971_s24 + $0x10] sm:$0xff]  ;;  %v19664_v49 = vld [vmem:[%s21971_s24 + $0x8] sm:$0xff] }
0x1118   :  { %v19482_v38 = vadd.f32 %v7427_v8, %v19456_v22  ;;  %v19485_v37 = vadd.f32 %v7432_v27, %v19456_v22  ;;  %v19488_v42 = vadd.f32 %v7437_v58, %v19456_v22  ;;  %v19491_v29 = vadd.f32 %v7442_v53, %v19456_v22  ;;  %v22089_v7 = vld [vmem:[#allocation37_spill] sm:$0xff]  ;;  %v22090_v8 = vld [vmem:[#allocation39_spill] sm:$0xff]  ;;  %v22091_v27 = vld [vmem:[#allocation22_spill] sm:$0xff] }
0x1119   :  { %vm7414_vm1 = vcmp.gt.f32.partialorder %v7413_v6, 0.0  ;;  %v7415_v50 = vmul.f32 0.01, %v7413_v6  ;;  %vm7409_vm6 = vcmp.gt.f32.partialorder %v7408_v10, 0.0  ;;  %v7410_v25 = vmul.f32 0.01, %v7408_v10 }
0x111a   :  { %v19527_v9 = vadd.f32 %v7447_v45, %v19456_v22  ;;  %v19530_v56 = vadd.f32 %v7452_v39, %v19456_v22  ;;  %v19535_v3 = vadd.f32 %v7457_v40, %v19456_v22  ;;  %v19538_v13 = vadd.f32 %v7462_v44, %v19456_v22  ;;  %v19675_v23 = vld [vmem:[%s21971_s24] sm:$0xff]  ;;  %v22092_v58 = vld [vmem:[#allocation23_spill] sm:$0xff]  ;;  %v22099_v45 = vld [vmem:[#allocation30_spill] sm:$0xff] }
0x111b   :  { %v19498_v24 = vsel %vm7414_vm1, %v7413_v6, %v7415_v50  ;;  %v19500_v43 = vsel %vm7409_vm6, %v7408_v10, %v7410_v25  ;;  %v19563_v2 = vadd.f32 %v7467_v51, %v19456_v22  ;;  %v19566_v16 = vadd.f32 %v7472_v11, %v19456_v22  ;;  %v22093_v53 = vld [vmem:[#allocation24_spill] sm:$0xff]  ;;  %v22094_v6 = vld [vmem:[#allocation25_spill] sm:$0xff]  ;;  %v22095_v10 = vld [vmem:[#allocation26_spill] sm:$0xff] }
0x111c   :  { %14192 = vmatmul.mubr.f32.vlgmr.msra.gmra.mxu0 %v19498_v24  ;;  %14227 = vmatmul.mubr.f32.vlgmr.msra.gmra.mxu1 %v19500_v43  ;;  %v19571_v35 = vadd.f32 %v7477_v12, %v19456_v22  ;;  %v19585_v59 = vadd.f32 %v7482_v33, %v19456_v22  ;;  %v19646_v22 = vld [vmem:[%s21971_s24 + $0x18] sm:$0xff]  ;;  %v22102_v44 = vld [vmem:[#allocation33_spill] sm:$0xff]  ;;  %v22103_v51 = vld [vmem:[#allocation34_spill] sm:$0xff]  ;;  %v7420_v12 = vmul.f32 0.01, %v19476_v18  ;;  %vm7419_vm7 = vcmp.gt.f32.partialorder %v19476_v18, 0.0 }
0x111d   :  { %14230 = vmatpush3.msra.mxu0 %v19160_v46  ;;  %14265 = vmatpush3.msra.mxu1 %v19496_v55  ;;  %v22096_v50 = vld [vmem:[#allocation27_spill] sm:$0xff]  ;;  %v22097_v25 = vld [vmem:[#allocation28_spill] sm:$0xff]  ;;  %vm7424_vm8 = vcmp.gt.f32.partialorder %v19479_v34, 0.0  ;;  %vm7429_vm9 = vcmp.gt.f32.partialorder %v19482_v38, 0.0  ;;  %vm7434_vm12 = vcmp.gt.f32.partialorder %v19485_v37, 0.0  ;;  %vm7439_vm10 = vcmp.gt.f32.partialorder %v19488_v42, 0.0 }
0x111e   :  { %14231 = vmatprep.subr.mxu0 %v22086_v47  ;;  %14266 = vmatprep.subr.mxu1 %v22086_v47  ;;  %22087 = vst [vmem:[#allocation40_spill] sm:$0xff] %v19571_v35  ;;  %22088 = vst [vmem:[#allocation41_spill] sm:$0xff] %v19585_v59  ;;  %v22100_v39 = vld [vmem:[#allocation31_spill] sm:$0xff]  ;;  %v22101_v40 = vld [vmem:[#allocation32_spill] sm:$0xff]  ;;  %v19758_v35 = vsel %vm7419_vm7, %v19476_v18, %v7420_v12  ;;  %v7425_v18 = vmul.f32 0.01, %v19479_v34 }
0x111f   :  { %14232 = vmatpush3.msra.mxu0 %v19174_v20  ;;  %14267 = vmatpush3.msra.mxu1 %v19507_v60  ;;  %v22104_v11 = vld [vmem:[#allocation35_spill] sm:$0xff]  ;;  %v22105_v33 = vld [vmem:[#allocation36_spill] sm:$0xff]  ;;  %v22106_v59 = vld [vmem:[#allocation38_spill] sm:$0xff]  ;;  %vm7444_vm2 = vcmp.gt.f32.partialorder %v19491_v29, 0.0  ;;  %vm7449_vm11 = vcmp.gt.f32.partialorder %v19527_v9, 0.0  ;;  %vm7454_vm13 = vcmp.gt.f32.partialorder %v19530_v56, 0.0 }
0x1120   :  { %14233 = vmatprep.subr.mxu0 %v22086_v47  ;;  %14268 = vmatprep.subr.mxu1 %v22086_v47  ;;  %vm7459_vm3 = vcmp.gt.f32.partialorder %v19535_v3, 0.0  ;;  %vm7464_vm14 = vcmp.gt.f32.partialorder %v19538_v13, 0.0  ;;  %vm7469_vm4 = vcmp.gt.f32.partialorder %v19563_v2, 0.0  ;;  %vm7474_vm5 = vcmp.gt.f32.partialorder %v19566_v16, 0.0 }
0x1121   :  { %14234 = vmatpush3.msra.mxu0 %v19190_v26  ;;  %14269 = vmatpush3.msra.mxu1 %v19524_v21 }
0x1122   :  { %14235 = vmatprep.subr.mxu0 %v22086_v47  ;;  %14270 = vmatprep.subr.mxu1 %v22086_v47 }
0x1123   :  { %14236 = vmatpush3.msra.mxu0 %v19208_v28  ;;  %14271 = vmatpush3.msra.mxu1 %v19545_v48 }
0x1124   :  { %14237 = vmatprep.subr.mxu0 %v22086_v47  ;;  %14272 = vmatprep.subr.mxu1 %v22086_v47 }
0x1125   :  { %14238 = vmatpush3.msra.mxu0 %v19224_v30  ;;  %14273 = vmatpush3.msra.mxu1 %v19560_v57 }
0x1126   :  { %14239 = vmatprep.subr.mxu0 %v22086_v47  ;;  %14274 = vmatprep.subr.mxu1 %v22086_v47 }
0x1127   :  { %14240 = vmatpush3.msra.mxu0 %v19240_v32  ;;  %14275 = vmatpush3.msra.mxu1 %v19580_v15 }
0x1128   :  { %14241 = vmatprep.subr.mxu0 %v22086_v47  ;;  %14276 = vmatprep.subr.mxu1 %v22086_v47 }
0x1129   :  { %14242 = vmatpush3.msra.mxu0 %v19258_v62  ;;  %14277 = vmatpush3.msra.mxu1 %v19592_v1 }
0x112a   :  { %14243 = vmatprep.subr.mxu0 %v22086_v47  ;;  %14278 = vmatprep.subr.mxu1 %v22086_v47 }
0x112b   :  { %14244 = vmatpush3.msra.mxu0 %v19274_v4  ;;  %14279 = vmatpush3.msra.mxu1 %v19601_v36 }
0x112c   :  { %14245 = vmatprep.subr.mxu0 %v22086_v47  ;;  %14280 = vmatprep.subr.mxu1 %v22086_v47 }
0x112d   :  { %14246 = vmatpush3.msra.mxu0 %v19290_v61  ;;  %14281 = vmatpush3.msra.mxu1 %v19610_v63 }
0x112e   :  { %14247 = vmatprep.subr.mxu0 %v22086_v47  ;;  %14282 = vmatprep.subr.mxu1 %v22086_v47 }
0x112f   :  { %14248 = vmatpush3.msra.mxu0 %v19308_v14  ;;  %14283 = vmatpush3.msra.mxu1 %v19619_v0 }
0x1130   :  { %14249 = vmatprep.subr.mxu0 %v22086_v47  ;;  %14284 = vmatprep.subr.mxu1 %v22086_v47 }
0x1131   :  { %14250 = vmatpush3.msra.mxu0 %v19324_v17  ;;  %14285 = vmatpush3.msra.mxu1 %v19628_v54 }
0x1132   :  { %14251 = vmatprep.subr.mxu0 %v22086_v47  ;;  %14286 = vmatprep.subr.mxu1 %v22086_v47 }
0x1133   :  { %14252 = vmatpush3.msra.mxu0 %v19340_v19  ;;  %14287 = vmatpush3.msra.mxu1 %v19637_v31 }
0x1134   :  { %14253 = vmatprep.subr.mxu0 %v22086_v47  ;;  %14288 = vmatprep.subr.mxu1 %v22086_v47 }
0x1135   :  { %14254 = vmatpush3.msra.mxu0 %v19358_v5  ;;  %14289 = vmatpush3.msra.mxu1 %v19646_v22 }
0x1136   :  { %14255 = vmatprep.subr.mxu0 %v22086_v47  ;;  %14290 = vmatprep.subr.mxu1 %v22086_v47 }
0x1137   :  { %14256 = vmatpush3.msra.mxu0 %v19374_v41  ;;  %14291 = vmatpush3.msra.mxu1 %v19655_v52 }
0x1138   :  { %14257 = vmatprep.subr.mxu0 %v22086_v47  ;;  %14292 = vmatprep.subr.mxu1 %v22086_v47 }
0x1139   :  { %14258 = vmatpush3.msra.mxu0 %v22089_v7  ;;  %14293 = vmatpush3.msra.mxu1 %v19664_v49 }
0x113a   :  { %14259 = vmatprep.subr.mxu0 %v22086_v47  ;;  %14294 = vmatprep.subr.mxu1 %v22086_v47 }
0x113b   :  { %14260 = vmatpush3.msra.mxu0 %v22090_v8  ;;  %14261 = vmatprep.mubr.msk.f32.mxu0 %vm16152_vm0, %v22086_v47 }
0x113c   :  { %14295 = vmatpush3.msra.mxu1 %v19675_v23  ;;  %14296 = vmatprep.mubr.msk.f32.mxu1 %vm16152_vm0, %v22086_v47 }
0x113d   :  { %14262 = vmatmul.mubr.f32.vlgmr.msra.gmra.mxu0 %v19498_v24  ;;  %14297 = vmatmul.mubr.f32.vlgmr.msra.gmra.mxu1 %v19500_v43  ;;  %v22098_v43 = vld [vmem:[#allocation29_spill] sm:$0xff] }
0x113e   :  { %14299 = vmatprep.subr.mxu0 %v22086_v47  ;;  %14334 = vmatprep.subr.mxu1 %v22086_v47 }
0x113f   :  { %14300 = vmatpush3.msra.mxu0 %v22091_v27  ;;  %14335 = vmatpush3.msra.mxu1 %v19160_v46 }
0x1140   :  { %14301 = vmatprep.subr.mxu0 %v22086_v47  ;;  %14336 = vmatprep.subr.mxu1 %v22086_v47 }
0x1141   :  { %14302 = vmatpush3.msra.mxu0 %v22092_v58  ;;  %14337 = vmatpush3.msra.mxu1 %v19174_v20 }
0x1142   :  { %14303 = vmatprep.subr.mxu0 %v22086_v47  ;;  %14338 = vmatprep.subr.mxu1 %v22086_v47 }
0x1143   :  { %14304 = vmatpush3.msra.mxu0 %v22093_v53  ;;  %14339 = vmatpush3.msra.mxu1 %v19190_v26 }
0x1144   :  { %14305 = vmatprep.subr.mxu0 %v22086_v47  ;;  %14340 = vmatprep.subr.mxu1 %v22086_v47 }
0x1145   :  { %14306 = vmatpush3.msra.mxu0 %v22094_v6  ;;  %14341 = vmatpush3.msra.mxu1 %v19208_v28 }
0x1146   :  { %14307 = vmatprep.subr.mxu0 %v22086_v47  ;;  %14342 = vmatprep.subr.mxu1 %v22086_v47 }
0x1147   :  { %14308 = vmatpush3.msra.mxu0 %v22095_v10  ;;  %14343 = vmatpush3.msra.mxu1 %v19224_v30 }
0x1148   :  { %14309 = vmatprep.subr.mxu0 %v22086_v47  ;;  %14344 = vmatprep.subr.mxu1 %v22086_v47 }
0x1149   :  { %14310 = vmatpush3.msra.mxu0 %v22096_v50  ;;  %14345 = vmatpush3.msra.mxu1 %v19240_v32 }
0x114a   :  { %14311 = vmatprep.subr.mxu0 %v22086_v47  ;;  %14346 = vmatprep.subr.mxu1 %v22086_v47 }
0x114b   :  { %14312 = vmatpush3.msra.mxu0 %v22097_v25  ;;  %14347 = vmatpush3.msra.mxu1 %v19258_v62 }
0x114c   :  { %14313 = vmatprep.subr.mxu0 %v22086_v47  ;;  %14348 = vmatprep.subr.mxu1 %v22086_v47 }
0x114d   :  { %14314 = vmatpush3.msra.mxu0 %v22098_v43  ;;  %14349 = vmatpush3.msra.mxu1 %v19274_v4 }
0x114e   :  { %14315 = vmatprep.subr.mxu0 %v22086_v47  ;;  %14350 = vmatprep.subr.mxu1 %v22086_v47 }
0x114f   :  { %14316 = vmatpush3.msra.mxu0 %v22099_v45  ;;  %14351 = vmatpush3.msra.mxu1 %v19290_v61 }
0x1150   :  { %14317 = vmatprep.subr.mxu0 %v22086_v47  ;;  %14352 = vmatprep.subr.mxu1 %v22086_v47 }
0x1151   :  { %14318 = vmatpush3.msra.mxu0 %v22100_v39  ;;  %14353 = vmatpush3.msra.mxu1 %v19308_v14 }
0x1152   :  { %14319 = vmatprep.subr.mxu0 %v22086_v47  ;;  %14354 = vmatprep.subr.mxu1 %v22086_v47 }
0x1153   :  { %14320 = vmatpush3.msra.mxu0 %v22101_v40  ;;  %14355 = vmatpush3.msra.mxu1 %v19324_v17 }
0x1154   :  { %14321 = vmatprep.subr.mxu0 %v22086_v47  ;;  %14356 = vmatprep.subr.mxu1 %v22086_v47 }
0x1155   :  { %14322 = vmatpush3.msra.mxu0 %v22102_v44  ;;  %14357 = vmatpush3.msra.mxu1 %v19340_v19 }
0x1156   :  { %14323 = vmatprep.subr.mxu0 %v22086_v47  ;;  %14358 = vmatprep.subr.mxu1 %v22086_v47 }
0x1157   :  { %14324 = vmatpush3.msra.mxu0 %v22103_v51  ;;  %14359 = vmatpush3.msra.mxu1 %v19358_v5 }
0x1158   :  { %14325 = vmatprep.subr.mxu0 %v22086_v47  ;;  %14360 = vmatprep.subr.mxu1 %v22086_v47 }
0x1159   :  { %14326 = vmatpush3.msra.mxu0 %v22104_v11  ;;  %14361 = vmatpush3.msra.mxu1 %v19374_v41 }
0x115a   :  { %14327 = vmatprep.subr.mxu0 %v22086_v47  ;;  %14362 = vmatprep.subr.mxu1 %v22086_v47 }
0x115b   :  { %14328 = vmatpush3.msra.mxu0 %v22105_v33  ;;  %14363 = vmatpush3.msra.mxu1 %v22089_v7 }
0x115c   :  { %14329 = vmatprep.subr.mxu0 %v22086_v47  ;;  %14364 = vmatprep.subr.mxu1 %v22086_v47 }
0x115d   :  { %14330 = vmatpush3.msra.mxu0 %v22106_v59  ;;  %14331 = vmatprep.mubr.msk.f32.mxu0 %vm16152_vm0, %v22086_v47 }
0x115e   :  { %14365 = vmatpush3.msra.mxu1 %v22090_v8  ;;  %14366 = vmatprep.mubr.msk.f32.mxu1 %vm16152_vm0, %v22086_v47 }
0x115f   :  { %14332 = vmatmul.mubr.f32.vlgmr.msra.gmra.mxu0 %v19758_v35  ;;  %14367 = vmatmul.mubr.f32.vlgmr.msra.gmra.mxu1 %v19758_v35 }
0x1160   :  { %14369 = vmatprep.subr.mxu0 %v22086_v47  ;;  %14404 = vmatprep.subr.mxu1 %v22086_v47 }
0x1161   :  { %14370 = vmatpush3.msra.mxu0 %v19496_v55  ;;  %14405 = vmatpush3.msra.mxu1 %v22091_v27  ;;  %v19833_v27 = vsel %vm7424_vm8, %v19479_v34, %v7425_v18  ;;  %v19946_v34 = vld [vmem:[%s21971_s24 + $0xe8] sm:$0xff] }
0x1162   :  { %14371 = vmatprep.subr.mxu0 %v22086_v47  ;;  %14406 = vmatprep.subr.mxu1 %v22086_v47 }
0x1163   :  { %14372 = vmatpush3.msra.mxu0 %v19507_v60  ;;  %14407 = vmatpush3.msra.mxu1 %v22092_v58  ;;  %v19968_v58 = vld [vmem:[%s21971_s24 + $0x158] sm:$0xff] }
0x1164   :  { %14373 = vmatprep.subr.mxu0 %v22086_v47  ;;  %14408 = vmatprep.subr.mxu1 %v22086_v47 }
0x1165   :  { %14374 = vmatpush3.msra.mxu0 %v19524_v21  ;;  %14409 = vmatpush3.msra.mxu1 %v22093_v53  ;;  %v19974_v53 = vld [vmem:[%s21971_s24 + $0xd8] sm:$0xff] }
0x1166   :  { %14375 = vmatprep.subr.mxu0 %v22086_v47  ;;  %14410 = vmatprep.subr.mxu1 %v22086_v47 }
0x1167   :  { %14376 = vmatpush3.msra.mxu0 %v19545_v48  ;;  %14411 = vmatpush3.msra.mxu1 %v22094_v6 }
0x1168   :  { %14377 = vmatprep.subr.mxu0 %v22086_v47  ;;  %14412 = vmatprep.subr.mxu1 %v22086_v47 }
0x1169   :  { %14378 = vmatpush3.msra.mxu0 %v19560_v57  ;;  %14413 = vmatpush3.msra.mxu1 %v22095_v10 }
0x116a   :  { %14379 = vmatprep.subr.mxu0 %v22086_v47  ;;  %14414 = vmatprep.subr.mxu1 %v22086_v47 }
0x116b   :  { %14380 = vmatpush3.msra.mxu0 %v19580_v15  ;;  %14415 = vmatpush3.msra.mxu1 %v22096_v50 }
0x116c   :  { %14381 = vmatprep.subr.mxu0 %v22086_v47  ;;  %14416 = vmatprep.subr.mxu1 %v22086_v47 }
0x116d   :  { %14382 = vmatpush3.msra.mxu0 %v19592_v1  ;;  %14417 = vmatpush3.msra.mxu1 %v22097_v25 }
0x116e   :  { %14383 = vmatprep.subr.mxu0 %v22086_v47  ;;  %14418 = vmatprep.subr.mxu1 %v22086_v47 }
0x116f   :  { %14384 = vmatpush3.msra.mxu0 %v19601_v36  ;;  %14419 = vmatpush3.msra.mxu1 %v22098_v43 }
0x1170   :  { %14385 = vmatprep.subr.mxu0 %v22086_v47  ;;  %14420 = vmatprep.subr.mxu1 %v22086_v47 }
0x1171   :  { %14386 = vmatpush3.msra.mxu0 %v19610_v63  ;;  %14421 = vmatpush3.msra.mxu1 %v22099_v45 }
0x1172   :  { %14387 = vmatprep.subr.mxu0 %v22086_v47  ;;  %14422 = vmatprep.subr.mxu1 %v22086_v47 }
0x1173   :  { %14388 = vmatpush3.msra.mxu0 %v19619_v0  ;;  %14423 = vmatpush3.msra.mxu1 %v22100_v39 }
0x1174   :  { %14389 = vmatprep.subr.mxu0 %v22086_v47  ;;  %14424 = vmatprep.subr.mxu1 %v22086_v47 }
0x1175   :  { %14390 = vmatpush3.msra.mxu0 %v19628_v54  ;;  %14425 = vmatpush3.msra.mxu1 %v22101_v40 }
0x1176   :  { %14391 = vmatprep.subr.mxu0 %v22086_v47  ;;  %14426 = vmatprep.subr.mxu1 %v22086_v47 }
0x1177   :  { %14392 = vmatpush3.msra.mxu0 %v19637_v31  ;;  %14427 = vmatpush3.msra.mxu1 %v22102_v44 }
0x1178   :  { %14393 = vmatprep.subr.mxu0 %v22086_v47  ;;  %14428 = vmatprep.subr.mxu1 %v22086_v47 }
0x1179   :  { %14394 = vmatpush3.msra.mxu0 %v19646_v22  ;;  %14429 = vmatpush3.msra.mxu1 %v22103_v51 }
0x117a   :  { %14395 = vmatprep.subr.mxu0 %v22086_v47  ;;  %14430 = vmatprep.subr.mxu1 %v22086_v47 }
0x117b   :  { %14396 = vmatpush3.msra.mxu0 %v19655_v52  ;;  %14431 = vmatpush3.msra.mxu1 %v22104_v11 }
0x117c   :  { %14397 = vmatprep.subr.mxu0 %v22086_v47  ;;  %14432 = vmatprep.subr.mxu1 %v22086_v47 }
0x117d   :  { %14398 = vmatpush3.msra.mxu0 %v19664_v49  ;;  %14433 = vmatpush3.msra.mxu1 %v22105_v33 }
0x117e   :  { %14399 = vmatprep.subr.mxu0 %v22086_v47  ;;  %14434 = vmatprep.subr.mxu1 %v22086_v47 }
0x117f   :  { %14400 = vmatpush3.msra.mxu0 %v19675_v23  ;;  %14401 = vmatprep.mubr.msk.f32.mxu0 %vm16152_vm0, %v22086_v47 }
0x1180   :  { %14435 = vmatpush3.msra.mxu1 %v22106_v59  ;;  %14436 = vmatprep.mubr.msk.f32.mxu1 %vm16152_vm0, %v22086_v47 }
0x1181   :  { %14402 = vmatmul.mubr.f32.vlgmr.msra.gmra.mxu0 %v19498_v24  ;;  %14437 = vmatmul.mubr.f32.vlgmr.msra.gmra.mxu1 %v19833_v27  ;;  %v19954_v24 = vld [vmem:[%s21971_s24 + $0x160] sm:$0xff] }
0x1182   :  { %14439 = vmatprep.subr.mxu0 %v22086_v47  ;;  %14474 = vmatprep.subr.mxu1 %v22086_v47 }
0x1183   :  { %14440 = vmatpush3.msra.mxu0 %v19160_v46  ;;  %14475 = vmatpush3.msra.mxu1 %v19496_v55  ;;  %v19912_v46 = vld [vmem:[%s21971_s24 + $0x178] sm:$0xff] }
0x1184   :  { %14441 = vmatprep.subr.mxu0 %v22086_v47  ;;  %14476 = vmatprep.subr.mxu1 %v22086_v47 }
0x1185   :  { %14442 = vmatpush3.msra.mxu0 %v19174_v20  ;;  %14477 = vmatpush3.msra.mxu1 %v19507_v60  ;;  %v19918_v20 = vld [vmem:[%s21971_s24 + $0xf8] sm:$0xff] }
0x1186   :  { %14443 = vmatprep.subr.mxu0 %v22086_v47  ;;  %14478 = vmatprep.subr.mxu1 %v22086_v47 }
0x1187   :  { %14444 = vmatpush3.msra.mxu0 %v19190_v26  ;;  %14479 = vmatpush3.msra.mxu1 %v19524_v21  ;;  %v19926_v26 = vld [vmem:[%s21971_s24 + $0x170] sm:$0xff] }
0x1188   :  { %14445 = vmatprep.subr.mxu0 %v22086_v47  ;;  %14480 = vmatprep.subr.mxu1 %v22086_v47 }
0x1189   :  { %14446 = vmatpush3.msra.mxu0 %v19208_v28  ;;  %14481 = vmatpush3.msra.mxu1 %v19545_v48  ;;  %v19932_v28 = vld [vmem:[%s21971_s24 + $0xf0] sm:$0xff] }
0x118a   :  { %14447 = vmatprep.subr.mxu0 %v22086_v47  ;;  %14482 = vmatprep.subr.mxu1 %v22086_v47 }
0x118b   :  { %14448 = vmatpush3.msra.mxu0 %v19224_v30  ;;  %14483 = vmatpush3.msra.mxu1 %v19560_v57  ;;  %v19940_v30 = vld [vmem:[%s21971_s24 + $0x168] sm:$0xff] }
0x118c   :  { %14449 = vmatprep.subr.mxu0 %v22086_v47  ;;  %14484 = vmatprep.subr.mxu1 %v22086_v47 }
0x118d   :  { %14450 = vmatpush3.msra.mxu0 %v19240_v32  ;;  %14485 = vmatpush3.msra.mxu1 %v19580_v15 }
0x118e   :  { %14451 = vmatprep.subr.mxu0 %v22086_v47  ;;  %14486 = vmatprep.subr.mxu1 %v22086_v47 }
0x118f   :  { %14452 = vmatpush3.msra.mxu0 %v19258_v62  ;;  %14487 = vmatpush3.msra.mxu1 %v19592_v1 }
0x1190   :  { %14453 = vmatprep.subr.mxu0 %v22086_v47  ;;  %14488 = vmatprep.subr.mxu1 %v22086_v47 }
0x1191   :  { %14454 = vmatpush3.msra.mxu0 %v19274_v4  ;;  %14489 = vmatpush3.msra.mxu1 %v19601_v36 }
0x1192   :  { %14455 = vmatprep.subr.mxu0 %v22086_v47  ;;  %14490 = vmatprep.subr.mxu1 %v22086_v47 }
0x1193   :  { %14456 = vmatpush3.msra.mxu0 %v19290_v61  ;;  %14491 = vmatpush3.msra.mxu1 %v19610_v63 }
0x1194   :  { %14457 = vmatprep.subr.mxu0 %v22086_v47  ;;  %14492 = vmatprep.subr.mxu1 %v22086_v47 }
0x1195   :  { %14458 = vmatpush3.msra.mxu0 %v19308_v14  ;;  %14493 = vmatpush3.msra.mxu1 %v19619_v0 }
0x1196   :  { %14459 = vmatprep.subr.mxu0 %v22086_v47  ;;  %14494 = vmatprep.subr.mxu1 %v22086_v47 }
0x1197   :  { %14460 = vmatpush3.msra.mxu0 %v19324_v17  ;;  %14495 = vmatpush3.msra.mxu1 %v19628_v54 }
0x1198   :  { %14461 = vmatprep.subr.mxu0 %v22086_v47  ;;  %14496 = vmatprep.subr.mxu1 %v22086_v47 }
0x1199   :  { %14462 = vmatpush3.msra.mxu0 %v19340_v19  ;;  %14497 = vmatpush3.msra.mxu1 %v19637_v31 }
0x119a   :  { %14463 = vmatprep.subr.mxu0 %v22086_v47  ;;  %14498 = vmatprep.subr.mxu1 %v22086_v47 }
0x119b   :  { %14464 = vmatpush3.msra.mxu0 %v19358_v5  ;;  %14499 = vmatpush3.msra.mxu1 %v19646_v22 }
0x119c   :  { %14465 = vmatprep.subr.mxu0 %v22086_v47  ;;  %14500 = vmatprep.subr.mxu1 %v22086_v47 }
0x119d   :  { %14466 = vmatpush3.msra.mxu0 %v19374_v41  ;;  %14501 = vmatpush3.msra.mxu1 %v19655_v52 }
0x119e   :  { %14467 = vmatprep.subr.mxu0 %v22086_v47  ;;  %14502 = vmatprep.subr.mxu1 %v22086_v47 }
0x119f   :  { %14468 = vmatpush3.msra.mxu0 %v22089_v7  ;;  %14503 = vmatpush3.msra.mxu1 %v19664_v49 }
0x11a0   :  { %14469 = vmatprep.subr.mxu0 %v22086_v47  ;;  %14504 = vmatprep.subr.mxu1 %v22086_v47 }
0x11a1   :  { %14470 = vmatpush3.msra.mxu0 %v22090_v8  ;;  %14471 = vmatprep.mubr.msk.f32.mxu0 %vm16152_vm0, %v22086_v47 }
0x11a2   :  { %14505 = vmatpush3.msra.mxu1 %v19675_v23  ;;  %14506 = vmatprep.mubr.msk.f32.mxu1 %vm16152_vm0, %v22086_v47 }
0x11a3   :  { %14472 = vmatmul.mubr.f32.vlgmr.msra.gmra.mxu0 %v19833_v27  ;;  %14507 = vmatmul.mubr.f32.vlgmr.msra.gmra.mxu1 %v19758_v35  ;;  %v19960_v35 = vld [vmem:[%s21971_s24 + $0xe0] sm:$0xff] }
0x11a4   :  { %14509 = vmatprep.subr.mxu0 %v22086_v47  ;;  %14544 = vmatprep.subr.mxu1 %v22086_v47 }
0x11a5   :  { %14510 = vmatpush3.msra.mxu0 %v19912_v46  ;;  %14545 = vmatpush3.msra.mxu1 %v19918_v20 }
0x11a6   :  { %14511 = vmatprep.subr.mxu0 %v22086_v47  ;;  %14546 = vmatprep.subr.mxu1 %v22086_v47 }
0x11a7   :  { %14512 = vmatpush3.msra.mxu0 %v19926_v26  ;;  %14547 = vmatpush3.msra.mxu1 %v19932_v28 }
0x11a8   :  { %14513 = vmatprep.subr.mxu0 %v22086_v47  ;;  %14548 = vmatprep.subr.mxu1 %v22086_v47 }
0x11a9   :  { %14514 = vmatpush3.msra.mxu0 %v19940_v30  ;;  %14549 = vmatpush3.msra.mxu1 %v19946_v34 }
0x11aa   :  { %14515 = vmatprep.subr.mxu0 %v22086_v47  ;;  %14550 = vmatprep.subr.mxu1 %v22086_v47 }
0x11ab   :  { %14516 = vmatpush3.msra.mxu0 %v19954_v24  ;;  %14551 = vmatpush3.msra.mxu1 %v19960_v35 }
0x11ac   :  { %14517 = vmatprep.subr.mxu0 %v22086_v47  ;;  %14552 = vmatprep.subr.mxu1 %v22086_v47 }
0x11ad   :  { %14518 = vmatpush3.msra.mxu0 %v19968_v58  ;;  %14553 = vmatpush3.msra.mxu1 %v19974_v53 }
0x11ae   :  { %14519 = vmatprep.subr.mxu0 %v22086_v47  ;;  %14554 = vmatprep.subr.mxu1 %v22086_v47 }
0x11af   :  { %14520 = vmatpush3.msra.mxu0 %v22096_v50  ;;  %14555 = vmatpush3.msra.mxu1 %v19240_v32  ;;  %v7430_v32 = vmul.f32 0.01, %v19482_v38  ;;  %v20126_v50 = vld [vmem:[%s21971_s24 + $0x118] sm:$0xff] }
0x11b0   :  { %14521 = vmatprep.subr.mxu0 %v22086_v47  ;;  %14556 = vmatprep.subr.mxu1 %v22086_v47 }
0x11b1   :  { %14522 = vmatpush3.msra.mxu0 %v22097_v25  ;;  %14557 = vmatpush3.msra.mxu1 %v19258_v62  ;;  %v20028_v62 = vsel %vm7429_vm9, %v19482_v38, %v7430_v32  ;;  %v7440_v32 = vmul.f32 0.01, %v19488_v42 }
0x11b2   :  { %14523 = vmatprep.subr.mxu0 %v22086_v47  ;;  %14558 = vmatprep.subr.mxu1 %v22086_v47 }
0x11b3   :  { %14524 = vmatpush3.msra.mxu0 %v22098_v43  ;;  %14559 = vmatpush3.msra.mxu1 %v19274_v4  ;;  %v20058_v4 = vld [vmem:[%s21971_s24 + $0x150] sm:$0xff] }
0x11b4   :  { %14525 = vmatprep.subr.mxu0 %v22086_v47  ;;  %14560 = vmatprep.subr.mxu1 %v22086_v47  ;;  %v20136_v43 = vld [vmem:[%s21971_s24 + $0x110] sm:$0xff] }
0x11b5   :  { %14526 = vmatpush3.msra.mxu0 %v22099_v45  ;;  %14561 = vmatpush3.msra.mxu1 %v19290_v61  ;;  %v20067_v61 = vld [vmem:[%s21971_s24 + $0x148] sm:$0xff]  ;;  %v7435_v45 = vmul.f32 0.01, %v19485_v37 }
0x11b6   :  { %14527 = vmatprep.subr.mxu0 %v22086_v47  ;;  %14562 = vmatprep.subr.mxu1 %v22086_v47 }
0x11b7   :  { %14528 = vmatpush3.msra.mxu0 %v22100_v39  ;;  %14563 = vmatpush3.msra.mxu1 %v19308_v14  ;;  %v20076_v14 = vld [vmem:[%s21971_s24 + $0x140] sm:$0xff]  ;;  %v20146_v39 = vld [vmem:[%s21971_s24 + $0x108] sm:$0xff] }
0x11b8   :  { %14529 = vmatprep.subr.mxu0 %v22086_v47  ;;  %14564 = vmatprep.subr.mxu1 %v22086_v47 }
0x11b9   :  { %14530 = vmatpush3.msra.mxu0 %v22101_v40  ;;  %14565 = vmatpush3.msra.mxu1 %v19324_v17  ;;  %v20085_v17 = vld [vmem:[%s21971_s24 + $0x138] sm:$0xff]  ;;  %v20158_v40 = vld [vmem:[%s21971_s24 + $0x100] sm:$0xff] }
0x11ba   :  { %14531 = vmatprep.subr.mxu0 %v22086_v47  ;;  %14566 = vmatprep.subr.mxu1 %v22086_v47 }
0x11bb   :  { %14532 = vmatpush3.msra.mxu0 %v22102_v44  ;;  %14567 = vmatpush3.msra.mxu1 %v19340_v19  ;;  %v20094_v19 = vld [vmem:[%s21971_s24 + $0x130] sm:$0xff]  ;;  %v20164_v44 = vsel %vm7434_vm12, %v19485_v37, %v7435_v45  ;;  %v20444_v45 = vld [vmem:[%s21971_s24 + $0x48] sm:$0xff] }
0x11bc   :  { %14533 = vmatprep.subr.mxu0 %v22086_v47  ;;  %14568 = vmatprep.subr.mxu1 %v22086_v47 }
0x11bd   :  { %14534 = vmatpush3.msra.mxu0 %v22103_v51  ;;  %14569 = vmatpush3.msra.mxu1 %v19358_v5  ;;  %v20103_v5 = vld [vmem:[%s21971_s24 + $0x128] sm:$0xff] }
0x11be   :  { %14535 = vmatprep.subr.mxu0 %v22086_v47  ;;  %14570 = vmatprep.subr.mxu1 %v22086_v47 }
0x11bf   :  { %14536 = vmatpush3.msra.mxu0 %v22104_v11  ;;  %14571 = vmatpush3.msra.mxu1 %v19374_v41 }
0x11c0   :  { %14537 = vmatprep.subr.mxu0 %v22086_v47  ;;  %14572 = vmatprep.subr.mxu1 %v22086_v47 }
0x11c1   :  { %14538 = vmatpush3.msra.mxu0 %v22105_v33  ;;  %14573 = vmatpush3.msra.mxu1 %v22089_v7  ;;  %v20117_v7 = vld [vmem:[%s21971_s24 + $0x120] sm:$0xff] }
0x11c2   :  { %14539 = vmatprep.subr.mxu0 %v22086_v47  ;;  %14574 = vmatprep.subr.mxu1 %v22086_v47 }
0x11c3   :  { %14540 = vmatpush3.msra.mxu0 %v22106_v59  ;;  %14541 = vmatprep.mubr.msk.f32.mxu0 %vm16152_vm0, %v22086_v47  ;;  %v20111_v59 = vld [vmem:[%s21972_s25] ss:$0 sm:$0xff] }
0x11c4   :  { %14575 = vmatpush3.msra.mxu1 %v22090_v8  ;;  %14576 = vmatprep.mubr.msk.f32.mxu1 %vm16152_vm0, %v22086_v47 }
0x11c5   :  { %14542 = vmatmul.mubr.f32.vlgmr.msra.gmra.mxu0 %v20028_v62  ;;  %14577 = vmatmul.mubr.f32.vlgmr.msra.gmra.mxu1 %v20028_v62 }
0x11c6   :  { %14579 = vmatprep.subr.mxu0 %v22086_v47  ;;  %14614 = vmatprep.subr.mxu1 %v22086_v47 }
0x11c7   :  { %14580 = vmatpush3.msra.mxu0 %v19496_v55  ;;  %14615 = vmatpush3.msra.mxu1 %v19912_v46 }
0x11c8   :  { %14581 = vmatprep.subr.mxu0 %v22086_v47  ;;  %14616 = vmatprep.subr.mxu1 %v22086_v47 }
0x11c9   :  { %14582 = vmatpush3.msra.mxu0 %v19507_v60  ;;  %14617 = vmatpush3.msra.mxu1 %v19926_v26 }
0x11ca   :  { %14583 = vmatprep.subr.mxu0 %v22086_v47  ;;  %14618 = vmatprep.subr.mxu1 %v22086_v47 }
0x11cb   :  { %14584 = vmatpush3.msra.mxu0 %v19524_v21  ;;  %14619 = vmatpush3.msra.mxu1 %v19940_v30 }
0x11cc   :  { %14585 = vmatprep.subr.mxu0 %v22086_v47  ;;  %14620 = vmatprep.subr.mxu1 %v22086_v47 }
0x11cd   :  { %14586 = vmatpush3.msra.mxu0 %v19545_v48  ;;  %14621 = vmatpush3.msra.mxu1 %v19954_v24 }
0x11ce   :  { %14587 = vmatprep.subr.mxu0 %v22086_v47  ;;  %14622 = vmatprep.subr.mxu1 %v22086_v47 }
0x11cf   :  { %14588 = vmatpush3.msra.mxu0 %v19560_v57  ;;  %14623 = vmatpush3.msra.mxu1 %v19968_v58 }
0x11d0   :  { %14589 = vmatprep.subr.mxu0 %v22086_v47  ;;  %14624 = vmatprep.subr.mxu1 %v22086_v47 }
0x11d1   :  { %14590 = vmatpush3.msra.mxu0 %v19580_v15  ;;  %14625 = vmatpush3.msra.mxu1 %v20058_v4 }
0x11d2   :  { %14591 = vmatprep.subr.mxu0 %v22086_v47  ;;  %14626 = vmatprep.subr.mxu1 %v22086_v47 }
0x11d3   :  { %14592 = vmatpush3.msra.mxu0 %v19592_v1  ;;  %14627 = vmatpush3.msra.mxu1 %v20067_v61 }
0x11d4   :  { %14593 = vmatprep.subr.mxu0 %v22086_v47  ;;  %14628 = vmatprep.subr.mxu1 %v22086_v47 }
0x11d5   :  { %14594 = vmatpush3.msra.mxu0 %v19601_v36  ;;  %14629 = vmatpush3.msra.mxu1 %v20076_v14 }
0x11d6   :  { %14595 = vmatprep.subr.mxu0 %v22086_v47  ;;  %14630 = vmatprep.subr.mxu1 %v22086_v47 }
0x11d7   :  { %14596 = vmatpush3.msra.mxu0 %v19610_v63  ;;  %14631 = vmatpush3.msra.mxu1 %v20085_v17 }
0x11d8   :  { %14597 = vmatprep.subr.mxu0 %v22086_v47  ;;  %14632 = vmatprep.subr.mxu1 %v22086_v47 }
0x11d9   :  { %14598 = vmatpush3.msra.mxu0 %v19619_v0  ;;  %14633 = vmatpush3.msra.mxu1 %v20094_v19 }
0x11da   :  { %14599 = vmatprep.subr.mxu0 %v22086_v47  ;;  %14634 = vmatprep.subr.mxu1 %v22086_v47 }
0x11db   :  { %14600 = vmatpush3.msra.mxu0 %v19628_v54  ;;  %14635 = vmatpush3.msra.mxu1 %v20103_v5 }
0x11dc   :  { %14601 = vmatprep.subr.mxu0 %v22086_v47  ;;  %14636 = vmatprep.subr.mxu1 %v22086_v47  ;;  %v7603_v41 = vpop.f32.mrf.mxu0  ;;  %v7673_v38 = vpop.f32.mrf.mxu1 }
0x11dd   :  { %14602 = vmatpush3.msra.mxu0 %v19637_v31  ;;  %14637 = vmatpush3.msra.mxu1 %v20117_v7  ;;  %v7674_v8 = vadd.f32 %v7673_v38, %v7603_v41  ;;  %v20386_v41 = vld [vmem:[%s21971_s24 + $0x78] sm:$0xff] }
0x11de   :  { %14603 = vmatprep.subr.mxu0 %v22086_v47  ;;  %14638 = vmatprep.subr.mxu1 %v22086_v47  ;;  %v14193_v6 = vpop.f32.mrf.mxu0  ;;  %v14228_v10 = vpop.f32.mrf.mxu1 }
0x11df   :  { %14604 = vmatpush3.msra.mxu0 %v19646_v22  ;;  %14639 = vmatpush3.msra.mxu1 %v20126_v50  ;;  %v10778_v25 = vadd.f32 %v20111_v59, %v7674_v8  ;;  %v20404_v8 = vld [vmem:[%s21971_s24 + $0x68] sm:$0xff]  ;;  %v20417_v6 = vld [vmem:[%s21971_s24 + $0x60] sm:$0xff]  ;;  %v20426_v10 = vld [vmem:[%s21971_s24 + $0x58] sm:$0xff] }
0x11e0   :  { %14605 = vmatprep.subr.mxu0 %v22086_v47  ;;  %14640 = vmatprep.subr.mxu1 %v22086_v47 }
0x11e1   :  { %14606 = vmatpush3.msra.mxu0 %v19655_v52  ;;  %14641 = vmatpush3.msra.mxu1 %v20136_v43  ;;  %15809 = vtanh.f32 %v10778_v25  ;;  %v20435_v25 = vld [vmem:[%s21971_s24 + $0x50] sm:$0xff] }
0x11e2   :  { %14607 = vmatprep.subr.mxu0 %v22086_v47  ;;  %14642 = vmatprep.subr.mxu1 %v22086_v47 }
0x11e3   :  { %14608 = vmatpush3.msra.mxu0 %v19664_v49  ;;  %14643 = vmatpush3.msra.mxu1 %v20146_v39 }
0x11e4   :  { %14609 = vmatprep.subr.mxu0 %v22086_v47  ;;  %14644 = vmatprep.subr.mxu1 %v22086_v47 }
0x11e5   :  { %14610 = vmatpush3.msra.mxu0 %v19675_v23  ;;  %14611 = vmatprep.mubr.msk.f32.mxu0 %vm16152_vm0, %v22086_v47 }
0x11e6   :  { %14645 = vmatpush3.msra.mxu1 %v20158_v40  ;;  %14646 = vmatprep.mubr.msk.f32.mxu1 %vm16152_vm0, %v22086_v47 }
0x11e7   :  { %14612 = vmatmul.mubr.f32.vlgmr.msra.gmra.mxu0 %v19833_v27  ;;  %14647 = vmatmul.mubr.f32.vlgmr.msra.gmra.mxu1 %v20164_v44 }
0x11e8   :  { %14649 = vmatprep.subr.mxu0 %v22086_v47  ;;  %14684 = vmatprep.subr.mxu1 %v22086_v47 }
0x11e9   :  { %14650 = vmatpush3.msra.mxu0 %v19918_v20  ;;  %14685 = vmatpush3.msra.mxu1 %v19496_v55  ;;  %v20197_v55 = vld [vmem:[%s21971_s24 + $0xd0] sm:$0xff] }
0x11ea   :  { %14651 = vmatprep.subr.mxu0 %v22086_v47  ;;  %14686 = vmatprep.subr.mxu1 %v22086_v47 }
0x11eb   :  { %14652 = vmatpush3.msra.mxu0 %v19932_v28  ;;  %14687 = vmatpush3.msra.mxu1 %v19507_v60  ;;  %v20206_v60 = vld [vmem:[%s21971_s24 + $0xc8] sm:$0xff] }
0x11ec   :  { %14653 = vmatprep.subr.mxu0 %v22086_v47  ;;  %14688 = vmatprep.subr.mxu1 %v22086_v47 }
0x11ed   :  { %14654 = vmatpush3.msra.mxu0 %v19946_v34  ;;  %14689 = vmatpush3.msra.mxu1 %v19524_v21  ;;  %v20215_v21 = vld [vmem:[%s21971_s24 + $0xc0] sm:$0xff] }
0x11ee   :  { %v15810_v37 = vpop.eup %15809  ;;  %14655 = vmatprep.subr.mxu0 %v22086_v47  ;;  %14690 = vmatprep.subr.mxu1 %v22086_v47 }
0x11ef   :  { %10781 = vst.msk [vmem:[%s21973_s26] sm:$0x3] %vm10780_vm15, %v15810_v37  ;;  %14656 = vmatpush3.msra.mxu0 %v19960_v35  ;;  %14691 = vmatpush3.msra.mxu1 %v19545_v48  ;;  %v20224_v48 = vld [vmem:[%s21971_s24 + $0xb8] sm:$0xff]  ;;  %v20453_v37 = vld [vmem:[%s21971_s24 + $0x40] sm:$0xff] }
0x11f0   :  { %14657 = vmatprep.subr.mxu0 %v22086_v47  ;;  %14692 = vmatprep.subr.mxu1 %v22086_v47 }
0x11f1   :  { %14658 = vmatpush3.msra.mxu0 %v19974_v53  ;;  %14693 = vmatpush3.msra.mxu1 %v19560_v57  ;;  %v20233_v57 = vld [vmem:[%s21971_s24 + $0xb0] sm:$0xff] }
0x11f2   :  { %14659 = vmatprep.subr.mxu0 %v22086_v47  ;;  %14694 = vmatprep.subr.mxu1 %v22086_v47 }
0x11f3   :  { %14660 = vmatpush3.msra.mxu0 %v20197_v55  ;;  %14695 = vmatpush3.msra.mxu1 %v19580_v15  ;;  %v20242_v15 = vld [vmem:[%s21971_s24 + $0xa8] sm:$0xff] }
0x11f4   :  { %14661 = vmatprep.subr.mxu0 %v22086_v47  ;;  %14696 = vmatprep.subr.mxu1 %v22086_v47 }
0x11f5   :  { %14662 = vmatpush3.msra.mxu0 %v20206_v60  ;;  %14697 = vmatpush3.msra.mxu1 %v19592_v1 }
0x11f6   :  { %14663 = vmatprep.subr.mxu0 %v22086_v47  ;;  %14698 = vmatprep.subr.mxu1 %v22086_v47 }
0x11f7   :  { %14664 = vmatpush3.msra.mxu0 %v20215_v21  ;;  %14699 = vmatpush3.msra.mxu1 %v19601_v36 }
0x11f8   :  { %14665 = vmatprep.subr.mxu0 %v22086_v47  ;;  %14700 = vmatprep.subr.mxu1 %v22086_v47 }
0x11f9   :  { %14666 = vmatpush3.msra.mxu0 %v20224_v48  ;;  %14701 = vmatpush3.msra.mxu1 %v19610_v63  ;;  %v20255_v63 = vld [vmem:[%s21971_s24 + $0xa0] sm:$0xff] }
0x11fa   :  { %14667 = vmatprep.subr.mxu0 %v22086_v47  ;;  %14702 = vmatprep.subr.mxu1 %v22086_v47 }
0x11fb   :  { %14668 = vmatpush3.msra.mxu0 %v20233_v57  ;;  %14703 = vmatpush3.msra.mxu1 %v19619_v0 }
0x11fc   :  { %14669 = vmatprep.subr.mxu0 %v22086_v47  ;;  %14704 = vmatprep.subr.mxu1 %v22086_v47 }
0x11fd   :  { %14670 = vmatpush3.msra.mxu0 %v20242_v15  ;;  %14705 = vmatpush3.msra.mxu1 %v19628_v54  ;;  %v20246_v1 = vpop.f32.mrf.mxu0  ;;  %v20248_v36 = vpop.f32.mrf.mxu1  ;;  %v20264_v54 = vld [vmem:[%s21971_s24 + $0x98] sm:$0xff] }
0x11fe   :  { %14671 = vmatprep.subr.mxu0 %v22086_v47  ;;  %14706 = vmatprep.subr.mxu1 %v22086_v47 }
0x11ff   :  { %14672 = vmatpush3.msra.mxu0 %v20255_v63  ;;  %14707 = vmatpush3.msra.mxu1 %v19637_v31  ;;  %v14263_v0 = vpop.f32.mrf.mxu0  ;;  %v14298_v51 = vpop.f32.mrf.mxu1  ;;  %v20273_v31 = vld [vmem:[%s21971_s24 + $0x90] sm:$0xff] }
0x1200   :  { %14673 = vmatprep.subr.mxu0 %v22086_v47  ;;  %14708 = vmatprep.subr.mxu1 %v22086_v47  ;;  %v20480_v0 = vld [vmem:[%s21971_s24 + $0x28] sm:$0xff] }
0x1201   :  { %14674 = vmatpush3.msra.mxu0 %v20264_v54  ;;  %14709 = vmatpush3.msra.mxu1 %v19646_v22  ;;  %v20282_v22 = vld [vmem:[%s21971_s24 + $0x88] sm:$0xff] }
0x1202   :  { %14675 = vmatprep.subr.mxu0 %v22086_v47  ;;  %14710 = vmatprep.subr.mxu1 %v22086_v47 }
0x1203   :  { %14676 = vmatpush3.msra.mxu0 %v20273_v31  ;;  %14711 = vmatpush3.msra.mxu1 %v19655_v52  ;;  %v20291_v52 = vld [vmem:[%s21971_s24 + $0x80] sm:$0xff] }
0x1204   :  { %14677 = vmatprep.subr.mxu0 %v22086_v47  ;;  %14712 = vmatprep.subr.mxu1 %v22086_v47 }
0x1205   :  { %14678 = vmatpush3.msra.mxu0 %v20282_v22  ;;  %14713 = vmatpush3.msra.mxu1 %v19664_v49  ;;  %v7814_v49 = vadd.f32 %v20248_v36, %v20246_v1  ;;  %v20462_v1 = vld [vmem:[%s21971_s24 + $0x38] sm:$0xff]  ;;  %v20471_v36 = vld [vmem:[%s21971_s24 + $0x30] sm:$0xff] }
0x1206   :  { %14679 = vmatprep.subr.mxu0 %v22086_v47  ;;  %14714 = vmatprep.subr.mxu1 %v22086_v47 }
0x1207   :  { %14680 = vmatpush3.msra.mxu0 %v20291_v52  ;;  %14681 = vmatprep.mubr.msk.f32.mxu0 %vm16152_vm0, %v22086_v47 }
0x1208   :  { %14715 = vmatpush3.msra.mxu1 %v19675_v23  ;;  %14716 = vmatprep.mubr.msk.f32.mxu1 %vm16152_vm0, %v22086_v47 }
0x1209   :  { %14682 = vmatmul.mubr.f32.vlgmr.msra.gmra.mxu0 %v20164_v44  ;;  %14717 = vmatmul.mubr.f32.vlgmr.msra.gmra.mxu1 %v20028_v62  ;;  %v20377_v62 = vsel %vm7439_vm10, %v19488_v42, %v7440_v32  ;;  %v20395_v42 = vld [vmem:[%s21971_s24 + $0x70] sm:$0xff] }
0x120a   :  { %14719 = vmatprep.subr.mxu0 %v22086_v47  ;;  %14754 = vmatprep.subr.mxu1 %v22086_v47 }
0x120b   :  { %14720 = vmatpush3.msra.mxu0 %v19912_v46  ;;  %14755 = vmatpush3.msra.mxu1 %v19918_v20 }
0x120c   :  { %14721 = vmatprep.subr.mxu0 %v22086_v47  ;;  %14756 = vmatprep.subr.mxu1 %v22086_v47 }
0x120d   :  { %14722 = vmatpush3.msra.mxu0 %v19926_v26  ;;  %14757 = vmatpush3.msra.mxu1 %v19932_v28 }
0x120e   :  { %14723 = vmatprep.subr.mxu0 %v22086_v47  ;;  %14758 = vmatprep.subr.mxu1 %v22086_v47 }
0x120f   :  { %14724 = vmatpush3.msra.mxu0 %v19940_v30  ;;  %14759 = vmatpush3.msra.mxu1 %v19946_v34 }
0x1210   :  { %14725 = vmatprep.subr.mxu0 %v22086_v47  ;;  %14760 = vmatprep.subr.mxu1 %v22086_v47 }
0x1211   :  { %14726 = vmatpush3.msra.mxu0 %v19954_v24  ;;  %14761 = vmatpush3.msra.mxu1 %v19960_v35 }
0x1212   :  { %14727 = vmatprep.subr.mxu0 %v22086_v47  ;;  %14762 = vmatprep.subr.mxu1 %v22086_v47 }
0x1213   :  { %14728 = vmatpush3.msra.mxu0 %v19968_v58  ;;  %14763 = vmatpush3.msra.mxu1 %v19974_v53 }
0x1214   :  { %14729 = vmatprep.subr.mxu0 %v22086_v47  ;;  %14764 = vmatprep.subr.mxu1 %v22086_v47 }
0x1215   :  { %14730 = vmatpush3.msra.mxu0 %v20058_v4  ;;  %14765 = vmatpush3.msra.mxu1 %v20197_v55 }
0x1216   :  { %14731 = vmatprep.subr.mxu0 %v22086_v47  ;;  %14766 = vmatprep.subr.mxu1 %v22086_v47 }
0x1217   :  { %14732 = vmatpush3.msra.mxu0 %v20067_v61  ;;  %14767 = vmatpush3.msra.mxu1 %v20206_v60 }
0x1218   :  { %14733 = vmatprep.subr.mxu0 %v22086_v47  ;;  %14768 = vmatprep.subr.mxu1 %v22086_v47 }
0x1219   :  { %14734 = vmatpush3.msra.mxu0 %v20076_v14  ;;  %14769 = vmatpush3.msra.mxu1 %v20215_v21 }
0x121a   :  { %14735 = vmatprep.subr.mxu0 %v22086_v47  ;;  %14770 = vmatprep.subr.mxu1 %v22086_v47 }
0x121b   :  { %14736 = vmatpush3.msra.mxu0 %v20085_v17  ;;  %14771 = vmatpush3.msra.mxu1 %v20224_v48 }
0x121c   :  { %14737 = vmatprep.subr.mxu0 %v22086_v47  ;;  %14772 = vmatprep.subr.mxu1 %v22086_v47 }
0x121d   :  { %14738 = vmatpush3.msra.mxu0 %v20094_v19  ;;  %14773 = vmatpush3.msra.mxu1 %v20233_v57 }
0x121e   :  { %14739 = vmatprep.subr.mxu0 %v22086_v47  ;;  %14774 = vmatprep.subr.mxu1 %v22086_v47 }
0x121f   :  { %14740 = vmatpush3.msra.mxu0 %v20103_v5  ;;  %14775 = vmatpush3.msra.mxu1 %v20242_v15  ;;  %v7883_v23 = vpop.f32.mrf.mxu0  ;;  %v20347_v11 = vpop.f32.mrf.mxu1 }
0x1220   :  { %14741 = vmatprep.subr.mxu0 %v22086_v47  ;;  %14776 = vmatprep.subr.mxu1 %v22086_v47  ;;  %v7887_v12 = vadd.f32 %v7883_v23, %v7814_v49 }
0x1221   :  { %14742 = vmatpush3.msra.mxu0 %v20117_v7  ;;  %14777 = vmatpush3.msra.mxu1 %v20255_v63  ;;  %v14333_v33 = vpop.f32.mrf.mxu0  ;;  %v14368_v18 = vpop.f32.mrf.mxu1 }
0x1222   :  { %14743 = vmatprep.subr.mxu0 %v22086_v47  ;;  %14778 = vmatprep.subr.mxu1 %v22086_v47  ;;  %v10782_v27 = vadd.f32 %v20111_v59, %v7887_v12  ;;  %v20490_v12 = vld [vmem:[%s21971_s24 + $0x20] sm:$0xff] }
0x1223   :  { %14744 = vmatpush3.msra.mxu0 %v20126_v50  ;;  %14779 = vmatpush3.msra.mxu1 %v20264_v54 }
0x1224   :  { %14745 = vmatprep.subr.mxu0 %v22086_v47  ;;  %14780 = vmatprep.subr.mxu1 %v22086_v47  ;;  %15811 = vtanh.f32 %v10782_v27 }
0x1225   :  { %14746 = vmatpush3.msra.mxu0 %v20136_v43  ;;  %14781 = vmatpush3.msra.mxu1 %v20273_v31 }
0x1226   :  { %14747 = vmatprep.subr.mxu0 %v22086_v47  ;;  %14782 = vmatprep.subr.mxu1 %v22086_v47 }
0x1227   :  { %14748 = vmatpush3.msra.mxu0 %v20146_v39  ;;  %14783 = vmatpush3.msra.mxu1 %v20282_v22 }
0x1228   :  { %14749 = vmatprep.subr.mxu0 %v22086_v47  ;;  %14784 = vmatprep.subr.mxu1 %v22086_v47 }
0x1229   :  { %14750 = vmatpush3.msra.mxu0 %v20158_v40  ;;  %14751 = vmatprep.mubr.msk.f32.mxu0 %vm16152_vm0, %v22086_v47 }
0x122a   :  { %14785 = vmatpush3.msra.mxu1 %v20291_v52  ;;  %14786 = vmatprep.mubr.msk.f32.mxu1 %vm16152_vm0, %v22086_v47 }
0x122b   :  { %14752 = vmatmul.mubr.f32.vlgmr.msra.gmra.mxu0 %v20377_v62  ;;  %14787 = vmatmul.mubr.f32.vlgmr.msra.gmra.mxu1 %v20377_v62 }
0x122c   :  { %14789 = vmatprep.subr.mxu0 %v22086_v47  ;;  %14824 = vmatprep.subr.mxu1 %v22086_v47 }
0x122d   :  { %14790 = vmatpush3.msra.mxu0 %v20386_v41  ;;  %14825 = vmatpush3.msra.mxu1 %v19912_v46 }
0x122e   :  { %14791 = vmatprep.subr.mxu0 %v22086_v47  ;;  %14826 = vmatprep.subr.mxu1 %v22086_v47 }
0x122f   :  { %14792 = vmatpush3.msra.mxu0 %v20395_v42  ;;  %14827 = vmatpush3.msra.mxu1 %v19926_v26 }
0x1230   :  { %14793 = vmatprep.subr.mxu0 %v22086_v47  ;;  %14828 = vmatprep.subr.mxu1 %v22086_v47 }
0x1231   :  { %v15812_v38 = vpop.eup %15811  ;;  %14794 = vmatpush3.msra.mxu0 %v20404_v8  ;;  %14829 = vmatpush3.msra.mxu1 %v19940_v30 }
0x1232   :  { %11102 = vst.msk [vmem:[%s21973_s26 + $0x2] sm:$0x3] %vm10780_vm15, %v15812_v38  ;;  %14795 = vmatprep.subr.mxu0 %v22086_v47  ;;  %14830 = vmatprep.subr.mxu1 %v22086_v47  ;;  %v20509_v38 = vld [vmem:[%s21971_s24 + $0x10] sm:$0xff] }
0x1233   :  { %14796 = vmatpush3.msra.mxu0 %v20417_v6  ;;  %14831 = vmatpush3.msra.mxu1 %v19954_v24 }
0x1234   :  { %14797 = vmatprep.subr.mxu0 %v22086_v47  ;;  %14832 = vmatprep.subr.mxu1 %v22086_v47 }
0x1235   :  { %14798 = vmatpush3.msra.mxu0 %v20426_v10  ;;  %14833 = vmatpush3.msra.mxu1 %v19968_v58 }
0x1236   :  { %14799 = vmatprep.subr.mxu0 %v22086_v47  ;;  %14834 = vmatprep.subr.mxu1 %v22086_v47 }
0x1237   :  { %14800 = vmatpush3.msra.mxu0 %v20435_v25  ;;  %14835 = vmatpush3.msra.mxu1 %v20058_v4 }
0x1238   :  { %14801 = vmatprep.subr.mxu0 %v22086_v47  ;;  %14836 = vmatprep.subr.mxu1 %v22086_v47 }
0x1239   :  { %14802 = vmatpush3.msra.mxu0 %v20444_v45  ;;  %14837 = vmatpush3.msra.mxu1 %v20067_v61 }
0x123a   :  { %14803 = vmatprep.subr.mxu0 %v22086_v47  ;;  %14838 = vmatprep.subr.mxu1 %v22086_v47 }
0x123b   :  { %14804 = vmatpush3.msra.mxu0 %v20453_v37  ;;  %14839 = vmatpush3.msra.mxu1 %v20076_v14 }
0x123c   :  { %14805 = vmatprep.subr.mxu0 %v22086_v47  ;;  %14840 = vmatprep.subr.mxu1 %v22086_v47 }
0x123d   :  { %14806 = vmatpush3.msra.mxu0 %v20462_v1  ;;  %14841 = vmatpush3.msra.mxu1 %v20085_v17 }
0x123e   :  { %14807 = vmatprep.subr.mxu0 %v22086_v47  ;;  %14842 = vmatprep.subr.mxu1 %v22086_v47 }
0x123f   :  { %14808 = vmatpush3.msra.mxu0 %v20471_v36  ;;  %14843 = vmatpush3.msra.mxu1 %v20094_v19 }
0x1240   :  { %14809 = vmatprep.subr.mxu0 %v22086_v47  ;;  %14844 = vmatprep.subr.mxu1 %v22086_v47 }
0x1241   :  { %14810 = vmatpush3.msra.mxu0 %v20480_v0  ;;  %14845 = vmatpush3.msra.mxu1 %v20103_v5  ;;  %v8024_v51 = vpop.f32.mrf.mxu0  ;;  %v8094_v49 = vpop.f32.mrf.mxu1 }
0x1242   :  { %14811 = vmatprep.subr.mxu0 %v22086_v47  ;;  %14846 = vmatprep.subr.mxu1 %v22086_v47  ;;  %v8025_v23 = vadd.f32 %v8024_v51, %v20347_v11  ;;  %v20499_v11 = vld [vmem:[%s21971_s24 + $0x18] sm:$0xff]  ;;  %v7445_v51 = vmul.f32 0.01, %v19491_v29 }
0x1243   :  { %14812 = vmatpush3.msra.mxu0 %v20490_v12  ;;  %14847 = vmatpush3.msra.mxu1 %v20117_v7  ;;  %v14403_v33 = vpop.f32.mrf.mxu0  ;;  %v14438_v18 = vpop.f32.mrf.mxu1 }
0x1244   :  { %14813 = vmatprep.subr.mxu0 %v22086_v47  ;;  %14848 = vmatprep.subr.mxu1 %v22086_v47  ;;  %v8098_v27 = vadd.f32 %v8094_v49, %v8025_v23  ;;  %v20519_v49 = vld [vmem:[%s21971_s24 + $0x8] sm:$0xff]  ;;  %v20529_v23 = vld [vmem:[%s21971_s24] sm:$0xff]  ;;  %v20538_v33 = vsel %vm7444_vm2, %v19491_v29, %v7445_v51 }
0x1245   :  { %14814 = vmatpush3.msra.mxu0 %v20499_v11  ;;  %14849 = vmatpush3.msra.mxu1 %v20126_v50  ;;  %v20724_v51 = vld [vmem:[%s21971_s24 + $0x168] sm:$0xff] }
0x1246   :  { %14815 = vmatprep.subr.mxu0 %v22086_v47  ;;  %14850 = vmatprep.subr.mxu1 %v22086_v47  ;;  %v10786_v32 = vadd.f32 %v20111_v59, %v8098_v27 }
0x1247   :  { %14816 = vmatpush3.msra.mxu0 %v20509_v38  ;;  %14851 = vmatpush3.msra.mxu1 %v20136_v43 }
0x1248   :  { %14817 = vmatprep.subr.mxu0 %v22086_v47  ;;  %14852 = vmatprep.subr.mxu1 %v22086_v47  ;;  %15813 = vtanh.f32 %v10786_v32 }
0x1249   :  { %14818 = vmatpush3.msra.mxu0 %v20519_v49  ;;  %14853 = vmatpush3.msra.mxu1 %v20146_v39 }
0x124a   :  { %14819 = vmatprep.subr.mxu0 %v22086_v47  ;;  %14854 = vmatprep.subr.mxu1 %v22086_v47 }
0x124b   :  { %14820 = vmatpush3.msra.mxu0 %v20529_v23  ;;  %14821 = vmatprep.mubr.msk.f32.mxu0 %vm16152_vm0, %v22086_v47 }
0x124c   :  { %14855 = vmatpush3.msra.mxu1 %v20158_v40  ;;  %14856 = vmatprep.mubr.msk.f32.mxu1 %vm16152_vm0, %v22086_v47 }
0x124d   :  { %14822 = vmatmul.mubr.f32.vlgmr.msra.gmra.mxu0 %v20164_v44  ;;  %14857 = vmatmul.mubr.f32.vlgmr.msra.gmra.mxu1 %v20538_v33 }
0x124e   :  { %14859 = vmatprep.subr.mxu0 %v22086_v47  ;;  %14894 = vmatprep.subr.mxu1 %v22086_v47 }
0x124f   :  { %14860 = vmatpush3.msra.mxu0 %v19918_v20  ;;  %14895 = vmatpush3.msra.mxu1 %v20386_v41 }
0x1250   :  { %14861 = vmatprep.subr.mxu0 %v22086_v47  ;;  %14896 = vmatprep.subr.mxu1 %v22086_v47 }
0x1251   :  { %14862 = vmatpush3.msra.mxu0 %v19932_v28  ;;  %14897 = vmatpush3.msra.mxu1 %v20395_v42 }
0x1252   :  { %14863 = vmatprep.subr.mxu0 %v22086_v47  ;;  %14898 = vmatprep.subr.mxu1 %v22086_v47 }
0x1253   :  { %14864 = vmatpush3.msra.mxu0 %v19946_v34  ;;  %14899 = vmatpush3.msra.mxu1 %v20404_v8 }
0x1254   :  { %14865 = vmatprep.subr.mxu0 %v22086_v47  ;;  %14900 = vmatprep.subr.mxu1 %v22086_v47 }
0x1255   :  { %v15814_v29 = vpop.eup %15813  ;;  %14866 = vmatpush3.msra.mxu0 %v19960_v35  ;;  %14901 = vmatpush3.msra.mxu1 %v20417_v6 }
0x1256   :  { %11103 = vst.msk [vmem:[%s21973_s26 + $0x4] sm:$0x3] %vm10780_vm15, %v15814_v29  ;;  %14867 = vmatprep.subr.mxu0 %v22086_v47  ;;  %14902 = vmatprep.subr.mxu1 %v22086_v47  ;;  %v20737_v29 = vld [vmem:[%s21971_s24 + $0x160] sm:$0xff] }
0x1257   :  { %14868 = vmatpush3.msra.mxu0 %v19974_v53  ;;  %14903 = vmatpush3.msra.mxu1 %v20426_v10 }
0x1258   :  { %14869 = vmatprep.subr.mxu0 %v22086_v47  ;;  %14904 = vmatprep.subr.mxu1 %v22086_v47 }
0x1259   :  { %14870 = vmatpush3.msra.mxu0 %v20197_v55  ;;  %14905 = vmatpush3.msra.mxu1 %v20435_v25 }
0x125a   :  { %14871 = vmatprep.subr.mxu0 %v22086_v47  ;;  %14906 = vmatprep.subr.mxu1 %v22086_v47 }
0x125b   :  { %14872 = vmatpush3.msra.mxu0 %v20206_v60  ;;  %14907 = vmatpush3.msra.mxu1 %v20444_v45 }
0x125c   :  { %14873 = vmatprep.subr.mxu0 %v22086_v47  ;;  %14908 = vmatprep.subr.mxu1 %v22086_v47 }
0x125d   :  { %14874 = vmatpush3.msra.mxu0 %v20215_v21  ;;  %14909 = vmatpush3.msra.mxu1 %v20453_v37 }
0x125e   :  { %14875 = vmatprep.subr.mxu0 %v22086_v47  ;;  %14910 = vmatprep.subr.mxu1 %v22086_v47 }
0x125f   :  { %14876 = vmatpush3.msra.mxu0 %v20224_v48  ;;  %14911 = vmatpush3.msra.mxu1 %v20462_v1 }
0x1260   :  { %14877 = vmatprep.subr.mxu0 %v22086_v47  ;;  %14912 = vmatprep.subr.mxu1 %v22086_v47 }
0x1261   :  { %14878 = vmatpush3.msra.mxu0 %v20233_v57  ;;  %14913 = vmatpush3.msra.mxu1 %v20471_v36 }
0x1262   :  { %14879 = vmatprep.subr.mxu0 %v22086_v47  ;;  %14914 = vmatprep.subr.mxu1 %v22086_v47 }
0x1263   :  { %14880 = vmatpush3.msra.mxu0 %v20242_v15  ;;  %14915 = vmatpush3.msra.mxu1 %v20480_v0  ;;  %v20590_v44 = vpop.f32.mrf.mxu0  ;;  %v20592_v18 = vpop.f32.mrf.mxu1 }
0x1264   :  { %14881 = vmatprep.subr.mxu0 %v22086_v47  ;;  %14916 = vmatprep.subr.mxu1 %v22086_v47 }
0x1265   :  { %14882 = vmatpush3.msra.mxu0 %v20255_v63  ;;  %14917 = vmatpush3.msra.mxu1 %v20490_v12  ;;  %v14473_v27 = vpop.f32.mrf.mxu0  ;;  %v14508_v32 = vpop.f32.mrf.mxu1 }
0x1266   :  { %14883 = vmatprep.subr.mxu0 %v22086_v47  ;;  %14918 = vmatprep.subr.mxu1 %v22086_v47  ;;  %v20982_v27 = vld [vmem:[%s21971_s24 + $0xb8] sm:$0xff]  ;;  %v20990_v32 = vld [vmem:[%s21971_s24 + $0x130] sm:$0xff] }
0x1267   :  { %14884 = vmatpush3.msra.mxu0 %v20264_v54  ;;  %14919 = vmatpush3.msra.mxu1 %v20499_v11 }
0x1268   :  { %14885 = vmatprep.subr.mxu0 %v22086_v47  ;;  %14920 = vmatprep.subr.mxu1 %v22086_v47 }
0x1269   :  { %14886 = vmatpush3.msra.mxu0 %v20273_v31  ;;  %14921 = vmatpush3.msra.mxu1 %v20509_v38 }
0x126a   :  { %14887 = vmatprep.subr.mxu0 %v22086_v47  ;;  %14922 = vmatprep.subr.mxu1 %v22086_v47 }
0x126b   :  { %14888 = vmatpush3.msra.mxu0 %v20282_v22  ;;  %14923 = vmatpush3.msra.mxu1 %v20519_v49 }
0x126c   :  { %14889 = vmatprep.subr.mxu0 %v22086_v47  ;;  %14924 = vmatprep.subr.mxu1 %v22086_v47 }
0x126d   :  { %14890 = vmatpush3.msra.mxu0 %v20291_v52  ;;  %14891 = vmatprep.mubr.msk.f32.mxu0 %vm16152_vm0, %v22086_v47 }
0x126e   :  { %14925 = vmatpush3.msra.mxu1 %v20529_v23  ;;  %14926 = vmatprep.mubr.msk.f32.mxu1 %vm16152_vm0, %v22086_v47 }
0x126f   :  { %14892 = vmatmul.mubr.f32.vlgmr.msra.gmra.mxu0 %v20538_v33  ;;  %14927 = vmatmul.mubr.f32.vlgmr.msra.gmra.mxu1 %v20377_v62 }
0x1270   :  { %14929 = vmatprep.subr.mxu0 %v22086_v47  ;;  %14964 = vmatprep.subr.mxu1 %v22086_v47 }
0x1271   :  { %14930 = vmatpush3.msra.mxu0 %v19912_v46  ;;  %14965 = vmatpush3.msra.mxu1 %v19918_v20  ;;  %v8236_v46 = vadd.f32 %v20592_v18, %v20590_v44  ;;  %v20746_v44 = vld [vmem:[%s21971_s24 + $0x158] sm:$0xff] }
0x1272   :  { %14931 = vmatprep.subr.mxu0 %v22086_v47  ;;  %14966 = vmatprep.subr.mxu1 %v22086_v47 }
0x1273   :  { %14932 = vmatpush3.msra.mxu0 %v19926_v26  ;;  %14967 = vmatpush3.msra.mxu1 %v19932_v28 }
0x1274   :  { %14933 = vmatprep.subr.mxu0 %v22086_v47  ;;  %14968 = vmatprep.subr.mxu1 %v22086_v47 }
0x1275   :  { %14934 = vmatpush3.msra.mxu0 %v19940_v30  ;;  %14969 = vmatpush3.msra.mxu1 %v19946_v34 }
0x1276   :  { %14935 = vmatprep.subr.mxu0 %v22086_v47  ;;  %14970 = vmatprep.subr.mxu1 %v22086_v47 }
0x1277   :  { %14936 = vmatpush3.msra.mxu0 %v19954_v24  ;;  %14971 = vmatpush3.msra.mxu1 %v19960_v35  ;;  %v7450_v35 = vmul.f32 0.01, %v19527_v9 }
0x1278   :  { %14937 = vmatprep.subr.mxu0 %v22086_v47  ;;  %14972 = vmatprep.subr.mxu1 %v22086_v47 }
0x1279   :  { %14938 = vmatpush3.msra.mxu0 %v19968_v58  ;;  %14973 = vmatpush3.msra.mxu1 %v19974_v53  ;;  %v20696_v58 = vsel %vm7449_vm11, %v19527_v9, %v7450_v35  ;;  %v20706_v53 = vld [vmem:[%s21971_s24 + $0x178] sm:$0xff]  ;;  %v20715_v9 = vld [vmem:[%s21971_s24 + $0x170] sm:$0xff]  ;;  %v21022_v35 = vld [vmem:[%s21971_s24 + $0x120] sm:$0xff] }
0x127a   :  { %14939 = vmatprep.subr.mxu0 %v22086_v47  ;;  %14974 = vmatprep.subr.mxu1 %v22086_v47 }
0x127b   :  { %14940 = vmatpush3.msra.mxu0 %v20058_v4  ;;  %14975 = vmatpush3.msra.mxu1 %v20197_v55 }
0x127c   :  { %14941 = vmatprep.subr.mxu0 %v22086_v47  ;;  %14976 = vmatprep.subr.mxu1 %v22086_v47 }
0x127d   :  { %14942 = vmatpush3.msra.mxu0 %v20067_v61  ;;  %14977 = vmatpush3.msra.mxu1 %v20206_v60 }
0x127e   :  { %14943 = vmatprep.subr.mxu0 %v22086_v47  ;;  %14978 = vmatprep.subr.mxu1 %v22086_v47 }
0x127f   :  { %14944 = vmatpush3.msra.mxu0 %v20076_v14  ;;  %14979 = vmatpush3.msra.mxu1 %v20215_v21 }
0x1280   :  { %14945 = vmatprep.subr.mxu0 %v22086_v47  ;;  %14980 = vmatprep.subr.mxu1 %v22086_v47 }
0x1281   :  { %14946 = vmatpush3.msra.mxu0 %v20085_v17  ;;  %14981 = vmatpush3.msra.mxu1 %v20224_v48 }
0x1282   :  { %14947 = vmatprep.subr.mxu0 %v22086_v47  ;;  %14982 = vmatprep.subr.mxu1 %v22086_v47 }
0x1283   :  { %14948 = vmatpush3.msra.mxu0 %v20094_v19  ;;  %14983 = vmatpush3.msra.mxu1 %v20233_v57 }
0x1284   :  { %14949 = vmatprep.subr.mxu0 %v22086_v47  ;;  %14984 = vmatprep.subr.mxu1 %v22086_v47 }
0x1285   :  { %14950 = vmatpush3.msra.mxu0 %v20103_v5  ;;  %14985 = vmatpush3.msra.mxu1 %v20242_v15  ;;  %v8305_v20 = vpop.f32.mrf.mxu0  ;;  %v20666_v26 = vpop.f32.mrf.mxu1 }
0x1286   :  { %14951 = vmatprep.subr.mxu0 %v22086_v47  ;;  %14986 = vmatprep.subr.mxu1 %v22086_v47  ;;  %v8309_v28 = vadd.f32 %v8305_v20, %v8236_v46  ;;  %v20996_v46 = vld [vmem:[%s21971_s24 + $0xb0] sm:$0xff] }
0x1287   :  { %14952 = vmatpush3.msra.mxu0 %v20117_v7  ;;  %14987 = vmatpush3.msra.mxu1 %v20255_v63  ;;  %v14543_v30 = vpop.f32.mrf.mxu0  ;;  %v14578_v34 = vpop.f32.mrf.mxu1 }
0x1288   :  { %14953 = vmatprep.subr.mxu0 %v22086_v47  ;;  %14988 = vmatprep.subr.mxu1 %v22086_v47  ;;  %v10790_v24 = vadd.f32 %v20111_v59, %v8309_v28  ;;  %v21012_v28 = vld [vmem:[%s21971_s24 + $0xa8] sm:$0xff] }
0x1289   :  { %14954 = vmatpush3.msra.mxu0 %v20126_v50  ;;  %14989 = vmatpush3.msra.mxu1 %v20264_v54 }
0x128a   :  { %14955 = vmatprep.subr.mxu0 %v22086_v47  ;;  %14990 = vmatprep.subr.mxu1 %v22086_v47  ;;  %15815 = vtanh.f32 %v10790_v24 }
0x128b   :  { %14956 = vmatpush3.msra.mxu0 %v20136_v43  ;;  %14991 = vmatpush3.msra.mxu1 %v20273_v31 }
0x128c   :  { %14957 = vmatprep.subr.mxu0 %v22086_v47  ;;  %14992 = vmatprep.subr.mxu1 %v22086_v47 }
0x128d   :  { %14958 = vmatpush3.msra.mxu0 %v20146_v39  ;;  %14993 = vmatpush3.msra.mxu1 %v20282_v22 }
0x128e   :  { %14959 = vmatprep.subr.mxu0 %v22086_v47  ;;  %14994 = vmatprep.subr.mxu1 %v22086_v47 }
0x128f   :  { %14960 = vmatpush3.msra.mxu0 %v20158_v40  ;;  %14961 = vmatprep.mubr.msk.f32.mxu0 %vm16152_vm0, %v22086_v47 }
0x1290   :  { %14995 = vmatpush3.msra.mxu1 %v20291_v52  ;;  %14996 = vmatprep.mubr.msk.f32.mxu1 %vm16152_vm0, %v22086_v47 }
0x1291   :  { %14962 = vmatmul.mubr.f32.vlgmr.msra.gmra.mxu0 %v20696_v58  ;;  %14997 = vmatmul.mubr.f32.vlgmr.msra.gmra.mxu1 %v20696_v58 }
0x1292   :  { %14999 = vmatprep.subr.mxu0 %v22086_v47  ;;  %15034 = vmatprep.subr.mxu1 %v22086_v47 }
0x1293   :  { %15000 = vmatpush3.msra.mxu0 %v20386_v41  ;;  %15035 = vmatpush3.msra.mxu1 %v20706_v53 }
0x1294   :  { %15001 = vmatprep.subr.mxu0 %v22086_v47  ;;  %15036 = vmatprep.subr.mxu1 %v22086_v47 }
0x1295   :  { %15002 = vmatpush3.msra.mxu0 %v20395_v42  ;;  %15037 = vmatpush3.msra.mxu1 %v20715_v9 }
0x1296   :  { %15003 = vmatprep.subr.mxu0 %v22086_v47  ;;  %15038 = vmatprep.subr.mxu1 %v22086_v47 }
0x1297   :  { %v15816_v62 = vpop.eup %15815  ;;  %15004 = vmatpush3.msra.mxu0 %v20404_v8  ;;  %15039 = vmatpush3.msra.mxu1 %v20724_v51 }
0x1298   :  { %11104 = vst.msk [vmem:[%s21973_s26 + $0x6] sm:$0x3] %vm10780_vm15, %v15816_v62  ;;  %15005 = vmatprep.subr.mxu0 %v22086_v47  ;;  %15040 = vmatprep.subr.mxu1 %v22086_v47 }
0x1299   :  { %15006 = vmatpush3.msra.mxu0 %v20417_v6  ;;  %15041 = vmatpush3.msra.mxu1 %v20737_v29 }
0x129a   :  { %15007 = vmatprep.subr.mxu0 %v22086_v47  ;;  %15042 = vmatprep.subr.mxu1 %v22086_v47 }
0x129b   :  { %15008 = vmatpush3.msra.mxu0 %v20426_v10  ;;  %15043 = vmatpush3.msra.mxu1 %v20746_v44 }
0x129c   :  { %15009 = vmatprep.subr.mxu0 %v22086_v47  ;;  %15044 = vmatprep.subr.mxu1 %v22086_v47 }
0x129d   :  { %15010 = vmatpush3.msra.mxu0 %v20435_v25  ;;  %15045 = vmatpush3.msra.mxu1 %v20058_v4 }
0x129e   :  { %15011 = vmatprep.subr.mxu0 %v22086_v47  ;;  %15046 = vmatprep.subr.mxu1 %v22086_v47 }
0x129f   :  { %15012 = vmatpush3.msra.mxu0 %v20444_v45  ;;  %15047 = vmatpush3.msra.mxu1 %v20067_v61 }
0x12a0   :  { %15013 = vmatprep.subr.mxu0 %v22086_v47  ;;  %15048 = vmatprep.subr.mxu1 %v22086_v47 }
0x12a1   :  { %15014 = vmatpush3.msra.mxu0 %v20453_v37  ;;  %15049 = vmatpush3.msra.mxu1 %v20076_v14 }
0x12a2   :  { %15015 = vmatprep.subr.mxu0 %v22086_v47  ;;  %15050 = vmatprep.subr.mxu1 %v22086_v47 }
0x12a3   :  { %15016 = vmatpush3.msra.mxu0 %v20462_v1  ;;  %15051 = vmatpush3.msra.mxu1 %v20085_v17 }
0x12a4   :  { %15017 = vmatprep.subr.mxu0 %v22086_v47  ;;  %15052 = vmatprep.subr.mxu1 %v22086_v47 }
0x12a5   :  { %15018 = vmatpush3.msra.mxu0 %v20471_v36  ;;  %15053 = vmatpush3.msra.mxu1 %v20094_v19 }
0x12a6   :  { %15019 = vmatprep.subr.mxu0 %v22086_v47  ;;  %15054 = vmatprep.subr.mxu1 %v22086_v47 }
0x12a7   :  { %15020 = vmatpush3.msra.mxu0 %v20480_v0  ;;  %15055 = vmatpush3.msra.mxu1 %v20103_v5  ;;  %v8446_v4 = vpop.f32.mrf.mxu0  ;;  %v8516_v61 = vpop.f32.mrf.mxu1 }
0x12a8   :  { %15021 = vmatprep.subr.mxu0 %v22086_v47  ;;  %15056 = vmatprep.subr.mxu1 %v22086_v47  ;;  %v8447_v14 = vadd.f32 %v8446_v4, %v20666_v26  ;;  %v21006_v26 = vld [vmem:[%s21971_s24 + $0x128] sm:$0xff] }
0x12a9   :  { %15022 = vmatpush3.msra.mxu0 %v20490_v12  ;;  %15057 = vmatpush3.msra.mxu1 %v20117_v7  ;;  %v14613_v17 = vpop.f32.mrf.mxu0  ;;  %v14648_v19 = vpop.f32.mrf.mxu1  ;;  %v7455_v7 = vmul.f32 0.01, %v19530_v56 }
0x12aa   :  { %15023 = vmatprep.subr.mxu0 %v22086_v47  ;;  %15058 = vmatprep.subr.mxu1 %v22086_v47  ;;  %v8520_v18 = vadd.f32 %v8516_v61, %v8447_v14  ;;  %v21036_v61 = vld [vmem:[%s21972_s25] ss:$0 sm:$0xff]  ;;  %v21042_v17 = vld [vmem:[%s21971_s24 + $0x118] sm:$0xff] }
0x12ab   :  { %15024 = vmatpush3.msra.mxu0 %v20499_v11  ;;  %15059 = vmatpush3.msra.mxu1 %v20126_v50  ;;  %v20811_v50 = vld [vmem:[%s21971_s24 + $0xf8] sm:$0xff] }
0x12ac   :  { %15025 = vmatprep.subr.mxu0 %v22086_v47  ;;  %15060 = vmatprep.subr.mxu1 %v22086_v47  ;;  %v10794_v5 = vadd.f32 %v20111_v59, %v8520_v18  ;;  %v20802_v59 = vsel %vm7454_vm13, %v19530_v56, %v7455_v7  ;;  %v20820_v56 = vld [vmem:[%s21971_s24 + $0xf0] sm:$0xff]  ;;  %v21048_v19 = vld [vmem:[%s21971_s24 + $0x98] sm:$0xff]  ;;  %v7460_v7 = vmul.f32 0.01, %v19535_v3 }
0x12ad   :  { %15026 = vmatpush3.msra.mxu0 %v20509_v38  ;;  %15061 = vmatpush3.msra.mxu1 %v20136_v43  ;;  %v20829_v43 = vld [vmem:[%s21971_s24 + $0xe8] sm:$0xff]  ;;  %v21056_v18 = vld [vmem:[%s21971_s24 + $0x110] sm:$0xff] }
0x12ae   :  { %15027 = vmatprep.subr.mxu0 %v22086_v47  ;;  %15062 = vmatprep.subr.mxu1 %v22086_v47  ;;  %15817 = vtanh.f32 %v10794_v5  ;;  %v21062_v5 = vld [vmem:[%s21971_s24 + $0x90] sm:$0xff] }
0x12af   :  { %15028 = vmatpush3.msra.mxu0 %v20519_v49  ;;  %15063 = vmatpush3.msra.mxu1 %v20146_v39 }
0x12b0   :  { %15029 = vmatprep.subr.mxu0 %v22086_v47  ;;  %15064 = vmatprep.subr.mxu1 %v22086_v47 }
0x12b1   :  { %15030 = vmatpush3.msra.mxu0 %v20529_v23  ;;  %15031 = vmatprep.mubr.msk.f32.mxu0 %vm16152_vm0, %v22086_v47 }
0x12b2   :  { %15065 = vmatpush3.msra.mxu1 %v20158_v40  ;;  %15066 = vmatprep.mubr.msk.f32.mxu1 %vm16152_vm0, %v22086_v47  ;;  %v20838_v40 = vld [vmem:[%s21971_s24 + $0xe0] sm:$0xff] }
0x12b3   :  { %15032 = vmatmul.mubr.f32.vlgmr.msra.gmra.mxu0 %v20538_v33  ;;  %15067 = vmatmul.mubr.f32.vlgmr.msra.gmra.mxu1 %v20802_v59  ;;  %v20851_v33 = vld [vmem:[%s21971_s24 + $0xd8] sm:$0xff] }
0x12b4   :  { %15069 = vmatprep.subr.mxu0 %v22086_v47  ;;  %15104 = vmatprep.subr.mxu1 %v22086_v47 }
0x12b5   :  { %15070 = vmatpush3.msra.mxu0 %v20811_v50  ;;  %15105 = vmatpush3.msra.mxu1 %v20386_v41 }
0x12b6   :  { %15071 = vmatprep.subr.mxu0 %v22086_v47  ;;  %15106 = vmatprep.subr.mxu1 %v22086_v47 }
0x12b7   :  { %15072 = vmatpush3.msra.mxu0 %v20820_v56  ;;  %15107 = vmatpush3.msra.mxu1 %v20395_v42 }
0x12b8   :  { %15073 = vmatprep.subr.mxu0 %v22086_v47  ;;  %15108 = vmatprep.subr.mxu1 %v22086_v47 }
0x12b9   :  { %15074 = vmatpush3.msra.mxu0 %v20829_v43  ;;  %15109 = vmatpush3.msra.mxu1 %v20404_v8 }
0x12ba   :  { %15075 = vmatprep.subr.mxu0 %v22086_v47  ;;  %15110 = vmatprep.subr.mxu1 %v22086_v47 }
0x12bb   :  { %v15818_v39 = vpop.eup %15817  ;;  %15076 = vmatpush3.msra.mxu0 %v20838_v40  ;;  %15111 = vmatpush3.msra.mxu1 %v20417_v6 }
0x12bc   :  { %11105 = vst.msk [vmem:[%s21973_s26 + $0x8] sm:$0x3] %vm10780_vm15, %v15818_v39  ;;  %15077 = vmatprep.subr.mxu0 %v22086_v47  ;;  %15112 = vmatprep.subr.mxu1 %v22086_v47  ;;  %v21071_v39 = vld [vmem:[%s21971_s24 + $0x108] sm:$0xff] }
0x12bd   :  { %15078 = vmatpush3.msra.mxu0 %v20851_v33  ;;  %15113 = vmatpush3.msra.mxu1 %v20426_v10 }
0x12be   :  { %15079 = vmatprep.subr.mxu0 %v22086_v47  ;;  %15114 = vmatprep.subr.mxu1 %v22086_v47 }
0x12bf   :  { %15080 = vmatpush3.msra.mxu0 %v20197_v55  ;;  %15115 = vmatpush3.msra.mxu1 %v20435_v25 }
0x12c0   :  { %15081 = vmatprep.subr.mxu0 %v22086_v47  ;;  %15116 = vmatprep.subr.mxu1 %v22086_v47 }
0x12c1   :  { %15082 = vmatpush3.msra.mxu0 %v20206_v60  ;;  %15117 = vmatpush3.msra.mxu1 %v20444_v45 }
0x12c2   :  { %15083 = vmatprep.subr.mxu0 %v22086_v47  ;;  %15118 = vmatprep.subr.mxu1 %v22086_v47 }
0x12c3   :  { %15084 = vmatpush3.msra.mxu0 %v20215_v21  ;;  %15119 = vmatpush3.msra.mxu1 %v20453_v37 }
0x12c4   :  { %15085 = vmatprep.subr.mxu0 %v22086_v47  ;;  %15120 = vmatprep.subr.mxu1 %v22086_v47 }
0x12c5   :  { %15086 = vmatpush3.msra.mxu0 %v20224_v48  ;;  %15121 = vmatpush3.msra.mxu1 %v20462_v1 }
0x12c6   :  { %15087 = vmatprep.subr.mxu0 %v22086_v47  ;;  %15122 = vmatprep.subr.mxu1 %v22086_v47 }
0x12c7   :  { %15088 = vmatpush3.msra.mxu0 %v20233_v57  ;;  %15123 = vmatpush3.msra.mxu1 %v20471_v36  ;;  %v20934_v57 = vld [vmem:[%s21971_s24 + $0x150] sm:$0xff] }
0x12c8   :  { %15089 = vmatprep.subr.mxu0 %v22086_v47  ;;  %15124 = vmatprep.subr.mxu1 %v22086_v47 }
0x12c9   :  { %15090 = vmatpush3.msra.mxu0 %v20242_v15  ;;  %15125 = vmatpush3.msra.mxu1 %v20480_v0  ;;  %v20879_v55 = vpop.f32.mrf.mxu0  ;;  %v20881_v60 = vpop.f32.mrf.mxu1  ;;  %v20940_v15 = vld [vmem:[%s21971_s24 + $0xd0] sm:$0xff] }
0x12ca   :  { %15091 = vmatprep.subr.mxu0 %v22086_v47  ;;  %15126 = vmatprep.subr.mxu1 %v22086_v47  ;;  %v8658_v20 = vadd.f32 %v20881_v60, %v20879_v55  ;;  %v21077_v55 = vld [vmem:[%s21971_s24 + $0x88] sm:$0xff]  ;;  %v21086_v60 = vld [vmem:[%s21971_s24 + $0x100] sm:$0xff] }
0x12cb   :  { %15092 = vmatpush3.msra.mxu0 %v20255_v63  ;;  %15127 = vmatpush3.msra.mxu1 %v20490_v12  ;;  %v14683_v21 = vpop.f32.mrf.mxu0  ;;  %v14718_v48 = vpop.f32.mrf.mxu1  ;;  %v20948_v63 = vld [vmem:[%s21971_s24 + $0x148] sm:$0xff] }
0x12cc   :  { %15093 = vmatprep.subr.mxu0 %v22086_v47  ;;  %15128 = vmatprep.subr.mxu1 %v22086_v47  ;;  %v21094_v21 = vld [vmem:[%s21971_s24 + $0x80] sm:$0xff]  ;;  %v21100_v48 = vsel %vm7459_vm3, %v19535_v3, %v7460_v7 }
0x12cd   :  { %15094 = vmatpush3.msra.mxu0 %v20264_v54  ;;  %15129 = vmatpush3.msra.mxu1 %v20499_v11  ;;  %v20954_v54 = vld [vmem:[%s21971_s24 + $0xc8] sm:$0xff] }
0x12ce   :  { %15095 = vmatprep.subr.mxu0 %v22086_v47  ;;  %15130 = vmatprep.subr.mxu1 %v22086_v47 }
0x12cf   :  { %15096 = vmatpush3.msra.mxu0 %v20273_v31  ;;  %15131 = vmatpush3.msra.mxu1 %v20509_v38  ;;  %v20962_v31 = vld [vmem:[%s21971_s24 + $0x140] sm:$0xff] }
0x12d0   :  { %15097 = vmatprep.subr.mxu0 %v22086_v47  ;;  %15132 = vmatprep.subr.mxu1 %v22086_v47 }
0x12d1   :  { %15098 = vmatpush3.msra.mxu0 %v20282_v22  ;;  %15133 = vmatpush3.msra.mxu1 %v20519_v49  ;;  %v20968_v22 = vld [vmem:[%s21971_s24 + $0xc0] sm:$0xff] }
0x12d2   :  { %15099 = vmatprep.subr.mxu0 %v22086_v47  ;;  %15134 = vmatprep.subr.mxu1 %v22086_v47 }
0x12d3   :  { %15100 = vmatpush3.msra.mxu0 %v20291_v52  ;;  %15101 = vmatprep.mubr.msk.f32.mxu0 %vm16152_vm0, %v22086_v47  ;;  %v20976_v52 = vld [vmem:[%s21971_s24 + $0x138] sm:$0xff] }
0x12d4   :  { %15135 = vmatpush3.msra.mxu1 %v20529_v23  ;;  %15136 = vmatprep.mubr.msk.f32.mxu1 %vm16152_vm0, %v22086_v47 }
0x12d5   :  { %15102 = vmatmul.mubr.f32.vlgmr.msra.gmra.mxu0 %v20802_v59  ;;  %15137 = vmatmul.mubr.f32.vlgmr.msra.gmra.mxu1 %v20696_v58  ;;  %v21028_v58 = vld [vmem:[%s21971_s24 + $0xa0] sm:$0xff] }
0x12d6   :  { %15139 = vmatprep.subr.mxu0 %v22086_v47  ;;  %15174 = vmatprep.subr.mxu1 %v22086_v47 }
0x12d7   :  { %15140 = vmatpush3.msra.mxu0 %v20706_v53  ;;  %15175 = vmatpush3.msra.mxu1 %v20811_v50 }
0x12d8   :  { %15141 = vmatprep.subr.mxu0 %v22086_v47  ;;  %15176 = vmatprep.subr.mxu1 %v22086_v47 }
0x12d9   :  { %15142 = vmatpush3.msra.mxu0 %v20715_v9  ;;  %15177 = vmatpush3.msra.mxu1 %v20820_v56 }
0x12da   :  { %15143 = vmatprep.subr.mxu0 %v22086_v47  ;;  %15178 = vmatprep.subr.mxu1 %v22086_v47 }
0x12db   :  { %15144 = vmatpush3.msra.mxu0 %v20724_v51  ;;  %15179 = vmatpush3.msra.mxu1 %v20829_v43 }
0x12dc   :  { %15145 = vmatprep.subr.mxu0 %v22086_v47  ;;  %15180 = vmatprep.subr.mxu1 %v22086_v47 }
0x12dd   :  { %15146 = vmatpush3.msra.mxu0 %v20737_v29  ;;  %15181 = vmatpush3.msra.mxu1 %v20838_v40 }
0x12de   :  { %15147 = vmatprep.subr.mxu0 %v22086_v47  ;;  %15182 = vmatprep.subr.mxu1 %v22086_v47 }
0x12df   :  { %15148 = vmatpush3.msra.mxu0 %v20746_v44  ;;  %15183 = vmatpush3.msra.mxu1 %v20851_v33 }
0x12e0   :  { %15149 = vmatprep.subr.mxu0 %v22086_v47  ;;  %15184 = vmatprep.subr.mxu1 %v22086_v47 }
0x12e1   :  { %15150 = vmatpush3.msra.mxu0 %v20934_v57  ;;  %15185 = vmatpush3.msra.mxu1 %v20940_v15 }
0x12e2   :  { %15151 = vmatprep.subr.mxu0 %v22086_v47  ;;  %15186 = vmatprep.subr.mxu1 %v22086_v47 }
0x12e3   :  { %15152 = vmatpush3.msra.mxu0 %v20948_v63  ;;  %15187 = vmatpush3.msra.mxu1 %v20954_v54 }
0x12e4   :  { %15153 = vmatprep.subr.mxu0 %v22086_v47  ;;  %15188 = vmatprep.subr.mxu1 %v22086_v47 }
0x12e5   :  { %15154 = vmatpush3.msra.mxu0 %v20962_v31  ;;  %15189 = vmatpush3.msra.mxu1 %v20968_v22 }
0x12e6   :  { %15155 = vmatprep.subr.mxu0 %v22086_v47  ;;  %15190 = vmatprep.subr.mxu1 %v22086_v47 }
0x12e7   :  { %15156 = vmatpush3.msra.mxu0 %v20976_v52  ;;  %15191 = vmatpush3.msra.mxu1 %v20982_v27 }
0x12e8   :  { %15157 = vmatprep.subr.mxu0 %v22086_v47  ;;  %15192 = vmatprep.subr.mxu1 %v22086_v47 }
0x12e9   :  { %15158 = vmatpush3.msra.mxu0 %v20990_v32  ;;  %15193 = vmatpush3.msra.mxu1 %v20996_v46 }
0x12ea   :  { %15159 = vmatprep.subr.mxu0 %v22086_v47  ;;  %15194 = vmatprep.subr.mxu1 %v22086_v47 }
0x12eb   :  { %15160 = vmatpush3.msra.mxu0 %v21006_v26  ;;  %15195 = vmatpush3.msra.mxu1 %v21012_v28  ;;  %v8727_v30 = vpop.f32.mrf.mxu0  ;;  %v21015_v34 = vpop.f32.mrf.mxu1 }
0x12ec   :  { %15161 = vmatprep.subr.mxu0 %v22086_v47  ;;  %15196 = vmatprep.subr.mxu1 %v22086_v47  ;;  %v8731_v24 = vadd.f32 %v8727_v30, %v8658_v20  ;;  %v21267_v20 = vld [vmem:[%s21971_s24 + $0x38] sm:$0xff]  ;;  %v21276_v30 = vld [vmem:[%s21971_s24 + $0x30] sm:$0xff] }
0x12ed   :  { %15162 = vmatpush3.msra.mxu0 %v21022_v35  ;;  %15197 = vmatpush3.msra.mxu1 %v21028_v58  ;;  %v14753_v62 = vpop.f32.mrf.mxu0  ;;  %v14788_v4 = vpop.f32.mrf.mxu1 }
0x12ee   :  { %15163 = vmatprep.subr.mxu0 %v22086_v47  ;;  %15198 = vmatprep.subr.mxu1 %v22086_v47  ;;  %v10798_v14 = vadd.f32 %v21036_v61, %v8731_v24  ;;  %v21298_v4 = vld [vmem:[%s21971_s24 + $0x20] sm:$0xff] }
0x12ef   :  { %15164 = vmatpush3.msra.mxu0 %v21042_v17  ;;  %15199 = vmatpush3.msra.mxu1 %v21048_v19 }
0x12f0   :  { %15165 = vmatprep.subr.mxu0 %v22086_v47  ;;  %15200 = vmatprep.subr.mxu1 %v22086_v47  ;;  %15819 = vtanh.f32 %v10798_v14 }
0x12f1   :  { %15166 = vmatpush3.msra.mxu0 %v21056_v18  ;;  %15201 = vmatpush3.msra.mxu1 %v21062_v5 }
0x12f2   :  { %15167 = vmatprep.subr.mxu0 %v22086_v47  ;;  %15202 = vmatprep.subr.mxu1 %v22086_v47 }
0x12f3   :  { %15168 = vmatpush3.msra.mxu0 %v21071_v39  ;;  %15203 = vmatpush3.msra.mxu1 %v21077_v55 }
0x12f4   :  { %15169 = vmatprep.subr.mxu0 %v22086_v47  ;;  %15204 = vmatprep.subr.mxu1 %v22086_v47 }
0x12f5   :  { %15170 = vmatpush3.msra.mxu0 %v21086_v60  ;;  %15171 = vmatprep.mubr.msk.f32.mxu0 %vm16152_vm0, %v22086_v47 }
0x12f6   :  { %15205 = vmatpush3.msra.mxu1 %v21094_v21  ;;  %15206 = vmatprep.mubr.msk.f32.mxu1 %vm16152_vm0, %v22086_v47 }
0x12f7   :  { %15172 = vmatmul.mubr.f32.vlgmr.msra.gmra.mxu0 %v21100_v48  ;;  %15207 = vmatmul.mubr.f32.vlgmr.msra.gmra.mxu1 %v21100_v48 }
0x12f8   :  { %15209 = vmatprep.subr.mxu0 %v22086_v47  ;;  %15244 = vmatprep.subr.mxu1 %v22086_v47 }
0x12f9   :  { %15210 = vmatpush3.msra.mxu0 %v20386_v41  ;;  %15245 = vmatpush3.msra.mxu1 %v20706_v53 }
0x12fa   :  { %15211 = vmatprep.subr.mxu0 %v22086_v47  ;;  %15246 = vmatprep.subr.mxu1 %v22086_v47 }
0x12fb   :  { %15212 = vmatpush3.msra.mxu0 %v20395_v42  ;;  %15247 = vmatpush3.msra.mxu1 %v20715_v9 }
0x12fc   :  { %15213 = vmatprep.subr.mxu0 %v22086_v47  ;;  %15248 = vmatprep.subr.mxu1 %v22086_v47 }
0x12fd   :  { %v15820_v3 = vpop.eup %15819  ;;  %15214 = vmatpush3.msra.mxu0 %v20404_v8  ;;  %15249 = vmatpush3.msra.mxu1 %v20724_v51 }
0x12fe   :  { %11106 = vst.msk [vmem:[%s21973_s26 + $0xa] sm:$0x3] %vm10780_vm15, %v15820_v3  ;;  %15215 = vmatprep.subr.mxu0 %v22086_v47  ;;  %15250 = vmatprep.subr.mxu1 %v22086_v47  ;;  %v21307_v3 = vld [vmem:[%s21971_s24 + $0x18] sm:$0xff] }
0x12ff   :  { %15216 = vmatpush3.msra.mxu0 %v20417_v6  ;;  %15251 = vmatpush3.msra.mxu1 %v20737_v29 }
0x1300   :  { %15217 = vmatprep.subr.mxu0 %v22086_v47  ;;  %15252 = vmatprep.subr.mxu1 %v22086_v47 }
0x1301   :  { %15218 = vmatpush3.msra.mxu0 %v20426_v10  ;;  %15253 = vmatpush3.msra.mxu1 %v20746_v44 }
0x1302   :  { %15219 = vmatprep.subr.mxu0 %v22086_v47  ;;  %15254 = vmatprep.subr.mxu1 %v22086_v47 }
0x1303   :  { %15220 = vmatpush3.msra.mxu0 %v20435_v25  ;;  %15255 = vmatpush3.msra.mxu1 %v20934_v57 }
0x1304   :  { %15221 = vmatprep.subr.mxu0 %v22086_v47  ;;  %15256 = vmatprep.subr.mxu1 %v22086_v47 }
0x1305   :  { %15222 = vmatpush3.msra.mxu0 %v20444_v45  ;;  %15257 = vmatpush3.msra.mxu1 %v20948_v63 }
0x1306   :  { %15223 = vmatprep.subr.mxu0 %v22086_v47  ;;  %15258 = vmatprep.subr.mxu1 %v22086_v47 }
0x1307   :  { %15224 = vmatpush3.msra.mxu0 %v20453_v37  ;;  %15259 = vmatpush3.msra.mxu1 %v20962_v31  ;;  %v7465_v37 = vmul.f32 0.01, %v19538_v13 }
0x1308   :  { %15225 = vmatprep.subr.mxu0 %v22086_v47  ;;  %15260 = vmatprep.subr.mxu1 %v22086_v47 }
0x1309   :  { %15226 = vmatpush3.msra.mxu0 %v20462_v1  ;;  %15261 = vmatpush3.msra.mxu1 %v20976_v52  ;;  %v21181_v1 = vsel %vm7464_vm14, %v19538_v13, %v7465_v37  ;;  %v21200_v13 = vld [vmem:[%s21971_s24 + $0x70] sm:$0xff] }
0x130a   :  { %15227 = vmatprep.subr.mxu0 %v22086_v47  ;;  %15262 = vmatprep.subr.mxu1 %v22086_v47 }
0x130b   :  { %15228 = vmatpush3.msra.mxu0 %v20471_v36  ;;  %15263 = vmatpush3.msra.mxu1 %v20990_v32  ;;  %v21191_v36 = vld [vmem:[%s21971_s24 + $0x78] sm:$0xff] }
0x130c   :  { %15229 = vmatprep.subr.mxu0 %v22086_v47  ;;  %15264 = vmatprep.subr.mxu1 %v22086_v47 }
0x130d   :  { %15230 = vmatpush3.msra.mxu0 %v20480_v0  ;;  %15265 = vmatpush3.msra.mxu1 %v21006_v26  ;;  %v8868_v41 = vpop.f32.mrf.mxu0  ;;  %v8938_v42 = vpop.f32.mrf.mxu1  ;;  %v21209_v0 = vld [vmem:[%s21971_s24 + $0x68] sm:$0xff] }
0x130e   :  { %15231 = vmatprep.subr.mxu0 %v22086_v47  ;;  %15266 = vmatprep.subr.mxu1 %v22086_v47  ;;  %v8869_v8 = vadd.f32 %v8868_v41, %v21015_v34  ;;  %v21285_v34 = vld [vmem:[%s21971_s24 + $0x28] sm:$0xff]  ;;  %v21316_v41 = vld [vmem:[%s21971_s24 + $0x10] sm:$0xff] }
0x130f   :  { %15232 = vmatpush3.msra.mxu0 %v20490_v12  ;;  %15267 = vmatpush3.msra.mxu1 %v21022_v35  ;;  %v14823_v6 = vpop.f32.mrf.mxu0  ;;  %v14858_v10 = vpop.f32.mrf.mxu1 }
0x1310   :  { %15233 = vmatprep.subr.mxu0 %v22086_v47  ;;  %15268 = vmatprep.subr.mxu1 %v22086_v47  ;;  %v8942_v25 = vadd.f32 %v8938_v42, %v8869_v8  ;;  %v21325_v42 = vld [vmem:[%s21971_s24 + $0x8] sm:$0xff]  ;;  %v21336_v8 = vld [vmem:[%s21971_s24] sm:$0xff] }
0x1311   :  { %15234 = vmatpush3.msra.mxu0 %v20499_v11  ;;  %15269 = vmatpush3.msra.mxu1 %v21042_v17  ;;  %v21218_v11 = vld [vmem:[%s21971_s24 + $0x60] sm:$0xff] }
0x1312   :  { %15235 = vmatprep.subr.mxu0 %v22086_v47  ;;  %15270 = vmatprep.subr.mxu1 %v22086_v47  ;;  %v10802_v45 = vadd.f32 %v21036_v61, %v8942_v25 }
0x1313   :  { %15236 = vmatpush3.msra.mxu0 %v20509_v38  ;;  %15271 = vmatpush3.msra.mxu1 %v21056_v18  ;;  %v21231_v38 = vld [vmem:[%s21971_s24 + $0x58] sm:$0xff] }
0x1314   :  { %15237 = vmatprep.subr.mxu0 %v22086_v47  ;;  %15272 = vmatprep.subr.mxu1 %v22086_v47  ;;  %15821 = vtanh.f32 %v10802_v45 }
0x1315   :  { %15238 = vmatpush3.msra.mxu0 %v20519_v49  ;;  %15273 = vmatpush3.msra.mxu1 %v21071_v39  ;;  %v21240_v49 = vld [vmem:[%s21971_s24 + $0x50] sm:$0xff] }
0x1316   :  { %15239 = vmatprep.subr.mxu0 %v22086_v47  ;;  %15274 = vmatprep.subr.mxu1 %v22086_v47 }
0x1317   :  { %15240 = vmatpush3.msra.mxu0 %v20529_v23  ;;  %15241 = vmatprep.mubr.msk.f32.mxu0 %vm16152_vm0, %v22086_v47  ;;  %v21249_v23 = vld [vmem:[%s21971_s24 + $0x48] sm:$0xff] }
0x1318   :  { %15275 = vmatpush3.msra.mxu1 %v21086_v60  ;;  %15276 = vmatprep.mubr.msk.f32.mxu1 %vm16152_vm0, %v22086_v47 }
0x1319   :  { %15242 = vmatmul.mubr.f32.vlgmr.msra.gmra.mxu0 %v20802_v59  ;;  %15277 = vmatmul.mubr.f32.vlgmr.msra.gmra.mxu1 %v21181_v1  ;;  %v21258_v59 = vld [vmem:[%s21971_s24 + $0x40] sm:$0xff] }
0x131a   :  { %15279 = vmatprep.subr.mxu0 %v22086_v47  ;;  %15314 = vmatprep.subr.mxu1 %v22086_v47 }
0x131b   :  { %15280 = vmatpush3.msra.mxu0 %v20811_v50  ;;  %15315 = vmatpush3.msra.mxu1 %v21191_v36 }
0x131c   :  { %15281 = vmatprep.subr.mxu0 %v22086_v47  ;;  %15316 = vmatprep.subr.mxu1 %v22086_v47 }
0x131d   :  { %15282 = vmatpush3.msra.mxu0 %v20820_v56  ;;  %15317 = vmatpush3.msra.mxu1 %v21200_v13 }
0x131e   :  { %15283 = vmatprep.subr.mxu0 %v22086_v47  ;;  %15318 = vmatprep.subr.mxu1 %v22086_v47 }
0x131f   :  { %15284 = vmatpush3.msra.mxu0 %v20829_v43  ;;  %15319 = vmatpush3.msra.mxu1 %v21209_v0 }
0x1320   :  { %15285 = vmatprep.subr.mxu0 %v22086_v47  ;;  %15320 = vmatprep.subr.mxu1 %v22086_v47 }
0x1321   :  { %v15822_v12 = vpop.eup %15821  ;;  %15286 = vmatpush3.msra.mxu0 %v20838_v40  ;;  %15321 = vmatpush3.msra.mxu1 %v21218_v11 }
0x1322   :  { %11107 = vst.msk [vmem:[%s21973_s26 + $0xc] sm:$0x3] %vm10780_vm15, %v15822_v12  ;;  %15287 = vmatprep.subr.mxu0 %v22086_v47  ;;  %15322 = vmatprep.subr.mxu1 %v22086_v47 }
0x1323   :  { %15288 = vmatpush3.msra.mxu0 %v20851_v33  ;;  %15323 = vmatpush3.msra.mxu1 %v21231_v38 }
0x1324   :  { %15289 = vmatprep.subr.mxu0 %v22086_v47  ;;  %15324 = vmatprep.subr.mxu1 %v22086_v47 }
0x1325   :  { %15290 = vmatpush3.msra.mxu0 %v20940_v15  ;;  %15325 = vmatpush3.msra.mxu1 %v21240_v49 }
0x1326   :  { %15291 = vmatprep.subr.mxu0 %v22086_v47  ;;  %15326 = vmatprep.subr.mxu1 %v22086_v47 }
0x1327   :  { %15292 = vmatpush3.msra.mxu0 %v20954_v54  ;;  %15327 = vmatpush3.msra.mxu1 %v21249_v23 }
0x1328   :  { %15293 = vmatprep.subr.mxu0 %v22086_v47  ;;  %15328 = vmatprep.subr.mxu1 %v22086_v47 }
0x1329   :  { %15294 = vmatpush3.msra.mxu0 %v20968_v22  ;;  %15329 = vmatpush3.msra.mxu1 %v21258_v59 }
0x132a   :  { %15295 = vmatprep.subr.mxu0 %v22086_v47  ;;  %15330 = vmatprep.subr.mxu1 %v22086_v47 }
0x132b   :  { %15296 = vmatpush3.msra.mxu0 %v20982_v27  ;;  %15331 = vmatpush3.msra.mxu1 %v21267_v20 }
0x132c   :  { %15297 = vmatprep.subr.mxu0 %v22086_v47  ;;  %15332 = vmatprep.subr.mxu1 %v22086_v47 }
0x132d   :  { %15298 = vmatpush3.msra.mxu0 %v20996_v46  ;;  %15333 = vmatpush3.msra.mxu1 %v21276_v30 }
0x132e   :  { %15299 = vmatprep.subr.mxu0 %v22086_v47  ;;  %15334 = vmatprep.subr.mxu1 %v22086_v47 }
0x132f   :  { %15300 = vmatpush3.msra.mxu0 %v21012_v28  ;;  %15335 = vmatpush3.msra.mxu1 %v21285_v34  ;;  %v21288_v24 = vpop.f32.mrf.mxu0  ;;  %v21290_v62 = vpop.f32.mrf.mxu1 }
0x1330   :  { %15301 = vmatprep.subr.mxu0 %v22086_v47  ;;  %15336 = vmatprep.subr.mxu1 %v22086_v47 }
0x1331   :  { %15302 = vmatpush3.msra.mxu0 %v21028_v58  ;;  %15337 = vmatpush3.msra.mxu1 %v21298_v4  ;;  %v14893_v14 = vpop.f32.mrf.mxu0  ;;  %v14928_v7 = vpop.f32.mrf.mxu1 }
0x1332   :  { %15303 = vmatprep.subr.mxu0 %v22086_v47  ;;  %15338 = vmatprep.subr.mxu1 %v22086_v47 }
0x1333   :  { %15304 = vmatpush3.msra.mxu0 %v21048_v19  ;;  %15339 = vmatpush3.msra.mxu1 %v21307_v3 }
0x1334   :  { %15305 = vmatprep.subr.mxu0 %v22086_v47  ;;  %15340 = vmatprep.subr.mxu1 %v22086_v47 }
0x1335   :  { %15306 = vmatpush3.msra.mxu0 %v21062_v5  ;;  %15341 = vmatpush3.msra.mxu1 %v21316_v41 }
0x1336   :  { %15307 = vmatprep.subr.mxu0 %v22086_v47  ;;  %15342 = vmatprep.subr.mxu1 %v22086_v47 }
0x1337   :  { %15308 = vmatpush3.msra.mxu0 %v21077_v55  ;;  %15343 = vmatpush3.msra.mxu1 %v21325_v42 }
0x1338   :  { %15309 = vmatprep.subr.mxu0 %v22086_v47  ;;  %15344 = vmatprep.subr.mxu1 %v22086_v47 }
0x1339   :  { %15310 = vmatpush3.msra.mxu0 %v21094_v21  ;;  %15311 = vmatprep.mubr.msk.f32.mxu0 %vm16152_vm0, %v22086_v47 }
0x133a   :  { %15345 = vmatpush3.msra.mxu1 %v21336_v8  ;;  %15346 = vmatprep.mubr.msk.f32.mxu1 %vm16152_vm0, %v22086_v47 }
0x133b   :  { %15312 = vmatmul.mubr.f32.vlgmr.msra.gmra.mxu0 %v21181_v1  ;;  %15347 = vmatmul.mubr.f32.vlgmr.msra.gmra.mxu1 %v21100_v48  ;;  %v9080_v48 = vadd.f32 %v21290_v62, %v21288_v24  ;;  %v7470_v24 = vmul.f32 0.01, %v19563_v2 }
0x133c   :  { %15349 = vmatprep.subr.mxu0 %v22086_v47  ;;  %15384 = vmatprep.subr.mxu1 %v22086_v47 }
0x133d   :  { %15350 = vmatpush3.msra.mxu0 %v20706_v53  ;;  %15385 = vmatpush3.msra.mxu1 %v20811_v50  ;;  %v21419_v62 = vsel %vm7469_vm4, %v19563_v2, %v7470_v24  ;;  %v21635_v24 = vld [vmem:[%s21971_s24 + $0xe0] sm:$0xff] }
0x133e   :  { %15351 = vmatprep.subr.mxu0 %v22086_v47  ;;  %15386 = vmatprep.subr.mxu1 %v22086_v47 }
0x133f   :  { %15352 = vmatpush3.msra.mxu0 %v20715_v9  ;;  %15387 = vmatpush3.msra.mxu1 %v20820_v56 }
0x1340   :  { %15353 = vmatprep.subr.mxu0 %v22086_v47  ;;  %15388 = vmatprep.subr.mxu1 %v22086_v47 }
0x1341   :  { %15354 = vmatpush3.msra.mxu0 %v20724_v51  ;;  %15389 = vmatpush3.msra.mxu1 %v20829_v43 }
0x1342   :  { %15355 = vmatprep.subr.mxu0 %v22086_v47  ;;  %15390 = vmatprep.subr.mxu1 %v22086_v47 }
0x1343   :  { %15356 = vmatpush3.msra.mxu0 %v20737_v29  ;;  %15391 = vmatpush3.msra.mxu1 %v20838_v40 }
0x1344   :  { %15357 = vmatprep.subr.mxu0 %v22086_v47  ;;  %15392 = vmatprep.subr.mxu1 %v22086_v47 }
0x1345   :  { %15358 = vmatpush3.msra.mxu0 %v20746_v44  ;;  %15393 = vmatpush3.msra.mxu1 %v20851_v33 }
0x1346   :  { %15359 = vmatprep.subr.mxu0 %v22086_v47  ;;  %15394 = vmatprep.subr.mxu1 %v22086_v47 }
0x1347   :  { %15360 = vmatpush3.msra.mxu0 %v20934_v57  ;;  %15395 = vmatpush3.msra.mxu1 %v20940_v15 }
0x1348   :  { %15361 = vmatprep.subr.mxu0 %v22086_v47  ;;  %15396 = vmatprep.subr.mxu1 %v22086_v47 }
0x1349   :  { %15362 = vmatpush3.msra.mxu0 %v20948_v63  ;;  %15397 = vmatpush3.msra.mxu1 %v20954_v54 }
0x134a   :  { %15363 = vmatprep.subr.mxu0 %v22086_v47  ;;  %15398 = vmatprep.subr.mxu1 %v22086_v47 }
0x134b   :  { %15364 = vmatpush3.msra.mxu0 %v20962_v31  ;;  %15399 = vmatpush3.msra.mxu1 %v20968_v22 }
0x134c   :  { %15365 = vmatprep.subr.mxu0 %v22086_v47  ;;  %15400 = vmatprep.subr.mxu1 %v22086_v47 }
0x134d   :  { %15366 = vmatpush3.msra.mxu0 %v20976_v52  ;;  %15401 = vmatpush3.msra.mxu1 %v20982_v27 }
0x134e   :  { %15367 = vmatprep.subr.mxu0 %v22086_v47  ;;  %15402 = vmatprep.subr.mxu1 %v22086_v47 }
0x134f   :  { %15368 = vmatpush3.msra.mxu0 %v20990_v32  ;;  %15403 = vmatpush3.msra.mxu1 %v20996_v46 }
0x1350   :  { %15369 = vmatprep.subr.mxu0 %v22086_v47  ;;  %15404 = vmatprep.subr.mxu1 %v22086_v47 }
0x1351   :  { %15370 = vmatpush3.msra.mxu0 %v21006_v26  ;;  %15405 = vmatpush3.msra.mxu1 %v21012_v28  ;;  %v9149_v6 = vpop.f32.mrf.mxu0  ;;  %v21389_v10 = vpop.f32.mrf.mxu1 }
0x1352   :  { %15371 = vmatprep.subr.mxu0 %v22086_v47  ;;  %15406 = vmatprep.subr.mxu1 %v22086_v47  ;;  %v9153_v25 = vadd.f32 %v9149_v6, %v9080_v48  ;;  %v7475_v48 = vmul.f32 0.01, %v19566_v16 }
0x1353   :  { %15372 = vmatpush3.msra.mxu0 %v21022_v35  ;;  %15407 = vmatpush3.msra.mxu1 %v21028_v58  ;;  %v14963_v45 = vpop.f32.mrf.mxu0  ;;  %v14998_v37 = vpop.f32.mrf.mxu1 }
0x1354   :  { %15373 = vmatprep.subr.mxu0 %v22086_v47  ;;  %15408 = vmatprep.subr.mxu1 %v22086_v47  ;;  %v10806_v12 = vadd.f32 %v21036_v61, %v9153_v25  ;;  %v21500_v6 = vsel %vm7474_vm5, %v19566_v16, %v7475_v48  ;;  %v21607_v25 = vld [vmem:[%s21971_s24 + $0xf0] sm:$0xff]  ;;  %v21615_v45 = vld [vmem:[%s21971_s24 + $0x168] sm:$0xff] }
0x1355   :  { %15374 = vmatpush3.msra.mxu0 %v21042_v17  ;;  %15409 = vmatpush3.msra.mxu1 %v21048_v19  ;;  %v21621_v37 = vld [vmem:[%s21971_s24 + $0xe8] sm:$0xff] }
0x1356   :  { %15375 = vmatprep.subr.mxu0 %v22086_v47  ;;  %15410 = vmatprep.subr.mxu1 %v22086_v47  ;;  %15823 = vtanh.f32 %v10806_v12  ;;  %v21629_v12 = vld [vmem:[%s21971_s24 + $0x160] sm:$0xff]  ;;  %v15958_v48 = vld [vmem:[%s21971_s24 + $0x108] sm:$0xff] }
0x1357   :  { %15376 = vmatpush3.msra.mxu0 %v21056_v18  ;;  %15411 = vmatpush3.msra.mxu1 %v21062_v5 }
0x1358   :  { %15377 = vmatprep.subr.mxu0 %v22086_v47  ;;  %15412 = vmatprep.subr.mxu1 %v22086_v47 }
0x1359   :  { %15378 = vmatpush3.msra.mxu0 %v21071_v39  ;;  %15413 = vmatpush3.msra.mxu1 %v21077_v55 }
0x135a   :  { %15379 = vmatprep.subr.mxu0 %v22086_v47  ;;  %15414 = vmatprep.subr.mxu1 %v22086_v47 }
0x135b   :  { %15380 = vmatpush3.msra.mxu0 %v21086_v60  ;;  %15381 = vmatprep.mubr.msk.f32.mxu0 %vm16152_vm0, %v22086_v47 }
0x135c   :  { %15415 = vmatpush3.msra.mxu1 %v21094_v21  ;;  %15416 = vmatprep.mubr.msk.f32.mxu1 %vm16152_vm0, %v22086_v47 }
0x135d   :  { %15382 = vmatmul.mubr.f32.vlgmr.msra.gmra.mxu0 %v21419_v62  ;;  %15417 = vmatmul.mubr.f32.vlgmr.msra.gmra.mxu1 %v21419_v62 }
0x135e   :  { %15419 = vmatprep.subr.mxu0 %v22086_v47  ;;  %15454 = vmatprep.subr.mxu1 %v22086_v47 }
0x135f   :  { %15420 = vmatpush3.msra.mxu0 %v21191_v36  ;;  %15455 = vmatpush3.msra.mxu1 %v20706_v53 }
0x1360   :  { %15421 = vmatprep.subr.mxu0 %v22086_v47  ;;  %15456 = vmatprep.subr.mxu1 %v22086_v47 }
0x1361   :  { %15422 = vmatpush3.msra.mxu0 %v21200_v13  ;;  %15457 = vmatpush3.msra.mxu1 %v20715_v9 }
0x1362   :  { %15423 = vmatprep.subr.mxu0 %v22086_v47  ;;  %15458 = vmatprep.subr.mxu1 %v22086_v47 }
0x1363   :  { %v15824_v2 = vpop.eup %15823  ;;  %15424 = vmatpush3.msra.mxu0 %v21209_v0  ;;  %15459 = vmatpush3.msra.mxu1 %v20724_v51 }
0x1364   :  { %11108 = vst.msk [vmem:[%s21973_s26 + $0xe] sm:$0x3] %vm10780_vm15, %v15824_v2  ;;  %15425 = vmatprep.subr.mxu0 %v22086_v47  ;;  %15460 = vmatprep.subr.mxu1 %v22086_v47  ;;  %v21649_v2 = vld [vmem:[%s21971_s24 + $0xd8] sm:$0xff] }
0x1365   :  { %15426 = vmatpush3.msra.mxu0 %v21218_v11  ;;  %15461 = vmatpush3.msra.mxu1 %v20737_v29 }
0x1366   :  { %15427 = vmatprep.subr.mxu0 %v22086_v47  ;;  %15462 = vmatprep.subr.mxu1 %v22086_v47 }
0x1367   :  { %15428 = vmatpush3.msra.mxu0 %v21231_v38  ;;  %15463 = vmatpush3.msra.mxu1 %v20746_v44 }
0x1368   :  { %15429 = vmatprep.subr.mxu0 %v22086_v47  ;;  %15464 = vmatprep.subr.mxu1 %v22086_v47 }
0x1369   :  { %15430 = vmatpush3.msra.mxu0 %v21240_v49  ;;  %15465 = vmatpush3.msra.mxu1 %v20934_v57 }
0x136a   :  { %15431 = vmatprep.subr.mxu0 %v22086_v47  ;;  %15466 = vmatprep.subr.mxu1 %v22086_v47 }
0x136b   :  { %15432 = vmatpush3.msra.mxu0 %v21249_v23  ;;  %15467 = vmatpush3.msra.mxu1 %v20948_v63 }
0x136c   :  { %15433 = vmatprep.subr.mxu0 %v22086_v47  ;;  %15468 = vmatprep.subr.mxu1 %v22086_v47 }
0x136d   :  { %15434 = vmatpush3.msra.mxu0 %v21258_v59  ;;  %15469 = vmatpush3.msra.mxu1 %v20962_v31 }
0x136e   :  { %15435 = vmatprep.subr.mxu0 %v22086_v47  ;;  %15470 = vmatprep.subr.mxu1 %v22086_v47 }
0x136f   :  { %15436 = vmatpush3.msra.mxu0 %v21267_v20  ;;  %15471 = vmatpush3.msra.mxu1 %v20976_v52 }
0x1370   :  { %15437 = vmatprep.subr.mxu0 %v22086_v47  ;;  %15472 = vmatprep.subr.mxu1 %v22086_v47 }
0x1371   :  { %15438 = vmatpush3.msra.mxu0 %v21276_v30  ;;  %15473 = vmatpush3.msra.mxu1 %v20990_v32 }
0x1372   :  { %15439 = vmatprep.subr.mxu0 %v22086_v47  ;;  %15474 = vmatprep.subr.mxu1 %v22086_v47 }
0x1373   :  { %15440 = vmatpush3.msra.mxu0 %v21285_v34  ;;  %15475 = vmatpush3.msra.mxu1 %v21006_v26  ;;  %v9290_v53 = vpop.f32.mrf.mxu0  ;;  %v9360_v9 = vpop.f32.mrf.mxu1 }
0x1374   :  { %15441 = vmatprep.subr.mxu0 %v22086_v47  ;;  %15476 = vmatprep.subr.mxu1 %v22086_v47  ;;  %v9291_v51 = vadd.f32 %v9290_v53, %v21389_v10  ;;  %v21601_v10 = vld [vmem:[%s21971_s24 + $0x170] sm:$0xff] }
0x1375   :  { %15442 = vmatpush3.msra.mxu0 %v21298_v4  ;;  %15477 = vmatpush3.msra.mxu1 %v21022_v35  ;;  %v15033_v29 = vpop.f32.mrf.mxu0  ;;  %v15068_v44 = vpop.f32.mrf.mxu1 }
0x1376   :  { %15443 = vmatprep.subr.mxu0 %v22086_v47  ;;  %15478 = vmatprep.subr.mxu1 %v22086_v47  ;;  %v9364_v14 = vadd.f32 %v9360_v9, %v9291_v51  ;;  %v15955_v9 = vld [vmem:[%s21971_s24 + $0x118] sm:$0xff]  ;;  %v21790_v51 = vld [vmem:[%s21972_s25] ss:$0 sm:$0xff]  ;;  %v15957_v44 = vld [vmem:[%s21971_s24 + $0x110] sm:$0xff] }
0x1377   :  { %15444 = vmatpush3.msra.mxu0 %v21307_v3  ;;  %15479 = vmatpush3.msra.mxu1 %v21042_v17 }
0x1378   :  { %15445 = vmatprep.subr.mxu0 %v22086_v47  ;;  %15480 = vmatprep.subr.mxu1 %v22086_v47  ;;  %v10810_v7 = vadd.f32 %v21036_v61, %v9364_v14  ;;  %v22108_v14 = vld [vmem:[#allocation41_spill] sm:$0xff] }
0x1379   :  { %15446 = vmatpush3.msra.mxu0 %v21316_v41  ;;  %15481 = vmatpush3.msra.mxu1 %v21056_v18  ;;  %vm7484_vm6 = vcmp.gt.f32.partialorder %v22108_v14, 0.0 }
0x137a   :  { %15447 = vmatprep.subr.mxu0 %v22086_v47  ;;  %15482 = vmatprep.subr.mxu1 %v22086_v47  ;;  %15825 = vtanh.f32 %v10810_v7  ;;  %v7485_v7 = vmul.f32 0.01, %v22108_v14 }
0x137b   :  { %15448 = vmatpush3.msra.mxu0 %v21325_v42  ;;  %15483 = vmatpush3.msra.mxu1 %v21071_v39 }
0x137c   :  { %15449 = vmatprep.subr.mxu0 %v22086_v47  ;;  %15484 = vmatprep.subr.mxu1 %v22086_v47 }
0x137d   :  { %15450 = vmatpush3.msra.mxu0 %v21336_v8  ;;  %15451 = vmatprep.mubr.msk.f32.mxu0 %vm16152_vm0, %v22086_v47 }
0x137e   :  { %15485 = vmatpush3.msra.mxu1 %v21086_v60  ;;  %15486 = vmatprep.mubr.msk.f32.mxu1 %vm16152_vm0, %v22086_v47 }
0x137f   :  { %15452 = vmatmul.mubr.f32.vlgmr.msra.gmra.mxu0 %v21181_v1  ;;  %15487 = vmatmul.mubr.f32.vlgmr.msra.gmra.mxu1 %v21500_v6  ;;  %v21593_v1 = vld [vmem:[%s21971_s24 + $0xf8] sm:$0xff] }
0x1380   :  { %15489 = vmatprep.subr.mxu0 %v22086_v47  ;;  %15524 = vmatprep.subr.mxu1 %v22086_v47 }
0x1381   :  { %15490 = vmatpush3.msra.mxu0 %v20811_v50  ;;  %15525 = vmatpush3.msra.mxu1 %v21191_v36 }
0x1382   :  { %15491 = vmatprep.subr.mxu0 %v22086_v47  ;;  %15526 = vmatprep.subr.mxu1 %v22086_v47 }
0x1383   :  { %15492 = vmatpush3.msra.mxu0 %v20820_v56  ;;  %15527 = vmatpush3.msra.mxu1 %v21200_v13 }
0x1384   :  { %15493 = vmatprep.subr.mxu0 %v22086_v47  ;;  %15528 = vmatprep.subr.mxu1 %v22086_v47 }
0x1385   :  { %15494 = vmatpush3.msra.mxu0 %v20829_v43  ;;  %15529 = vmatpush3.msra.mxu1 %v21209_v0 }
0x1386   :  { %15495 = vmatprep.subr.mxu0 %v22086_v47  ;;  %15530 = vmatprep.subr.mxu1 %v22086_v47 }
0x1387   :  { %v15826_v16 = vpop.eup %15825  ;;  %15496 = vmatpush3.msra.mxu0 %v20838_v40  ;;  %15531 = vmatpush3.msra.mxu1 %v21218_v11 }
0x1388   :  { %11109 = vst.msk [vmem:[%s21973_s26 + $0x10] sm:$0x3] %vm10780_vm15, %v15826_v16  ;;  %15497 = vmatprep.subr.mxu0 %v22086_v47  ;;  %15532 = vmatprep.subr.mxu1 %v22086_v47  ;;  %v15959_v16 = vld [vmem:[%s21971_s24 + $0x100] sm:$0xff] }
0x1389   :  { %15498 = vmatpush3.msra.mxu0 %v20851_v33  ;;  %15533 = vmatpush3.msra.mxu1 %v21231_v38  ;;  %v21587_v33 = vld [vmem:[%s21971_s24 + $0x178] sm:$0xff] }
0x138a   :  { %15499 = vmatprep.subr.mxu0 %v22086_v47  ;;  %15534 = vmatprep.subr.mxu1 %v22086_v47 }
0x138b   :  { %15500 = vmatpush3.msra.mxu0 %v20940_v15  ;;  %15535 = vmatpush3.msra.mxu1 %v21240_v49 }
0x138c   :  { %15501 = vmatprep.subr.mxu0 %v22086_v47  ;;  %15536 = vmatprep.subr.mxu1 %v22086_v47 }
0x138d   :  { %15502 = vmatpush3.msra.mxu0 %v20954_v54  ;;  %15537 = vmatpush3.msra.mxu1 %v21249_v23 }
0x138e   :  { %15503 = vmatprep.subr.mxu0 %v22086_v47  ;;  %15538 = vmatprep.subr.mxu1 %v22086_v47 }
0x138f   :  { %15504 = vmatpush3.msra.mxu0 %v20968_v22  ;;  %15539 = vmatpush3.msra.mxu1 %v21258_v59 }
0x1390   :  { %15505 = vmatprep.subr.mxu0 %v22086_v47  ;;  %15540 = vmatprep.subr.mxu1 %v22086_v47 }
0x1391   :  { %15506 = vmatpush3.msra.mxu0 %v20982_v27  ;;  %15541 = vmatpush3.msra.mxu1 %v21267_v20 }
0x1392   :  { %15507 = vmatprep.subr.mxu0 %v22086_v47  ;;  %15542 = vmatprep.subr.mxu1 %v22086_v47 }
0x1393   :  { %15508 = vmatpush3.msra.mxu0 %v20996_v46  ;;  %15543 = vmatpush3.msra.mxu1 %v21276_v30 }
0x1394   :  { %15509 = vmatprep.subr.mxu0 %v22086_v47  ;;  %15544 = vmatprep.subr.mxu1 %v22086_v47 }
0x1395   :  { %15510 = vmatpush3.msra.mxu0 %v21012_v28  ;;  %15545 = vmatpush3.msra.mxu1 %v21285_v34  ;;  %v21552_v50 = vpop.f32.mrf.mxu0  ;;  %v21554_v56 = vpop.f32.mrf.mxu1 }
0x1396   :  { %15511 = vmatprep.subr.mxu0 %v22086_v47  ;;  %15546 = vmatprep.subr.mxu1 %v22086_v47 }
0x1397   :  { %15512 = vmatpush3.msra.mxu0 %v21028_v58  ;;  %15547 = vmatpush3.msra.mxu1 %v21298_v4  ;;  %v15103_v43 = vpop.f32.mrf.mxu0  ;;  %v15138_v40 = vpop.f32.mrf.mxu1 }
0x1398   :  { %15513 = vmatprep.subr.mxu0 %v22086_v47  ;;  %15548 = vmatprep.subr.mxu1 %v22086_v47  ;;  %v15969_v43 = vld [vmem:[%s21971_s24 + $0x88] sm:$0xff] }
0x1399   :  { %15514 = vmatpush3.msra.mxu0 %v21048_v19  ;;  %15549 = vmatpush3.msra.mxu1 %v21307_v3 }
0x139a   :  { %15515 = vmatprep.subr.mxu0 %v22086_v47  ;;  %15550 = vmatprep.subr.mxu1 %v22086_v47 }
0x139b   :  { %15516 = vmatpush3.msra.mxu0 %v21062_v5  ;;  %15551 = vmatpush3.msra.mxu1 %v21316_v41 }
0x139c   :  { %15517 = vmatprep.subr.mxu0 %v22086_v47  ;;  %15552 = vmatprep.subr.mxu1 %v22086_v47 }
0x139d   :  { %15518 = vmatpush3.msra.mxu0 %v21077_v55  ;;  %15553 = vmatpush3.msra.mxu1 %v21325_v42 }
0x139e   :  { %15519 = vmatprep.subr.mxu0 %v22086_v47  ;;  %15554 = vmatprep.subr.mxu1 %v22086_v47 }
0x139f   :  { %15520 = vmatpush3.msra.mxu0 %v21094_v21  ;;  %15521 = vmatprep.mubr.msk.f32.mxu0 %vm16152_vm0, %v22086_v47 }
0x13a0   :  { %15555 = vmatpush3.msra.mxu1 %v21336_v8  ;;  %15556 = vmatprep.mubr.msk.f32.mxu1 %vm16152_vm0, %v22086_v47 }
0x13a1   :  { %15522 = vmatmul.mubr.f32.vlgmr.msra.gmra.mxu0 %v21500_v6  ;;  %15557 = vmatmul.mubr.f32.vlgmr.msra.gmra.mxu1 %v21419_v62  ;;  %v21643_v62 = vld [vmem:[%s21971_s24 + $0x158] sm:$0xff] }
0x13a2   :  { %15559 = vmatprep.subr.mxu0 %v22086_v47  ;;  %15594 = vmatprep.subr.mxu1 %v22086_v47 }
0x13a3   :  { %15560 = vmatpush3.msra.mxu0 %v21587_v33  ;;  %15595 = vmatpush3.msra.mxu1 %v21593_v1 }
0x13a4   :  { %15561 = vmatprep.subr.mxu0 %v22086_v47  ;;  %15596 = vmatprep.subr.mxu1 %v22086_v47 }
0x13a5   :  { %15562 = vmatpush3.msra.mxu0 %v21601_v10  ;;  %15597 = vmatpush3.msra.mxu1 %v21607_v25 }
0x13a6   :  { %15563 = vmatprep.subr.mxu0 %v22086_v47  ;;  %15598 = vmatprep.subr.mxu1 %v22086_v47 }
0x13a7   :  { %15564 = vmatpush3.msra.mxu0 %v21615_v45  ;;  %15599 = vmatpush3.msra.mxu1 %v21621_v37 }
0x13a8   :  { %15565 = vmatprep.subr.mxu0 %v22086_v47  ;;  %15600 = vmatprep.subr.mxu1 %v22086_v47 }
0x13a9   :  { %15566 = vmatpush3.msra.mxu0 %v21629_v12  ;;  %15601 = vmatpush3.msra.mxu1 %v21635_v24 }
0x13aa   :  { %15567 = vmatprep.subr.mxu0 %v22086_v47  ;;  %15602 = vmatprep.subr.mxu1 %v22086_v47 }
0x13ab   :  { %15568 = vmatpush3.msra.mxu0 %v21643_v62  ;;  %15603 = vmatpush3.msra.mxu1 %v21649_v2 }
0x13ac   :  { %15569 = vmatprep.subr.mxu0 %v22086_v47  ;;  %15604 = vmatprep.subr.mxu1 %v22086_v47 }
0x13ad   :  { %15570 = vmatpush3.msra.mxu0 %v20934_v57  ;;  %15605 = vmatpush3.msra.mxu1 %v20940_v15  ;;  %v9502_v57 = vadd.f32 %v21554_v56, %v21552_v50  ;;  %v21816_v50 = vsel %vm7484_vm6, %v22108_v14, %v7485_v7 }
0x13ae   :  { %15571 = vmatprep.subr.mxu0 %v22086_v47  ;;  %15606 = vmatprep.subr.mxu1 %v22086_v47 }
0x13af   :  { %15572 = vmatpush3.msra.mxu0 %v20948_v63  ;;  %15607 = vmatpush3.msra.mxu1 %v20954_v54 }
0x13b0   :  { %15573 = vmatprep.subr.mxu0 %v22086_v47  ;;  %15608 = vmatprep.subr.mxu1 %v22086_v47 }
0x13b1   :  { %15574 = vmatpush3.msra.mxu0 %v20962_v31  ;;  %15609 = vmatpush3.msra.mxu1 %v20968_v22 }
0x13b2   :  { %15575 = vmatprep.subr.mxu0 %v22086_v47  ;;  %15610 = vmatprep.subr.mxu1 %v22086_v47 }
0x13b3   :  { %15576 = vmatpush3.msra.mxu0 %v20976_v52  ;;  %15611 = vmatpush3.msra.mxu1 %v20982_v27  ;;  %v22107_v27 = vld [vmem:[#allocation40_spill] sm:$0xff] }
0x13b4   :  { %15577 = vmatprep.subr.mxu0 %v22086_v47  ;;  %15612 = vmatprep.subr.mxu1 %v22086_v47  ;;  %vm7479_vm1 = vcmp.gt.f32.partialorder %v22107_v27, 0.0 }
0x13b5   :  { %15578 = vmatpush3.msra.mxu0 %v20990_v32  ;;  %15613 = vmatpush3.msra.mxu1 %v20996_v46  ;;  %v7480_v32 = vmul.f32 0.01, %v22107_v27 }
0x13b6   :  { %15579 = vmatprep.subr.mxu0 %v22086_v47  ;;  %15614 = vmatprep.subr.mxu1 %v22086_v47 }
0x13b7   :  { %15580 = vmatpush3.msra.mxu0 %v21006_v26  ;;  %15615 = vmatpush3.msra.mxu1 %v21012_v28  ;;  %v9571_v15 = vpop.f32.mrf.mxu0  ;;  %v21678_v63 = vpop.f32.mrf.mxu1  ;;  %v21708_v46 = vsel %vm7479_vm1, %v22107_v27, %v7480_v32  ;;  %v15948_v28 = vld [vmem:[%s21971_s24 + $0x150] sm:$0xff] }
0x13b8   :  { %15581 = vmatprep.subr.mxu0 %v22086_v47  ;;  %15616 = vmatprep.subr.mxu1 %v22086_v47  ;;  %v9575_v54 = vadd.f32 %v9571_v15, %v9502_v57 }
0x13b9   :  { %15582 = vmatpush3.msra.mxu0 %v21022_v35  ;;  %15617 = vmatpush3.msra.mxu1 %v21028_v58  ;;  %v15173_v31 = vpop.f32.mrf.mxu0  ;;  %v15208_v22 = vpop.f32.mrf.mxu1  ;;  %v15949_v35 = vld [vmem:[%s21971_s24 + $0x148] sm:$0xff]  ;;  %v15950_v58 = vld [vmem:[%s21971_s24 + $0x140] sm:$0xff] }
0x13ba   :  { %15583 = vmatprep.subr.mxu0 %v22086_v47  ;;  %15618 = vmatprep.subr.mxu1 %v22086_v47  ;;  %v10814_v52 = vadd.f32 %v21036_v61, %v9575_v54  ;;  %v15951_v61 = vld [vmem:[%s21971_s24 + $0x138] sm:$0xff] }
0x13bb   :  { %15584 = vmatpush3.msra.mxu0 %v21042_v17  ;;  %15619 = vmatpush3.msra.mxu1 %v21048_v19  ;;  %v15952_v17 = vld [vmem:[%s21971_s24 + $0x130] sm:$0xff]  ;;  %v15953_v19 = vld [vmem:[%s21971_s24 + $0x128] sm:$0xff] }
0x13bc   :  { %15585 = vmatprep.subr.mxu0 %v22086_v47  ;;  %15620 = vmatprep.subr.mxu1 %v22086_v47  ;;  %15827 = vtanh.f32 %v10814_v52 }
0x13bd   :  { %15586 = vmatpush3.msra.mxu0 %v21056_v18  ;;  %15621 = vmatpush3.msra.mxu1 %v21062_v5 }
0x13be   :  { %15587 = vmatprep.subr.mxu0 %v22086_v47  ;;  %15622 = vmatprep.subr.mxu1 %v22086_v47 }
0x13bf   :  { %15588 = vmatpush3.msra.mxu0 %v21071_v39  ;;  %15623 = vmatpush3.msra.mxu1 %v21077_v55  ;;  %v15954_v55 = vld [vmem:[%s21971_s24 + $0x120] sm:$0xff] }
0x13c0   :  { %15589 = vmatprep.subr.mxu0 %v22086_v47  ;;  %15624 = vmatprep.subr.mxu1 %v22086_v47 }
0x13c1   :  { %15590 = vmatpush3.msra.mxu0 %v21086_v60  ;;  %15591 = vmatprep.mubr.msk.f32.mxu0 %vm16152_vm0, %v22086_v47 }
0x13c2   :  { %15625 = vmatpush3.msra.mxu1 %v21094_v21  ;;  %15626 = vmatprep.mubr.msk.f32.mxu1 %vm16152_vm0, %v22086_v47 }
0x13c3   :  { %15592 = vmatmul.mubr.f32.vlgmr.msra.gmra.mxu0 %v21708_v46  ;;  %15627 = vmatmul.mubr.f32.vlgmr.msra.gmra.mxu1 %v21708_v46 }
0x13c4   :  { %15629 = vmatprep.subr.mxu0 %v22086_v47  ;;  %15664 = vmatprep.subr.mxu1 %v22086_v47 }
0x13c5   :  { %15630 = vmatpush3.msra.mxu0 %v21191_v36  ;;  %15665 = vmatpush3.msra.mxu1 %v21587_v33 }
0x13c6   :  { %15631 = vmatprep.subr.mxu0 %v22086_v47  ;;  %15666 = vmatprep.subr.mxu1 %v22086_v47 }
0x13c7   :  { %15632 = vmatpush3.msra.mxu0 %v21200_v13  ;;  %15667 = vmatpush3.msra.mxu1 %v21601_v10 }
0x13c8   :  { %15633 = vmatprep.subr.mxu0 %v22086_v47  ;;  %15668 = vmatprep.subr.mxu1 %v22086_v47 }
0x13c9   :  { %v15828_v26 = vpop.eup %15827  ;;  %15634 = vmatpush3.msra.mxu0 %v21209_v0  ;;  %15669 = vmatpush3.msra.mxu1 %v21615_v45 }
0x13ca   :  { %11110 = vst.msk [vmem:[%s21973_s26 + $0x12] sm:$0x3] %vm10780_vm15, %v15828_v26  ;;  %15635 = vmatprep.subr.mxu0 %v22086_v47  ;;  %15670 = vmatprep.subr.mxu1 %v22086_v47 }
0x13cb   :  { %15636 = vmatpush3.msra.mxu0 %v21218_v11  ;;  %15671 = vmatpush3.msra.mxu1 %v21629_v12 }
0x13cc   :  { %15637 = vmatprep.subr.mxu0 %v22086_v47  ;;  %15672 = vmatprep.subr.mxu1 %v22086_v47 }
0x13cd   :  { %15638 = vmatpush3.msra.mxu0 %v21231_v38  ;;  %15673 = vmatpush3.msra.mxu1 %v21643_v62 }
0x13ce   :  { %15639 = vmatprep.subr.mxu0 %v22086_v47  ;;  %15674 = vmatprep.subr.mxu1 %v22086_v47 }
0x13cf   :  { %15640 = vmatpush3.msra.mxu0 %v21240_v49  ;;  %15675 = vmatpush3.msra.mxu1 %v15948_v28 }
0x13d0   :  { %15641 = vmatprep.subr.mxu0 %v22086_v47  ;;  %15676 = vmatprep.subr.mxu1 %v22086_v47 }
0x13d1   :  { %15642 = vmatpush3.msra.mxu0 %v21249_v23  ;;  %15677 = vmatpush3.msra.mxu1 %v15949_v35 }
0x13d2   :  { %15643 = vmatprep.subr.mxu0 %v22086_v47  ;;  %15678 = vmatprep.subr.mxu1 %v22086_v47 }
0x13d3   :  { %15644 = vmatpush3.msra.mxu0 %v21258_v59  ;;  %15679 = vmatpush3.msra.mxu1 %v15950_v58 }
0x13d4   :  { %15645 = vmatprep.subr.mxu0 %v22086_v47  ;;  %15680 = vmatprep.subr.mxu1 %v22086_v47 }
0x13d5   :  { %15646 = vmatpush3.msra.mxu0 %v21267_v20  ;;  %15681 = vmatpush3.msra.mxu1 %v15951_v61 }
0x13d6   :  { %15647 = vmatprep.subr.mxu0 %v22086_v47  ;;  %15682 = vmatprep.subr.mxu1 %v22086_v47 }
0x13d7   :  { %15648 = vmatpush3.msra.mxu0 %v21276_v30  ;;  %15683 = vmatpush3.msra.mxu1 %v15952_v17 }
0x13d8   :  { %15649 = vmatprep.subr.mxu0 %v22086_v47  ;;  %15684 = vmatprep.subr.mxu1 %v22086_v47 }
0x13d9   :  { %15650 = vmatpush3.msra.mxu0 %v21285_v34  ;;  %15685 = vmatpush3.msra.mxu1 %v15953_v19  ;;  %v9712_v18 = vpop.f32.mrf.mxu0  ;;  %v9782_v5 = vpop.f32.mrf.mxu1 }
0x13da   :  { %15651 = vmatprep.subr.mxu0 %v22086_v47  ;;  %15686 = vmatprep.subr.mxu1 %v22086_v47  ;;  %v9713_v39 = vadd.f32 %v9712_v18, %v21678_v63 }
0x13db   :  { %15652 = vmatpush3.msra.mxu0 %v21298_v4  ;;  %15687 = vmatpush3.msra.mxu1 %v15954_v55  ;;  %v15243_v60 = vpop.f32.mrf.mxu0  ;;  %v15278_v21 = vpop.f32.mrf.mxu1 }
0x13dc   :  { %15653 = vmatprep.subr.mxu0 %v22086_v47  ;;  %15688 = vmatprep.subr.mxu1 %v22086_v47  ;;  %v9786_v53 = vadd.f32 %v9782_v5, %v9713_v39 }
0x13dd   :  { %15654 = vmatpush3.msra.mxu0 %v21307_v3  ;;  %15689 = vmatpush3.msra.mxu1 %v15955_v9 }
0x13de   :  { %15655 = vmatprep.subr.mxu0 %v22086_v47  ;;  %15690 = vmatprep.subr.mxu1 %v22086_v47  ;;  %v10818_v29 = vadd.f32 %v21790_v51, %v9786_v53 }
0x13df   :  { %15656 = vmatpush3.msra.mxu0 %v21316_v41  ;;  %15691 = vmatpush3.msra.mxu1 %v15957_v44 }
0x13e0   :  { %15657 = vmatprep.subr.mxu0 %v22086_v47  ;;  %15692 = vmatprep.subr.mxu1 %v22086_v47  ;;  %15829 = vtanh.f32 %v10818_v29 }
0x13e1   :  { %15658 = vmatpush3.msra.mxu0 %v21325_v42  ;;  %15693 = vmatpush3.msra.mxu1 %v15958_v48 }
0x13e2   :  { %15659 = vmatprep.subr.mxu0 %v22086_v47  ;;  %15694 = vmatprep.subr.mxu1 %v22086_v47 }
0x13e3   :  { %15660 = vmatpush3.msra.mxu0 %v21336_v8  ;;  %15661 = vmatprep.mubr.msk.f32.mxu0 %vm16152_vm0, %v22086_v47 }
0x13e4   :  { %15695 = vmatpush3.msra.mxu1 %v15959_v16  ;;  %15696 = vmatprep.mubr.msk.f32.mxu1 %vm16152_vm0, %v22086_v47 }
0x13e5   :  { %15662 = vmatmul.mubr.f32.vlgmr.msra.gmra.mxu0 %v21500_v6  ;;  %15697 = vmatmul.mubr.f32.vlgmr.msra.gmra.mxu1 %v21816_v50 }
0x13e6   :  { %15699 = vmatprep.subr.mxu0 %v22086_v47  ;;  %15734 = vmatprep.subr.mxu1 %v22086_v47 }
0x13e7   :  { %15700 = vmatpush3.msra.mxu0 %v21593_v1  ;;  %15735 = vmatpush3.msra.mxu1 %v21191_v36 }
0x13e8   :  { %15701 = vmatprep.subr.mxu0 %v22086_v47  ;;  %15736 = vmatprep.subr.mxu1 %v22086_v47 }
0x13e9   :  { %15702 = vmatpush3.msra.mxu0 %v21607_v25  ;;  %15737 = vmatpush3.msra.mxu1 %v21200_v13  ;;  %v15960_v13 = vld [vmem:[%s21971_s24 + $0xd0] sm:$0xff] }
0x13ea   :  { %15703 = vmatprep.subr.mxu0 %v22086_v47  ;;  %15738 = vmatprep.subr.mxu1 %v22086_v47 }
0x13eb   :  { %15704 = vmatpush3.msra.mxu0 %v21621_v37  ;;  %15739 = vmatpush3.msra.mxu1 %v21209_v0  ;;  %v15961_v0 = vld [vmem:[%s21971_s24 + $0xc8] sm:$0xff] }
0x13ec   :  { %15705 = vmatprep.subr.mxu0 %v22086_v47  ;;  %15740 = vmatprep.subr.mxu1 %v22086_v47 }
0x13ed   :  { %v15830_v36 = vpop.eup %15829  ;;  %15706 = vmatpush3.msra.mxu0 %v21635_v24  ;;  %15741 = vmatpush3.msra.mxu1 %v21218_v11  ;;  %v15962_v11 = vld [vmem:[%s21971_s24 + $0xc0] sm:$0xff] }
0x13ee   :  { %11111 = vst.msk [vmem:[%s21973_s26 + $0x14] sm:$0x3] %vm10780_vm15, %v15830_v36  ;;  %15707 = vmatprep.subr.mxu0 %v22086_v47  ;;  %15742 = vmatprep.subr.mxu1 %v22086_v47 }
0x13ef   :  { %15708 = vmatpush3.msra.mxu0 %v21649_v2  ;;  %15743 = vmatpush3.msra.mxu1 %v21231_v38  ;;  %v15963_v38 = vld [vmem:[%s21971_s24 + $0xb8] sm:$0xff] }
0x13f0   :  { %15709 = vmatprep.subr.mxu0 %v22086_v47  ;;  %15744 = vmatprep.subr.mxu1 %v22086_v47 }
0x13f1   :  { %15710 = vmatpush3.msra.mxu0 %v15960_v13  ;;  %15745 = vmatpush3.msra.mxu1 %v21240_v49  ;;  %v15964_v49 = vld [vmem:[%s21971_s24 + $0xb0] sm:$0xff] }
0x13f2   :  { %15711 = vmatprep.subr.mxu0 %v22086_v47  ;;  %15746 = vmatprep.subr.mxu1 %v22086_v47 }
0x13f3   :  { %15712 = vmatpush3.msra.mxu0 %v15961_v0  ;;  %15747 = vmatpush3.msra.mxu1 %v21249_v23  ;;  %v15965_v23 = vld [vmem:[%s21971_s24 + $0xa8] sm:$0xff] }
0x13f4   :  { %15713 = vmatprep.subr.mxu0 %v22086_v47  ;;  %15748 = vmatprep.subr.mxu1 %v22086_v47 }
0x13f5   :  { %15714 = vmatpush3.msra.mxu0 %v15962_v11  ;;  %15749 = vmatpush3.msra.mxu1 %v21258_v59 }
0x13f6   :  { %15715 = vmatprep.subr.mxu0 %v22086_v47  ;;  %15750 = vmatprep.subr.mxu1 %v22086_v47 }
0x13f7   :  { %15716 = vmatpush3.msra.mxu0 %v15963_v38  ;;  %15751 = vmatpush3.msra.mxu1 %v21267_v20 }
0x13f8   :  { %15717 = vmatprep.subr.mxu0 %v22086_v47  ;;  %15752 = vmatprep.subr.mxu1 %v22086_v47 }
0x13f9   :  { %15718 = vmatpush3.msra.mxu0 %v15964_v49  ;;  %15753 = vmatpush3.msra.mxu1 %v21276_v30  ;;  %v15966_v30 = vld [vmem:[%s21971_s24 + $0xa0] sm:$0xff] }
0x13fa   :  { %15719 = vmatprep.subr.mxu0 %v22086_v47  ;;  %15754 = vmatprep.subr.mxu1 %v22086_v47 }
0x13fb   :  { %15720 = vmatpush3.msra.mxu0 %v15965_v23  ;;  %15755 = vmatpush3.msra.mxu1 %v21285_v34  ;;  %v9853_v59 = vpop.f32.mrf.mxu0  ;;  %v9923_v20 = vpop.f32.mrf.mxu1  ;;  %v15967_v34 = vld [vmem:[%s21971_s24 + $0x98] sm:$0xff] }
0x13fc   :  { %15721 = vmatprep.subr.mxu0 %v22086_v47  ;;  %15756 = vmatprep.subr.mxu1 %v22086_v47 }
0x13fd   :  { %15722 = vmatpush3.msra.mxu0 %v15966_v30  ;;  %15757 = vmatpush3.msra.mxu1 %v21298_v4  ;;  %v15313_v6 = vpop.f32.mrf.mxu0  ;;  %v15348_v56 = vpop.f32.mrf.mxu1  ;;  %v15968_v4 = vld [vmem:[%s21971_s24 + $0x90] sm:$0xff] }
0x13fe   :  { %15723 = vmatprep.subr.mxu0 %v22086_v47  ;;  %15758 = vmatprep.subr.mxu1 %v22086_v47 }
0x13ff   :  { %15724 = vmatpush3.msra.mxu0 %v15967_v34  ;;  %15759 = vmatpush3.msra.mxu1 %v21307_v3  ;;  %v15970_v3 = vld [vmem:[%s21971_s24 + $0x80] sm:$0xff] }
0x1400   :  { %15725 = vmatprep.subr.mxu0 %v22086_v47  ;;  %15760 = vmatprep.subr.mxu1 %v22086_v47 }
0x1401   :  { %15726 = vmatpush3.msra.mxu0 %v15968_v4  ;;  %15761 = vmatpush3.msra.mxu1 %v21316_v41  ;;  %v9924_v41 = vadd.f32 %v9923_v20, %v9853_v59 }
0x1402   :  { %15727 = vmatprep.subr.mxu0 %v22086_v47  ;;  %15762 = vmatprep.subr.mxu1 %v22086_v47 }
0x1403   :  { %15728 = vmatpush3.msra.mxu0 %v15969_v43  ;;  %15763 = vmatpush3.msra.mxu1 %v21325_v42 }
0x1404   :  { %15729 = vmatprep.subr.mxu0 %v22086_v47  ;;  %15764 = vmatprep.subr.mxu1 %v22086_v47 }
0x1405   :  { %15730 = vmatpush3.msra.mxu0 %v15970_v3  ;;  %15731 = vmatprep.mubr.msk.f32.mxu0 %vm16152_vm0, %v22086_v47 }
0x1406   :  { %15765 = vmatpush3.msra.mxu1 %v21336_v8  ;;  %15766 = vmatprep.mubr.msk.f32.mxu1 %vm16152_vm0, %v22086_v47 }
0x1407   :  { %15732 = vmatmul.mubr.f32.vlgmr.msra.gmra.mxu0 %v21816_v50  ;;  %15767 = vmatmul.mubr.f32.vlgmr.msra.gmra.mxu1 %v21708_v46 }
0x141d   :  { %v9993_v42 = vpop.f32.mrf.mxu0  ;;  %v10064_v40 = vpop.f32.mrf.mxu1 }
0x141e   :  { %v9997_v33 = vadd.f32 %v9993_v42, %v9924_v41 }
0x141f   :  { %v15383_v1 = vpop.f32.mrf.mxu0  ;;  %v15418_v10 = vpop.f32.mrf.mxu1 }
0x1420   :  { %v10822_v25 = vadd.f32 %v21790_v51, %v9997_v33 }
0x1422   :  { %15831 = vtanh.f32 %v10822_v25 }
0x142f   :  { %v15832_v45 = vpop.eup %15831 }
0x1430   :  { %11112 = vst.msk [vmem:[%s21973_s26 + $0x16] sm:$0x3] %vm10780_vm15, %v15832_v45 }
0x143f   :  { %v10134_v47 = vpop.f32.mrf.mxu0  ;;  %v10204_v8 = vpop.f32.mrf.mxu1 }
0x1440   :  { %v10135_v37 = vadd.f32 %v10134_v47, %v10064_v40 }
0x1441   :  { %v15453_v12 = vpop.f32.mrf.mxu0  ;;  %v15488_v24 = vpop.f32.mrf.mxu1 }
0x1442   :  { %v10208_v62 = vadd.f32 %v10204_v8, %v10135_v37 }
0x1444   :  { %v10826_v2 = vadd.f32 %v21790_v51, %v10208_v62 }
0x1446   :  { %15833 = vtanh.f32 %v10826_v2 }
0x1453   :  { %v15834_v57 = vpop.eup %15833 }
0x1454   :  { %11113 = vst.msk [vmem:[%s21973_s26 + $0x18] sm:$0x3] %vm10780_vm15, %v15834_v57 }
0x1455   :  { %16102 = shalt.err (!%p16099_p6)
}
0x1456   :  { %10853 = dma.vmem_to_hbm [thread:$0]  %s10851_s6, 32, %s21974_s27, [#allocation4]  }
0x1457   :  { %s16111_s16 = scalar_lea.vmem %s10861_s11, 32  ;;  %p16116_p8 = scmp.lt.s32.totalorder %s10861_s11, %s10861_s11 }
0x1458   :  { %p16112_p7 = scmp.ne.s32.totalorder %s10861_s11, %s16111_s16  ;;  %p16117_p9 = scmp.lt.s32.totalorder %s16111_s16, %s16111_s16 }
0x145a   :  { %p16118_p10 = por %p16117_p9, %p16116_p8 }
0x145c   :  { %p16119_p11 = pnand %p16118_p10, %p16112_p7 }
0x145e   :  { %16122 = shalt.err (!%p16119_p11)
}
0x145f   :  { %10863 = dma.vmem_to_hbm [thread:$0]  %s10861_s11, 32, %s21975_s28, [#allocation15]  }
0x1461   :  { %v10275_v15 = vpop.f32.mrf.mxu0  ;;  %v10345_v63 = vpop.f32.mrf.mxu1 }
0x1462   :  { %v10346_v22 = vadd.f32 %v10345_v63, %v10275_v15 }
0x1463   :  { %v15523_v54 = vpop.f32.mrf.mxu0  ;;  %v15558_v31 = vpop.f32.mrf.mxu1 }
0x1483   :  { %v10415_v52 = vpop.f32.mrf.mxu0  ;;  %v10486_v27 = vpop.f32.mrf.mxu1 }
0x1484   :  { %v10419_v32 = vadd.f32 %v10415_v52, %v10346_v22 }
0x1485   :  { %v15593_v46 = vpop.f32.mrf.mxu0  ;;  %v15628_v26 = vpop.f32.mrf.mxu1 }
0x1486   :  { %v10830_v28 = vadd.f32 %v21790_v51, %v10419_v32 }
0x1488   :  { %15835 = vtanh.f32 %v10830_v28 }
0x1495   :  { %v15836_v35 = vpop.eup %15835 }
0x1496   :  { %11114 = vst.msk [vmem:[%s21973_s26 + $0x1a] sm:$0x3] %vm10780_vm15, %v15836_v35 }
0x14a5   :  { %v10556_v58 = vpop.f32.mrf.mxu0  ;;  %v10626_v61 = vpop.f32.mrf.mxu1 }
0x14a6   :  { %v10557_v17 = vadd.f32 %v10556_v58, %v10486_v27 }
0x14a7   :  { %v15663_v19 = vpop.f32.mrf.mxu0  ;;  %v15698_v18 = vpop.f32.mrf.mxu1 }
0x14a8   :  { %v10630_v5 = vadd.f32 %v10626_v61, %v10557_v17 }
0x14aa   :  { %v10834_v39 = vadd.f32 %v21790_v51, %v10630_v5 }
0x14ac   :  { %15837 = vtanh.f32 %v10834_v39 }
0x14b9   :  { %v15838_v55 = vpop.eup %15837 }
0x14ba   :  { %11115 = vst.msk [vmem:[%s21973_s26 + $0x1c] sm:$0x3] %vm10780_vm15, %v15838_v55 }
0x14c7   :  { %v10697_v60 = vpop.f32.mrf.mxu0  ;;  %v10767_v21 = vpop.f32.mrf.mxu1 }
0x14c8   :  { %v10768_v53 = vadd.f32 %v10767_v21, %v10697_v60 }
0x14c9   :  { %v15733_v9 = vpop.f32.mrf.mxu0  ;;  %v15768_v29 = vpop.f32.mrf.mxu1 }
0x14ca   :  { %v10838_v44 = vadd.f32 %v21790_v51, %v10768_v53 }
0x14cc   :  { %15839 = vtanh.f32 %v10838_v44 }
0x14d9   :  { %v15840_v14 = vpop.eup %15839 }
0x14da   :  { %11116 = vst.msk [vmem:[%s21973_s26 + $0x1e] sm:$0x3] %vm10780_vm15, %v15840_v14 }
0x14db   :  { %16139 = dma.done.wait [#allocation4], 32  }
0x14dc   :  { %16140 = vsyncadd [#allocation4], 4294967264 }
0x14dd   :  { %16141 = dma.done.wait [#allocation15], 32  }
0x14de   :  { %16142 = vsyncadd [#allocation15], 4294967264 }
0x14df   :  { %10872 = vsyncpa [#allocation3], 1 }
0x14e0   :  { %10873 = vsyncpa [#allocation6], 1 }
0x14e1   :  { %10874 = vsyncpa [#allocation9], 1 }
0x14e2   :  { %10875 = vsyncpa [#allocation12], 1 }
0x14e3   :  { %10876 = vsyncpa [#allocation4], 1 }
0x14e4   :  { %10877 = vsyncpa [#allocation15], 1 }

</bundles_post_ra>
